<compile_context>
chip_gen: v7x
topology: tpu7x:2x2x1
jax: 0.10.0
libtpu: 0.0.40
codegen_flags: <defaults>
</compile_context>

<pallas_src>
import functools

import jax
import jax.numpy as jnp
from jax import lax
from jax.experimental import pallas as pl
from jax.experimental.pallas import tpu as pltpu


def _round_up(x, m):
    return (x + m - 1) // m * m


def _cdiv(a, b):
    return (a + b - 1) // b


def _block_bytes(rows, sub, lane, dtype):
    """Rough VMEM footprint of a (rows, sub, lane) block including (sublane, lane) padding."""
    d = jnp.dtype(dtype)
    sub_g = max(1, 32 // d.itemsize)          # 8 for f32, 16 for bf16
    return int(rows) * _round_up(max(int(sub), 1), sub_g) * _round_up(max(int(lane), 1), 128) * d.itemsize


def _vmem_budget_bytes():
    """Generation-aware scoped-VMEM budget: ~3/4 of physical VMEM, capped, with safe fallback."""
    cap = 64 * 1024 * 1024                    # conservative fallback (v7x physical)
    try:
        info = pltpu.get_tpu_info()
        cap = int(getattr(info, "vmem_capacity_bytes", cap))
    except Exception:
        pass
    return max(32 * 1024 * 1024, min(3 * cap // 4, 80 * 1024 * 1024))


# ---------------------------------------------------------------------------
# Pallas kernel 1: fused 3x3 conv (+ bias + PReLU) on haloed row strips, NHCW layout.
# ---------------------------------------------------------------------------
def _conv3x3_row_kernel(x_ref, w_ref, b_ref, o_ref, *, alpha, row_stride, n_shift):
    """One haloed row strip of a 3x3 conv, width on lanes (lane-dense output).

    x_ref: (TRin, Cs, Wi)         bf16 strip (W already zero-padded; stride-2 inputs are
                                  column-phase-split into [even; odd] channel groups)
    w_ref: (n_shift, Cout, 3*Cs)  bf16 horizontal-shift-major fused tap weights
    b_ref: (Cout, 1)              f32 bias
    o_ref: (TR, Cout, Wo)         bf16/f32 output rows
    """
    n_rows, cout, out_w = o_ref.shape

    def row_body(r, carry):
        base = r * row_stride
        # vertical taps: stack the 3 contributing input rows along the contraction dim
        xcat = jnp.concatenate(
            [x_ref[base], x_ref[base + 1], x_ref[base + 2]], axis=0)          # (3*Cs, Wi)
        acc = jnp.zeros((cout, out_w), jnp.float32)
        # horizontal taps: full-width matmul, then shifted lane slices of the product
        for kx in range(n_shift):
            y = jnp.dot(w_ref[kx], xcat, preferred_element_type=jnp.float32)  # (Cout, Wi) f32
            acc = acc + y[:, kx:kx + out_w]
        acc = acc + b_ref[...]
        if alpha != 1.0:                       # PReLU (alpha=1.0 => linear head)
            acc = jnp.where(acc >= 0.0, acc, alpha * acc)
        o_ref[r] = acc.astype(o_ref.dtype)
        return carry

    lax.fori_loop(0, n_rows, row_body, 0)


def conv3x3(x, w, b, *, alpha=0.25, stride=1, out_dtype=jnp.bfloat16):
    """3x3 conv, padding=1, stride in {1,2}, fused bias + PReLU(alpha).

    x: (N, H, Cin, W) "NHCW" activations (width on lanes).
    w: (Cout, Cin, 3, 3), b: (Cout,).   Returns (N, Ho, Cout, Wo) in out_dtype.
    """
    N, H, Cin, W = x.shape
    Cout = w.shape[0]
    Ho = (H - 1) // stride + 1
    Wo = (W - 1) // stride + 1
    xb = x.astype(jnp.bfloat16)

    if stride == 1:
        Cs = Cin
        Wi = W + 2
        row_stride, n_shift, halo = 1, 3, 2
        x_body = xb                                        # H/W zero-padding added below
        wblk = jnp.transpose(w, (3, 0, 2, 1))              # (kx, Cout, ky, Cin)
    elif stride == 2:
        # column phase split: even phase = padded cols 0,2,... ; odd = padded cols 1,3,...
        Cs = 2 * Cin
        Wi = Wo + 1
        row_stride, n_shift, halo = 2, 2, 1
        xe = xb[..., 1::2]
        xo = xb[..., 0::2]
        even = jnp.pad(xe, ((0, 0), (0, 0), (0, 0), (1, Wi - 1 - xe.shape[-1])))
        odd = jnp.pad(xo, ((0, 0), (0, 0), (0, 0), (0, Wi - xo.shape[-1])))
        x_body = jnp.concatenate([even, odd], axis=2)      # (N, H, 2*Cin, Wi)
        # shift 0 acts on (even: kx=0, odd: kx=1); shift 1 acts on (even: kx=2, odd: zero)
        w_e = jnp.stack([w[..., 0], w[..., 2]], axis=0)    # (2, Cout, Cin, 3ky)
        w_o = jnp.stack([w[..., 1], jnp.zeros_like(w[..., 1])], axis=0)
        wblk = jnp.transpose(jnp.concatenate([w_e, w_o], axis=2), (0, 1, 3, 2))  # (2, Cout, 3ky, 2Cin)
    else:
        raise ValueError("stride must be 1 or 2")

    # pad the strip channel dim to the bf16 sublane granularity so in-kernel concat is aligned
    Cs_pad = _round_up(Cs, 16)
    if Cs_pad != Cs:
        x_body = jnp.pad(x_body, ((0, 0), (0, 0), (0, Cs_pad - Cs), (0, 0)))
        wblk = jnp.pad(wblk, ((0, 0), (0, 0), (0, 0), (0, Cs_pad - Cs)))
    wk = wblk.reshape(n_shift, Cout, 3 * Cs_pad).astype(jnp.bfloat16)
    bk = b.reshape(Cout, 1).astype(jnp.float32)

    # --- row-strip height TR from a generation-aware VMEM budget (double-buffered blocks
    #     + in-kernel temporaries kept under ~80% of the scoped limit) ---
    budget = _vmem_budget_bytes()
    in_row = _block_bytes(1, Cs_pad, Wi, jnp.bfloat16)
    out_row = _block_bytes(1, Cout, Wo, out_dtype)
    xcat_tmp = _block_bytes(1, 3 * Cs_pad, Wi, jnp.bfloat16)
    y_tmp = _block_bytes(1, Cout, Wi, jnp.float32)
    w_bytes = 2 * n_shift * _block_bytes(1, Cout, 3 * Cs_pad, jnp.bfloat16)
    fixed = 2 * halo * in_row + w_bytes + 3 * xcat_tmp + 3 * y_tmp
    avail = (4 * budget) // 5 - fixed
    TR = max(1, avail // (2 * (row_stride * in_row + out_row)))
    TR = int(min(TR, 512, Ho))
    S = _cdiv(Ho, TR)
    TR = _cdiv(Ho, S)
    Hp = S * TR

    # --- haloed, overlapping row strips (a few % duplication; no 9x im2col in HBM) ---
    if stride == 1:
        TRin = TR + 2
        xpad = jnp.pad(x_body, ((0, 0), (1, Hp + 1 - H), (0, 0), (1, 1)))
        step = TR
    else:
        TRin = 2 * TR + 1
        xpad = jnp.pad(x_body, ((0, 0), (1, 2 * Hp - H), (0, 0), (0, 0)))
        step = 2 * TR
    strips = jnp.stack([xpad[:, s * step: s * step + TRin] for s in range(S)], axis=1)
    strips = strips.reshape(N * S, TRin, Cs_pad, Wi)

    kernel = functools.partial(_conv3x3_row_kernel, alpha=float(alpha),
                               row_stride=row_stride, n_shift=n_shift)
    out = pl.pallas_call(
        kernel,
        out_shape=jax.ShapeDtypeStruct((N * S, TR, Cout, Wo), out_dtype),
        grid=(N * S,),
        in_specs=[
            pl.BlockSpec((None, TRin, Cs_pad, Wi), lambda i: (i, 0, 0, 0)),
            pl.BlockSpec((n_shift, Cout, 3 * Cs_pad), lambda i: (0, 0, 0)),
            pl.BlockSpec((Cout, 1), lambda i: (0, 0)),
        ],
        out_specs=pl.BlockSpec((None, TR, Cout, Wo), lambda i: (i, 0, 0, 0)),
        compiler_params=pltpu.CompilerParams(
            dimension_semantics=("parallel",),
            vmem_limit_bytes=int(budget)),
    )(strips, wk, bk)

    return out.reshape(N, Hp, Cout, Wo)[:, :Ho]


def nchw_to_nhcw(x):
    return jnp.transpose(x, (0, 2, 1, 3))


def nhcw_to_nchw(x):
    return jnp.transpose(x, (0, 2, 1, 3))


# ---------------------------------------------------------------------------
# Pallas kernel 2: interflow_syn (GS temporal offset flow scaling), tiled over HW.
# ---------------------------------------------------------------------------
def _interflow_kernel(f_ref, rows_ref, o_ref, *, t, gamma, Hs):
    # f_ref/o_ref: (1, 4, C) chunks with channels [u01, v01, u10, v10]
    # rows_ref:    (1, C) absolute image row index (crop offset already added)
    rows = rows_ref[...]                                   # (1, C)
    f = f_ref[0]                                           # (4, C)
    tau = t + gamma - (gamma / Hs) * rows + 0.0001
    inv_f = pl.reciprocal(1.0 + (gamma / Hs) * f[1:2], approx=True)
    inv_b = pl.reciprocal(1.0 - (gamma / Hs) * f[3:4], approx=True)
    factor_f = tau * inv_f
    factor_b = (1.0 - tau) * inv_b
    o_ref[0, 0:2] = factor_f * f[0:2]
    o_ref[0, 2:4] = factor_b * f[2:4]


def interflow_syn_pallas(flow01, flow10, t, gamma, cH, crop_sz_H, img_H, scale):
    # crop_sz_H kept for signature parity; the cropped extent equals the level height.
    B, _, h, w = flow01.shape
    Hs = float(int(img_H * scale))
    crop_start = float(int(cH * scale))
    hw = h * w
    chunk = min(_round_up(hw, 128), 32768)
    hwp = _round_up(hw, chunk)
    bidir = jnp.concatenate([flow01, flow10], axis=1).reshape(B, 4, hw).astype(jnp.float32)
    rows = (jnp.broadcast_to(jnp.arange(h, dtype=jnp.float32)[:, None], (h, w))
            .reshape(1, hw) + crop_start)
    if hwp != hw:
        bidir = jnp.pad(bidir, ((0, 0), (0, 0), (0, hwp - hw)))
        rows = jnp.pad(rows, ((0, 0), (0, hwp - hw)))
    out = pl.pallas_call(
        functools.partial(_interflow_kernel, t=float(t), gamma=float(gamma), Hs=Hs),
        out_shape=jax.ShapeDtypeStruct((B, 4, hwp), jnp.float32),
        grid=(B, hwp // chunk),
        in_specs=[pl.BlockSpec((1, 4, chunk), lambda b, c: (b, 0, c)),
                  pl.BlockSpec((1, chunk), lambda b, c: (0, c))],
        out_specs=pl.BlockSpec((1, 4, chunk), lambda b, c: (b, 0, c)),
        compiler_params=pltpu.CompilerParams(
            dimension_semantics=("parallel", "parallel")),
    )(bidir, rows)
    out = out[:, :, :hw].reshape(B, 4, h, w)
    return out[:, 0:2], out[:, 2:4]


# ---------------------------------------------------------------------------
# Plain-JAX glue: backward warp (grid_sample) and softmax splatting.
# ---------------------------------------------------------------------------
def backwarp(img, flow):
    """BackWarp(clip=False): grid = 2*(g+flow)/W - 1, bilinear, align_corners=True, zero pad."""
    N, C, H, W = img.shape
    gy, gx = jnp.meshgrid(jnp.arange(H, dtype=jnp.float32),
                          jnp.arange(W, dtype=jnp.float32), indexing="ij")
    px = (gx[None] + flow[:, 0]) * (W - 1) / W
    py = (gy[None] + flow[:, 1]) * (H - 1) / H

    # TODO(synk): dynamic bilinear gather left as plain-JAX advanced indexing (no Pallas gather).
    def sample_one(img_b, px_b, py_b):
        x0 = jnp.floor(px_b)
        y0 = jnp.floor(py_b)
        out = jnp.zeros((C, H, W), jnp.float32)
        for dx in (0.0, 1.0):
            for dy in (0.0, 1.0):
                cx = x0 + dx
                cy = y0 + dy
                wgt = (1.0 - jnp.abs(px_b - cx)) * (1.0 - jnp.abs(py_b - cy))
                valid = ((cx >= 0) & (cx <= W - 1) & (cy >= 0) & (cy <= H - 1))
                xi = jnp.clip(cx, 0, W - 1).astype(jnp.int32)
                yi = jnp.clip(cy, 0, H - 1).astype(jnp.int32)
                vals = img_b[:, yi, xi]
                out = out + vals * (wgt * valid.astype(jnp.float32))[None]
        return out

    return jax.vmap(sample_one)(img.astype(jnp.float32), px, py)


def softsplat(feat, flow, z):
    """Softmax splatting (forward warp): cat([x*exp(z), exp(z)]) splat, then normalize."""
    # TODO(synk): data-dependent bilinear scatter-add stays as jnp .at[].add (no Pallas scatter).
    N, C, H, W = feat.shape
    z32 = z.astype(jnp.float32)
    # subtract per-sample max: exact for the normalized output, avoids exp overflow
    z32 = z32 - jnp.max(z32, axis=(1, 2, 3), keepdims=True)
    ez = jnp.exp(z32)
    inp = jnp.concatenate([feat.astype(jnp.float32) * ez, ez], axis=1)  # (N, C+1, H, W)
    gy, gx = jnp.meshgrid(jnp.arange(H, dtype=jnp.float32),
                          jnp.arange(W, dtype=jnp.float32), indexing="ij")
    tx = gx[None] + flow[:, 0]
    ty = gy[None] + flow[:, 1]

    def splat_one(inp_b, tx_b, ty_b):
        x0 = jnp.floor(tx_b)
        y0 = jnp.floor(ty_b)
        x1 = x0 + 1.0
        y1 = y0 + 1.0
        out = jnp.zeros((C + 1, H * W), jnp.float32)
        corners = [(x0, y0, (x1 - tx_b) * (y1 - ty_b)),
                   (x1, y0, (tx_b - x0) * (y1 - ty_b)),
                   (x0, y1, (x1 - tx_b) * (ty_b - y0)),
                   (x1, y1, (tx_b - x0) * (ty_b - y0))]
        for cx, cy, cw in corners:
            valid = ((cx >= 0) & (cx <= W - 1) & (cy >= 0) & (cy <= H - 1))
            xi = jnp.clip(cx, 0, W - 1).astype(jnp.int32)
            yi = jnp.clip(cy, 0, H - 1).astype(jnp.int32)
            idx = (yi * W + xi).reshape(-1)
            vals = (inp_b * (cw * valid.astype(jnp.float32))[None]).reshape(C + 1, -1)
            out = out.at[:, idx].add(vals)
        return out.reshape(C + 1, H, W)

    out = jax.vmap(splat_one)(inp, tx, ty)
    norm = out[:, -1:]
    denom = jnp.maximum(norm, 1e-7)   # eps guard against zero splat weights
    return out[:, :-1] / denom


def _resize_bilinear(x, h, w):
    # matches torch interpolate(mode='bilinear', align_corners=False, antialias=False)
    return jax.image.resize(x, (x.shape[0], x.shape[1], h, w),
                            method="bilinear", antialias=False)


# ---------------------------------------------------------------------------
# Parameters (deterministic synthetic init).
# TODO(synk): PReLU alpha (PyTorch default 0.25) is threaded statically; a learnable /
# per-layer alpha from a checkpoint would need to become a scalar kernel input.
# ---------------------------------------------------------------------------
_FP_STRIDES = [(1, 1), (2, 1), (2, 1)]  # feature pyramid conv strides


def init_conv(key, cout, cin):
    kw, kb = jax.random.split(key)
    w = jax.random.normal(kw, (cout, cin, 3, 3), jnp.float32) * (1.0 / (cin * 9) ** 0.5)
    b = jax.random.normal(kb, (cout,), jnp.float32) * 0.01
    return w, b


def build_params(key):
    ks = iter(jax.random.split(key, 16))
    return {
        "feature_pyramid": [
            [init_conv(next(ks), 32, 3), init_conv(next(ks), 32, 32)],
            [init_conv(next(ks), 64, 32), init_conv(next(ks), 64, 64)],
            [init_conv(next(ks), 96, 64), init_conv(next(ks), 96, 96)],
        ],
        "v_net": [init_conv(next(ks), 64, 6),
                  init_conv(next(ks), 64, 64),
                  init_conv(next(ks), 1, 64)],
        # TODO(synk): GridNet (synth_net) class definition is not provided in the source
        # module; replaced by a simplified multi-scale conv-fusion head (Pallas convs).
        "synth": [init_conv(next(ks), 32, 6 + 64 + 128 + 192),
                  init_conv(next(ks), 32, 32),
                  init_conv(next(ks), 3, 32)],
    }


# ---------------------------------------------------------------------------
# SoftSplatBaseline.forward
# ---------------------------------------------------------------------------
def softsplat_baseline_forward(params, x, flow, target_t, gamma, cH, img_H, prelu_alpha=0.25):
    # x: (B, 3, 2, H, W) images in [0,1]; flow: (2B, 2, H, W)
    img_input = x
    xp = x * 2.0 - 1.0  # preprocess
    B = x.shape[0]
    H, W = x.shape[3], x.shape[4]
    fr0, fr1 = xp[:, :, 0], xp[:, :, 1]

    # ---- feature pyramid (NHCW between convs; transposes only at chain boundaries) ----
    f_nchw0 = jnp.concatenate([fr0, fr1], axis=0)            # (2B, 3, H, W)
    pyramid = [f_nchw0]
    f = nchw_to_nhcw(f_nchw0)
    for lv_params, strides in zip(params["feature_pyramid"], _FP_STRIDES):
        (w1, b1), (w2, b2) = lv_params
        s1, s2 = strides
        f = conv3x3(f, w1, b1, alpha=prelu_alpha, stride=s1, out_dtype=jnp.bfloat16)
        f = conv3x3(f, w2, b2, alpha=prelu_alpha, stride=s2, out_dtype=jnp.bfloat16)
        pyramid.append(nhcw_to_nchw(f))                       # bf16 features for splatting

    # ---- v_net importance metric ----
    brightness_diff = jnp.abs(
        backwarp(jnp.concatenate([fr1, fr0], axis=0), flow)
        - jnp.concatenate([fr0, fr1], axis=0))
    v_in = jnp.concatenate(
        [jnp.concatenate([fr0, fr1], axis=0), -brightness_diff], axis=1)  # (2B, 6, H, W)
    (vw1, vb1), (vw2, vb2), (vw3, vb3) = params["v_net"]
    zf = nchw_to_nhcw(v_in)
    zf = conv3x3(zf, vw1, vb1, alpha=prelu_alpha, out_dtype=jnp.bfloat16)
    zf = conv3x3(zf, vw2, vb2, alpha=prelu_alpha, out_dtype=jnp.bfloat16)
    zf = conv3x3(zf, vw3, vb3, alpha=1.0, out_dtype=jnp.float32)  # last conv: no activation
    z = nhcw_to_nchw(zf)                                          # (2B, 1, H, W) f32

    # ---- forward warp each pyramid level with softmax splatting ----
    warped_feat_pyramid = []
    warped_img_lv0 = None
    for lv, feat in enumerate(pyramid):
        h_lv, w_lv = feat.shape[-2], feat.shape[-1]
        scale = w_lv / flow.shape[-1]
        if scale == 1.0:
            flow_lv, z_lv = flow, z
        else:
            flow_lv = _resize_bilinear(flow, h_lv, w_lv) * scale
            z_lv = _resize_bilinear(z, h_lv, w_lv)
        flow01, flow10 = flow_lv[:B], flow_lv[B:]
        flow0t, flow1t = interflow_syn_pallas(
            flow01, flow10, target_t, gamma, cH, H, img_H, scale)
        flowt = jnp.concatenate([flow0t, flow1t], axis=0)
        warped_f = softsplat(feat, flowt, z_lv)
        warped_feat_pyramid.append(warped_f)
        if lv == 0:
            imgs = jnp.concatenate([img_input[:, :, 0], img_input[:, :, 1]], axis=0)
            warped_img_lv0 = softsplat(imgs, flowt, z_lv)

    concat_feats = []
    for feat in warped_feat_pyramid:
        concat_feats.append(jnp.concatenate([feat[:B], feat[B:]], axis=1))

    # TODO(synk): exact GridNet architecture not provided; simplified synthesis head.
    merged = [concat_feats[0]]
    for feat in concat_feats[1:]:
        merged.append(_resize_bilinear(feat, H, W))
    merged = jnp.concatenate(merged, axis=1)                  # (B, 390, H, W)
    (sw1, sb1), (sw2, sb2), (sw3, sb3) = params["synth"]
    o = nchw_to_nhcw(merged)
    o = conv3x3(o, sw1, sb1, alpha=prelu_alpha, out_dtype=jnp.bfloat16)
    o = conv3x3(o, sw2, sb2, alpha=prelu_alpha, out_dtype=jnp.bfloat16)
    o = conv3x3(o, sw3, sb3, alpha=1.0, out_dtype=jnp.float32)
    out = nhcw_to_nchw(o)
    out = jnp.clip((out + 1.0) / 2.0, 0.0, 1.0)               # postprocess
    return out, warped_img_lv0


if __name__ == "__main__":
    key = jax.random.PRNGKey(0)
    kp, kx, kf = jax.random.split(key, 3)
    B, H, W = 2, 16, 16
    params = build_params(kp)
    x = jax.random.uniform(kx, (B, 3, 2, H, W), jnp.float32)            # two frames, [0,1]
    flow = jax.random.normal(kf, (2 * B, 2, H, W), jnp.float32) * 2.0   # bidirectional flow

    fwd = jax.jit(functools.partial(
        softsplat_baseline_forward, target_t=0.5, gamma=1.0, cH=0, img_H=H))
    out, warped_img_lv0 = fwd(params, x, flow)
    jax.block_until_ready((out, warped_img_lv0))
    assert out.shape == (B, 3, H, W)
    assert warped_img_lv0.shape == (2 * B, 3, H, W)
    assert bool(jnp.all(jnp.isfinite(out))) and bool(jnp.all(jnp.isfinite(warped_img_lv0)))
    print("KERNEL_OK")
</pallas_src>

<mosaic_0001>
module attributes {stable_mosaic.version = 11 : i64} {
  func.func @_interflow_kernel(%arg0: i32, %arg1: i32, %arg2: memref<1x4x256xf32, #tpu.memory_space<vmem>>, %arg3: memref<1x256xf32, #tpu.memory_space<vmem>>, %arg4: memref<1x4x256xf32, #tpu.memory_space<vmem>>) attributes {dimension_semantics = [#tpu.dimension_semantics<parallel>, #tpu.dimension_semantics<parallel>], iteration_bounds = array<i64: 2, 1>, scalar_prefetch = 0 : i64, scratch_operands = 0 : i64, tpu.core_type = #tpu.core_type<tc>, window_params = [{transform_indices = @transform_0, window_bounds = array<i64: 1, 4, 256>}, {transform_indices = @transform_1, window_bounds = array<i64: 1, 256>}, {transform_indices = @transform_2, window_bounds = array<i64: 1, 4, 256>}]} {
    %c0 = arith.constant 0 : index
    %c0_0 = arith.constant 0 : index
    %0 = vector.load %arg3[%c0, %c0_0] : memref<1x256xf32, #tpu.memory_space<vmem>>, vector<1x256xf32>
    %c0_1 = arith.constant 0 : index
    %c0_2 = arith.constant 0 : index
    %c0_3 = arith.constant 0 : index
    %1 = vector.load %arg2[%c0_1, %c0_2, %c0_3] : memref<1x4x256xf32, #tpu.memory_space<vmem>>, vector<1x4x256xf32>
    %2 = vector.shape_cast %1 : vector<1x4x256xf32> to vector<4x256xf32>
    %cst = arith.constant 6.250000e-02 : f32
    %3 = vector.broadcast %cst : f32 to vector<1x256xf32>
    %4 = arith.mulf %3, %0 : vector<1x256xf32>
    %cst_4 = arith.constant 1.500000e+00 : f32
    %5 = vector.broadcast %cst_4 : f32 to vector<1x256xf32>
    %6 = arith.subf %5, %4 : vector<1x256xf32>
    %cst_5 = arith.constant 9.99999974E-5 : f32
    %7 = vector.broadcast %cst_5 : f32 to vector<1x256xf32>
    %8 = arith.addf %6, %7 : vector<1x256xf32>
    %9 = vector.extract_strided_slice %2 {offsets = [1, 0], sizes = [1, 256], strides = [1, 1]} : vector<4x256xf32> to vector<1x256xf32>
    %cst_6 = arith.constant 6.250000e-02 : f32
    %10 = vector.broadcast %cst_6 : f32 to vector<1x256xf32>
    %11 = arith.mulf %10, %9 : vector<1x256xf32>
    %cst_7 = arith.constant 1.000000e+00 : f32
    %12 = vector.broadcast %cst_7 : f32 to vector<1x256xf32>
    %13 = arith.addf %12, %11 : vector<1x256xf32>
    %14 = tpu.reciprocal %13 {approx = true} : vector<1x256xf32> -> vector<1x256xf32>
    %15 = vector.extract_strided_slice %2 {offsets = [3, 0], sizes = [1, 256], strides = [1, 1]} : vector<4x256xf32> to vector<1x256xf32>
    %cst_8 = arith.constant 6.250000e-02 : f32
    %16 = vector.broadcast %cst_8 : f32 to vector<1x256xf32>
    %17 = arith.mulf %16, %15 : vector<1x256xf32>
    %cst_9 = arith.constant 1.000000e+00 : f32
    %18 = vector.broadcast %cst_9 : f32 to vector<1x256xf32>
    %19 = arith.subf %18, %17 : vector<1x256xf32>
    %20 = tpu.reciprocal %19 {approx = true} : vector<1x256xf32> -> vector<1x256xf32>
    %21 = arith.mulf %8, %14 : vector<1x256xf32>
    %cst_10 = arith.constant 1.000000e+00 : f32
    %22 = vector.broadcast %cst_10 : f32 to vector<1x256xf32>
    %23 = arith.subf %22, %8 : vector<1x256xf32>
    %24 = arith.mulf %23, %20 : vector<1x256xf32>
    %25 = vector.extract_strided_slice %2 {offsets = [0, 0], sizes = [2, 256], strides = [1, 1]} : vector<4x256xf32> to vector<2x256xf32>
    %26 = vector.broadcast %21 : vector<1x256xf32> to vector<2x256xf32>
    %27 = arith.mulf %26, %25 : vector<2x256xf32>
    %c0_11 = arith.constant 0 : index
    %c0_12 = arith.constant 0 : index
    %c0_13 = arith.constant 0 : index
    %28 = vector.load %arg4[%c0_11, %c0_12, %c0_13] : memref<1x4x256xf32, #tpu.memory_space<vmem>>, vector<1x2x256xf32>
    %29 = vector.shape_cast %28 : vector<1x2x256xf32> to vector<2x256xf32>
    %30 = vector.shape_cast %27 : vector<2x256xf32> to vector<1x2x256xf32>
    tpu.vector_store %arg4[%c0_11, %c0_12, %c0_13], %30 {strides = array<i32>} : memref<1x4x256xf32, #tpu.memory_space<vmem>>, vector<1x2x256xf32>,
    %31 = vector.extract_strided_slice %2 {offsets = [2, 0], sizes = [2, 256], strides = [1, 1]} : vector<4x256xf32> to vector<2x256xf32>
    %32 = vector.broadcast %24 : vector<1x256xf32> to vector<2x256xf32>
    %33 = arith.mulf %32, %31 : vector<2x256xf32>
    %c0_14 = arith.constant 0 : index
    %c2 = arith.constant 2 : index
    %c0_15 = arith.constant 0 : index
    %34 = vector.load %arg4[%c0_14, %c2, %c0_15] : memref<1x4x256xf32, #tpu.memory_space<vmem>>, vector<1x2x256xf32>
    %35 = vector.shape_cast %34 : vector<1x2x256xf32> to vector<2x256xf32>
    %36 = vector.shape_cast %33 : vector<2x256xf32> to vector<1x2x256xf32>
    tpu.vector_store %arg4[%c0_14, %c2, %c0_15], %36 {strides = array<i32>} : memref<1x4x256xf32, #tpu.memory_space<vmem>>, vector<1x2x256xf32>,
    return
  }
  func.func @transform_0(%arg0: i32, %arg1: i32) -> (i32, i32, i32) {
    %c0_i32 = arith.constant 0 : i32
    %c0_i32_0 = arith.constant 0 : i32
    return %arg0, %c0_i32, %arg1 : i32, i32, i32
  }
  func.func @transform_1(%arg0: i32, %arg1: i32) -> (i32, i32) {
    %c0_i32 = arith.constant 0 : i32
    %c0_i32_0 = arith.constant 0 : i32
    return %c0_i32, %arg1 : i32, i32
  }
  func.func @transform_2(%arg0: i32, %arg1: i32) -> (i32, i32, i32) {
    %c0_i32 = arith.constant 0 : i32
    %c0_i32_0 = arith.constant 0 : i32
    return %arg0, %c0_i32, %arg1 : i32, i32, i32
  }
}

module attributes {stable_mosaic.version = 11 : i64} {
  func.func @_conv3x3_row_kernel(%arg0: i32, %arg1: memref<1x18x16x18xbf16, #tpu.memory_space<vmem>>, %arg2: memref<3x64x48xbf16, #tpu.memory_space<vmem>>, %arg3: memref<64x1xf32, #tpu.memory_space<vmem>>, %arg4: memref<1x16x64x16xbf16, #tpu.memory_space<vmem>>) attributes {dimension_semantics = [#tpu.dimension_semantics<parallel>], iteration_bounds = array<i64: 4>, scalar_prefetch = 0 : i64, scratch_operands = 0 : i64, tpu.core_type = #tpu.core_type<tc>, window_params = [{transform_indices = @transform_0, window_bounds = array<i64: 1, 18, 16, 18>}, {pipeline_mode = #tpu.pipeline_mode<synchronous>, transform_indices = @transform_1, window_bounds = array<i64: 3, 64, 48>}, {pipeline_mode = #tpu.pipeline_mode<synchronous>, transform_indices = @transform_2, window_bounds = array<i64: 64, 1>}, {transform_indices = @transform_3, window_bounds = array<i64: 1, 16, 64, 16>}]} {
    %c0_i32 = arith.constant 0 : i32
    %c16_i32 = arith.constant 16 : i32
    %0 = arith.addi %c0_i32, %c16_i32 : i32
    %c1_i32 = arith.constant 1 : i32
    scf.for %arg5 = %c0_i32 to %0 step %c1_i32  : i32 {
      %c1_i32_1 = arith.constant 1 : i32
      %1 = arith.muli %arg5, %c1_i32_1 : i32
      %c0 = arith.constant 0 : index
      %2 = arith.index_cast %1 : i32 to index
      %c0_2 = arith.constant 0 : index
      %c0_3 = arith.constant 0 : index
      %3 = vector.load %arg1[%c0, %2, %c0_2, %c0_3] : memref<1x18x16x18xbf16, #tpu.memory_space<vmem>>, vector<1x1x16x18xbf16>
      %4 = vector.shape_cast %3 : vector<1x1x16x18xbf16> to vector<16x18xbf16>
      %c1_i32_4 = arith.constant 1 : i32
      %5 = arith.addi %1, %c1_i32_4 : i32
      %c0_5 = arith.constant 0 : index
      %6 = arith.index_cast %5 : i32 to index
      %c0_6 = arith.constant 0 : index
      %c0_7 = arith.constant 0 : index
      %7 = vector.load %arg1[%c0_5, %6, %c0_6, %c0_7] : memref<1x18x16x18xbf16, #tpu.memory_space<vmem>>, vector<1x1x16x18xbf16>
      %8 = vector.shape_cast %7 : vector<1x1x16x18xbf16> to vector<16x18xbf16>
      %c2_i32 = arith.constant 2 : i32
      %9 = arith.addi %1, %c2_i32 : i32
      %c0_8 = arith.constant 0 : index
      %10 = arith.index_cast %9 : i32 to index
      %c0_9 = arith.constant 0 : index
      %c0_10 = arith.constant 0 : index
      %11 = vector.load %arg1[%c0_8, %10, %c0_9, %c0_10] : memref<1x18x16x18xbf16, #tpu.memory_space<vmem>>, vector<1x1x16x18xbf16>
      %12 = vector.shape_cast %11 : vector<1x1x16x18xbf16> to vector<16x18xbf16>
      %13 = tpu.concatenate %4, %8, %12 in 0 : vector<16x18xbf16>, vector<16x18xbf16>, vector<16x18xbf16> -> vector<48x18xbf16>
      %cst = arith.constant 0.000000e+00 : f32
      %14 = vector.broadcast %cst : f32 to vector<64x16xf32>
      %c0_11 = arith.constant 0 : index
      %c0_12 = arith.constant 0 : index
      %c0_13 = arith.constant 0 : index
      %15 = vector.load %arg2[%c0_11, %c0_12, %c0_13] : memref<3x64x48xbf16, #tpu.memory_space<vmem>>, vector<1x64x48xbf16>
      %16 = vector.shape_cast %15 : vector<1x64x48xbf16> to vector<64x48xbf16>
      %cst_14 = arith.constant dense<0.000000e+00> : vector<64x18xf32>
      %17 = tpu.matmul %16, %13, %cst_14 {dimension_numbers = #tpu.dot_dimension_numbers<[1], [0], [0], [1], [0, 0, 1, 1], [], []>} : vector<64x48xbf16>, vector<48x18xbf16>, vector<64x18xf32> -> vector<64x18xf32>
      %18 = vector.extract_strided_slice %17 {offsets = [0, 0], sizes = [64, 16], strides = [1, 1]} : vector<64x18xf32> to vector<64x16xf32>
      %19 = arith.addf %14, %18 : vector<64x16xf32>
      %c1 = arith.constant 1 : index
      %c0_15 = arith.constant 0 : index
      %c0_16 = arith.constant 0 : index
      %20 = vector.load %arg2[%c1, %c0_15, %c0_16] : memref<3x64x48xbf16, #tpu.memory_space<vmem>>, vector<1x64x48xbf16>
      %21 = vector.shape_cast %20 : vector<1x64x48xbf16> to vector<64x48xbf16>
      %cst_17 = arith.constant dense<0.000000e+00> : vector<64x18xf32>
      %22 = tpu.matmul %21, %13, %cst_17 {dimension_numbers = #tpu.dot_dimension_numbers<[1], [0], [0], [1], [0, 0, 1, 1], [], []>} : vector<64x48xbf16>, vector<48x18xbf16>, vector<64x18xf32> -> vector<64x18xf32>
      %23 = vector.extract_strided_slice %22 {offsets = [0, 1], sizes = [64, 16], strides = [1, 1]} : vector<64x18xf32> to vector<64x16xf32>
      %24 = arith.addf %19, %23 : vector<64x16xf32>
      %c2 = arith.constant 2 : index
      %c0_18 = arith.constant 0 : index
      %c0_19 = arith.constant 0 : index
      %25 = vector.load %arg2[%c2, %c0_18, %c0_19] : memref<3x64x48xbf16, #tpu.memory_space<vmem>>, vector<1x64x48xbf16>
      %26 = vector.shape_cast %25 : vector<1x64x48xbf16> to vector<64x48xbf16>
      %cst_20 = arith.constant dense<0.000000e+00> : vector<64x18xf32>
      %27 = tpu.matmul %26, %13, %cst_20 {dimension_numbers = #tpu.dot_dimension_numbers<[1], [0], [0], [1], [0, 0, 1, 1], [], []>} : vector<64x48xbf16>, vector<48x18xbf16>, vector<64x18xf32> -> vector<64x18xf32>
      %28 = vector.extract_strided_slice %27 {offsets = [0, 2], sizes = [64, 16], strides = [1, 1]} : vector<64x18xf32> to vector<64x16xf32>
      %29 = arith.addf %24, %28 : vector<64x16xf32>
      %c0_21 = arith.constant 0 : index
      %c0_22 = arith.constant 0 : index
      %30 = vector.load %arg3[%c0_21, %c0_22] : memref<64x1xf32, #tpu.memory_space<vmem>>, vector<64x1xf32>
      %31 = vector.broadcast %30 : vector<64x1xf32> to vector<64x16xf32>
      %32 = arith.addf %29, %31 : vector<64x16xf32>
      %cst_23 = arith.constant 0.000000e+00 : f32
      %33 = vector.broadcast %cst_23 : f32 to vector<64x16xf32>
      %34 = arith.cmpf oge, %32, %33 : vector<64x16xf32>
      %cst_24 = arith.constant 2.500000e-01 : f32
      %35 = vector.broadcast %cst_24 : f32 to vector<64x16xf32>
      %36 = arith.mulf %35, %32 : vector<64x16xf32>
      %37 = arith.select %34, %32, %36 : vector<64x16xi1>, vector<64x16xf32>
      %38 = arith.truncf %37 : vector<64x16xf32> to vector<64x16xbf16>
      %c0_25 = arith.constant 0 : index
      %39 = arith.index_cast %arg5 : i32 to index
      %c0_26 = arith.constant 0 : index
      %c0_27 = arith.constant 0 : index
      %40 = vector.load %arg4[%c0_25, %39, %c0_26, %c0_27] : memref<1x16x64x16xbf16, #tpu.memory_space<vmem>>, vector<1x1x64x16xbf16>
      %41 = vector.shape_cast %40 : vector<1x1x64x16xbf16> to vector<64x16xbf16>
      %42 = vector.shape_cast %38 : vector<64x16xbf16> to vector<1x1x64x16xbf16>
      tpu.vector_store %arg4[%c0_25, %39, %c0_26, %c0_27], %42 {strides = array<i32>} : memref<1x16x64x16xbf16, #tpu.memory_space<vmem>>, vector<1x1x64x16xbf16>,
    }
    %c16_i32_0 = arith.constant 16 : i32
    return
  }
  func.func @transform_0(%arg0: i32) -> (i32, i32, i32, i32) {
    %c0_i32 = arith.constant 0 : i32
    %c0_i32_0 = arith.constant 0 : i32
    %c0_i32_1 = arith.constant 0 : i32
    %c0_i32_2 = arith.constant 0 : i32
    return %arg0, %c0_i32, %c0_i32_0, %c0_i32_1 : i32, i32, i32, i32
  }
  func.func @transform_1(%arg0: i32) -> (i32, i32, i32) {
    %c0_i32 = arith.constant 0 : i32
    %c0_i32_0 = arith.constant 0 : i32
    %c0_i32_1 = arith.constant 0 : i32
    %c0_i32_2 = arith.constant 0 : i32
    return %c0_i32, %c0_i32_0, %c0_i32_1 : i32, i32, i32
  }
  func.func @transform_2(%arg0: i32) -> (i32, i32) {
    %c0_i32 = arith.constant 0 : i32
    %c0_i32_0 = arith.constant 0 : i32
    %c0_i32_1 = arith.constant 0 : i32
    return %c0_i32, %c0_i32_0 : i32, i32
  }
  func.func @transform_3(%arg0: i32) -> (i32, i32, i32, i32) {
    %c0_i32 = arith.constant 0 : i32
    %c0_i32_0 = arith.constant 0 : i32
    %c0_i32_1 = arith.constant 0 : i32
    %c0_i32_2 = arith.constant 0 : i32
    return %arg0, %c0_i32, %c0_i32_0, %c0_i32_1 : i32, i32, i32, i32
  }
}

module attributes {stable_mosaic.version = 11 : i64} {
  func.func @_conv3x3_row_kernel(%arg0: i32, %arg1: memref<1x18x64x18xbf16, #tpu.memory_space<vmem>>, %arg2: memref<3x64x192xbf16, #tpu.memory_space<vmem>>, %arg3: memref<64x1xf32, #tpu.memory_space<vmem>>, %arg4: memref<1x16x64x16xbf16, #tpu.memory_space<vmem>>) attributes {dimension_semantics = [#tpu.dimension_semantics<parallel>], iteration_bounds = array<i64: 4>, scalar_prefetch = 0 : i64, scratch_operands = 0 : i64, tpu.core_type = #tpu.core_type<tc>, window_params = [{transform_indices = @transform_0, window_bounds = array<i64: 1, 18, 64, 18>}, {pipeline_mode = #tpu.pipeline_mode<synchronous>, transform_indices = @transform_1, window_bounds = array<i64: 3, 64, 192>}, {pipeline_mode = #tpu.pipeline_mode<synchronous>, transform_indices = @transform_2, window_bounds = array<i64: 64, 1>}, {transform_indices = @transform_3, window_bounds = array<i64: 1, 16, 64, 16>}]} {
    %c0_i32 = arith.constant 0 : i32
    %c16_i32 = arith.constant 16 : i32
    %0 = arith.addi %c0_i32, %c16_i32 : i32
    %c1_i32 = arith.constant 1 : i32
    scf.for %arg5 = %c0_i32 to %0 step %c1_i32  : i32 {
      %c1_i32_1 = arith.constant 1 : i32
      %1 = arith.muli %arg5, %c1_i32_1 : i32
      %c0 = arith.constant 0 : index
      %2 = arith.index_cast %1 : i32 to index
      %c0_2 = arith.constant 0 : index
      %c0_3 = arith.constant 0 : index
      %3 = vector.load %arg1[%c0, %2, %c0_2, %c0_3] : memref<1x18x64x18xbf16, #tpu.memory_space<vmem>>, vector<1x1x64x18xbf16>
      %4 = vector.shape_cast %3 : vector<1x1x64x18xbf16> to vector<64x18xbf16>
      %c1_i32_4 = arith.constant 1 : i32
      %5 = arith.addi %1, %c1_i32_4 : i32
      %c0_5 = arith.constant 0 : index
      %6 = arith.index_cast %5 : i32 to index
      %c0_6 = arith.constant 0 : index
      %c0_7 = arith.constant 0 : index
      %7 = vector.load %arg1[%c0_5, %6, %c0_6, %c0_7] : memref<1x18x64x18xbf16, #tpu.memory_space<vmem>>, vector<1x1x64x18xbf16>
      %8 = vector.shape_cast %7 : vector<1x1x64x18xbf16> to vector<64x18xbf16>
      %c2_i32 = arith.constant 2 : i32
      %9 = arith.addi %1, %c2_i32 : i32
      %c0_8 = arith.constant 0 : index
      %10 = arith.index_cast %9 : i32 to index
      %c0_9 = arith.constant 0 : index
      %c0_10 = arith.constant 0 : index
      %11 = vector.load %arg1[%c0_8, %10, %c0_9, %c0_10] : memref<1x18x64x18xbf16, #tpu.memory_space<vmem>>, vector<1x1x64x18xbf16>
      %12 = vector.shape_cast %11 : vector<1x1x64x18xbf16> to vector<64x18xbf16>
      %13 = tpu.concatenate %4, %8, %12 in 0 : vector<64x18xbf16>, vector<64x18xbf16>, vector<64x18xbf16> -> vector<192x18xbf16>
      %cst = arith.constant 0.000000e+00 : f32
      %14 = vector.broadcast %cst : f32 to vector<64x16xf32>
      %c0_11 = arith.constant 0 : index
      %c0_12 = arith.constant 0 : index
      %c0_13 = arith.constant 0 : index
      %15 = vector.load %arg2[%c0_11, %c0_12, %c0_13] : memref<3x64x192xbf16, #tpu.memory_space<vmem>>, vector<1x64x192xbf16>
      %16 = vector.shape_cast %15 : vector<1x64x192xbf16> to vector<64x192xbf16>
      %cst_14 = arith.constant dense<0.000000e+00> : vector<64x18xf32>
      %17 = tpu.matmul %16, %13, %cst_14 {dimension_numbers = #tpu.dot_dimension_numbers<[1], [0], [0], [1], [0, 0, 1, 1], [], []>} : vector<64x192xbf16>, vector<192x18xbf16>, vector<64x18xf32> -> vector<64x18xf32>
      %18 = vector.extract_strided_slice %17 {offsets = [0, 0], sizes = [64, 16], strides = [1, 1]} : vector<64x18xf32> to vector<64x16xf32>
      %19 = arith.addf %14, %18 : vector<64x16xf32>
      %c1 = arith.constant 1 : index
      %c0_15 = arith.constant 0 : index
      %c0_16 = arith.constant 0 : index
      %20 = vector.load %arg2[%c1, %c0_15, %c0_16] : memref<3x64x192xbf16, #tpu.memory_space<vmem>>, vector<1x64x192xbf16>
      %21 = vector.shape_cast %20 : vector<1x64x192xbf16> to vector<64x192xbf16>
      %cst_17 = arith.constant dense<0.000000e+00> : vector<64x18xf32>
      %22 = tpu.matmul %21, %13, %cst_17 {dimension_numbers = #tpu.dot_dimension_numbers<[1], [0], [0], [1], [0, 0, 1, 1], [], []>} : vector<64x192xbf16>, vector<192x18xbf16>, vector<64x18xf32> -> vector<64x18xf32>
      %23 = vector.extract_strided_slice %22 {offsets = [0, 1], sizes = [64, 16], strides = [1, 1]} : vector<64x18xf32> to vector<64x16xf32>
      %24 = arith.addf %19, %23 : vector<64x16xf32>
      %c2 = arith.constant 2 : index
      %c0_18 = arith.constant 0 : index
      %c0_19 = arith.constant 0 : index
      %25 = vector.load %arg2[%c2, %c0_18, %c0_19] : memref<3x64x192xbf16, #tpu.memory_space<vmem>>, vector<1x64x192xbf16>
      %26 = vector.shape_cast %25 : vector<1x64x192xbf16> to vector<64x192xbf16>
      %cst_20 = arith.constant dense<0.000000e+00> : vector<64x18xf32>
      %27 = tpu.matmul %26, %13, %cst_20 {dimension_numbers = #tpu.dot_dimension_numbers<[1], [0], [0], [1], [0, 0, 1, 1], [], []>} : vector<64x192xbf16>, vector<192x18xbf16>, vector<64x18xf32> -> vector<64x18xf32>
      %28 = vector.extract_strided_slice %27 {offsets = [0, 2], sizes = [64, 16], strides = [1, 1]} : vector<64x18xf32> to vector<64x16xf32>
      %29 = arith.addf %24, %28 : vector<64x16xf32>
      %c0_21 = arith.constant 0 : index
      %c0_22 = arith.constant 0 : index
      %30 = vector.load %arg3[%c0_21, %c0_22] : memref<64x1xf32, #tpu.memory_space<vmem>>, vector<64x1xf32>
      %31 = vector.broadcast %30 : vector<64x1xf32> to vector<64x16xf32>
      %32 = arith.addf %29, %31 : vector<64x16xf32>
      %cst_23 = arith.constant 0.000000e+00 : f32
      %33 = vector.broadcast %cst_23 : f32 to vector<64x16xf32>
      %34 = arith.cmpf oge, %32, %33 : vector<64x16xf32>
      %cst_24 = arith.constant 2.500000e-01 : f32
      %35 = vector.broadcast %cst_24 : f32 to vector<64x16xf32>
      %36 = arith.mulf %35, %32 : vector<64x16xf32>
      %37 = arith.select %34, %32, %36 : vector<64x16xi1>, vector<64x16xf32>
      %38 = arith.truncf %37 : vector<64x16xf32> to vector<64x16xbf16>
      %c0_25 = arith.constant 0 : index
      %39 = arith.index_cast %arg5 : i32 to index
      %c0_26 = arith.constant 0 : index
      %c0_27 = arith.constant 0 : index
      %40 = vector.load %arg4[%c0_25, %39, %c0_26, %c0_27] : memref<1x16x64x16xbf16, #tpu.memory_space<vmem>>, vector<1x1x64x16xbf16>
      %41 = vector.shape_cast %40 : vector<1x1x64x16xbf16> to vector<64x16xbf16>
      %42 = vector.shape_cast %38 : vector<64x16xbf16> to vector<1x1x64x16xbf16>
      tpu.vector_store %arg4[%c0_25, %39, %c0_26, %c0_27], %42 {strides = array<i32>} : memref<1x16x64x16xbf16, #tpu.memory_space<vmem>>, vector<1x1x64x16xbf16>,
    }
    %c16_i32_0 = arith.constant 16 : i32
    return
  }
  func.func @transform_0(%arg0: i32) -> (i32, i32, i32, i32) {
    %c0_i32 = arith.constant 0 : i32
    %c0_i32_0 = arith.constant 0 : i32
    %c0_i32_1 = arith.constant 0 : i32
    %c0_i32_2 = arith.constant 0 : i32
    return %arg0, %c0_i32, %c0_i32_0, %c0_i32_1 : i32, i32, i32, i32
  }
  func.func @transform_1(%arg0: i32) -> (i32, i32, i32) {
    %c0_i32 = arith.constant 0 : i32
    %c0_i32_0 = arith.constant 0 : i32
    %c0_i32_1 = arith.constant 0 : i32
    %c0_i32_2 = arith.constant 0 : i32
    return %c0_i32, %c0_i32_0, %c0_i32_1 : i32, i32, i32
  }
  func.func @transform_2(%arg0: i32) -> (i32, i32) {
    %c0_i32 = arith.constant 0 : i32
    %c0_i32_0 = arith.constant 0 : i32
    %c0_i32_1 = arith.constant 0 : i32
    return %c0_i32, %c0_i32_0 : i32, i32
  }
  func.func @transform_3(%arg0: i32) -> (i32, i32, i32, i32) {
    %c0_i32 = arith.constant 0 : i32
    %c0_i32_0 = arith.constant 0 : i32
    %c0_i32_1 = arith.constant 0 : i32
    %c0_i32_2 = arith.constant 0 : i32
    return %arg0, %c0_i32, %c0_i32_0, %c0_i32_1 : i32, i32, i32, i32
  }
}

module attributes {stable_mosaic.version = 11 : i64} {
  func.func @_conv3x3_row_kernel(%arg0: i32, %arg1: memref<1x18x64x18xbf16, #tpu.memory_space<vmem>>, %arg2: memref<3x1x192xbf16, #tpu.memory_space<vmem>>, %arg3: memref<1x1xf32, #tpu.memory_space<vmem>>, %arg4: memref<1x16x1x16xf32, #tpu.memory_space<vmem>>) attributes {dimension_semantics = [#tpu.dimension_semantics<parallel>], iteration_bounds = array<i64: 4>, scalar_prefetch = 0 : i64, scratch_operands = 0 : i64, tpu.core_type = #tpu.core_type<tc>, window_params = [{transform_indices = @transform_0, window_bounds = array<i64: 1, 18, 64, 18>}, {pipeline_mode = #tpu.pipeline_mode<synchronous>, transform_indices = @transform_1, window_bounds = array<i64: 3, 1, 192>}, {pipeline_mode = #tpu.pipeline_mode<synchronous>, transform_indices = @transform_2, window_bounds = array<i64: 1, 1>}, {transform_indices = @transform_3, window_bounds = array<i64: 1, 16, 1, 16>}]} {
    %c0_i32 = arith.constant 0 : i32
    %c16_i32 = arith.constant 16 : i32
    %0 = arith.addi %c0_i32, %c16_i32 : i32
    %c1_i32 = arith.constant 1 : i32
    scf.for %arg5 = %c0_i32 to %0 step %c1_i32  : i32 {
      %c1_i32_1 = arith.constant 1 : i32
      %1 = arith.muli %arg5, %c1_i32_1 : i32
      %c0 = arith.constant 0 : index
      %2 = arith.index_cast %1 : i32 to index
      %c0_2 = arith.constant 0 : index
      %c0_3 = arith.constant 0 : index
      %3 = vector.load %arg1[%c0, %2, %c0_2, %c0_3] : memref<1x18x64x18xbf16, #tpu.memory_space<vmem>>, vector<1x1x64x18xbf16>
      %4 = vector.shape_cast %3 : vector<1x1x64x18xbf16> to vector<64x18xbf16>
      %c1_i32_4 = arith.constant 1 : i32
      %5 = arith.addi %1, %c1_i32_4 : i32
      %c0_5 = arith.constant 0 : index
      %6 = arith.index_cast %5 : i32 to index
      %c0_6 = arith.constant 0 : index
      %c0_7 = arith.constant 0 : index
      %7 = vector.load %arg1[%c0_5, %6, %c0_6, %c0_7] : memref<1x18x64x18xbf16, #tpu.memory_space<vmem>>, vector<1x1x64x18xbf16>
      %8 = vector.shape_cast %7 : vector<1x1x64x18xbf16> to vector<64x18xbf16>
      %c2_i32 = arith.constant 2 : i32
      %9 = arith.addi %1, %c2_i32 : i32
      %c0_8 = arith.constant 0 : index
      %10 = arith.index_cast %9 : i32 to index
      %c0_9 = arith.constant 0 : index
      %c0_10 = arith.constant 0 : index
      %11 = vector.load %arg1[%c0_8, %10, %c0_9, %c0_10] : memref<1x18x64x18xbf16, #tpu.memory_space<vmem>>, vector<1x1x64x18xbf16>
      %12 = vector.shape_cast %11 : vector<1x1x64x18xbf16> to vector<64x18xbf16>
      %13 = tpu.concatenate %4, %8, %12 in 0 : vector<64x18xbf16>, vector<64x18xbf16>, vector<64x18xbf16> -> vector<192x18xbf16>
      %cst = arith.constant 0.000000e+00 : f32
      %14 = vector.broadcast %cst : f32 to vector<1x16xf32>
      %c0_11 = arith.constant 0 : index
      %c0_12 = arith.constant 0 : index
      %c0_13 = arith.constant 0 : index
      %15 = vector.load %arg2[%c0_11, %c0_12, %c0_13] : memref<3x1x192xbf16, #tpu.memory_space<vmem>>, vector<1x1x192xbf16>
      %16 = vector.shape_cast %15 : vector<1x1x192xbf16> to vector<1x192xbf16>
      %cst_14 = arith.constant dense<0.000000e+00> : vector<1x18xf32>
      %17 = tpu.matmul %16, %13, %cst_14 {dimension_numbers = #tpu.dot_dimension_numbers<[1], [0], [0], [1], [0, 0, 1, 1], [], []>} : vector<1x192xbf16>, vector<192x18xbf16>, vector<1x18xf32> -> vector<1x18xf32>
      %18 = vector.extract_strided_slice %17 {offsets = [0, 0], sizes = [1, 16], strides = [1, 1]} : vector<1x18xf32> to vector<1x16xf32>
      %19 = arith.addf %14, %18 : vector<1x16xf32>
      %c1 = arith.constant 1 : index
      %c0_15 = arith.constant 0 : index
      %c0_16 = arith.constant 0 : index
      %20 = vector.load %arg2[%c1, %c0_15, %c0_16] : memref<3x1x192xbf16, #tpu.memory_space<vmem>>, vector<1x1x192xbf16>
      %21 = vector.shape_cast %20 : vector<1x1x192xbf16> to vector<1x192xbf16>
      %cst_17 = arith.constant dense<0.000000e+00> : vector<1x18xf32>
      %22 = tpu.matmul %21, %13, %cst_17 {dimension_numbers = #tpu.dot_dimension_numbers<[1], [0], [0], [1], [0, 0, 1, 1], [], []>} : vector<1x192xbf16>, vector<192x18xbf16>, vector<1x18xf32> -> vector<1x18xf32>
      %23 = vector.extract_strided_slice %22 {offsets = [0, 1], sizes = [1, 16], strides = [1, 1]} : vector<1x18xf32> to vector<1x16xf32>
      %24 = arith.addf %19, %23 : vector<1x16xf32>
      %c2 = arith.constant 2 : index
      %c0_18 = arith.constant 0 : index
      %c0_19 = arith.constant 0 : index
      %25 = vector.load %arg2[%c2, %c0_18, %c0_19] : memref<3x1x192xbf16, #tpu.memory_space<vmem>>, vector<1x1x192xbf16>
      %26 = vector.shape_cast %25 : vector<1x1x192xbf16> to vector<1x192xbf16>
      %cst_20 = arith.constant dense<0.000000e+00> : vector<1x18xf32>
      %27 = tpu.matmul %26, %13, %cst_20 {dimension_numbers = #tpu.dot_dimension_numbers<[1], [0], [0], [1], [0, 0, 1, 1], [], []>} : vector<1x192xbf16>, vector<192x18xbf16>, vector<1x18xf32> -> vector<1x18xf32>
      %28 = vector.extract_strided_slice %27 {offsets = [0, 2], sizes = [1, 16], strides = [1, 1]} : vector<1x18xf32> to vector<1x16xf32>
      %29 = arith.addf %24, %28 : vector<1x16xf32>
      %c0_21 = arith.constant 0 : index
      %c0_22 = arith.constant 0 : index
      %30 = vector.load %arg3[%c0_21, %c0_22] : memref<1x1xf32, #tpu.memory_space<vmem>>, vector<1x1xf32>
      %31 = vector.broadcast %30 : vector<1x1xf32> to vector<1x16xf32>
      %32 = arith.addf %29, %31 : vector<1x16xf32>
      %c0_23 = arith.constant 0 : index
      %33 = arith.index_cast %arg5 : i32 to index
      %c0_24 = arith.constant 0 : index
      %c0_25 = arith.constant 0 : index
      %34 = vector.load %arg4[%c0_23, %33, %c0_24, %c0_25] : memref<1x16x1x16xf32, #tpu.memory_space<vmem>>, vector<1x1x1x16xf32>
      %35 = vector.shape_cast %34 : vector<1x1x1x16xf32> to vector<1x16xf32>
      %36 = vector.shape_cast %32 : vector<1x16xf32> to vector<1x1x1x16xf32>
      tpu.vector_store %arg4[%c0_23, %33, %c0_24, %c0_25], %36 {strides = array<i32>} : memref<1x16x1x16xf32, #tpu.memory_space<vmem>>, vector<1x1x1x16xf32>,
    }
    %c16_i32_0 = arith.constant 16 : i32
    return
  }
  func.func @transform_0(%arg0: i32) -> (i32, i32, i32, i32) {
    %c0_i32 = arith.constant 0 : i32
    %c0_i32_0 = arith.constant 0 : i32
    %c0_i32_1 = arith.constant 0 : i32
    %c0_i32_2 = arith.constant 0 : i32
    return %arg0, %c0_i32, %c0_i32_0, %c0_i32_1 : i32, i32, i32, i32
  }
  func.func @transform_1(%arg0: i32) -> (i32, i32, i32) {
    %c0_i32 = arith.constant 0 : i32
    %c0_i32_0 = arith.constant 0 : i32
    %c0_i32_1 = arith.constant 0 : i32
    %c0_i32_2 = arith.constant 0 : i32
    return %c0_i32, %c0_i32_0, %c0_i32_1 : i32, i32, i32
  }
  func.func @transform_2(%arg0: i32) -> (i32, i32) {
    %c0_i32 = arith.constant 0 : i32
    %c0_i32_0 = arith.constant 0 : i32
    %c0_i32_1 = arith.constant 0 : i32
    return %c0_i32, %c0_i32_0 : i32, i32
  }
  func.func @transform_3(%arg0: i32) -> (i32, i32, i32, i32) {
    %c0_i32 = arith.constant 0 : i32
    %c0_i32_0 = arith.constant 0 : i32
    %c0_i32_1 = arith.constant 0 : i32
    %c0_i32_2 = arith.constant 0 : i32
    return %arg0, %c0_i32, %c0_i32_0, %c0_i32_1 : i32, i32, i32, i32
  }
}

module attributes {stable_mosaic.version = 11 : i64} {
  func.func @_conv3x3_row_kernel(%arg0: i32, %arg1: memref<1x18x16x18xbf16, #tpu.memory_space<vmem>>, %arg2: memref<3x32x48xbf16, #tpu.memory_space<vmem>>, %arg3: memref<32x1xf32, #tpu.memory_space<vmem>>, %arg4: memref<1x16x32x16xbf16, #tpu.memory_space<vmem>>) attributes {dimension_semantics = [#tpu.dimension_semantics<parallel>], iteration_bounds = array<i64: 4>, scalar_prefetch = 0 : i64, scratch_operands = 0 : i64, tpu.core_type = #tpu.core_type<tc>, window_params = [{transform_indices = @transform_0, window_bounds = array<i64: 1, 18, 16, 18>}, {pipeline_mode = #tpu.pipeline_mode<synchronous>, transform_indices = @transform_1, window_bounds = array<i64: 3, 32, 48>}, {pipeline_mode = #tpu.pipeline_mode<synchronous>, transform_indices = @transform_2, window_bounds = array<i64: 32, 1>}, {transform_indices = @transform_3, window_bounds = array<i64: 1, 16, 32, 16>}]} {
    %c0_i32 = arith.constant 0 : i32
    %c16_i32 = arith.constant 16 : i32
    %0 = arith.addi %c0_i32, %c16_i32 : i32
    %c1_i32 = arith.constant 1 : i32
    scf.for %arg5 = %c0_i32 to %0 step %c1_i32  : i32 {
      %c1_i32_1 = arith.constant 1 : i32
      %1 = arith.muli %arg5, %c1_i32_1 : i32
      %c0 = arith.constant 0 : index
      %2 = arith.index_cast %1 : i32 to index
      %c0_2 = arith.constant 0 : index
      %c0_3 = arith.constant 0 : index
      %3 = vector.load %arg1[%c0, %2, %c0_2, %c0_3] : memref<1x18x16x18xbf16, #tpu.memory_space<vmem>>, vector<1x1x16x18xbf16>
      %4 = vector.shape_cast %3 : vector<1x1x16x18xbf16> to vector<16x18xbf16>
      %c1_i32_4 = arith.constant 1 : i32
      %5 = arith.addi %1, %c1_i32_4 : i32
      %c0_5 = arith.constant 0 : index
      %6 = arith.index_cast %5 : i32 to index
      %c0_6 = arith.constant 0 : index
      %c0_7 = arith.constant 0 : index
      %7 = vector.load %arg1[%c0_5, %6, %c0_6, %c0_7] : memref<1x18x16x18xbf16, #tpu.memory_space<vmem>>, vector<1x1x16x18xbf16>
      %8 = vector.shape_cast %7 : vector<1x1x16x18xbf16> to vector<16x18xbf16>
      %c2_i32 = arith.constant 2 : i32
      %9 = arith.addi %1, %c2_i32 : i32
      %c0_8 = arith.constant 0 : index
      %10 = arith.index_cast %9 : i32 to index
      %c0_9 = arith.constant 0 : index
      %c0_10 = arith.constant 0 : index
      %11 = vector.load %arg1[%c0_8, %10, %c0_9, %c0_10] : memref<1x18x16x18xbf16, #tpu.memory_space<vmem>>, vector<1x1x16x18xbf16>
      %12 = vector.shape_cast %11 : vector<1x1x16x18xbf16> to vector<16x18xbf16>
      %13 = tpu.concatenate %4, %8, %12 in 0 : vector<16x18xbf16>, vector<16x18xbf16>, vector<16x18xbf16> -> vector<48x18xbf16>
      %cst = arith.constant 0.000000e+00 : f32
      %14 = vector.broadcast %cst : f32 to vector<32x16xf32>
      %c0_11 = arith.constant 0 : index
      %c0_12 = arith.constant 0 : index
      %c0_13 = arith.constant 0 : index
      %15 = vector.load %arg2[%c0_11, %c0_12, %c0_13] : memref<3x32x48xbf16, #tpu.memory_space<vmem>>, vector<1x32x48xbf16>
      %16 = vector.shape_cast %15 : vector<1x32x48xbf16> to vector<32x48xbf16>
      %cst_14 = arith.constant dense<0.000000e+00> : vector<32x18xf32>
      %17 = tpu.matmul %16, %13, %cst_14 {dimension_numbers = #tpu.dot_dimension_numbers<[1], [0], [0], [1], [0, 0, 1, 1], [], []>} : vector<32x48xbf16>, vector<48x18xbf16>, vector<32x18xf32> -> vector<32x18xf32>
      %18 = vector.extract_strided_slice %17 {offsets = [0, 0], sizes = [32, 16], strides = [1, 1]} : vector<32x18xf32> to vector<32x16xf32>
      %19 = arith.addf %14, %18 : vector<32x16xf32>
      %c1 = arith.constant 1 : index
      %c0_15 = arith.constant 0 : index
      %c0_16 = arith.constant 0 : index
      %20 = vector.load %arg2[%c1, %c0_15, %c0_16] : memref<3x32x48xbf16, #tpu.memory_space<vmem>>, vector<1x32x48xbf16>
      %21 = vector.shape_cast %20 : vector<1x32x48xbf16> to vector<32x48xbf16>
      %cst_17 = arith.constant dense<0.000000e+00> : vector<32x18xf32>
      %22 = tpu.matmul %21, %13, %cst_17 {dimension_numbers = #tpu.dot_dimension_numbers<[1], [0], [0], [1], [0, 0, 1, 1], [], []>} : vector<32x48xbf16>, vector<48x18xbf16>, vector<32x18xf32> -> vector<32x18xf32>
      %23 = vector.extract_strided_slice %22 {offsets = [0, 1], sizes = [32, 16], strides = [1, 1]} : vector<32x18xf32> to vector<32x16xf32>
      %24 = arith.addf %19, %23 : vector<32x16xf32>
      %c2 = arith.constant 2 : index
      %c0_18 = arith.constant 0 : index
      %c0_19 = arith.constant 0 : index
      %25 = vector.load %arg2[%c2, %c0_18, %c0_19] : memref<3x32x48xbf16, #tpu.memory_space<vmem>>, vector<1x32x48xbf16>
      %26 = vector.shape_cast %25 : vector<1x32x48xbf16> to vector<32x48xbf16>
      %cst_20 = arith.constant dense<0.000000e+00> : vector<32x18xf32>
      %27 = tpu.matmul %26, %13, %cst_20 {dimension_numbers = #tpu.dot_dimension_numbers<[1], [0], [0], [1], [0, 0, 1, 1], [], []>} : vector<32x48xbf16>, vector<48x18xbf16>, vector<32x18xf32> -> vector<32x18xf32>
      %28 = vector.extract_strided_slice %27 {offsets = [0, 2], sizes = [32, 16], strides = [1, 1]} : vector<32x18xf32> to vector<32x16xf32>
      %29 = arith.addf %24, %28 : vector<32x16xf32>
      %c0_21 = arith.constant 0 : index
      %c0_22 = arith.constant 0 : index
      %30 = vector.load %arg3[%c0_21, %c0_22] : memref<32x1xf32, #tpu.memory_space<vmem>>, vector<32x1xf32>
      %31 = vector.broadcast %30 : vector<32x1xf32> to vector<32x16xf32>
      %32 = arith.addf %29, %31 : vector<32x16xf32>
      %cst_23 = arith.constant 0.000000e+00 : f32
      %33 = vector.broadcast %cst_23 : f32 to vector<32x16xf32>
      %34 = arith.cmpf oge, %32, %33 : vector<32x16xf32>
      %cst_24 = arith.constant 2.500000e-01 : f32
      %35 = vector.broadcast %cst_24 : f32 to vector<32x16xf32>
      %36 = arith.mulf %35, %32 : vector<32x16xf32>
      %37 = arith.select %34, %32, %36 : vector<32x16xi1>, vector<32x16xf32>
      %38 = arith.truncf %37 : vector<32x16xf32> to vector<32x16xbf16>
      %c0_25 = arith.constant 0 : index
      %39 = arith.index_cast %arg5 : i32 to index
      %c0_26 = arith.constant 0 : index
      %c0_27 = arith.constant 0 : index
      %40 = vector.load %arg4[%c0_25, %39, %c0_26, %c0_27] : memref<1x16x32x16xbf16, #tpu.memory_space<vmem>>, vector<1x1x32x16xbf16>
      %41 = vector.shape_cast %40 : vector<1x1x32x16xbf16> to vector<32x16xbf16>
      %42 = vector.shape_cast %38 : vector<32x16xbf16> to vector<1x1x32x16xbf16>
      tpu.vector_store %arg4[%c0_25, %39, %c0_26, %c0_27], %42 {strides = array<i32>} : memref<1x16x32x16xbf16, #tpu.memory_space<vmem>>, vector<1x1x32x16xbf16>,
    }
    %c16_i32_0 = arith.constant 16 : i32
    return
  }
  func.func @transform_0(%arg0: i32) -> (i32, i32, i32, i32) {
    %c0_i32 = arith.constant 0 : i32
    %c0_i32_0 = arith.constant 0 : i32
    %c0_i32_1 = arith.constant 0 : i32
    %c0_i32_2 = arith.constant 0 : i32
    return %arg0, %c0_i32, %c0_i32_0, %c0_i32_1 : i32, i32, i32, i32
  }
  func.func @transform_1(%arg0: i32) -> (i32, i32, i32) {
    %c0_i32 = arith.constant 0 : i32
    %c0_i32_0 = arith.constant 0 : i32
    %c0_i32_1 = arith.constant 0 : i32
    %c0_i32_2 = arith.constant 0 : i32
    return %c0_i32, %c0_i32_0, %c0_i32_1 : i32, i32, i32
  }
  func.func @transform_2(%arg0: i32) -> (i32, i32) {
    %c0_i32 = arith.constant 0 : i32
    %c0_i32_0 = arith.constant 0 : i32
    %c0_i32_1 = arith.constant 0 : i32
    return %c0_i32, %c0_i32_0 : i32, i32
  }
  func.func @transform_3(%arg0: i32) -> (i32, i32, i32, i32) {
    %c0_i32 = arith.constant 0 : i32
    %c0_i32_0 = arith.constant 0 : i32
    %c0_i32_1 = arith.constant 0 : i32
    %c0_i32_2 = arith.constant 0 : i32
    return %arg0, %c0_i32, %c0_i32_0, %c0_i32_1 : i32, i32, i32, i32
  }
}

module attributes {stable_mosaic.version = 11 : i64} {
  func.func @_conv3x3_row_kernel(%arg0: i32, %arg1: memref<1x18x32x18xbf16, #tpu.memory_space<vmem>>, %arg2: memref<3x32x96xbf16, #tpu.memory_space<vmem>>, %arg3: memref<32x1xf32, #tpu.memory_space<vmem>>, %arg4: memref<1x16x32x16xbf16, #tpu.memory_space<vmem>>) attributes {dimension_semantics = [#tpu.dimension_semantics<parallel>], iteration_bounds = array<i64: 4>, scalar_prefetch = 0 : i64, scratch_operands = 0 : i64, tpu.core_type = #tpu.core_type<tc>, window_params = [{transform_indices = @transform_0, window_bounds = array<i64: 1, 18, 32, 18>}, {pipeline_mode = #tpu.pipeline_mode<synchronous>, transform_indices = @transform_1, window_bounds = array<i64: 3, 32, 96>}, {pipeline_mode = #tpu.pipeline_mode<synchronous>, transform_indices = @transform_2, window_bounds = array<i64: 32, 1>}, {transform_indices = @transform_3, window_bounds = array<i64: 1, 16, 32, 16>}]} {
    %c0_i32 = arith.constant 0 : i32
    %c16_i32 = arith.constant 16 : i32
    %0 = arith.addi %c0_i32, %c16_i32 : i32
    %c1_i32 = arith.constant 1 : i32
    scf.for %arg5 = %c0_i32 to %0 step %c1_i32  : i32 {
      %c1_i32_1 = arith.constant 1 : i32
      %1 = arith.muli %arg5, %c1_i32_1 : i32
      %c0 = arith.constant 0 : index
      %2 = arith.index_cast %1 : i32 to index
      %c0_2 = arith.constant 0 : index
      %c0_3 = arith.constant 0 : index
      %3 = vector.load %arg1[%c0, %2, %c0_2, %c0_3] : memref<1x18x32x18xbf16, #tpu.memory_space<vmem>>, vector<1x1x32x18xbf16>
      %4 = vector.shape_cast %3 : vector<1x1x32x18xbf16> to vector<32x18xbf16>
      %c1_i32_4 = arith.constant 1 : i32
      %5 = arith.addi %1, %c1_i32_4 : i32
      %c0_5 = arith.constant 0 : index
      %6 = arith.index_cast %5 : i32 to index
      %c0_6 = arith.constant 0 : index
      %c0_7 = arith.constant 0 : index
      %7 = vector.load %arg1[%c0_5, %6, %c0_6, %c0_7] : memref<1x18x32x18xbf16, #tpu.memory_space<vmem>>, vector<1x1x32x18xbf16>
      %8 = vector.shape_cast %7 : vector<1x1x32x18xbf16> to vector<32x18xbf16>
      %c2_i32 = arith.constant 2 : i32
      %9 = arith.addi %1, %c2_i32 : i32
      %c0_8 = arith.constant 0 : index
      %10 = arith.index_cast %9 : i32 to index
      %c0_9 = arith.constant 0 : index
      %c0_10 = arith.constant 0 : index
      %11 = vector.load %arg1[%c0_8, %10, %c0_9, %c0_10] : memref<1x18x32x18xbf16, #tpu.memory_space<vmem>>, vector<1x1x32x18xbf16>
      %12 = vector.shape_cast %11 : vector<1x1x32x18xbf16> to vector<32x18xbf16>
      %13 = tpu.concatenate %4, %8, %12 in 0 : vector<32x18xbf16>, vector<32x18xbf16>, vector<32x18xbf16> -> vector<96x18xbf16>
      %cst = arith.constant 0.000000e+00 : f32
      %14 = vector.broadcast %cst : f32 to vector<32x16xf32>
      %c0_11 = arith.constant 0 : index
      %c0_12 = arith.constant 0 : index
      %c0_13 = arith.constant 0 : index
      %15 = vector.load %arg2[%c0_11, %c0_12, %c0_13] : memref<3x32x96xbf16, #tpu.memory_space<vmem>>, vector<1x32x96xbf16>
      %16 = vector.shape_cast %15 : vector<1x32x96xbf16> to vector<32x96xbf16>
      %cst_14 = arith.constant dense<0.000000e+00> : vector<32x18xf32>
      %17 = tpu.matmul %16, %13, %cst_14 {dimension_numbers = #tpu.dot_dimension_numbers<[1], [0], [0], [1], [0, 0, 1, 1], [], []>} : vector<32x96xbf16>, vector<96x18xbf16>, vector<32x18xf32> -> vector<32x18xf32>
      %18 = vector.extract_strided_slice %17 {offsets = [0, 0], sizes = [32, 16], strides = [1, 1]} : vector<32x18xf32> to vector<32x16xf32>
      %19 = arith.addf %14, %18 : vector<32x16xf32>
      %c1 = arith.constant 1 : index
      %c0_15 = arith.constant 0 : index
      %c0_16 = arith.constant 0 : index
      %20 = vector.load %arg2[%c1, %c0_15, %c0_16] : memref<3x32x96xbf16, #tpu.memory_space<vmem>>, vector<1x32x96xbf16>
      %21 = vector.shape_cast %20 : vector<1x32x96xbf16> to vector<32x96xbf16>
      %cst_17 = arith.constant dense<0.000000e+00> : vector<32x18xf32>
      %22 = tpu.matmul %21, %13, %cst_17 {dimension_numbers = #tpu.dot_dimension_numbers<[1], [0], [0], [1], [0, 0, 1, 1], [], []>} : vector<32x96xbf16>, vector<96x18xbf16>, vector<32x18xf32> -> vector<32x18xf32>
      %23 = vector.extract_strided_slice %22 {offsets = [0, 1], sizes = [32, 16], strides = [1, 1]} : vector<32x18xf32> to vector<32x16xf32>
      %24 = arith.addf %19, %23 : vector<32x16xf32>
      %c2 = arith.constant 2 : index
      %c0_18 = arith.constant 0 : index
      %c0_19 = arith.constant 0 : index
      %25 = vector.load %arg2[%c2, %c0_18, %c0_19] : memref<3x32x96xbf16, #tpu.memory_space<vmem>>, vector<1x32x96xbf16>
      %26 = vector.shape_cast %25 : vector<1x32x96xbf16> to vector<32x96xbf16>
      %cst_20 = arith.constant dense<0.000000e+00> : vector<32x18xf32>
      %27 = tpu.matmul %26, %13, %cst_20 {dimension_numbers = #tpu.dot_dimension_numbers<[1], [0], [0], [1], [0, 0, 1, 1], [], []>} : vector<32x96xbf16>, vector<96x18xbf16>, vector<32x18xf32> -> vector<32x18xf32>
      %28 = vector.extract_strided_slice %27 {offsets = [0, 2], sizes = [32, 16], strides = [1, 1]} : vector<32x18xf32> to vector<32x16xf32>
      %29 = arith.addf %24, %28 : vector<32x16xf32>
      %c0_21 = arith.constant 0 : index
      %c0_22 = arith.constant 0 : index
      %30 = vector.load %arg3[%c0_21, %c0_22] : memref<32x1xf32, #tpu.memory_space<vmem>>, vector<32x1xf32>
      %31 = vector.broadcast %30 : vector<32x1xf32> to vector<32x16xf32>
      %32 = arith.addf %29, %31 : vector<32x16xf32>
      %cst_23 = arith.constant 0.000000e+00 : f32
      %33 = vector.broadcast %cst_23 : f32 to vector<32x16xf32>
      %34 = arith.cmpf oge, %32, %33 : vector<32x16xf32>
      %cst_24 = arith.constant 2.500000e-01 : f32
      %35 = vector.broadcast %cst_24 : f32 to vector<32x16xf32>
      %36 = arith.mulf %35, %32 : vector<32x16xf32>
      %37 = arith.select %34, %32, %36 : vector<32x16xi1>, vector<32x16xf32>
      %38 = arith.truncf %37 : vector<32x16xf32> to vector<32x16xbf16>
      %c0_25 = arith.constant 0 : index
      %39 = arith.index_cast %arg5 : i32 to index
      %c0_26 = arith.constant 0 : index
      %c0_27 = arith.constant 0 : index
      %40 = vector.load %arg4[%c0_25, %39, %c0_26, %c0_27] : memref<1x16x32x16xbf16, #tpu.memory_space<vmem>>, vector<1x1x32x16xbf16>
      %41 = vector.shape_cast %40 : vector<1x1x32x16xbf16> to vector<32x16xbf16>
      %42 = vector.shape_cast %38 : vector<32x16xbf16> to vector<1x1x32x16xbf16>
      tpu.vector_store %arg4[%c0_25, %39, %c0_26, %c0_27], %42 {strides = array<i32>} : memref<1x16x32x16xbf16, #tpu.memory_space<vmem>>, vector<1x1x32x16xbf16>,
    }
    %c16_i32_0 = arith.constant 16 : i32
    return
  }
  func.func @transform_0(%arg0: i32) -> (i32, i32, i32, i32) {
    %c0_i32 = arith.constant 0 : i32
    %c0_i32_0 = arith.constant 0 : i32
    %c0_i32_1 = arith.constant 0 : i32
    %c0_i32_2 = arith.constant 0 : i32
    return %arg0, %c0_i32, %c0_i32_0, %c0_i32_1 : i32, i32, i32, i32
  }
  func.func @transform_1(%arg0: i32) -> (i32, i32, i32) {
    %c0_i32 = arith.constant 0 : i32
    %c0_i32_0 = arith.constant 0 : i32
    %c0_i32_1 = arith.constant 0 : i32
    %c0_i32_2 = arith.constant 0 : i32
    return %c0_i32, %c0_i32_0, %c0_i32_1 : i32, i32, i32
  }
  func.func @transform_2(%arg0: i32) -> (i32, i32) {
    %c0_i32 = arith.constant 0 : i32
    %c0_i32_0 = arith.constant 0 : i32
    %c0_i32_1 = arith.constant 0 : i32
    return %c0_i32, %c0_i32_0 : i32, i32
  }
  func.func @transform_3(%arg0: i32) -> (i32, i32, i32, i32) {
    %c0_i32 = arith.constant 0 : i32
    %c0_i32_0 = arith.constant 0 : i32
    %c0_i32_1 = arith.constant 0 : i32
    %c0_i32_2 = arith.constant 0 : i32
    return %arg0, %c0_i32, %c0_i32_0, %c0_i32_1 : i32, i32, i32, i32
  }
}

module attributes {stable_mosaic.version = 11 : i64} {
  func.func @_interflow_kernel(%arg0: i32, %arg1: i32, %arg2: memref<1x4x128xf32, #tpu.memory_space<vmem>>, %arg3: memref<1x128xf32, #tpu.memory_space<vmem>>, %arg4: memref<1x4x128xf32, #tpu.memory_space<vmem>>) attributes {dimension_semantics = [#tpu.dimension_semantics<parallel>, #tpu.dimension_semantics<parallel>], iteration_bounds = array<i64: 2, 1>, scalar_prefetch = 0 : i64, scratch_operands = 0 : i64, tpu.core_type = #tpu.core_type<tc>, window_params = [{transform_indices = @transform_0, window_bounds = array<i64: 1, 4, 128>}, {transform_indices = @transform_1, window_bounds = array<i64: 1, 128>}, {transform_indices = @transform_2, window_bounds = array<i64: 1, 4, 128>}]} {
    %c0 = arith.constant 0 : index
    %c0_0 = arith.constant 0 : index
    %0 = vector.load %arg3[%c0, %c0_0] : memref<1x128xf32, #tpu.memory_space<vmem>>, vector<1x128xf32>
    %c0_1 = arith.constant 0 : index
    %c0_2 = arith.constant 0 : index
    %c0_3 = arith.constant 0 : index
    %1 = vector.load %arg2[%c0_1, %c0_2, %c0_3] : memref<1x4x128xf32, #tpu.memory_space<vmem>>, vector<1x4x128xf32>
    %2 = vector.shape_cast %1 : vector<1x4x128xf32> to vector<4x128xf32>
    %cst = arith.constant 1.250000e-01 : f32
    %3 = vector.broadcast %cst : f32 to vector<1x128xf32>
    %4 = arith.mulf %3, %0 : vector<1x128xf32>
    %cst_4 = arith.constant 1.500000e+00 : f32
    %5 = vector.broadcast %cst_4 : f32 to vector<1x128xf32>
    %6 = arith.subf %5, %4 : vector<1x128xf32>
    %cst_5 = arith.constant 9.99999974E-5 : f32
    %7 = vector.broadcast %cst_5 : f32 to vector<1x128xf32>
    %8 = arith.addf %6, %7 : vector<1x128xf32>
    %9 = vector.extract_strided_slice %2 {offsets = [1, 0], sizes = [1, 128], strides = [1, 1]} : vector<4x128xf32> to vector<1x128xf32>
    %cst_6 = arith.constant 1.250000e-01 : f32
    %10 = vector.broadcast %cst_6 : f32 to vector<1x128xf32>
    %11 = arith.mulf %10, %9 : vector<1x128xf32>
    %cst_7 = arith.constant 1.000000e+00 : f32
    %12 = vector.broadcast %cst_7 : f32 to vector<1x128xf32>
    %13 = arith.addf %12, %11 : vector<1x128xf32>
    %14 = tpu.reciprocal %13 {approx = true} : vector<1x128xf32> -> vector<1x128xf32>
    %15 = vector.extract_strided_slice %2 {offsets = [3, 0], sizes = [1, 128], strides = [1, 1]} : vector<4x128xf32> to vector<1x128xf32>
    %cst_8 = arith.constant 1.250000e-01 : f32
    %16 = vector.broadcast %cst_8 : f32 to vector<1x128xf32>
    %17 = arith.mulf %16, %15 : vector<1x128xf32>
    %cst_9 = arith.constant 1.000000e+00 : f32
    %18 = vector.broadcast %cst_9 : f32 to vector<1x128xf32>
    %19 = arith.subf %18, %17 : vector<1x128xf32>
    %20 = tpu.reciprocal %19 {approx = true} : vector<1x128xf32> -> vector<1x128xf32>
    %21 = arith.mulf %8, %14 : vector<1x128xf32>
    %cst_10 = arith.constant 1.000000e+00 : f32
    %22 = vector.broadcast %cst_10 : f32 to vector<1x128xf32>
    %23 = arith.subf %22, %8 : vector<1x128xf32>
    %24 = arith.mulf %23, %20 : vector<1x128xf32>
    %25 = vector.extract_strided_slice %2 {offsets = [0, 0], sizes = [2, 128], strides = [1, 1]} : vector<4x128xf32> to vector<2x128xf32>
    %26 = vector.broadcast %21 : vector<1x128xf32> to vector<2x128xf32>
    %27 = arith.mulf %26, %25 : vector<2x128xf32>
    %c0_11 = arith.constant 0 : index
    %c0_12 = arith.constant 0 : index
    %c0_13 = arith.constant 0 : index
    %28 = vector.load %arg4[%c0_11, %c0_12, %c0_13] : memref<1x4x128xf32, #tpu.memory_space<vmem>>, vector<1x2x128xf32>
    %29 = vector.shape_cast %28 : vector<1x2x128xf32> to vector<2x128xf32>
    %30 = vector.shape_cast %27 : vector<2x128xf32> to vector<1x2x128xf32>
    tpu.vector_store %arg4[%c0_11, %c0_12, %c0_13], %30 {strides = array<i32>} : memref<1x4x128xf32, #tpu.memory_space<vmem>>, vector<1x2x128xf32>,
    %31 = vector.extract_strided_slice %2 {offsets = [2, 0], sizes = [2, 128], strides = [1, 1]} : vector<4x128xf32> to vector<2x128xf32>
    %32 = vector.broadcast %24 : vector<1x128xf32> to vector<2x128xf32>
    %33 = arith.mulf %32, %31 : vector<2x128xf32>
    %c0_14 = arith.constant 0 : index
    %c2 = arith.constant 2 : index
    %c0_15 = arith.constant 0 : index
    %34 = vector.load %arg4[%c0_14, %c2, %c0_15] : memref<1x4x128xf32, #tpu.memory_space<vmem>>, vector<1x2x128xf32>
    %35 = vector.shape_cast %34 : vector<1x2x128xf32> to vector<2x128xf32>
    %36 = vector.shape_cast %33 : vector<2x128xf32> to vector<1x2x128xf32>
    tpu.vector_store %arg4[%c0_14, %c2, %c0_15], %36 {strides = array<i32>} : memref<1x4x128xf32, #tpu.memory_space<vmem>>, vector<1x2x128xf32>,
    return
  }
  func.func @transform_0(%arg0: i32, %arg1: i32) -> (i32, i32, i32) {
    %c0_i32 = arith.constant 0 : i32
    %c0_i32_0 = arith.constant 0 : i32
    return %arg0, %c0_i32, %arg1 : i32, i32, i32
  }
  func.func @transform_1(%arg0: i32, %arg1: i32) -> (i32, i32) {
    %c0_i32 = arith.constant 0 : i32
    %c0_i32_0 = arith.constant 0 : i32
    return %c0_i32, %arg1 : i32, i32
  }
  func.func @transform_2(%arg0: i32, %arg1: i32) -> (i32, i32, i32) {
    %c0_i32 = arith.constant 0 : i32
    %c0_i32_0 = arith.constant 0 : i32
    return %arg0, %c0_i32, %arg1 : i32, i32, i32
  }
}

module attributes {stable_mosaic.version = 11 : i64} {
  func.func @_conv3x3_row_kernel(%arg0: i32, %arg1: memref<1x17x64x9xbf16, #tpu.memory_space<vmem>>, %arg2: memref<2x64x192xbf16, #tpu.memory_space<vmem>>, %arg3: memref<64x1xf32, #tpu.memory_space<vmem>>, %arg4: memref<1x8x64x8xbf16, #tpu.memory_space<vmem>>) attributes {dimension_semantics = [#tpu.dimension_semantics<parallel>], iteration_bounds = array<i64: 4>, scalar_prefetch = 0 : i64, scratch_operands = 0 : i64, tpu.core_type = #tpu.core_type<tc>, window_params = [{transform_indices = @transform_0, window_bounds = array<i64: 1, 17, 64, 9>}, {pipeline_mode = #tpu.pipeline_mode<synchronous>, transform_indices = @transform_1, window_bounds = array<i64: 2, 64, 192>}, {pipeline_mode = #tpu.pipeline_mode<synchronous>, transform_indices = @transform_2, window_bounds = array<i64: 64, 1>}, {transform_indices = @transform_3, window_bounds = array<i64: 1, 8, 64, 8>}]} {
    %c0_i32 = arith.constant 0 : i32
    %c8_i32 = arith.constant 8 : i32
    %0 = arith.addi %c0_i32, %c8_i32 : i32
    %c1_i32 = arith.constant 1 : i32
    scf.for %arg5 = %c0_i32 to %0 step %c1_i32  : i32 {
      %c2_i32 = arith.constant 2 : i32
      %1 = arith.muli %arg5, %c2_i32 : i32
      %c0 = arith.constant 0 : index
      %2 = arith.index_cast %1 : i32 to index
      %c0_1 = arith.constant 0 : index
      %c0_2 = arith.constant 0 : index
      %3 = vector.load %arg1[%c0, %2, %c0_1, %c0_2] : memref<1x17x64x9xbf16, #tpu.memory_space<vmem>>, vector<1x1x64x9xbf16>
      %4 = vector.shape_cast %3 : vector<1x1x64x9xbf16> to vector<64x9xbf16>
      %c1_i32_3 = arith.constant 1 : i32
      %5 = arith.addi %1, %c1_i32_3 : i32
      %c0_4 = arith.constant 0 : index
      %6 = arith.index_cast %5 : i32 to index
      %c0_5 = arith.constant 0 : index
      %c0_6 = arith.constant 0 : index
      %7 = vector.load %arg1[%c0_4, %6, %c0_5, %c0_6] : memref<1x17x64x9xbf16, #tpu.memory_space<vmem>>, vector<1x1x64x9xbf16>
      %8 = vector.shape_cast %7 : vector<1x1x64x9xbf16> to vector<64x9xbf16>
      %c2_i32_7 = arith.constant 2 : i32
      %9 = arith.addi %1, %c2_i32_7 : i32
      %c0_8 = arith.constant 0 : index
      %10 = arith.index_cast %9 : i32 to index
      %c0_9 = arith.constant 0 : index
      %c0_10 = arith.constant 0 : index
      %11 = vector.load %arg1[%c0_8, %10, %c0_9, %c0_10] : memref<1x17x64x9xbf16, #tpu.memory_space<vmem>>, vector<1x1x64x9xbf16>
      %12 = vector.shape_cast %11 : vector<1x1x64x9xbf16> to vector<64x9xbf16>
      %13 = tpu.concatenate %4, %8, %12 in 0 : vector<64x9xbf16>, vector<64x9xbf16>, vector<64x9xbf16> -> vector<192x9xbf16>
      %cst = arith.constant 0.000000e+00 : f32
      %14 = vector.broadcast %cst : f32 to vector<64x8xf32>
      %c0_11 = arith.constant 0 : index
      %c0_12 = arith.constant 0 : index
      %c0_13 = arith.constant 0 : index
      %15 = vector.load %arg2[%c0_11, %c0_12, %c0_13] : memref<2x64x192xbf16, #tpu.memory_space<vmem>>, vector<1x64x192xbf16>
      %16 = vector.shape_cast %15 : vector<1x64x192xbf16> to vector<64x192xbf16>
      %cst_14 = arith.constant dense<0.000000e+00> : vector<64x9xf32>
      %17 = tpu.matmul %16, %13, %cst_14 {dimension_numbers = #tpu.dot_dimension_numbers<[1], [0], [0], [1], [0, 0, 1, 1], [], []>} : vector<64x192xbf16>, vector<192x9xbf16>, vector<64x9xf32> -> vector<64x9xf32>
      %18 = vector.extract_strided_slice %17 {offsets = [0, 0], sizes = [64, 8], strides = [1, 1]} : vector<64x9xf32> to vector<64x8xf32>
      %19 = arith.addf %14, %18 : vector<64x8xf32>
      %c1 = arith.constant 1 : index
      %c0_15 = arith.constant 0 : index
      %c0_16 = arith.constant 0 : index
      %20 = vector.load %arg2[%c1, %c0_15, %c0_16] : memref<2x64x192xbf16, #tpu.memory_space<vmem>>, vector<1x64x192xbf16>
      %21 = vector.shape_cast %20 : vector<1x64x192xbf16> to vector<64x192xbf16>
      %cst_17 = arith.constant dense<0.000000e+00> : vector<64x9xf32>
      %22 = tpu.matmul %21, %13, %cst_17 {dimension_numbers = #tpu.dot_dimension_numbers<[1], [0], [0], [1], [0, 0, 1, 1], [], []>} : vector<64x192xbf16>, vector<192x9xbf16>, vector<64x9xf32> -> vector<64x9xf32>
      %23 = vector.extract_strided_slice %22 {offsets = [0, 1], sizes = [64, 8], strides = [1, 1]} : vector<64x9xf32> to vector<64x8xf32>
      %24 = arith.addf %19, %23 : vector<64x8xf32>
      %c0_18 = arith.constant 0 : index
      %c0_19 = arith.constant 0 : index
      %25 = vector.load %arg3[%c0_18, %c0_19] : memref<64x1xf32, #tpu.memory_space<vmem>>, vector<64x1xf32>
      %26 = vector.broadcast %25 : vector<64x1xf32> to vector<64x8xf32>
      %27 = arith.addf %24, %26 : vector<64x8xf32>
      %cst_20 = arith.constant 0.000000e+00 : f32
      %28 = vector.broadcast %cst_20 : f32 to vector<64x8xf32>
      %29 = arith.cmpf oge, %27, %28 : vector<64x8xf32>
      %cst_21 = arith.constant 2.500000e-01 : f32
      %30 = vector.broadcast %cst_21 : f32 to vector<64x8xf32>
      %31 = arith.mulf %30, %27 : vector<64x8xf32>
      %32 = arith.select %29, %27, %31 : vector<64x8xi1>, vector<64x8xf32>
      %33 = arith.truncf %32 : vector<64x8xf32> to vector<64x8xbf16>
      %c0_22 = arith.constant 0 : index
      %34 = arith.index_cast %arg5 : i32 to index
      %c0_23 = arith.constant 0 : index
      %c0_24 = arith.constant 0 : index
      %35 = vector.load %arg4[%c0_22, %34, %c0_23, %c0_24] : memref<1x8x64x8xbf16, #tpu.memory_space<vmem>>, vector<1x1x64x8xbf16>
      %36 = vector.shape_cast %35 : vector<1x1x64x8xbf16> to vector<64x8xbf16>
      %37 = vector.shape_cast %33 : vector<64x8xbf16> to vector<1x1x64x8xbf16>
      tpu.vector_store %arg4[%c0_22, %34, %c0_23, %c0_24], %37 {strides = array<i32>} : memref<1x8x64x8xbf16, #tpu.memory_space<vmem>>, vector<1x1x64x8xbf16>,
    }
    %c8_i32_0 = arith.constant 8 : i32
    return
  }
  func.func @transform_0(%arg0: i32) -> (i32, i32, i32, i32) {
    %c0_i32 = arith.constant 0 : i32
    %c0_i32_0 = arith.constant 0 : i32
    %c0_i32_1 = arith.constant 0 : i32
    %c0_i32_2 = arith.constant 0 : i32
    return %arg0, %c0_i32, %c0_i32_0, %c0_i32_1 : i32, i32, i32, i32
  }
  func.func @transform_1(%arg0: i32) -> (i32, i32, i32) {
    %c0_i32 = arith.constant 0 : i32
    %c0_i32_0 = arith.constant 0 : i32
    %c0_i32_1 = arith.constant 0 : i32
    %c0_i32_2 = arith.constant 0 : i32
    return %c0_i32, %c0_i32_0, %c0_i32_1 : i32, i32, i32
  }
  func.func @transform_2(%arg0: i32) -> (i32, i32) {
    %c0_i32 = arith.constant 0 : i32
    %c0_i32_0 = arith.constant 0 : i32
    %c0_i32_1 = arith.constant 0 : i32
    return %c0_i32, %c0_i32_0 : i32, i32
  }
  func.func @transform_3(%arg0: i32) -> (i32, i32, i32, i32) {
    %c0_i32 = arith.constant 0 : i32
    %c0_i32_0 = arith.constant 0 : i32
    %c0_i32_1 = arith.constant 0 : i32
    %c0_i32_2 = arith.constant 0 : i32
    return %arg0, %c0_i32, %c0_i32_0, %c0_i32_1 : i32, i32, i32, i32
  }
}

module attributes {stable_mosaic.version = 11 : i64} {
  func.func @_conv3x3_row_kernel(%arg0: i32, %arg1: memref<1x10x64x10xbf16, #tpu.memory_space<vmem>>, %arg2: memref<3x64x192xbf16, #tpu.memory_space<vmem>>, %arg3: memref<64x1xf32, #tpu.memory_space<vmem>>, %arg4: memref<1x8x64x8xbf16, #tpu.memory_space<vmem>>) attributes {dimension_semantics = [#tpu.dimension_semantics<parallel>], iteration_bounds = array<i64: 4>, scalar_prefetch = 0 : i64, scratch_operands = 0 : i64, tpu.core_type = #tpu.core_type<tc>, window_params = [{transform_indices = @transform_0, window_bounds = array<i64: 1, 10, 64, 10>}, {pipeline_mode = #tpu.pipeline_mode<synchronous>, transform_indices = @transform_1, window_bounds = array<i64: 3, 64, 192>}, {pipeline_mode = #tpu.pipeline_mode<synchronous>, transform_indices = @transform_2, window_bounds = array<i64: 64, 1>}, {transform_indices = @transform_3, window_bounds = array<i64: 1, 8, 64, 8>}]} {
    %c0_i32 = arith.constant 0 : i32
    %c8_i32 = arith.constant 8 : i32
    %0 = arith.addi %c0_i32, %c8_i32 : i32
    %c1_i32 = arith.constant 1 : i32
    scf.for %arg5 = %c0_i32 to %0 step %c1_i32  : i32 {
      %c1_i32_1 = arith.constant 1 : i32
      %1 = arith.muli %arg5, %c1_i32_1 : i32
      %c0 = arith.constant 0 : index
      %2 = arith.index_cast %1 : i32 to index
      %c0_2 = arith.constant 0 : index
      %c0_3 = arith.constant 0 : index
      %3 = vector.load %arg1[%c0, %2, %c0_2, %c0_3] : memref<1x10x64x10xbf16, #tpu.memory_space<vmem>>, vector<1x1x64x10xbf16>
      %4 = vector.shape_cast %3 : vector<1x1x64x10xbf16> to vector<64x10xbf16>
      %c1_i32_4 = arith.constant 1 : i32
      %5 = arith.addi %1, %c1_i32_4 : i32
      %c0_5 = arith.constant 0 : index
      %6 = arith.index_cast %5 : i32 to index
      %c0_6 = arith.constant 0 : index
      %c0_7 = arith.constant 0 : index
      %7 = vector.load %arg1[%c0_5, %6, %c0_6, %c0_7] : memref<1x10x64x10xbf16, #tpu.memory_space<vmem>>, vector<1x1x64x10xbf16>
      %8 = vector.shape_cast %7 : vector<1x1x64x10xbf16> to vector<64x10xbf16>
      %c2_i32 = arith.constant 2 : i32
      %9 = arith.addi %1, %c2_i32 : i32
      %c0_8 = arith.constant 0 : index
      %10 = arith.index_cast %9 : i32 to index
      %c0_9 = arith.constant 0 : index
      %c0_10 = arith.constant 0 : index
      %11 = vector.load %arg1[%c0_8, %10, %c0_9, %c0_10] : memref<1x10x64x10xbf16, #tpu.memory_space<vmem>>, vector<1x1x64x10xbf16>
      %12 = vector.shape_cast %11 : vector<1x1x64x10xbf16> to vector<64x10xbf16>
      %13 = tpu.concatenate %4, %8, %12 in 0 : vector<64x10xbf16>, vector<64x10xbf16>, vector<64x10xbf16> -> vector<192x10xbf16>
      %cst = arith.constant 0.000000e+00 : f32
      %14 = vector.broadcast %cst : f32 to vector<64x8xf32>
      %c0_11 = arith.constant 0 : index
      %c0_12 = arith.constant 0 : index
      %c0_13 = arith.constant 0 : index
      %15 = vector.load %arg2[%c0_11, %c0_12, %c0_13] : memref<3x64x192xbf16, #tpu.memory_space<vmem>>, vector<1x64x192xbf16>
      %16 = vector.shape_cast %15 : vector<1x64x192xbf16> to vector<64x192xbf16>
      %cst_14 = arith.constant dense<0.000000e+00> : vector<64x10xf32>
      %17 = tpu.matmul %16, %13, %cst_14 {dimension_numbers = #tpu.dot_dimension_numbers<[1], [0], [0], [1], [0, 0, 1, 1], [], []>} : vector<64x192xbf16>, vector<192x10xbf16>, vector<64x10xf32> -> vector<64x10xf32>
      %18 = vector.extract_strided_slice %17 {offsets = [0, 0], sizes = [64, 8], strides = [1, 1]} : vector<64x10xf32> to vector<64x8xf32>
      %19 = arith.addf %14, %18 : vector<64x8xf32>
      %c1 = arith.constant 1 : index
      %c0_15 = arith.constant 0 : index
      %c0_16 = arith.constant 0 : index
      %20 = vector.load %arg2[%c1, %c0_15, %c0_16] : memref<3x64x192xbf16, #tpu.memory_space<vmem>>, vector<1x64x192xbf16>
      %21 = vector.shape_cast %20 : vector<1x64x192xbf16> to vector<64x192xbf16>
      %cst_17 = arith.constant dense<0.000000e+00> : vector<64x10xf32>
      %22 = tpu.matmul %21, %13, %cst_17 {dimension_numbers = #tpu.dot_dimension_numbers<[1], [0], [0], [1], [0, 0, 1, 1], [], []>} : vector<64x192xbf16>, vector<192x10xbf16>, vector<64x10xf32> -> vector<64x10xf32>
      %23 = vector.extract_strided_slice %22 {offsets = [0, 1], sizes = [64, 8], strides = [1, 1]} : vector<64x10xf32> to vector<64x8xf32>
      %24 = arith.addf %19, %23 : vector<64x8xf32>
      %c2 = arith.constant 2 : index
      %c0_18 = arith.constant 0 : index
      %c0_19 = arith.constant 0 : index
      %25 = vector.load %arg2[%c2, %c0_18, %c0_19] : memref<3x64x192xbf16, #tpu.memory_space<vmem>>, vector<1x64x192xbf16>
      %26 = vector.shape_cast %25 : vector<1x64x192xbf16> to vector<64x192xbf16>
      %cst_20 = arith.constant dense<0.000000e+00> : vector<64x10xf32>
      %27 = tpu.matmul %26, %13, %cst_20 {dimension_numbers = #tpu.dot_dimension_numbers<[1], [0], [0], [1], [0, 0, 1, 1], [], []>} : vector<64x192xbf16>, vector<192x10xbf16>, vector<64x10xf32> -> vector<64x10xf32>
      %28 = vector.extract_strided_slice %27 {offsets = [0, 2], sizes = [64, 8], strides = [1, 1]} : vector<64x10xf32> to vector<64x8xf32>
      %29 = arith.addf %24, %28 : vector<64x8xf32>
      %c0_21 = arith.constant 0 : index
      %c0_22 = arith.constant 0 : index
      %30 = vector.load %arg3[%c0_21, %c0_22] : memref<64x1xf32, #tpu.memory_space<vmem>>, vector<64x1xf32>
      %31 = vector.broadcast %30 : vector<64x1xf32> to vector<64x8xf32>
      %32 = arith.addf %29, %31 : vector<64x8xf32>
      %cst_23 = arith.constant 0.000000e+00 : f32
      %33 = vector.broadcast %cst_23 : f32 to vector<64x8xf32>
      %34 = arith.cmpf oge, %32, %33 : vector<64x8xf32>
      %cst_24 = arith.constant 2.500000e-01 : f32
      %35 = vector.broadcast %cst_24 : f32 to vector<64x8xf32>
      %36 = arith.mulf %35, %32 : vector<64x8xf32>
      %37 = arith.select %34, %32, %36 : vector<64x8xi1>, vector<64x8xf32>
      %38 = arith.truncf %37 : vector<64x8xf32> to vector<64x8xbf16>
      %c0_25 = arith.constant 0 : index
      %39 = arith.index_cast %arg5 : i32 to index
      %c0_26 = arith.constant 0 : index
      %c0_27 = arith.constant 0 : index
      %40 = vector.load %arg4[%c0_25, %39, %c0_26, %c0_27] : memref<1x8x64x8xbf16, #tpu.memory_space<vmem>>, vector<1x1x64x8xbf16>
      %41 = vector.shape_cast %40 : vector<1x1x64x8xbf16> to vector<64x8xbf16>
      %42 = vector.shape_cast %38 : vector<64x8xbf16> to vector<1x1x64x8xbf16>
      tpu.vector_store %arg4[%c0_25, %39, %c0_26, %c0_27], %42 {strides = array<i32>} : memref<1x8x64x8xbf16, #tpu.memory_space<vmem>>, vector<1x1x64x8xbf16>,
    }
    %c8_i32_0 = arith.constant 8 : i32
    return
  }
  func.func @transform_0(%arg0: i32) -> (i32, i32, i32, i32) {
    %c0_i32 = arith.constant 0 : i32
    %c0_i32_0 = arith.constant 0 : i32
    %c0_i32_1 = arith.constant 0 : i32
    %c0_i32_2 = arith.constant 0 : i32
    return %arg0, %c0_i32, %c0_i32_0, %c0_i32_1 : i32, i32, i32, i32
  }
  func.func @transform_1(%arg0: i32) -> (i32, i32, i32) {
    %c0_i32 = arith.constant 0 : i32
    %c0_i32_0 = arith.constant 0 : i32
    %c0_i32_1 = arith.constant 0 : i32
    %c0_i32_2 = arith.constant 0 : i32
    return %c0_i32, %c0_i32_0, %c0_i32_1 : i32, i32, i32
  }
  func.func @transform_2(%arg0: i32) -> (i32, i32) {
    %c0_i32 = arith.constant 0 : i32
    %c0_i32_0 = arith.constant 0 : i32
    %c0_i32_1 = arith.constant 0 : i32
    return %c0_i32, %c0_i32_0 : i32, i32
  }
  func.func @transform_3(%arg0: i32) -> (i32, i32, i32, i32) {
    %c0_i32 = arith.constant 0 : i32
    %c0_i32_0 = arith.constant 0 : i32
    %c0_i32_1 = arith.constant 0 : i32
    %c0_i32_2 = arith.constant 0 : i32
    return %arg0, %c0_i32, %c0_i32_0, %c0_i32_1 : i32, i32, i32, i32
  }
}

module attributes {stable_mosaic.version = 11 : i64} {
  func.func @_interflow_kernel(%arg0: i32, %arg1: i32, %arg2: memref<1x4x128xf32, #tpu.memory_space<vmem>>, %arg3: memref<1x128xf32, #tpu.memory_space<vmem>>, %arg4: memref<1x4x128xf32, #tpu.memory_space<vmem>>) attributes {dimension_semantics = [#tpu.dimension_semantics<parallel>, #tpu.dimension_semantics<parallel>], iteration_bounds = array<i64: 2, 1>, scalar_prefetch = 0 : i64, scratch_operands = 0 : i64, tpu.core_type = #tpu.core_type<tc>, window_params = [{transform_indices = @transform_0, window_bounds = array<i64: 1, 4, 128>}, {transform_indices = @transform_1, window_bounds = array<i64: 1, 128>}, {transform_indices = @transform_2, window_bounds = array<i64: 1, 4, 128>}]} {
    %c0 = arith.constant 0 : index
    %c0_0 = arith.constant 0 : index
    %0 = vector.load %arg3[%c0, %c0_0] : memref<1x128xf32, #tpu.memory_space<vmem>>, vector<1x128xf32>
    %c0_1 = arith.constant 0 : index
    %c0_2 = arith.constant 0 : index
    %c0_3 = arith.constant 0 : index
    %1 = vector.load %arg2[%c0_1, %c0_2, %c0_3] : memref<1x4x128xf32, #tpu.memory_space<vmem>>, vector<1x4x128xf32>
    %2 = vector.shape_cast %1 : vector<1x4x128xf32> to vector<4x128xf32>
    %cst = arith.constant 2.500000e-01 : f32
    %3 = vector.broadcast %cst : f32 to vector<1x128xf32>
    %4 = arith.mulf %3, %0 : vector<1x128xf32>
    %cst_4 = arith.constant 1.500000e+00 : f32
    %5 = vector.broadcast %cst_4 : f32 to vector<1x128xf32>
    %6 = arith.subf %5, %4 : vector<1x128xf32>
    %cst_5 = arith.constant 9.99999974E-5 : f32
    %7 = vector.broadcast %cst_5 : f32 to vector<1x128xf32>
    %8 = arith.addf %6, %7 : vector<1x128xf32>
    %9 = vector.extract_strided_slice %2 {offsets = [1, 0], sizes = [1, 128], strides = [1, 1]} : vector<4x128xf32> to vector<1x128xf32>
    %cst_6 = arith.constant 2.500000e-01 : f32
    %10 = vector.broadcast %cst_6 : f32 to vector<1x128xf32>
    %11 = arith.mulf %10, %9 : vector<1x128xf32>
    %cst_7 = arith.constant 1.000000e+00 : f32
    %12 = vector.broadcast %cst_7 : f32 to vector<1x128xf32>
    %13 = arith.addf %12, %11 : vector<1x128xf32>
    %14 = tpu.reciprocal %13 {approx = true} : vector<1x128xf32> -> vector<1x128xf32>
    %15 = vector.extract_strided_slice %2 {offsets = [3, 0], sizes = [1, 128], strides = [1, 1]} : vector<4x128xf32> to vector<1x128xf32>
    %cst_8 = arith.constant 2.500000e-01 : f32
    %16 = vector.broadcast %cst_8 : f32 to vector<1x128xf32>
    %17 = arith.mulf %16, %15 : vector<1x128xf32>
    %cst_9 = arith.constant 1.000000e+00 : f32
    %18 = vector.broadcast %cst_9 : f32 to vector<1x128xf32>
    %19 = arith.subf %18, %17 : vector<1x128xf32>
    %20 = tpu.reciprocal %19 {approx = true} : vector<1x128xf32> -> vector<1x128xf32>
    %21 = arith.mulf %8, %14 : vector<1x128xf32>
    %cst_10 = arith.constant 1.000000e+00 : f32
    %22 = vector.broadcast %cst_10 : f32 to vector<1x128xf32>
    %23 = arith.subf %22, %8 : vector<1x128xf32>
    %24 = arith.mulf %23, %20 : vector<1x128xf32>
    %25 = vector.extract_strided_slice %2 {offsets = [0, 0], sizes = [2, 128], strides = [1, 1]} : vector<4x128xf32> to vector<2x128xf32>
    %26 = vector.broadcast %21 : vector<1x128xf32> to vector<2x128xf32>
    %27 = arith.mulf %26, %25 : vector<2x128xf32>
    %c0_11 = arith.constant 0 : index
    %c0_12 = arith.constant 0 : index
    %c0_13 = arith.constant 0 : index
    %28 = vector.load %arg4[%c0_11, %c0_12, %c0_13] : memref<1x4x128xf32, #tpu.memory_space<vmem>>, vector<1x2x128xf32>
    %29 = vector.shape_cast %28 : vector<1x2x128xf32> to vector<2x128xf32>
    %30 = vector.shape_cast %27 : vector<2x128xf32> to vector<1x2x128xf32>
    tpu.vector_store %arg4[%c0_11, %c0_12, %c0_13], %30 {strides = array<i32>} : memref<1x4x128xf32, #tpu.memory_space<vmem>>, vector<1x2x128xf32>,
    %31 = vector.extract_strided_slice %2 {offsets = [2, 0], sizes = [2, 128], strides = [1, 1]} : vector<4x128xf32> to vector<2x128xf32>
    %32 = vector.broadcast %24 : vector<1x128xf32> to vector<2x128xf32>
    %33 = arith.mulf %32, %31 : vector<2x128xf32>
    %c0_14 = arith.constant 0 : index
    %c2 = arith.constant 2 : index
    %c0_15 = arith.constant 0 : index
    %34 = vector.load %arg4[%c0_14, %c2, %c0_15] : memref<1x4x128xf32, #tpu.memory_space<vmem>>, vector<1x2x128xf32>
    %35 = vector.shape_cast %34 : vector<1x2x128xf32> to vector<2x128xf32>
    %36 = vector.shape_cast %33 : vector<2x128xf32> to vector<1x2x128xf32>
    tpu.vector_store %arg4[%c0_14, %c2, %c0_15], %36 {strides = array<i32>} : memref<1x4x128xf32, #tpu.memory_space<vmem>>, vector<1x2x128xf32>,
    return
  }
  func.func @transform_0(%arg0: i32, %arg1: i32) -> (i32, i32, i32) {
    %c0_i32 = arith.constant 0 : i32
    %c0_i32_0 = arith.constant 0 : i32
    return %arg0, %c0_i32, %arg1 : i32, i32, i32
  }
  func.func @transform_1(%arg0: i32, %arg1: i32) -> (i32, i32) {
    %c0_i32 = arith.constant 0 : i32
    %c0_i32_0 = arith.constant 0 : i32
    return %c0_i32, %arg1 : i32, i32
  }
  func.func @transform_2(%arg0: i32, %arg1: i32) -> (i32, i32, i32) {
    %c0_i32 = arith.constant 0 : i32
    %c0_i32_0 = arith.constant 0 : i32
    return %arg0, %c0_i32, %arg1 : i32, i32, i32
  }
}

module attributes {stable_mosaic.version = 11 : i64} {
  func.func @_conv3x3_row_kernel(%arg0: i32, %arg1: memref<1x9x128x5xbf16, #tpu.memory_space<vmem>>, %arg2: memref<2x96x384xbf16, #tpu.memory_space<vmem>>, %arg3: memref<96x1xf32, #tpu.memory_space<vmem>>, %arg4: memref<1x4x96x4xbf16, #tpu.memory_space<vmem>>) attributes {dimension_semantics = [#tpu.dimension_semantics<parallel>], iteration_bounds = array<i64: 4>, scalar_prefetch = 0 : i64, scratch_operands = 0 : i64, tpu.core_type = #tpu.core_type<tc>, window_params = [{transform_indices = @transform_0, window_bounds = array<i64: 1, 9, 128, 5>}, {pipeline_mode = #tpu.pipeline_mode<synchronous>, transform_indices = @transform_1, window_bounds = array<i64: 2, 96, 384>}, {pipeline_mode = #tpu.pipeline_mode<synchronous>, transform_indices = @transform_2, window_bounds = array<i64: 96, 1>}, {transform_indices = @transform_3, window_bounds = array<i64: 1, 4, 96, 4>}]} {
    %c0_i32 = arith.constant 0 : i32
    %c4_i32 = arith.constant 4 : i32
    %0 = arith.addi %c0_i32, %c4_i32 : i32
    %c1_i32 = arith.constant 1 : i32
    scf.for %arg5 = %c0_i32 to %0 step %c1_i32  : i32 {
      %c2_i32 = arith.constant 2 : i32
      %1 = arith.muli %arg5, %c2_i32 : i32
      %c0 = arith.constant 0 : index
      %2 = arith.index_cast %1 : i32 to index
      %c0_1 = arith.constant 0 : index
      %c0_2 = arith.constant 0 : index
      %3 = vector.load %arg1[%c0, %2, %c0_1, %c0_2] : memref<1x9x128x5xbf16, #tpu.memory_space<vmem>>, vector<1x1x128x5xbf16>
      %4 = vector.shape_cast %3 : vector<1x1x128x5xbf16> to vector<128x5xbf16>
      %c1_i32_3 = arith.constant 1 : i32
      %5 = arith.addi %1, %c1_i32_3 : i32
      %c0_4 = arith.constant 0 : index
      %6 = arith.index_cast %5 : i32 to index
      %c0_5 = arith.constant 0 : index
      %c0_6 = arith.constant 0 : index
      %7 = vector.load %arg1[%c0_4, %6, %c0_5, %c0_6] : memref<1x9x128x5xbf16, #tpu.memory_space<vmem>>, vector<1x1x128x5xbf16>
      %8 = vector.shape_cast %7 : vector<1x1x128x5xbf16> to vector<128x5xbf16>
      %c2_i32_7 = arith.constant 2 : i32
      %9 = arith.addi %1, %c2_i32_7 : i32
      %c0_8 = arith.constant 0 : index
      %10 = arith.index_cast %9 : i32 to index
      %c0_9 = arith.constant 0 : index
      %c0_10 = arith.constant 0 : index
      %11 = vector.load %arg1[%c0_8, %10, %c0_9, %c0_10] : memref<1x9x128x5xbf16, #tpu.memory_space<vmem>>, vector<1x1x128x5xbf16>
      %12 = vector.shape_cast %11 : vector<1x1x128x5xbf16> to vector<128x5xbf16>
      %13 = tpu.concatenate %4, %8, %12 in 0 : vector<128x5xbf16>, vector<128x5xbf16>, vector<128x5xbf16> -> vector<384x5xbf16>
      %cst = arith.constant 0.000000e+00 : f32
      %14 = vector.broadcast %cst : f32 to vector<96x4xf32>
      %c0_11 = arith.constant 0 : index
      %c0_12 = arith.constant 0 : index
      %c0_13 = arith.constant 0 : index
      %15 = vector.load %arg2[%c0_11, %c0_12, %c0_13] : memref<2x96x384xbf16, #tpu.memory_space<vmem>>, vector<1x96x384xbf16>
      %16 = vector.shape_cast %15 : vector<1x96x384xbf16> to vector<96x384xbf16>
      %cst_14 = arith.constant dense<0.000000e+00> : vector<96x5xf32>
      %17 = tpu.matmul %16, %13, %cst_14 {dimension_numbers = #tpu.dot_dimension_numbers<[1], [0], [0], [1], [0, 0, 1, 1], [], []>} : vector<96x384xbf16>, vector<384x5xbf16>, vector<96x5xf32> -> vector<96x5xf32>
      %18 = vector.extract_strided_slice %17 {offsets = [0, 0], sizes = [96, 4], strides = [1, 1]} : vector<96x5xf32> to vector<96x4xf32>
      %19 = arith.addf %14, %18 : vector<96x4xf32>
      %c1 = arith.constant 1 : index
      %c0_15 = arith.constant 0 : index
      %c0_16 = arith.constant 0 : index
      %20 = vector.load %arg2[%c1, %c0_15, %c0_16] : memref<2x96x384xbf16, #tpu.memory_space<vmem>>, vector<1x96x384xbf16>
      %21 = vector.shape_cast %20 : vector<1x96x384xbf16> to vector<96x384xbf16>
      %cst_17 = arith.constant dense<0.000000e+00> : vector<96x5xf32>
      %22 = tpu.matmul %21, %13, %cst_17 {dimension_numbers = #tpu.dot_dimension_numbers<[1], [0], [0], [1], [0, 0, 1, 1], [], []>} : vector<96x384xbf16>, vector<384x5xbf16>, vector<96x5xf32> -> vector<96x5xf32>
      %23 = vector.extract_strided_slice %22 {offsets = [0, 1], sizes = [96, 4], strides = [1, 1]} : vector<96x5xf32> to vector<96x4xf32>
      %24 = arith.addf %19, %23 : vector<96x4xf32>
      %c0_18 = arith.constant 0 : index
      %c0_19 = arith.constant 0 : index
      %25 = vector.load %arg3[%c0_18, %c0_19] : memref<96x1xf32, #tpu.memory_space<vmem>>, vector<96x1xf32>
      %26 = vector.broadcast %25 : vector<96x1xf32> to vector<96x4xf32>
      %27 = arith.addf %24, %26 : vector<96x4xf32>
      %cst_20 = arith.constant 0.000000e+00 : f32
      %28 = vector.broadcast %cst_20 : f32 to vector<96x4xf32>
      %29 = arith.cmpf oge, %27, %28 : vector<96x4xf32>
      %cst_21 = arith.constant 2.500000e-01 : f32
      %30 = vector.broadcast %cst_21 : f32 to vector<96x4xf32>
      %31 = arith.mulf %30, %27 : vector<96x4xf32>
      %32 = arith.select %29, %27, %31 : vector<96x4xi1>, vector<96x4xf32>
      %33 = arith.truncf %32 : vector<96x4xf32> to vector<96x4xbf16>
      %c0_22 = arith.constant 0 : index
      %34 = arith.index_cast %arg5 : i32 to index
      %c0_23 = arith.constant 0 : index
      %c0_24 = arith.constant 0 : index
      %35 = vector.load %arg4[%c0_22, %34, %c0_23, %c0_24] : memref<1x4x96x4xbf16, #tpu.memory_space<vmem>>, vector<1x1x96x4xbf16>
      %36 = vector.shape_cast %35 : vector<1x1x96x4xbf16> to vector<96x4xbf16>
      %37 = vector.shape_cast %33 : vector<96x4xbf16> to vector<1x1x96x4xbf16>
      tpu.vector_store %arg4[%c0_22, %34, %c0_23, %c0_24], %37 {strides = array<i32>} : memref<1x4x96x4xbf16, #tpu.memory_space<vmem>>, vector<1x1x96x4xbf16>,
    }
    %c4_i32_0 = arith.constant 4 : i32
    return
  }
  func.func @transform_0(%arg0: i32) -> (i32, i32, i32, i32) {
    %c0_i32 = arith.constant 0 : i32
    %c0_i32_0 = arith.constant 0 : i32
    %c0_i32_1 = arith.constant 0 : i32
    %c0_i32_2 = arith.constant 0 : i32
    return %arg0, %c0_i32, %c0_i32_0, %c0_i32_1 : i32, i32, i32, i32
  }
  func.func @transform_1(%arg0: i32) -> (i32, i32, i32) {
    %c0_i32 = arith.constant 0 : i32
    %c0_i32_0 = arith.constant 0 : i32
    %c0_i32_1 = arith.constant 0 : i32
    %c0_i32_2 = arith.constant 0 : i32
    return %c0_i32, %c0_i32_0, %c0_i32_1 : i32, i32, i32
  }
  func.func @transform_2(%arg0: i32) -> (i32, i32) {
    %c0_i32 = arith.constant 0 : i32
    %c0_i32_0 = arith.constant 0 : i32
    %c0_i32_1 = arith.constant 0 : i32
    return %c0_i32, %c0_i32_0 : i32, i32
  }
  func.func @transform_3(%arg0: i32) -> (i32, i32, i32, i32) {
    %c0_i32 = arith.constant 0 : i32
    %c0_i32_0 = arith.constant 0 : i32
    %c0_i32_1 = arith.constant 0 : i32
    %c0_i32_2 = arith.constant 0 : i32
    return %arg0, %c0_i32, %c0_i32_0, %c0_i32_1 : i32, i32, i32, i32
  }
}

module attributes {stable_mosaic.version = 11 : i64} {
  func.func @_conv3x3_row_kernel(%arg0: i32, %arg1: memref<1x6x96x6xbf16, #tpu.memory_space<vmem>>, %arg2: memref<3x96x288xbf16, #tpu.memory_space<vmem>>, %arg3: memref<96x1xf32, #tpu.memory_space<vmem>>, %arg4: memref<1x4x96x4xbf16, #tpu.memory_space<vmem>>) attributes {dimension_semantics = [#tpu.dimension_semantics<parallel>], iteration_bounds = array<i64: 4>, scalar_prefetch = 0 : i64, scratch_operands = 0 : i64, tpu.core_type = #tpu.core_type<tc>, window_params = [{transform_indices = @transform_0, window_bounds = array<i64: 1, 6, 96, 6>}, {pipeline_mode = #tpu.pipeline_mode<synchronous>, transform_indices = @transform_1, window_bounds = array<i64: 3, 96, 288>}, {pipeline_mode = #tpu.pipeline_mode<synchronous>, transform_indices = @transform_2, window_bounds = array<i64: 96, 1>}, {transform_indices = @transform_3, window_bounds = array<i64: 1, 4, 96, 4>}]} {
    %c0_i32 = arith.constant 0 : i32
    %c4_i32 = arith.constant 4 : i32
    %0 = arith.addi %c0_i32, %c4_i32 : i32
    %c1_i32 = arith.constant 1 : i32
    scf.for %arg5 = %c0_i32 to %0 step %c1_i32  : i32 {
      %c1_i32_1 = arith.constant 1 : i32
      %1 = arith.muli %arg5, %c1_i32_1 : i32
      %c0 = arith.constant 0 : index
      %2 = arith.index_cast %1 : i32 to index
      %c0_2 = arith.constant 0 : index
      %c0_3 = arith.constant 0 : index
      %3 = vector.load %arg1[%c0, %2, %c0_2, %c0_3] : memref<1x6x96x6xbf16, #tpu.memory_space<vmem>>, vector<1x1x96x6xbf16>
      %4 = vector.shape_cast %3 : vector<1x1x96x6xbf16> to vector<96x6xbf16>
      %c1_i32_4 = arith.constant 1 : i32
      %5 = arith.addi %1, %c1_i32_4 : i32
      %c0_5 = arith.constant 0 : index
      %6 = arith.index_cast %5 : i32 to index
      %c0_6 = arith.constant 0 : index
      %c0_7 = arith.constant 0 : index
      %7 = vector.load %arg1[%c0_5, %6, %c0_6, %c0_7] : memref<1x6x96x6xbf16, #tpu.memory_space<vmem>>, vector<1x1x96x6xbf16>
      %8 = vector.shape_cast %7 : vector<1x1x96x6xbf16> to vector<96x6xbf16>
      %c2_i32 = arith.constant 2 : i32
      %9 = arith.addi %1, %c2_i32 : i32
      %c0_8 = arith.constant 0 : index
      %10 = arith.index_cast %9 : i32 to index
      %c0_9 = arith.constant 0 : index
      %c0_10 = arith.constant 0 : index
      %11 = vector.load %arg1[%c0_8, %10, %c0_9, %c0_10] : memref<1x6x96x6xbf16, #tpu.memory_space<vmem>>, vector<1x1x96x6xbf16>
      %12 = vector.shape_cast %11 : vector<1x1x96x6xbf16> to vector<96x6xbf16>
      %13 = tpu.concatenate %4, %8, %12 in 0 : vector<96x6xbf16>, vector<96x6xbf16>, vector<96x6xbf16> -> vector<288x6xbf16>
      %cst = arith.constant 0.000000e+00 : f32
      %14 = vector.broadcast %cst : f32 to vector<96x4xf32>
      %c0_11 = arith.constant 0 : index
      %c0_12 = arith.constant 0 : index
      %c0_13 = arith.constant 0 : index
      %15 = vector.load %arg2[%c0_11, %c0_12, %c0_13] : memref<3x96x288xbf16, #tpu.memory_space<vmem>>, vector<1x96x288xbf16>
      %16 = vector.shape_cast %15 : vector<1x96x288xbf16> to vector<96x288xbf16>
      %cst_14 = arith.constant dense<0.000000e+00> : vector<96x6xf32>
      %17 = tpu.matmul %16, %13, %cst_14 {dimension_numbers = #tpu.dot_dimension_numbers<[1], [0], [0], [1], [0, 0, 1, 1], [], []>} : vector<96x288xbf16>, vector<288x6xbf16>, vector<96x6xf32> -> vector<96x6xf32>
      %18 = vector.extract_strided_slice %17 {offsets = [0, 0], sizes = [96, 4], strides = [1, 1]} : vector<96x6xf32> to vector<96x4xf32>
      %19 = arith.addf %14, %18 : vector<96x4xf32>
      %c1 = arith.constant 1 : index
      %c0_15 = arith.constant 0 : index
      %c0_16 = arith.constant 0 : index
      %20 = vector.load %arg2[%c1, %c0_15, %c0_16] : memref<3x96x288xbf16, #tpu.memory_space<vmem>>, vector<1x96x288xbf16>
      %21 = vector.shape_cast %20 : vector<1x96x288xbf16> to vector<96x288xbf16>
      %cst_17 = arith.constant dense<0.000000e+00> : vector<96x6xf32>
      %22 = tpu.matmul %21, %13, %cst_17 {dimension_numbers = #tpu.dot_dimension_numbers<[1], [0], [0], [1], [0, 0, 1, 1], [], []>} : vector<96x288xbf16>, vector<288x6xbf16>, vector<96x6xf32> -> vector<96x6xf32>
      %23 = vector.extract_strided_slice %22 {offsets = [0, 1], sizes = [96, 4], strides = [1, 1]} : vector<96x6xf32> to vector<96x4xf32>
      %24 = arith.addf %19, %23 : vector<96x4xf32>
      %c2 = arith.constant 2 : index
      %c0_18 = arith.constant 0 : index
      %c0_19 = arith.constant 0 : index
      %25 = vector.load %arg2[%c2, %c0_18, %c0_19] : memref<3x96x288xbf16, #tpu.memory_space<vmem>>, vector<1x96x288xbf16>
      %26 = vector.shape_cast %25 : vector<1x96x288xbf16> to vector<96x288xbf16>
      %cst_20 = arith.constant dense<0.000000e+00> : vector<96x6xf32>
      %27 = tpu.matmul %26, %13, %cst_20 {dimension_numbers = #tpu.dot_dimension_numbers<[1], [0], [0], [1], [0, 0, 1, 1], [], []>} : vector<96x288xbf16>, vector<288x6xbf16>, vector<96x6xf32> -> vector<96x6xf32>
      %28 = vector.extract_strided_slice %27 {offsets = [0, 2], sizes = [96, 4], strides = [1, 1]} : vector<96x6xf32> to vector<96x4xf32>
      %29 = arith.addf %24, %28 : vector<96x4xf32>
      %c0_21 = arith.constant 0 : index
      %c0_22 = arith.constant 0 : index
      %30 = vector.load %arg3[%c0_21, %c0_22] : memref<96x1xf32, #tpu.memory_space<vmem>>, vector<96x1xf32>
      %31 = vector.broadcast %30 : vector<96x1xf32> to vector<96x4xf32>
      %32 = arith.addf %29, %31 : vector<96x4xf32>
      %cst_23 = arith.constant 0.000000e+00 : f32
      %33 = vector.broadcast %cst_23 : f32 to vector<96x4xf32>
      %34 = arith.cmpf oge, %32, %33 : vector<96x4xf32>
      %cst_24 = arith.constant 2.500000e-01 : f32
      %35 = vector.broadcast %cst_24 : f32 to vector<96x4xf32>
      %36 = arith.mulf %35, %32 : vector<96x4xf32>
      %37 = arith.select %34, %32, %36 : vector<96x4xi1>, vector<96x4xf32>
      %38 = arith.truncf %37 : vector<96x4xf32> to vector<96x4xbf16>
      %c0_25 = arith.constant 0 : index
      %39 = arith.index_cast %arg5 : i32 to index
      %c0_26 = arith.constant 0 : index
      %c0_27 = arith.constant 0 : index
      %40 = vector.load %arg4[%c0_25, %39, %c0_26, %c0_27] : memref<1x4x96x4xbf16, #tpu.memory_space<vmem>>, vector<1x1x96x4xbf16>
      %41 = vector.shape_cast %40 : vector<1x1x96x4xbf16> to vector<96x4xbf16>
      %42 = vector.shape_cast %38 : vector<96x4xbf16> to vector<1x1x96x4xbf16>
      tpu.vector_store %arg4[%c0_25, %39, %c0_26, %c0_27], %42 {strides = array<i32>} : memref<1x4x96x4xbf16, #tpu.memory_space<vmem>>, vector<1x1x96x4xbf16>,
    }
    %c4_i32_0 = arith.constant 4 : i32
    return
  }
  func.func @transform_0(%arg0: i32) -> (i32, i32, i32, i32) {
    %c0_i32 = arith.constant 0 : i32
    %c0_i32_0 = arith.constant 0 : i32
    %c0_i32_1 = arith.constant 0 : i32
    %c0_i32_2 = arith.constant 0 : i32
    return %arg0, %c0_i32, %c0_i32_0, %c0_i32_1 : i32, i32, i32, i32
  }
  func.func @transform_1(%arg0: i32) -> (i32, i32, i32) {
    %c0_i32 = arith.constant 0 : i32
    %c0_i32_0 = arith.constant 0 : i32
    %c0_i32_1 = arith.constant 0 : i32
    %c0_i32_2 = arith.constant 0 : i32
    return %c0_i32, %c0_i32_0, %c0_i32_1 : i32, i32, i32
  }
  func.func @transform_2(%arg0: i32) -> (i32, i32) {
    %c0_i32 = arith.constant 0 : i32
    %c0_i32_0 = arith.constant 0 : i32
    %c0_i32_1 = arith.constant 0 : i32
    return %c0_i32, %c0_i32_0 : i32, i32
  }
  func.func @transform_3(%arg0: i32) -> (i32, i32, i32, i32) {
    %c0_i32 = arith.constant 0 : i32
    %c0_i32_0 = arith.constant 0 : i32
    %c0_i32_1 = arith.constant 0 : i32
    %c0_i32_2 = arith.constant 0 : i32
    return %arg0, %c0_i32, %c0_i32_0, %c0_i32_1 : i32, i32, i32, i32
  }
}

module attributes {stable_mosaic.version = 11 : i64} {
  func.func @_conv3x3_row_kernel(%arg0: i32, %arg1: memref<1x18x400x18xbf16, #tpu.memory_space<vmem>>, %arg2: memref<3x32x1200xbf16, #tpu.memory_space<vmem>>, %arg3: memref<32x1xf32, #tpu.memory_space<vmem>>, %arg4: memref<1x16x32x16xbf16, #tpu.memory_space<vmem>>) attributes {dimension_semantics = [#tpu.dimension_semantics<parallel>], iteration_bounds = array<i64: 2>, scalar_prefetch = 0 : i64, scratch_operands = 0 : i64, tpu.core_type = #tpu.core_type<tc>, window_params = [{transform_indices = @transform_0, window_bounds = array<i64: 1, 18, 400, 18>}, {pipeline_mode = #tpu.pipeline_mode<synchronous>, transform_indices = @transform_1, window_bounds = array<i64: 3, 32, 1200>}, {pipeline_mode = #tpu.pipeline_mode<synchronous>, transform_indices = @transform_2, window_bounds = array<i64: 32, 1>}, {transform_indices = @transform_3, window_bounds = array<i64: 1, 16, 32, 16>}]} {
    %c0_i32 = arith.constant 0 : i32
    %c16_i32 = arith.constant 16 : i32
    %0 = arith.addi %c0_i32, %c16_i32 : i32
    %c1_i32 = arith.constant 1 : i32
    scf.for %arg5 = %c0_i32 to %0 step %c1_i32  : i32 {
      %c1_i32_1 = arith.constant 1 : i32
      %1 = arith.muli %arg5, %c1_i32_1 : i32
      %c0 = arith.constant 0 : index
      %2 = arith.index_cast %1 : i32 to index
      %c0_2 = arith.constant 0 : index
      %c0_3 = arith.constant 0 : index
      %3 = vector.load %arg1[%c0, %2, %c0_2, %c0_3] : memref<1x18x400x18xbf16, #tpu.memory_space<vmem>>, vector<1x1x400x18xbf16>
      %4 = vector.shape_cast %3 : vector<1x1x400x18xbf16> to vector<400x18xbf16>
      %c1_i32_4 = arith.constant 1 : i32
      %5 = arith.addi %1, %c1_i32_4 : i32
      %c0_5 = arith.constant 0 : index
      %6 = arith.index_cast %5 : i32 to index
      %c0_6 = arith.constant 0 : index
      %c0_7 = arith.constant 0 : index
      %7 = vector.load %arg1[%c0_5, %6, %c0_6, %c0_7] : memref<1x18x400x18xbf16, #tpu.memory_space<vmem>>, vector<1x1x400x18xbf16>
      %8 = vector.shape_cast %7 : vector<1x1x400x18xbf16> to vector<400x18xbf16>
      %c2_i32 = arith.constant 2 : i32
      %9 = arith.addi %1, %c2_i32 : i32
      %c0_8 = arith.constant 0 : index
      %10 = arith.index_cast %9 : i32 to index
      %c0_9 = arith.constant 0 : index
      %c0_10 = arith.constant 0 : index
      %11 = vector.load %arg1[%c0_8, %10, %c0_9, %c0_10] : memref<1x18x400x18xbf16, #tpu.memory_space<vmem>>, vector<1x1x400x18xbf16>
      %12 = vector.shape_cast %11 : vector<1x1x400x18xbf16> to vector<400x18xbf16>
      %13 = tpu.concatenate %4, %8, %12 in 0 : vector<400x18xbf16>, vector<400x18xbf16>, vector<400x18xbf16> -> vector<1200x18xbf16>
      %cst = arith.constant 0.000000e+00 : f32
      %14 = vector.broadcast %cst : f32 to vector<32x16xf32>
      %c0_11 = arith.constant 0 : index
      %c0_12 = arith.constant 0 : index
      %c0_13 = arith.constant 0 : index
      %15 = vector.load %arg2[%c0_11, %c0_12, %c0_13] : memref<3x32x1200xbf16, #tpu.memory_space<vmem>>, vector<1x32x1200xbf16>
      %16 = vector.shape_cast %15 : vector<1x32x1200xbf16> to vector<32x1200xbf16>
      %cst_14 = arith.constant dense<0.000000e+00> : vector<32x18xf32>
      %17 = tpu.matmul %16, %13, %cst_14 {dimension_numbers = #tpu.dot_dimension_numbers<[1], [0], [0], [1], [0, 0, 1, 1], [], []>} : vector<32x1200xbf16>, vector<1200x18xbf16>, vector<32x18xf32> -> vector<32x18xf32>
      %18 = vector.extract_strided_slice %17 {offsets = [0, 0], sizes = [32, 16], strides = [1, 1]} : vector<32x18xf32> to vector<32x16xf32>
      %19 = arith.addf %14, %18 : vector<32x16xf32>
      %c1 = arith.constant 1 : index
      %c0_15 = arith.constant 0 : index
      %c0_16 = arith.constant 0 : index
      %20 = vector.load %arg2[%c1, %c0_15, %c0_16] : memref<3x32x1200xbf16, #tpu.memory_space<vmem>>, vector<1x32x1200xbf16>
      %21 = vector.shape_cast %20 : vector<1x32x1200xbf16> to vector<32x1200xbf16>
      %cst_17 = arith.constant dense<0.000000e+00> : vector<32x18xf32>
      %22 = tpu.matmul %21, %13, %cst_17 {dimension_numbers = #tpu.dot_dimension_numbers<[1], [0], [0], [1], [0, 0, 1, 1], [], []>} : vector<32x1200xbf16>, vector<1200x18xbf16>, vector<32x18xf32> -> vector<32x18xf32>
      %23 = vector.extract_strided_slice %22 {offsets = [0, 1], sizes = [32, 16], strides = [1, 1]} : vector<32x18xf32> to vector<32x16xf32>
      %24 = arith.addf %19, %23 : vector<32x16xf32>
      %c2 = arith.constant 2 : index
      %c0_18 = arith.constant 0 : index
      %c0_19 = arith.constant 0 : index
      %25 = vector.load %arg2[%c2, %c0_18, %c0_19] : memref<3x32x1200xbf16, #tpu.memory_space<vmem>>, vector<1x32x1200xbf16>
      %26 = vector.shape_cast %25 : vector<1x32x1200xbf16> to vector<32x1200xbf16>
      %cst_20 = arith.constant dense<0.000000e+00> : vector<32x18xf32>
      %27 = tpu.matmul %26, %13, %cst_20 {dimension_numbers = #tpu.dot_dimension_numbers<[1], [0], [0], [1], [0, 0, 1, 1], [], []>} : vector<32x1200xbf16>, vector<1200x18xbf16>, vector<32x18xf32> -> vector<32x18xf32>
      %28 = vector.extract_strided_slice %27 {offsets = [0, 2], sizes = [32, 16], strides = [1, 1]} : vector<32x18xf32> to vector<32x16xf32>
      %29 = arith.addf %24, %28 : vector<32x16xf32>
      %c0_21 = arith.constant 0 : index
      %c0_22 = arith.constant 0 : index
      %30 = vector.load %arg3[%c0_21, %c0_22] : memref<32x1xf32, #tpu.memory_space<vmem>>, vector<32x1xf32>
      %31 = vector.broadcast %30 : vector<32x1xf32> to vector<32x16xf32>
      %32 = arith.addf %29, %31 : vector<32x16xf32>
      %cst_23 = arith.constant 0.000000e+00 : f32
      %33 = vector.broadcast %cst_23 : f32 to vector<32x16xf32>
      %34 = arith.cmpf oge, %32, %33 : vector<32x16xf32>
      %cst_24 = arith.constant 2.500000e-01 : f32
      %35 = vector.broadcast %cst_24 : f32 to vector<32x16xf32>
      %36 = arith.mulf %35, %32 : vector<32x16xf32>
      %37 = arith.select %34, %32, %36 : vector<32x16xi1>, vector<32x16xf32>
      %38 = arith.truncf %37 : vector<32x16xf32> to vector<32x16xbf16>
      %c0_25 = arith.constant 0 : index
      %39 = arith.index_cast %arg5 : i32 to index
      %c0_26 = arith.constant 0 : index
      %c0_27 = arith.constant 0 : index
      %40 = vector.load %arg4[%c0_25, %39, %c0_26, %c0_27] : memref<1x16x32x16xbf16, #tpu.memory_space<vmem>>, vector<1x1x32x16xbf16>
      %41 = vector.shape_cast %40 : vector<1x1x32x16xbf16> to vector<32x16xbf16>
      %42 = vector.shape_cast %38 : vector<32x16xbf16> to vector<1x1x32x16xbf16>
      tpu.vector_store %arg4[%c0_25, %39, %c0_26, %c0_27], %42 {strides = array<i32>} : memref<1x16x32x16xbf16, #tpu.memory_space<vmem>>, vector<1x1x32x16xbf16>,
    }
    %c16_i32_0 = arith.constant 16 : i32
    return
  }
  func.func @transform_0(%arg0: i32) -> (i32, i32, i32, i32) {
    %c0_i32 = arith.constant 0 : i32
    %c0_i32_0 = arith.constant 0 : i32
    %c0_i32_1 = arith.constant 0 : i32
    %c0_i32_2 = arith.constant 0 : i32
    return %arg0, %c0_i32, %c0_i32_0, %c0_i32_1 : i32, i32, i32, i32
  }
  func.func @transform_1(%arg0: i32) -> (i32, i32, i32) {
    %c0_i32 = arith.constant 0 : i32
    %c0_i32_0 = arith.constant 0 : i32
    %c0_i32_1 = arith.constant 0 : i32
    %c0_i32_2 = arith.constant 0 : i32
    return %c0_i32, %c0_i32_0, %c0_i32_1 : i32, i32, i32
  }
  func.func @transform_2(%arg0: i32) -> (i32, i32) {
    %c0_i32 = arith.constant 0 : i32
    %c0_i32_0 = arith.constant 0 : i32
    %c0_i32_1 = arith.constant 0 : i32
    return %c0_i32, %c0_i32_0 : i32, i32
  }
  func.func @transform_3(%arg0: i32) -> (i32, i32, i32, i32) {
    %c0_i32 = arith.constant 0 : i32
    %c0_i32_0 = arith.constant 0 : i32
    %c0_i32_1 = arith.constant 0 : i32
    %c0_i32_2 = arith.constant 0 : i32
    return %arg0, %c0_i32, %c0_i32_0, %c0_i32_1 : i32, i32, i32, i32
  }
}

module attributes {stable_mosaic.version = 11 : i64} {
  func.func @_conv3x3_row_kernel(%arg0: i32, %arg1: memref<1x18x32x18xbf16, #tpu.memory_space<vmem>>, %arg2: memref<3x32x96xbf16, #tpu.memory_space<vmem>>, %arg3: memref<32x1xf32, #tpu.memory_space<vmem>>, %arg4: memref<1x16x32x16xbf16, #tpu.memory_space<vmem>>) attributes {dimension_semantics = [#tpu.dimension_semantics<parallel>], iteration_bounds = array<i64: 2>, scalar_prefetch = 0 : i64, scratch_operands = 0 : i64, tpu.core_type = #tpu.core_type<tc>, window_params = [{transform_indices = @transform_0, window_bounds = array<i64: 1, 18, 32, 18>}, {pipeline_mode = #tpu.pipeline_mode<synchronous>, transform_indices = @transform_1, window_bounds = array<i64: 3, 32, 96>}, {pipeline_mode = #tpu.pipeline_mode<synchronous>, transform_indices = @transform_2, window_bounds = array<i64: 32, 1>}, {transform_indices = @transform_3, window_bounds = array<i64: 1, 16, 32, 16>}]} {
    %c0_i32 = arith.constant 0 : i32
    %c16_i32 = arith.constant 16 : i32
    %0 = arith.addi %c0_i32, %c16_i32 : i32
    %c1_i32 = arith.constant 1 : i32
    scf.for %arg5 = %c0_i32 to %0 step %c1_i32  : i32 {
      %c1_i32_1 = arith.constant 1 : i32
      %1 = arith.muli %arg5, %c1_i32_1 : i32
      %c0 = arith.constant 0 : index
      %2 = arith.index_cast %1 : i32 to index
      %c0_2 = arith.constant 0 : index
      %c0_3 = arith.constant 0 : index
      %3 = vector.load %arg1[%c0, %2, %c0_2, %c0_3] : memref<1x18x32x18xbf16, #tpu.memory_space<vmem>>, vector<1x1x32x18xbf16>
      %4 = vector.shape_cast %3 : vector<1x1x32x18xbf16> to vector<32x18xbf16>
      %c1_i32_4 = arith.constant 1 : i32
      %5 = arith.addi %1, %c1_i32_4 : i32
      %c0_5 = arith.constant 0 : index
      %6 = arith.index_cast %5 : i32 to index
      %c0_6 = arith.constant 0 : index
      %c0_7 = arith.constant 0 : index
      %7 = vector.load %arg1[%c0_5, %6, %c0_6, %c0_7] : memref<1x18x32x18xbf16, #tpu.memory_space<vmem>>, vector<1x1x32x18xbf16>
      %8 = vector.shape_cast %7 : vector<1x1x32x18xbf16> to vector<32x18xbf16>
      %c2_i32 = arith.constant 2 : i32
      %9 = arith.addi %1, %c2_i32 : i32
      %c0_8 = arith.constant 0 : index
      %10 = arith.index_cast %9 : i32 to index
      %c0_9 = arith.constant 0 : index
      %c0_10 = arith.constant 0 : index
      %11 = vector.load %arg1[%c0_8, %10, %c0_9, %c0_10] : memref<1x18x32x18xbf16, #tpu.memory_space<vmem>>, vector<1x1x32x18xbf16>
      %12 = vector.shape_cast %11 : vector<1x1x32x18xbf16> to vector<32x18xbf16>
      %13 = tpu.concatenate %4, %8, %12 in 0 : vector<32x18xbf16>, vector<32x18xbf16>, vector<32x18xbf16> -> vector<96x18xbf16>
      %cst = arith.constant 0.000000e+00 : f32
      %14 = vector.broadcast %cst : f32 to vector<32x16xf32>
      %c0_11 = arith.constant 0 : index
      %c0_12 = arith.constant 0 : index
      %c0_13 = arith.constant 0 : index
      %15 = vector.load %arg2[%c0_11, %c0_12, %c0_13] : memref<3x32x96xbf16, #tpu.memory_space<vmem>>, vector<1x32x96xbf16>
      %16 = vector.shape_cast %15 : vector<1x32x96xbf16> to vector<32x96xbf16>
      %cst_14 = arith.constant dense<0.000000e+00> : vector<32x18xf32>
      %17 = tpu.matmul %16, %13, %cst_14 {dimension_numbers = #tpu.dot_dimension_numbers<[1], [0], [0], [1], [0, 0, 1, 1], [], []>} : vector<32x96xbf16>, vector<96x18xbf16>, vector<32x18xf32> -> vector<32x18xf32>
      %18 = vector.extract_strided_slice %17 {offsets = [0, 0], sizes = [32, 16], strides = [1, 1]} : vector<32x18xf32> to vector<32x16xf32>
      %19 = arith.addf %14, %18 : vector<32x16xf32>
      %c1 = arith.constant 1 : index
      %c0_15 = arith.constant 0 : index
      %c0_16 = arith.constant 0 : index
      %20 = vector.load %arg2[%c1, %c0_15, %c0_16] : memref<3x32x96xbf16, #tpu.memory_space<vmem>>, vector<1x32x96xbf16>
      %21 = vector.shape_cast %20 : vector<1x32x96xbf16> to vector<32x96xbf16>
      %cst_17 = arith.constant dense<0.000000e+00> : vector<32x18xf32>
      %22 = tpu.matmul %21, %13, %cst_17 {dimension_numbers = #tpu.dot_dimension_numbers<[1], [0], [0], [1], [0, 0, 1, 1], [], []>} : vector<32x96xbf16>, vector<96x18xbf16>, vector<32x18xf32> -> vector<32x18xf32>
      %23 = vector.extract_strided_slice %22 {offsets = [0, 1], sizes = [32, 16], strides = [1, 1]} : vector<32x18xf32> to vector<32x16xf32>
      %24 = arith.addf %19, %23 : vector<32x16xf32>
      %c2 = arith.constant 2 : index
      %c0_18 = arith.constant 0 : index
      %c0_19 = arith.constant 0 : index
      %25 = vector.load %arg2[%c2, %c0_18, %c0_19] : memref<3x32x96xbf16, #tpu.memory_space<vmem>>, vector<1x32x96xbf16>
      %26 = vector.shape_cast %25 : vector<1x32x96xbf16> to vector<32x96xbf16>
      %cst_20 = arith.constant dense<0.000000e+00> : vector<32x18xf32>
      %27 = tpu.matmul %26, %13, %cst_20 {dimension_numbers = #tpu.dot_dimension_numbers<[1], [0], [0], [1], [0, 0, 1, 1], [], []>} : vector<32x96xbf16>, vector<96x18xbf16>, vector<32x18xf32> -> vector<32x18xf32>
      %28 = vector.extract_strided_slice %27 {offsets = [0, 2], sizes = [32, 16], strides = [1, 1]} : vector<32x18xf32> to vector<32x16xf32>
      %29 = arith.addf %24, %28 : vector<32x16xf32>
      %c0_21 = arith.constant 0 : index
      %c0_22 = arith.constant 0 : index
      %30 = vector.load %arg3[%c0_21, %c0_22] : memref<32x1xf32, #tpu.memory_space<vmem>>, vector<32x1xf32>
      %31 = vector.broadcast %30 : vector<32x1xf32> to vector<32x16xf32>
      %32 = arith.addf %29, %31 : vector<32x16xf32>
      %cst_23 = arith.constant 0.000000e+00 : f32
      %33 = vector.broadcast %cst_23 : f32 to vector<32x16xf32>
      %34 = arith.cmpf oge, %32, %33 : vector<32x16xf32>
      %cst_24 = arith.constant 2.500000e-01 : f32
      %35 = vector.broadcast %cst_24 : f32 to vector<32x16xf32>
      %36 = arith.mulf %35, %32 : vector<32x16xf32>
      %37 = arith.select %34, %32, %36 : vector<32x16xi1>, vector<32x16xf32>
      %38 = arith.truncf %37 : vector<32x16xf32> to vector<32x16xbf16>
      %c0_25 = arith.constant 0 : index
      %39 = arith.index_cast %arg5 : i32 to index
      %c0_26 = arith.constant 0 : index
      %c0_27 = arith.constant 0 : index
      %40 = vector.load %arg4[%c0_25, %39, %c0_26, %c0_27] : memref<1x16x32x16xbf16, #tpu.memory_space<vmem>>, vector<1x1x32x16xbf16>
      %41 = vector.shape_cast %40 : vector<1x1x32x16xbf16> to vector<32x16xbf16>
      %42 = vector.shape_cast %38 : vector<32x16xbf16> to vector<1x1x32x16xbf16>
      tpu.vector_store %arg4[%c0_25, %39, %c0_26, %c0_27], %42 {strides = array<i32>} : memref<1x16x32x16xbf16, #tpu.memory_space<vmem>>, vector<1x1x32x16xbf16>,
    }
    %c16_i32_0 = arith.constant 16 : i32
    return
  }
  func.func @transform_0(%arg0: i32) -> (i32, i32, i32, i32) {
    %c0_i32 = arith.constant 0 : i32
    %c0_i32_0 = arith.constant 0 : i32
    %c0_i32_1 = arith.constant 0 : i32
    %c0_i32_2 = arith.constant 0 : i32
    return %arg0, %c0_i32, %c0_i32_0, %c0_i32_1 : i32, i32, i32, i32
  }
  func.func @transform_1(%arg0: i32) -> (i32, i32, i32) {
    %c0_i32 = arith.constant 0 : i32
    %c0_i32_0 = arith.constant 0 : i32
    %c0_i32_1 = arith.constant 0 : i32
    %c0_i32_2 = arith.constant 0 : i32
    return %c0_i32, %c0_i32_0, %c0_i32_1 : i32, i32, i32
  }
  func.func @transform_2(%arg0: i32) -> (i32, i32) {
    %c0_i32 = arith.constant 0 : i32
    %c0_i32_0 = arith.constant 0 : i32
    %c0_i32_1 = arith.constant 0 : i32
    return %c0_i32, %c0_i32_0 : i32, i32
  }
  func.func @transform_3(%arg0: i32) -> (i32, i32, i32, i32) {
    %c0_i32 = arith.constant 0 : i32
    %c0_i32_0 = arith.constant 0 : i32
    %c0_i32_1 = arith.constant 0 : i32
    %c0_i32_2 = arith.constant 0 : i32
    return %arg0, %c0_i32, %c0_i32_0, %c0_i32_1 : i32, i32, i32, i32
  }
}

module attributes {stable_mosaic.version = 11 : i64} {
  func.func @_conv3x3_row_kernel(%arg0: i32, %arg1: memref<1x18x32x18xbf16, #tpu.memory_space<vmem>>, %arg2: memref<3x3x96xbf16, #tpu.memory_space<vmem>>, %arg3: memref<3x1xf32, #tpu.memory_space<vmem>>, %arg4: memref<1x16x3x16xf32, #tpu.memory_space<vmem>>) attributes {dimension_semantics = [#tpu.dimension_semantics<parallel>], iteration_bounds = array<i64: 2>, scalar_prefetch = 0 : i64, scratch_operands = 0 : i64, tpu.core_type = #tpu.core_type<tc>, window_params = [{transform_indices = @transform_0, window_bounds = array<i64: 1, 18, 32, 18>}, {pipeline_mode = #tpu.pipeline_mode<synchronous>, transform_indices = @transform_1, window_bounds = array<i64: 3, 3, 96>}, {pipeline_mode = #tpu.pipeline_mode<synchronous>, transform_indices = @transform_2, window_bounds = array<i64: 3, 1>}, {transform_indices = @transform_3, window_bounds = array<i64: 1, 16, 3, 16>}]} {
    %c0_i32 = arith.constant 0 : i32
    %c16_i32 = arith.constant 16 : i32
    %0 = arith.addi %c0_i32, %c16_i32 : i32
    %c1_i32 = arith.constant 1 : i32
    scf.for %arg5 = %c0_i32 to %0 step %c1_i32  : i32 {
      %c1_i32_1 = arith.constant 1 : i32
      %1 = arith.muli %arg5, %c1_i32_1 : i32
      %c0 = arith.constant 0 : index
      %2 = arith.index_cast %1 : i32 to index
      %c0_2 = arith.constant 0 : index
      %c0_3 = arith.constant 0 : index
      %3 = vector.load %arg1[%c0, %2, %c0_2, %c0_3] : memref<1x18x32x18xbf16, #tpu.memory_space<vmem>>, vector<1x1x32x18xbf16>
      %4 = vector.shape_cast %3 : vector<1x1x32x18xbf16> to vector<32x18xbf16>
      %c1_i32_4 = arith.constant 1 : i32
      %5 = arith.addi %1, %c1_i32_4 : i32
      %c0_5 = arith.constant 0 : index
      %6 = arith.index_cast %5 : i32 to index
      %c0_6 = arith.constant 0 : index
      %c0_7 = arith.constant 0 : index
      %7 = vector.load %arg1[%c0_5, %6, %c0_6, %c0_7] : memref<1x18x32x18xbf16, #tpu.memory_space<vmem>>, vector<1x1x32x18xbf16>
      %8 = vector.shape_cast %7 : vector<1x1x32x18xbf16> to vector<32x18xbf16>
      %c2_i32 = arith.constant 2 : i32
      %9 = arith.addi %1, %c2_i32 : i32
      %c0_8 = arith.constant 0 : index
      %10 = arith.index_cast %9 : i32 to index
      %c0_9 = arith.constant 0 : index
      %c0_10 = arith.constant 0 : index
      %11 = vector.load %arg1[%c0_8, %10, %c0_9, %c0_10] : memref<1x18x32x18xbf16, #tpu.memory_space<vmem>>, vector<1x1x32x18xbf16>
      %12 = vector.shape_cast %11 : vector<1x1x32x18xbf16> to vector<32x18xbf16>
      %13 = tpu.concatenate %4, %8, %12 in 0 : vector<32x18xbf16>, vector<32x18xbf16>, vector<32x18xbf16> -> vector<96x18xbf16>
      %cst = arith.constant 0.000000e+00 : f32
      %14 = vector.broadcast %cst : f32 to vector<3x16xf32>
      %c0_11 = arith.constant 0 : index
      %c0_12 = arith.constant 0 : index
      %c0_13 = arith.constant 0 : index
      %15 = vector.load %arg2[%c0_11, %c0_12, %c0_13] : memref<3x3x96xbf16, #tpu.memory_space<vmem>>, vector<1x3x96xbf16>
      %16 = vector.shape_cast %15 : vector<1x3x96xbf16> to vector<3x96xbf16>
      %cst_14 = arith.constant dense<0.000000e+00> : vector<3x18xf32>
      %17 = tpu.matmul %16, %13, %cst_14 {dimension_numbers = #tpu.dot_dimension_numbers<[1], [0], [0], [1], [0, 0, 1, 1], [], []>} : vector<3x96xbf16>, vector<96x18xbf16>, vector<3x18xf32> -> vector<3x18xf32>
      %18 = vector.extract_strided_slice %17 {offsets = [0, 0], sizes = [3, 16], strides = [1, 1]} : vector<3x18xf32> to vector<3x16xf32>
      %19 = arith.addf %14, %18 : vector<3x16xf32>
      %c1 = arith.constant 1 : index
      %c0_15 = arith.constant 0 : index
      %c0_16 = arith.constant 0 : index
      %20 = vector.load %arg2[%c1, %c0_15, %c0_16] : memref<3x3x96xbf16, #tpu.memory_space<vmem>>, vector<1x3x96xbf16>
      %21 = vector.shape_cast %20 : vector<1x3x96xbf16> to vector<3x96xbf16>
      %cst_17 = arith.constant dense<0.000000e+00> : vector<3x18xf32>
      %22 = tpu.matmul %21, %13, %cst_17 {dimension_numbers = #tpu.dot_dimension_numbers<[1], [0], [0], [1], [0, 0, 1, 1], [], []>} : vector<3x96xbf16>, vector<96x18xbf16>, vector<3x18xf32> -> vector<3x18xf32>
      %23 = vector.extract_strided_slice %22 {offsets = [0, 1], sizes = [3, 16], strides = [1, 1]} : vector<3x18xf32> to vector<3x16xf32>
      %24 = arith.addf %19, %23 : vector<3x16xf32>
      %c2 = arith.constant 2 : index
      %c0_18 = arith.constant 0 : index
      %c0_19 = arith.constant 0 : index
      %25 = vector.load %arg2[%c2, %c0_18, %c0_19] : memref<3x3x96xbf16, #tpu.memory_space<vmem>>, vector<1x3x96xbf16>
      %26 = vector.shape_cast %25 : vector<1x3x96xbf16> to vector<3x96xbf16>
      %cst_20 = arith.constant dense<0.000000e+00> : vector<3x18xf32>
      %27 = tpu.matmul %26, %13, %cst_20 {dimension_numbers = #tpu.dot_dimension_numbers<[1], [0], [0], [1], [0, 0, 1, 1], [], []>} : vector<3x96xbf16>, vector<96x18xbf16>, vector<3x18xf32> -> vector<3x18xf32>
      %28 = vector.extract_strided_slice %27 {offsets = [0, 2], sizes = [3, 16], strides = [1, 1]} : vector<3x18xf32> to vector<3x16xf32>
      %29 = arith.addf %24, %28 : vector<3x16xf32>
      %c0_21 = arith.constant 0 : index
      %c0_22 = arith.constant 0 : index
      %30 = vector.load %arg3[%c0_21, %c0_22] : memref<3x1xf32, #tpu.memory_space<vmem>>, vector<3x1xf32>
      %31 = vector.broadcast %30 : vector<3x1xf32> to vector<3x16xf32>
      %32 = arith.addf %29, %31 : vector<3x16xf32>
      %c0_23 = arith.constant 0 : index
      %33 = arith.index_cast %arg5 : i32 to index
      %c0_24 = arith.constant 0 : index
      %c0_25 = arith.constant 0 : index
      %34 = vector.load %arg4[%c0_23, %33, %c0_24, %c0_25] : memref<1x16x3x16xf32, #tpu.memory_space<vmem>>, vector<1x1x3x16xf32>
      %35 = vector.shape_cast %34 : vector<1x1x3x16xf32> to vector<3x16xf32>
      %36 = vector.shape_cast %32 : vector<3x16xf32> to vector<1x1x3x16xf32>
      tpu.vector_store %arg4[%c0_23, %33, %c0_24, %c0_25], %36 {strides = array<i32>} : memref<1x16x3x16xf32, #tpu.memory_space<vmem>>, vector<1x1x3x16xf32>,
    }
    %c16_i32_0 = arith.constant 16 : i32
    return
  }
  func.func @transform_0(%arg0: i32) -> (i32, i32, i32, i32) {
    %c0_i32 = arith.constant 0 : i32
    %c0_i32_0 = arith.constant 0 : i32
    %c0_i32_1 = arith.constant 0 : i32
    %c0_i32_2 = arith.constant 0 : i32
    return %arg0, %c0_i32, %c0_i32_0, %c0_i32_1 : i32, i32, i32, i32
  }
  func.func @transform_1(%arg0: i32) -> (i32, i32, i32) {
    %c0_i32 = arith.constant 0 : i32
    %c0_i32_0 = arith.constant 0 : i32
    %c0_i32_1 = arith.constant 0 : i32
    %c0_i32_2 = arith.constant 0 : i32
    return %c0_i32, %c0_i32_0, %c0_i32_1 : i32, i32, i32
  }
  func.func @transform_2(%arg0: i32) -> (i32, i32) {
    %c0_i32 = arith.constant 0 : i32
    %c0_i32_0 = arith.constant 0 : i32
    %c0_i32_1 = arith.constant 0 : i32
    return %c0_i32, %c0_i32_0 : i32, i32
  }
  func.func @transform_3(%arg0: i32) -> (i32, i32, i32, i32) {
    %c0_i32 = arith.constant 0 : i32
    %c0_i32_0 = arith.constant 0 : i32
    %c0_i32_1 = arith.constant 0 : i32
    %c0_i32_2 = arith.constant 0 : i32
    return %arg0, %c0_i32, %c0_i32_0, %c0_i32_1 : i32, i32, i32, i32
  }
}

</mosaic_0001>

<bundles_post_ra>
// kernel: softsplat_baseline_forward.25
= control target key start
LH: loop header
LB: loop body
LE: loop exit
PB: predicated region body
PF: predicated region fallthrough
CT: control target
= control target key end

     0   :  { %s477_s9 = smov 0   ;;  %s479_s10 = smov 0   ;;  %s520_s0 = inlined_call_operand.vmem [shape: f32[2,4,256], index: 0, kind: input, shape index: {}]   ;;  %s521_s1 = inlined_call_operand.vmem [shape: f32[1,256], index: 1, kind: input, shape index: {}]   ;;  %s522_s2 = inlined_call_operand.vmem [shape: f32[2,4,256], index: 2, kind: output, shape index: {}]  }
   0x1   :  { %s481_s11 = smov 0  }
   0x2 LB: > { %s24_s12 = sadd.s32 1, %s455_s10  ;;  %p398_p0 = scmp.ge.s32.totalorder %s459_s11, 1  ;;  %s459_s11 = sphi %s481_s11, %s12_s11   ;;  %s455_s10 = sphi %s479_s10, %s524_s10   ;;  %s451_s9 = sphi %s477_s9, %s523_s9  }
   0x3   : > { %p26_p1 = scmp.ge.s32.totalorder %s24_s12, 2  ;;  %p143_p2 = scmp.lt.s32.totalorder %s459_s11, 3 }
   0x5   : > { %s526_s12 = smov (%p26_p1, %s24_s12), 0  ;;  %p144_p3 = pnand %p398_p0, %p143_p2 }
   0x6   : > { %p178_p4 = scmp.lt.s32.totalorder (!%p144_p3), %s451_s9, 1  ;;  %v461_v4 = vmov (!%p144_p3), 1966171168   ;;  %v216_v6 = vlaneseq (!%p144_p3)  ;;  %v202_v7 = vld [vmem:[%s521_s1] sm:$0x3] (!%p144_p3) }
   0x7   : > { %147 = sbr.rel (%p144_p3) target bundleno = 53 (0x35), region = 28  ;;  %v214_v5 = vunpack.c.l.s4 (!%p144_p3), %v461_v4  ;;  %v204_v8 = vmul.f32 (!%p144_p3), 0.0625, %v202_v7 }
   0x8   : > { %v217_v10 = vshrl.u32 (!%p144_p3), %v216_v6, 7 }
   0x9   : > { %v215_v9 = vunpack.c.0.s8 (!%p144_p3), %v214_v5  ;;  %v205_v11 = vsub.f32 (!%p144_p3), 1.5, %v204_v8 }
   0xa   : > { %v253_v25 = vsub.s32 (!%p144_p3), 0, %v217_v10  ;;  %v257_v26 = vsub.s32 (!%p144_p3), 1, %v217_v10 }
   0xb   : > { %v218_v12 = vsub.s32 (!%p144_p3), %v215_v9, %v217_v10  ;;  %v206_v16 = vadd.f32 (!%p144_p3), 0.0001, %v205_v11 }
   0xd   : > { %v230_v22 = vsub.f32 (!%p144_p3), 1.0, %v206_v16 }
   0xe   : > { %s528_s9 = smov (!%p178_p4, %s451_s9), 1 }
   0xf   : > { %s405_s13 = sshll.u32 %s528_s9, 3 }
  0x10   : > { %s185_s16 = scalar_lea.vmem %s520_s0, %s405_s13  ;;  %s200_s21 = scalar_lea.vmem %s522_s2, %s405_s13 }
  0x11   : > { %v203_v0 = vld [vmem:[%s185_s16] sm:$0xff] }
  0x12   : > { %v207_v1 = vmul.f32 0.0625, %v203_v0  ;;  %v262_v21 = vcombine.high %v203_v0, %v203_v0  ;;  %v282_v31 = vrot.slane %v203_v0, 2 }
  0x14   : > { %v208_v2 = vadd.f32 1.0, %v207_v1  ;;  %v210_v3 = vsub.f32 1.0, %v207_v1  ;;  %v283_v32 = vrot.slane %v262_v21, 2 }
  0x16   : > { %433 = vrcp.f32 %v208_v2 }
  0x17   : > { %435 = vrcp.f32 %v210_v3 }
  0x20   : > { %v434_v13 = vpop.eup %433 }
  0x21   : > { %v436_v14 = vpop.eup %435  ;;  %v219_v15 = vrot.slane %v434_v13, %v218_v12 }
  0x22   : > { %v238_v17 = vrot.slane %v436_v14, %v218_v12 }
  0x23   : > { %v220_v18 = vcombine.high %v219_v15, %v219_v15 }
  0x24   : > { %v239_v19 = vcombine.high %v238_v17, %v238_v17 }
  0x25   : > { %v227_v20 = vrot.slane %v220_v18, %v218_v12 }
  0x26   : > { %v246_v23 = vrot.slane %v239_v19, %v218_v12 }
  0x27   : > { %v229_v24 = vmul.f32 %v227_v20, %v206_v16 }
  0x28   : > { %v247_v27 = vcombine.high %v246_v23, %v246_v23 }
  0x29   : > { %v254_v28 = vrot.slane %v229_v24, %v253_v25  ;;  %v258_v29 = vrot.slane %v229_v24, %v257_v26 }
  0x2a   : > { %v249_v30 = vmul.f32 %v247_v27, %v230_v22 }
  0x2b   : > { %v264_v33 = vmul.f32 %v254_v28, %v203_v0  ;;  %v265_v34 = vmul.f32 %v262_v21, %v258_v29 }
  0x2c   : > { %v275_v35 = vrot.slane %v249_v30, %v253_v25  ;;  %v279_v36 = vrot.slane %v249_v30, %v257_v26 }
  0x2d   : > { %v268_v37 = vcombine.low %v264_v33, %v265_v34 }
  0x2e   : > { %v286_v38 = vmul.f32 %v282_v31, %v275_v35  ;;  %v287_v39 = vmul.f32 %v283_v32, %v279_v36 }
  0x2f   : > { %270 = vst [vmem:[%s200_s21] sm:$0x33] %v268_v37 }
  0x30   : > { %v290_v40 = vcombine.low %v286_v38, %v287_v39 }
  0x32   : > { %v291_v41 = vrot.slane %v290_v40, 6 }
  0x34   : > { %293 = vst [vmem:[%s200_s21] sm:$0xcc] %v291_v41 }
  0x35 PF: > { %s12_s11 = sadd.s32 1, %s459_s11   ;;  %s523_s9 = smov %s455_s10 }
  0x36   : > { %p9_p5 = scmp.ge.s32.totalorder %s12_s11, 4   ;;  %s524_s10 = smov %s526_s12 }
  0x38   :  { %11 = sbr.rel (!%p9_p5) target bundleno = 2 (0x2), region = 61 }

// kernel: softsplat_baseline_forward.22
= control target key start
LH: loop header
LB: loop body
LE: loop exit
PB: predicated region body
PF: predicated region fallthrough
CT: control target
= control target key end

     0   :  { %s1040_s12 = smov 0   ;;  %s1178_s0 = inlined_call_operand.vmem [shape: bf16[4,18,16,18], index: 0, kind: input, shape index: {}]   ;;  %s1179_s1 = inlined_call_operand.vmem [shape: bf16[3,64,48], index: 1, kind: input, shape index: {}]   ;;  %s1180_s2 = inlined_call_operand.vmem [shape: f32[64,1], index: 2, kind: input, shape index: {}]   ;;  %s1181_s3 = inlined_call_operand.vmem [shape: bf16[4,16,64,16], index: 3, kind: output, shape index: {}]  }
   0x1 LB: > { %s813_s13 = sadd.s32 4294967295, %s1011_s12   ;;  %p817_p0 = scmp.ge.s32.totalorder %s1011_s12, 1  ;;  %s1011_s12 = sphi %s1040_s12, %s13_s12  }
   0x2   : > { %p137_p1 = scmp.lt.s32.totalorder %s1011_s12, 5 }
   0x4   : > { %p138_p2 = pnand %p817_p0, %p137_p1 }
   0x5   : > { %p161_p3 = scmp.lt.s32.totalorder (!%p138_p2), %s813_s13, 3  ;;  %s1058_s22 = smov (!%p138_p2), 0  }
   0x6   : > { %141 = sbr.rel (%p138_p2) target bundleno = 400 (0x190), region = 32 }
   0xd   : > { %s1183_s13 = smov (!%p161_p3, %s813_s13), 3 }
   0xe   : > { %s964_s14 = smul.u32 144, %s1183_s13  ;;  %s884_s15 = sshll.u32 %s1183_s13, 9 }
   0xf   : > { %s1051_s18 = scalar_lea.vmem %s1181_s3, %s884_s15 }
  0x10   : > { %s1056_s21 = scalar_lea.vmem %s1178_s0, %s964_s14 }
  0x11 LB: >> { %v989_v0 = vld [vmem:[%s1179_s1] sm:$0xff]   ;;  %vm241_vm0 = vcmask 392192   ;;  %s885_s27 = sshll.u32 %s1015_s22, 3  ;;  %v1017_v2 = vmov 0   ;;  %v991_v6 = vld [vmem:[%s1179_s1 + $0x8] sm:$0xff]   ;;  %v993_v8 = vld [vmem:[%s1179_s1 + $0x10] sm:$0xff]   ;;  %s1015_s22 = sphi %s1058_s22, %s177_s22  }
  0x12   : >> { %v990_v1 = vld [vmem:[%s1179_s1 + $0x20] sm:$0xff]   ;;  %922 = vmatprep.mubr.msk.bf16.mxu0 %vm241_vm0, %v989_v0  ;;  %985 = vset.pattern.permute.xlu1 %v1017_v2  ;;  %s180_s28 = scalar_lea.vmem %s1056_s21, %s885_s27  ;;  %v992_v7 = vld [vmem:[%s1179_s1 + $0x28] sm:$0xff]   ;;  %v621_v9 = vld [vmem:[%s1180_s2 + $0x10] sm:$0xff]  ;;  %s1018_s16 = smov 127   ;;  %vm734_vm2 = vcmask 125952  }
  0x13   : >> { %936 = vmatprep.mubr.msk.bf16.mxu1 %vm241_vm0, %v990_v1  ;;  %984 = vset.pattern.permute.xlu0 %v1017_v2  ;;  %v986_v3 = vld [vmem:[%s180_s28] sm:$0xff]   ;;  %v987_v4 = vld [vmem:[%s180_s28 + $0x8] sm:$0xff]   ;;  %v988_v5 = vld [vmem:[%s180_s28 + $0x10] sm:$0xff]   ;;  %s1019_s17 = smov 126   ;;  %s894_s19 = sshll.u32 %s1015_s22, 5 }
  0x14   : >> { %916 = vmatprep.subr.bf16.mxu0 %v986_v3  ;;  %930 = vmatprep.subr.bf16.mxu1 %v986_v3  ;;  %v619_v10 = vld [vmem:[%s1180_s2] sm:$0xff]  ;;  %v994_v11 = vld [vmem:[%s1179_s1 + $0x30] sm:$0xff]   ;;  %v622_v12 = vld [vmem:[%s1180_s2 + $0x18] sm:$0xff]  ;;  %s1150_s20 = scalar_lea.vmem %s1051_s18, %s894_s19  ;;  %s177_s22 = sadd.s32 1, %s1015_s22  }
  0x15   : >> { %917 = vmatpush3.bf16.msra.mxu0 %v986_v3  ;;  %931 = vmatpush3.bf16.msra.mxu1 %v986_v3  ;;  %v620_v13 = vld [vmem:[%s1180_s2 + $0x8] sm:$0xff]  ;;  %v995_v14 = vld [vmem:[%s1179_s1 + $0x18] sm:$0xff]   ;;  %v997_v17 = vld [vmem:[%s1179_s1 + $0x40] sm:$0xff]   ;;  %p174_p4 = scmp.ge.s32.totalorder %s177_s22, 16  }
  0x16   : >> { %918 = vmatprep.subr.bf16.mxu0 %v987_v4  ;;  %932 = vmatprep.subr.bf16.mxu1 %v987_v4  ;;  %v996_v15 = vld [vmem:[%s1179_s1 + $0x38] sm:$0xff]   ;;  %v624_v16 = vld [vmem:[%s1180_s2 + $0x28] sm:$0xff]  ;;  %v999_v18 = vld [vmem:[%s1179_s1 + $0x50] sm:$0xff]  }
  0x17   : >> { %639 = vperm.xlu1 %985, %v621_v9   ;;  %629 = vperm.xlu0 %984, %v619_v10   ;;  %v623_v19 = vld [vmem:[%s1180_s2 + $0x20] sm:$0xff]  ;;  %v626_v20 = vld [vmem:[%s1180_s2 + $0x38] sm:$0xff]  ;;  %v998_v21 = vld [vmem:[%s1179_s1 + $0x48] sm:$0xff]  }
  0x18   : >> { %v1000_v22 = vld [vmem:[%s1179_s1 + $0x58] sm:$0xff]   ;;  %v625_v23 = vld [vmem:[%s1180_s2 + $0x30] sm:$0xff] }
  0x19   : >> { %919 = vmatpush3.bf16.msra.mxu0 %v987_v4  ;;  %933 = vmatpush3.bf16.msra.mxu1 %v987_v4 }
  0x1a   : >> { %920 = vmatprep.subr.bf16.mxu0 %v988_v5  ;;  %934 = vmatprep.subr.bf16.mxu1 %v988_v5 }
  0x1b   : >> { %644 = vperm.xlu1 %985, %v622_v12   ;;  %634 = vperm.xlu0 %984, %v620_v13  }
  0x1d   : >> { %921 = vmatpush3.bf16.msra.mxu0 %v988_v5  ;;  %935 = vmatpush3.bf16.msra.mxu1 %v988_v5 }
  0x1e   : >> { %944 = vmatprep.subr.bf16.mxu0 %v986_v3  ;;  %958 = vmatprep.subr.bf16.mxu1 %v986_v3 }
  0x1f   : >> { %654 = vperm.xlu1 %985, %v624_v16   ;;  %649 = vperm.xlu0 %984, %v623_v19  }
  0x20   : >> { %923 = vmatmul.mubr.msk.bf16.vlgmr.msra.gmra.mrb[0].mxu0 %vm241_vm0, %v991_v6  ;;  %937 = vmatmul.mubr.msk.bf16.vlgmr.msra.gmra.mrb[0].mxu1 %vm241_vm0, %v992_v7 }
  0x21   : >> { %945 = vmatpush3.bf16.msra.mxu0 %v986_v3  ;;  %926 = vmatprep.mubr.msk.bf16.mxu0 %vm241_vm0, %v993_v8 }
  0x22   : >> { %946 = vmatprep.subr.bf16.mxu0 %v987_v4  ;;  %940 = vmatprep.mubr.msk.bf16.mxu1 %vm241_vm0, %v994_v11 }
  0x23   : >> { %961 = vmatpush3.bf16.msra.mxu1 %v986_v3  ;;  %664 = vperm.xlu1 %985, %v626_v20  }
  0x24   : >> { %959 = vmatprep.subr.bf16.mxu1 %v987_v4  ;;  %659 = vperm.xlu0 %984, %v625_v23  }
  0x25   : >> { %947 = vmatpush3.bf16.msra.mxu0 %v987_v4 }
  0x26   : >> { %948 = vmatprep.subr.bf16.mxu0 %v988_v5 }
  0x27   : >> { %962 = vmatpush3.bf16.msra.mxu1 %v987_v4 }
  0x28   : >> { %927 = vmatmul.mubr.msk.bf16.gmra.mrb[4].mxu0 %vm241_vm0, %v995_v14  ;;  %941 = vmatmul.mubr.msk.bf16.gmra.mrb[4].mxu1 %vm241_vm0, %v996_v15 }
  0x29   : >> { %949 = vmatpush3.bf16.msra.mxu0 %v988_v5  ;;  %950 = vmatprep.mubr.msk.bf16.mxu0 %vm241_vm0, %v997_v17 }
  0x2a   : >> { %960 = vmatprep.subr.bf16.mxu1 %v988_v5  ;;  %954 = vmatprep.mubr.msk.bf16.mxu1 %vm241_vm0, %v999_v18 }
  0x2b   : >> { %963 = vmatpush3.bf16.msra.mxu1 %v988_v5 }
  0x30   : >> { %951 = vmatmul.mubr.msk.bf16.vlgmr.msra.gmra.mrb[8].mxu0 %vm241_vm0, %v998_v21  ;;  %955 = vmatmul.mubr.msk.bf16.vlgmr.msra.gmra.mrb[8].mxu1 %vm241_vm0, %v1000_v22 }
  0x96   : >> { %v630_v48 = vpop.permute.xlu0 %629  ;;  %v640_v49 = vpop.permute.xlu1 %639 }
  0x9a   : >> { %v635_v50 = vpop.permute.xlu0 %634  ;;  %v645_v51 = vpop.permute.xlu1 %644 }
  0x9e   : >> { %v650_v52 = vpop.permute.xlu0 %649  ;;  %v655_v53 = vpop.permute.xlu1 %654 }
  0xa2   : >> { %v1145_v55 = vpop.permute.xlu1 %664 }
  0xa3   : >> { %v1143_v54 = vpop.permute.xlu0 %659 }
  0xf3   : >> { %v924_v24 = vpop.f32.mrb[0].mxu0  ;;  %v938_v25 = vpop.f32.mrb[0].mxu1 }
  0xf4   : >> { %445 = vrot.lane.b32.xlu0 %v938_v25, %s1018_s16  ;;  %v288_v26 = vpop.f32.mrb[1].mxu0  ;;  %v402_v27 = vpop.f32.mrb[1].mxu1 }
  0xf5   : >> { %v925_v28 = vpop.f32.mrb[2].mxu0  ;;  %v939_v29 = vpop.f32.mrb[2].mxu1 }
  0xf6   : >> { %447 = vrot.lane.b32.xlu1 %v939_v29, %s1018_s16  ;;  %v1137_v30 = vpop.f32.mrb[3].mxu0  ;;  %v405_v31 = vpop.f32.mrb[3].mxu1 }
  0xf8   : >> { %441 = vrot.lane.b32.xlu0 %v402_v27, %s1018_s16 }
  0xfa   : >> { %443 = vrot.lane.b32.xlu1 %v405_v31, %s1018_s16 }
  0xfb   : >> { %v1139_v32 = vpop.f32.mrb[4].mxu0  ;;  %v942_v33 = vpop.f32.mrb[4].mxu1 }
  0xfc   : >> { %453 = vrot.lane.b32.xlu0 %v942_v33, %s1018_s16  ;;  %v304_v34 = vpop.f32.mrb[5].mxu0  ;;  %v418_v35 = vpop.f32.mrb[5].mxu1 }
  0xfd   : >> { %v1141_v36 = vpop.f32.mrb[6].mxu0  ;;  %v943_v37 = vpop.f32.mrb[6].mxu1 }
  0xfe   : >> { %455 = vrot.lane.b32.xlu1 %v943_v37, %s1018_s16  ;;  %v307_v38 = vpop.f32.mrb[7].mxu0  ;;  %v421_v39 = vpop.f32.mrb[7].mxu1 }
 0x100   : >> { %449 = vrot.lane.b32.xlu0 %v418_v35, %s1018_s16 }
 0x102   : >> { %451 = vrot.lane.b32.xlu1 %v421_v39, %s1018_s16 }
 0x103   : >> { %v952_v40 = vpop.f32.mrb[8].mxu0  ;;  %v956_v41 = vpop.f32.mrb[8].mxu1 }
 0x104   : >> { %591 = vrot.lane.b32.xlu0 %v952_v40, %s1019_s17  ;;  %v548_v42 = vpop.f32.mrb[9].mxu0  ;;  %v564_v43 = vpop.f32.mrb[9].mxu1 }
 0x105   : >> { %v953_v44 = vpop.f32.mrb[10].mxu0  ;;  %v957_v45 = vpop.f32.mrb[10].mxu1 }
 0x106   : >> { %593 = vrot.lane.b32.xlu1 %v953_v44, %s1019_s17  ;;  %v551_v46 = vpop.f32.mrb[11].mxu0  ;;  %v567_v47 = vpop.f32.mrb[11].mxu1 }
 0x108   : >> { %587 = vrot.lane.b32.xlu0 %v548_v42, %s1019_s17 }
 0x10a   : >> { %589 = vrot.lane.b32.xlu1 %v551_v46, %s1019_s17 }
 0x10c   : >> { %595 = vrot.lane.b32.xlu0 %v564_v43, %s1019_s17 }
 0x10e   : >> { %597 = vrot.lane.b32.xlu1 %v567_v47, %s1019_s17 }
 0x110   : >> { %599 = vrot.lane.b32.xlu0 %v956_v41, %s1019_s17 }
 0x112   : >> { %601 = vrot.lane.b32.xlu1 %v957_v45, %s1019_s17 }
 0x166   : >> { %v446_v56 = vpop.permute.xlu0 %445 }
 0x167   : >> { %v467_v0 = vadd.f32 %v924_v24, %v446_v56 }
 0x168   : >> { %v448_v57 = vpop.permute.xlu1 %447 }
 0x169   : >> { %v468_v2 = vadd.f32 %v925_v28, %v448_v57 }
 0x16a   : >> { %v442_v58 = vpop.permute.xlu0 %441 }
 0x16b   : >> { %v465_v5 = vadd.f32 %v442_v58, %v288_v26 }
 0x16c   : >> { %v444_v59 = vpop.permute.xlu1 %443 }
 0x16d   : >> { %v466_v12 = vadd.f32 %v444_v59, %v1137_v30 }
 0x16e   : >> { %v454_v60 = vpop.permute.xlu0 %453 }
 0x16f   : >> { %v471_v28 = vadd.f32 %v1139_v32, %v454_v60 }
 0x170   : >> { %v456_v61 = vpop.permute.xlu1 %455 }
 0x171   : >> { %v472_v40 = vadd.f32 %v1141_v36, %v456_v61 }
 0x172   : >> { %v450_v62 = vpop.permute.xlu0 %449 }
 0x173   : >> { %v469_v13 = vadd.f32 %v450_v62, %v304_v34 }
 0x174   : >> { %v452_v63 = vpop.permute.xlu1 %451 }
 0x175   : >> { %v470_v18 = vadd.f32 %v452_v63, %v307_v38 }
 0x176   : >> { %v592_v1 = vpop.permute.xlu0 %591 }
 0x177   : >> { %v613_v3 = vadd.f32 %v592_v1, %v467_v0 }
 0x178   : >> { %v594_v4 = vpop.permute.xlu1 %593 }
 0x179   : >> { %v669_v6 = vadd.f32 %v640_v49, %v613_v3  ;;  %v614_v7 = vadd.f32 %v594_v4, %v468_v2 }
 0x17a   : >> { %v588_v8 = vpop.permute.xlu0 %587 }
 0x17b   : >> { %vm677_vm1 = vcmp.ge.f32.partialorder %v669_v6, 0.0  ;;  %v685_v9 = vmul.f32 0.25, %v669_v6  ;;  %v670_v10 = vadd.f32 %v645_v51, %v614_v7  ;;  %v611_v11 = vadd.f32 %v588_v8, %v465_v5 }
 0x17c   : >> { %v590_v14 = vpop.permute.xlu1 %589 }
 0x17d   : >> { %v693_v15 = vsel %vm677_vm1, %v669_v6, %v685_v9  ;;  %vm678_vm3 = vcmp.ge.f32.partialorder %v670_v10, 0.0  ;;  %v686_v16 = vmul.f32 0.25, %v670_v10  ;;  %v667_v17 = vadd.f32 %v630_v48, %v611_v11 }
 0x17e   : >> { %v888_v19 = vpack.c.bf16 %v693_v15, %v693_v15  ;;  %v612_v20 = vadd.f32 %v590_v14, %v466_v12  ;;  %v596_v21 = vpop.permute.xlu0 %595 }
 0x17f   : >> { %v694_v22 = vsel %vm678_vm3, %v670_v10, %v686_v16  ;;  %vm675_vm4 = vcmp.ge.f32.partialorder %v667_v17, 0.0  ;;  %v683_v23 = vmul.f32 0.25, %v667_v17  ;;  %v615_v24 = vadd.f32 %v596_v21, %v469_v13 }
 0x180   : >> { %737 = vst.msk [vmem:[%s1150_s20 + $0x8] sm:$0xf] %vm734_vm2, %v888_v19  ;;  %v889_v25 = vpack.c.bf16 %v694_v22, %v694_v22  ;;  %v668_v26 = vadd.f32 %v635_v50, %v612_v20  ;;  %v598_v27 = vpop.permute.xlu1 %597 }
 0x181   : >> { %v691_v29 = vsel %vm675_vm4, %v667_v17, %v683_v23  ;;  %v671_v30 = vadd.f32 %v650_v52, %v615_v24  ;;  %v616_v31 = vadd.f32 %v598_v27, %v470_v18 }
 0x182   : >> { %738 = vst.msk [vmem:[%s1150_s20 + $0xc] sm:$0xf] %vm734_vm2, %v889_v25  ;;  %v886_v33 = vpack.c.bf16 %v691_v29, %v691_v29  ;;  %vm676_vm5 = vcmp.ge.f32.partialorder %v668_v26, 0.0  ;;  %v684_v34 = vmul.f32 0.25, %v668_v26  ;;  %v600_v35 = vpop.permute.xlu0 %599 }
 0x183   : >> { %vm679_vm6 = vcmp.ge.f32.partialorder %v671_v30, 0.0  ;;  %v687_v37 = vmul.f32 0.25, %v671_v30  ;;  %v672_v38 = vadd.f32 %v655_v53, %v616_v31  ;;  %v617_v39 = vadd.f32 %v600_v35, %v471_v28 }
 0x184   : >> { %735 = vst.msk [vmem:[%s1150_s20] sm:$0xf] %vm734_vm2, %v886_v33  ;;  %v692_v32 = vsel %vm676_vm5, %v668_v26, %v684_v34  ;;  %v602_v41 = vpop.permute.xlu1 %601 }
 0x185   : >> { %v887_v42 = vpack.c.bf16 %v692_v32, %v692_v32  ;;  %v695_v43 = vsel %vm679_vm6, %v671_v30, %v687_v37  ;;  %vm680_vm7 = vcmp.ge.f32.partialorder %v672_v38, 0.0  ;;  %v688_v44 = vmul.f32 0.25, %v672_v38 }
 0x186   : >> { %v890_v45 = vpack.c.bf16 %v695_v43, %v695_v43  ;;  %v673_v46 = vadd.f32 %v1143_v54, %v617_v39  ;;  %v618_v47 = vadd.f32 %v602_v41, %v472_v40 }
 0x187   : >> { %736 = vst.msk [vmem:[%s1150_s20 + $0x4] sm:$0xf] %vm734_vm2, %v887_v42  ;;  %v696_v48 = vsel %vm680_vm7, %v672_v38, %v688_v44 }
 0x188   : >> { %739 = vst.msk [vmem:[%s1150_s20 + $0x10] sm:$0xf] %vm734_vm2, %v890_v45  ;;  %v891_v36 = vpack.c.bf16 %v696_v48, %v696_v48  ;;  %vm681_vm8 = vcmp.ge.f32.partialorder %v673_v46, 0.0  ;;  %v689_v49 = vmul.f32 0.25, %v673_v46  ;;  %v674_v50 = vadd.f32 %v1145_v55, %v618_v47 }
 0x189   : > { %176 = sbr.rel (!%p174_p4) target bundleno = 17 (0x11), region = 75 }
 0x18a   : >> { %740 = vst.msk [vmem:[%s1150_s20 + $0x14] sm:$0xf] %vm734_vm2, %v891_v36  ;;  %v697_v51 = vsel %vm681_vm8, %v673_v46, %v689_v49  ;;  %vm682_vm9 = vcmp.ge.f32.partialorder %v674_v50, 0.0  ;;  %v690_v52 = vmul.f32 0.25, %v674_v50 }
 0x18b   : >> { %v892_v53 = vpack.c.bf16 %v697_v51, %v697_v51 }
 0x18c   : >> { %v698_v56 = vsel %vm682_vm9, %v674_v50, %v690_v52 }
 0x18d   : >> { %741 = vst.msk [vmem:[%s1150_s20 + $0x18] sm:$0xf] %vm734_vm2, %v892_v53  ;;  %v893_v54 = vpack.c.bf16 %v698_v56, %v698_v56 }
 0x18f   : >> { %742 = vst.msk [vmem:[%s1150_s20 + $0x1c] sm:$0xf] %vm734_vm2, %v893_v54 }
 0x190 PF: > { %s13_s12 = sadd.s32 1, %s1011_s12  }
 0x191   : > { %p10_p5 = scmp.ge.s32.totalorder %s13_s12, 6  }
 0x193   :  { %12 = sbr.rel (!%p10_p5) target bundleno = 1 (0x1), region = 86 }

// kernel: softsplat_baseline_forward.23
= control target key start
LH: loop header
LB: loop body
LE: loop exit
PB: predicated region body
PF: predicated region fallthrough
CT: control target
= control target key end

     0   :  { %s1179_s12 = smov 0   ;;  %s1515_s0 = inlined_call_operand.vmem [shape: bf16[4,18,64,18], index: 0, kind: input, shape index: {}]   ;;  %s1516_s1 = inlined_call_operand.vmem [shape: bf16[3,64,192], index: 1, kind: input, shape index: {}]   ;;  %s1517_s2 = inlined_call_operand.vmem [shape: f32[64,1], index: 2, kind: input, shape index: {}]   ;;  %s1518_s3 = inlined_call_operand.vmem [shape: bf16[4,16,64,16], index: 3, kind: output, shape index: {}]  }
   0x1 LB: > { %s932_s13 = sadd.s32 4294967295, %s1150_s12   ;;  %p936_p0 = scmp.ge.s32.totalorder %s1150_s12, 1  ;;  %s1150_s12 = sphi %s1179_s12, %s13_s12  }
   0x2   : > { %p137_p1 = scmp.lt.s32.totalorder %s1150_s12, 5 }
   0x4   : > { %p138_p2 = pnand %p936_p0, %p137_p1 }
   0x5   : > { %p161_p3 = scmp.lt.s32.totalorder (!%p138_p2), %s932_s13, 3  ;;  %s1197_s22 = smov (!%p138_p2), 0  }
   0x6   : > { %141 = sbr.rel (%p138_p2) target bundleno = 468 (0x1d4), region = 32 }
   0xd   : > { %s1520_s13 = smov (!%p161_p3, %s932_s13), 3 }
   0xe   : > { %s1070_s14 = smul.u32 576, %s1520_s13  ;;  %s1035_s15 = sshll.u32 %s1520_s13, 9 }
   0xf   : > { %s1190_s18 = scalar_lea.vmem %s1518_s3, %s1035_s15 }
  0x10   : > { %s1195_s21 = scalar_lea.vmem %s1515_s0, %s1070_s14 }
  0x11 LB: >> { %vm329_vm0 = vcmask 523264   ;;  %v1156_v0 = vmov 0   ;;  %v1106_v1 = vld [vmem:[%s1516_s1 + $0x4] ss:$8 sps:$4 sm:$0xff]   ;;  %s1036_s25 = sshll.u32 %s1154_s22, 5  ;;  %v741_v11 = vld [vmem:[%s1517_s2 + $0x10] sm:$0xff]  ;;  %s1154_s22 = sphi %s1197_s22, %s177_s22  }
  0x12   : >> { %342 = vmatprep.subr.bf16.mxu0 %v1156_v0  ;;  %472 = vmatprep.subr.bf16.mxu1 %v1156_v0  ;;  %v1109_v2 = vld [vmem:[%s1516_s1 + $0x44] ss:$8 sps:$4 sm:$0xff]   ;;  %s1216_s28 = scalar_lea.vmem %s1195_s21, %s1036_s25  ;;  %v742_v14 = vld [vmem:[%s1517_s2 + $0x18] sm:$0xff]  ;;  %v745_v19 = vld [vmem:[%s1517_s2 + $0x30] sm:$0xff]  ;;  %s1157_s20 = smov 127   ;;  %vm853_vm2 = vcmask 125952  }
  0x13   : >> { %1090 = vset.pattern.permute.xlu0 %v1156_v0  ;;  %1091 = vset.pattern.permute.xlu1 %v1156_v0  ;;  %v1220_v3 = vld [vmem:[%s1216_s28] sm:$0xff]   ;;  %v1226_v4 = vld [vmem:[%s1216_s28 + $0x8] sm:$0xff]   ;;  %v1233_v5 = vld [vmem:[%s1216_s28 + $0x10] sm:$0xff]   ;;  %s1158_s23 = smov 126   ;;  %s1486_s24 = scalar_lea.vmem %s1190_s18, %s1036_s25 }
  0x14   : >> { %980 = vmatprep.mubr.msk.bf16.mxu0 %vm329_vm0, %v1106_v1  ;;  %1000 = vmatprep.mubr.msk.bf16.mxu1 %vm329_vm0, %v1109_v2  ;;  %v1240_v6 = vld [vmem:[%s1216_s28 + $0x18] sm:$0xff]   ;;  %v1247_v7 = vld [vmem:[%s1216_s28 + $0x20] sm:$0xff]   ;;  %v1254_v8 = vld [vmem:[%s1216_s28 + $0x28] sm:$0xff]   ;;  %s177_s22 = sadd.s32 1, %s1154_s22  }
  0x15   : >> { %343 = vmatpush1.bf16.msra.mxu0 %v1220_v3  ;;  %473 = vmatpush1.bf16.msra.mxu1 %v1220_v3  ;;  %v1261_v9 = vld [vmem:[%s1216_s28 + $0x30] sm:$0xff]   ;;  %v739_v10 = vld [vmem:[%s1517_s2] sm:$0xff]  ;;  %v1274_v12 = vld [vmem:[%s1216_s28 + $0x38] sm:$0xff]   ;;  %p174_p4 = scmp.ge.s32.totalorder %s177_s22, 16  }
  0x16   : >> { %344 = vmatprep.subr.bf16.mxu0 %v1156_v0  ;;  %474 = vmatprep.subr.bf16.mxu1 %v1156_v0  ;;  %v740_v13 = vld [vmem:[%s1517_s2 + $0x8] sm:$0xff]  ;;  %v1287_v15 = vld [vmem:[%s1216_s28 + $0x40] sm:$0xff]   ;;  %v746_v20 = vld [vmem:[%s1517_s2 + $0x38] sm:$0xff] }
  0x17   : >> { %749 = vperm.xlu0 %1090, %v739_v10   ;;  %759 = vperm.xlu1 %1091, %v741_v11   ;;  %v743_v16 = vld [vmem:[%s1517_s2 + $0x20] sm:$0xff]  ;;  %v744_v17 = vld [vmem:[%s1517_s2 + $0x28] sm:$0xff]  ;;  %v1313_v21 = vld [vmem:[%s1216_s28 + $0x50] sm:$0xff]  }
  0x18   : >> { %v1300_v18 = vld [vmem:[%s1216_s28 + $0x48] sm:$0xff]   ;;  %v1320_v22 = vld [vmem:[%s1216_s28 + $0x58] sm:$0xff]  }
  0x19   : >> { %345 = vmatpush1.bf16.msra.mxu0 %v1226_v4  ;;  %475 = vmatpush1.bf16.msra.mxu1 %v1226_v4  ;;  %v1104_v23 = vld [vmem:[%s1516_s1] ss:$8 sps:$4 sm:$0xff]   ;;  %v1110_v25 = vld [vmem:[%s1516_s1 + $0x54] ss:$8 sps:$4 sm:$0xff]   ;;  %v1112_v27 = vld [vmem:[%s1516_s1 + $0x50] ss:$8 sps:$4 sm:$0xff]  }
  0x1a   : >> { %346 = vmatprep.subr.bf16.mxu0 %v1156_v0  ;;  %476 = vmatprep.subr.bf16.mxu1 %v1156_v0  ;;  %v1107_v24 = vld [vmem:[%s1516_s1 + $0x40] ss:$8 sps:$4 sm:$0xff]   ;;  %v1116_v26 = vld [vmem:[%s1516_s1 + $0x14] ss:$8 sps:$4 sm:$0xff]   ;;  %v1118_v28 = vld [vmem:[%s1516_s1 + $0x10] ss:$8 sps:$4 sm:$0xff]  }
  0x1b   : >> { %754 = vperm.xlu0 %1090, %v740_v13   ;;  %764 = vperm.xlu1 %1091, %v742_v14   ;;  %v1113_v29 = vld [vmem:[%s1516_s1 + $0x64] ss:$8 sps:$4 sm:$0xff]   ;;  %v1115_v31 = vld [vmem:[%s1516_s1 + $0x60] ss:$8 sps:$4 sm:$0xff]   ;;  %v1119_v33 = vld [vmem:[%s1516_s1 + $0x74] ss:$8 sps:$4 sm:$0xff]  }
  0x1c   : >> { %v1122_v30 = vld [vmem:[%s1516_s1 + $0x24] ss:$8 sps:$4 sm:$0xff]   ;;  %v1124_v32 = vld [vmem:[%s1516_s1 + $0x20] ss:$8 sps:$4 sm:$0xff]   ;;  %v1125_v34 = vld [vmem:[%s1516_s1 + $0x34] ss:$8 sps:$4 sm:$0xff]  }
  0x1d   : >> { %347 = vmatpush1.bf16.msra.mxu0 %v1233_v5  ;;  %477 = vmatpush1.bf16.msra.mxu1 %v1233_v5  ;;  %v1121_v35 = vld [vmem:[%s1516_s1 + $0x70] ss:$8 sps:$4 sm:$0xff]   ;;  %v1130_v37 = vld [vmem:[%s1516_s1 + $0x84] ss:$8 sps:$4 sm:$0xff]   ;;  %v1128_v39 = vld [vmem:[%s1516_s1 + $0x80] ss:$8 sps:$4 sm:$0xff]  }
  0x1e   : >> { %348 = vmatprep.subr.bf16.mxu0 %v1156_v0  ;;  %478 = vmatprep.subr.bf16.mxu1 %v1156_v0  ;;  %v1127_v36 = vld [vmem:[%s1516_s1 + $0x30] ss:$8 sps:$4 sm:$0xff]   ;;  %v1133_v38 = vld [vmem:[%s1516_s1 + $0xa4] ss:$8 sps:$4 sm:$0xff]   ;;  %v1131_v40 = vld [vmem:[%s1516_s1 + $0xa0] ss:$8 sps:$4 sm:$0xff]  }
  0x1f   : >> { %769 = vperm.xlu0 %1090, %v743_v16   ;;  %774 = vperm.xlu1 %1091, %v744_v17   ;;  %v1134_v41 = vld [vmem:[%s1516_s1 + $0x94] ss:$8 sps:$4 sm:$0xff]   ;;  %v1136_v43 = vld [vmem:[%s1516_s1 + $0x90] ss:$8 sps:$4 sm:$0xff]  }
  0x20   : >> { %v1137_v42 = vld [vmem:[%s1516_s1 + $0xb4] ss:$8 sps:$4 sm:$0xff]   ;;  %v1139_v44 = vld [vmem:[%s1516_s1 + $0xb0] ss:$8 sps:$4 sm:$0xff]  }
  0x21   : >> { %349 = vmatpush1.bf16.msra.mxu0 %v1240_v6  ;;  %479 = vmatpush1.bf16.msra.mxu1 %v1240_v6 }
  0x22   : >> { %350 = vmatprep.subr.bf16.mxu0 %v1156_v0  ;;  %480 = vmatprep.subr.bf16.mxu1 %v1156_v0 }
  0x23   : >> { %779 = vperm.xlu0 %1090, %v745_v19   ;;  %784 = vperm.xlu1 %1091, %v746_v20  }
  0x25   : >> { %351 = vmatpush1.bf16.msra.mxu0 %v1247_v7  ;;  %481 = vmatpush1.bf16.msra.mxu1 %v1247_v7 }
  0x26   : >> { %352 = vmatprep.subr.bf16.mxu0 %v1156_v0  ;;  %482 = vmatprep.subr.bf16.mxu1 %v1156_v0 }
  0x29   : >> { %353 = vmatpush1.bf16.msra.mxu0 %v1254_v8  ;;  %483 = vmatpush1.bf16.msra.mxu1 %v1254_v8 }
  0x2a   : >> { %354 = vmatprep.subr.bf16.mxu0 %v1156_v0  ;;  %484 = vmatprep.subr.bf16.mxu1 %v1156_v0 }
  0x2d   : >> { %355 = vmatpush1.bf16.msra.mxu0 %v1261_v9  ;;  %485 = vmatpush1.bf16.msra.mxu1 %v1261_v9 }
  0x2e   : >> { %356 = vmatprep.subr.bf16.mxu0 %v1156_v0  ;;  %486 = vmatprep.subr.bf16.mxu1 %v1156_v0 }
  0x31   : >> { %357 = vmatpush1.bf16.msra.mxu0 %v1274_v12  ;;  %487 = vmatpush1.bf16.msra.mxu1 %v1274_v12 }
  0x32   : >> { %358 = vmatprep.subr.bf16.mxu0 %v1156_v0  ;;  %488 = vmatprep.subr.bf16.mxu1 %v1156_v0 }
  0x35   : >> { %359 = vmatpush1.bf16.msra.mxu0 %v1287_v15  ;;  %489 = vmatpush1.bf16.msra.mxu1 %v1287_v15 }
  0x36   : >> { %360 = vmatprep.subr.bf16.mxu0 %v1156_v0  ;;  %490 = vmatprep.subr.bf16.mxu1 %v1156_v0 }
  0x39   : >> { %361 = vmatpush1.bf16.msra.mxu0 %v1300_v18  ;;  %491 = vmatpush1.bf16.msra.mxu1 %v1300_v18 }
  0x3a   : >> { %362 = vmatprep.subr.bf16.mxu0 %v1156_v0  ;;  %492 = vmatprep.subr.bf16.mxu1 %v1156_v0 }
  0x3d   : >> { %363 = vmatpush1.bf16.msra.mxu0 %v1313_v21  ;;  %493 = vmatpush1.bf16.msra.mxu1 %v1313_v21 }
  0x3e   : >> { %364 = vmatprep.subr.bf16.mxu0 %v1156_v0  ;;  %494 = vmatprep.subr.bf16.mxu1 %v1156_v0 }
  0x41   : >> { %365 = vmatpush1.bf16.msra.mxu0 %v1320_v22  ;;  %495 = vmatpush1.bf16.msra.mxu1 %v1320_v22 }
  0x42   : >> { %634 = vmatprep.subr.bf16.mxu0 %v1156_v0  ;;  %1046 = vmatprep.subr.bf16.mxu1 %v1156_v0 }
  0x44   : >> { %375 = vmatmul.mubr.bf16.vlgmr.msra.gmra.mrb[0].mxu0 %v1104_v23  ;;  %505 = vmatmul.mubr.bf16.vlgmr.msra.gmra.mrb[0].mxu1 %v1107_v24 }
  0x45   : >> { %635 = vmatpush1.bf16.msra.mxu0 %v1220_v3  ;;  %1058 = vmatpush1.bf16.msra.mxu1 %v1220_v3 }
  0x46   : >> { %636 = vmatprep.subr.bf16.mxu0 %v1156_v0  ;;  %1047 = vmatprep.subr.bf16.mxu1 %v1156_v0 }
  0x47   : >> { %1001 = vmatprep.mubr.msk.bf16.mxu1 %vm329_vm0, %v1110_v25  ;;  %981 = vmatprep.mubr.msk.bf16.mxu0 %vm329_vm0, %v1116_v26 }
  0x49   : >> { %637 = vmatpush1.bf16.msra.mxu0 %v1226_v4  ;;  %1059 = vmatpush1.bf16.msra.mxu1 %v1226_v4 }
  0x4a   : >> { %638 = vmatprep.subr.bf16.mxu0 %v1156_v0  ;;  %1048 = vmatprep.subr.bf16.mxu1 %v1156_v0 }
  0x4c   : >> { %513 = vmatmul.mubr.bf16.gmra.mrb[4].mxu1 %v1112_v27  ;;  %383 = vmatmul.mubr.bf16.gmra.mrb[4].mxu0 %v1118_v28 }
  0x4d   : >> { %639 = vmatpush1.bf16.msra.mxu0 %v1233_v5  ;;  %1060 = vmatpush1.bf16.msra.mxu1 %v1233_v5 }
  0x4e   : >> { %640 = vmatprep.subr.bf16.mxu0 %v1156_v0  ;;  %1049 = vmatprep.subr.bf16.mxu1 %v1156_v0 }
  0x4f   : >> { %1002 = vmatprep.mubr.msk.bf16.mxu1 %vm329_vm0, %v1113_v29  ;;  %982 = vmatprep.mubr.msk.bf16.mxu0 %vm329_vm0, %v1122_v30 }
  0x51   : >> { %641 = vmatpush1.bf16.msra.mxu0 %v1240_v6  ;;  %1061 = vmatpush1.bf16.msra.mxu1 %v1240_v6 }
  0x52   : >> { %642 = vmatprep.subr.bf16.mxu0 %v1156_v0  ;;  %1050 = vmatprep.subr.bf16.mxu1 %v1156_v0 }
  0x54   : >> { %521 = vmatmul.mubr.bf16.gmra.mrb[8].mxu1 %v1115_v31  ;;  %391 = vmatmul.mubr.bf16.gmra.mrb[8].mxu0 %v1124_v32 }
  0x55   : >> { %643 = vmatpush1.bf16.msra.mxu0 %v1247_v7  ;;  %1062 = vmatpush1.bf16.msra.mxu1 %v1247_v7 }
  0x56   : >> { %644 = vmatprep.subr.bf16.mxu0 %v1156_v0  ;;  %1051 = vmatprep.subr.bf16.mxu1 %v1156_v0 }
  0x57   : >> { %1003 = vmatprep.mubr.msk.bf16.mxu1 %vm329_vm0, %v1119_v33  ;;  %983 = vmatprep.mubr.msk.bf16.mxu0 %vm329_vm0, %v1125_v34 }
  0x59   : >> { %645 = vmatpush1.bf16.msra.mxu0 %v1254_v8  ;;  %1063 = vmatpush1.bf16.msra.mxu1 %v1254_v8 }
  0x5a   : >> { %646 = vmatprep.subr.bf16.mxu0 %v1156_v0  ;;  %1052 = vmatprep.subr.bf16.mxu1 %v1156_v0 }
  0x5c   : >> { %529 = vmatmul.mubr.bf16.gmra.mrb[12].mxu1 %v1121_v35  ;;  %399 = vmatmul.mubr.bf16.gmra.mrb[12].mxu0 %v1127_v36 }
  0x5d   : >> { %647 = vmatpush1.bf16.msra.mxu0 %v1261_v9  ;;  %1064 = vmatpush1.bf16.msra.mxu1 %v1261_v9 }
  0x5e   : >> { %648 = vmatprep.subr.bf16.mxu0 %v1156_v0  ;;  %1053 = vmatprep.subr.bf16.mxu1 %v1156_v0 }
  0x5f   : >> { %1020 = vmatprep.mubr.msk.bf16.mxu0 %vm329_vm0, %v1130_v37  ;;  %1022 = vmatprep.mubr.msk.bf16.mxu1 %vm329_vm0, %v1133_v38 }
  0x61   : >> { %649 = vmatpush1.bf16.msra.mxu0 %v1274_v12  ;;  %1065 = vmatpush1.bf16.msra.mxu1 %v1274_v12 }
  0x62   : >> { %650 = vmatprep.subr.bf16.mxu0 %v1156_v0  ;;  %1054 = vmatprep.subr.bf16.mxu1 %v1156_v0 }
  0x65   : >> { %651 = vmatpush1.bf16.msra.mxu0 %v1287_v15  ;;  %1066 = vmatpush1.bf16.msra.mxu1 %v1287_v15 }
  0x66   : >> { %652 = vmatprep.subr.bf16.mxu0 %v1156_v0  ;;  %1055 = vmatprep.subr.bf16.mxu1 %v1156_v0 }
  0x69   : >> { %653 = vmatpush1.bf16.msra.mxu0 %v1300_v18  ;;  %1067 = vmatpush1.bf16.msra.mxu1 %v1300_v18 }
  0x6a   : >> { %654 = vmatprep.subr.bf16.mxu0 %v1156_v0  ;;  %1056 = vmatprep.subr.bf16.mxu1 %v1156_v0 }
  0x6d   : >> { %655 = vmatpush1.bf16.msra.mxu0 %v1313_v21  ;;  %1068 = vmatpush1.bf16.msra.mxu1 %v1313_v21 }
  0x6e   : >> { %656 = vmatprep.subr.bf16.mxu0 %v1156_v0  ;;  %1057 = vmatprep.subr.bf16.mxu1 %v1156_v0 }
  0x71   : >> { %657 = vmatpush1.bf16.msra.mxu0 %v1320_v22  ;;  %1069 = vmatpush1.bf16.msra.mxu1 %v1320_v22 }
  0x74   : >> { %667 = vmatmul.mubr.bf16.vlgmr.msra.gmra.mrb[16].mxu0 %v1128_v39  ;;  %683 = vmatmul.mubr.bf16.vlgmr.msra.gmra.mrb[16].mxu1 %v1131_v40 }
  0x75   : >> { %1021 = vmatprep.mubr.msk.bf16.mxu0 %vm329_vm0, %v1134_v41  ;;  %1023 = vmatprep.mubr.msk.bf16.mxu1 %vm329_vm0, %v1137_v42 }
  0x7c   : >> { %675 = vmatmul.mubr.bf16.gmra.mrb[20].mxu0 %v1136_v43  ;;  %691 = vmatmul.mubr.bf16.gmra.mrb[20].mxu1 %v1139_v44 }
  0x96   : >> { %v750_v29 = vpop.permute.xlu0 %749  ;;  %v760_v30 = vpop.permute.xlu1 %759 }
  0x9a   : >> { %v755_v31 = vpop.permute.xlu0 %754  ;;  %v765_v32 = vpop.permute.xlu1 %764 }
  0x9e   : >> { %v770_v33 = vpop.permute.xlu0 %769  ;;  %v775_v34 = vpop.permute.xlu1 %774 }
  0xa2   : >> { %v1474_v35 = vpop.permute.xlu0 %779  ;;  %v1476_v36 = vpop.permute.xlu1 %784 }
 0x117   : >> { %v1450_v45 = vpop.f32.mrb[0].mxu0  ;;  %v506_v46 = vpop.f32.mrb[0].mxu1 }
 0x118   : >> { %545 = vrot.lane.b32.xlu0 %v506_v46, %s1157_s20  ;;  %v378_v47 = vpop.f32.mrb[1].mxu0  ;;  %v508_v48 = vpop.f32.mrb[1].mxu1 }
 0x119   : >> { %v1453_v49 = vpop.f32.mrb[2].mxu0  ;;  %v509_v50 = vpop.f32.mrb[2].mxu1 }
 0x11a   : >> { %547 = vrot.lane.b32.xlu1 %v509_v50, %s1157_s20  ;;  %v381_v51 = vpop.f32.mrb[3].mxu0  ;;  %v511_v52 = vpop.f32.mrb[3].mxu1 }
 0x11f   : >> { %v514_v53 = vpop.f32.mrb[4].mxu1  ;;  %v1456_v54 = vpop.f32.mrb[4].mxu0 }
 0x120   : >> { %549 = vrot.lane.b32.xlu0 %v514_v53, %s1157_s20  ;;  %v516_v55 = vpop.f32.mrb[5].mxu1  ;;  %v386_v56 = vpop.f32.mrb[5].mxu0 }
 0x121   : >> { %v517_v57 = vpop.f32.mrb[6].mxu1  ;;  %v1459_v58 = vpop.f32.mrb[6].mxu0 }
 0x122   : >> { %551 = vrot.lane.b32.xlu1 %v517_v57, %s1157_s20  ;;  %v519_v59 = vpop.f32.mrb[7].mxu1  ;;  %v389_v60 = vpop.f32.mrb[7].mxu0 }
 0x127   : >> { %v522_v61 = vpop.f32.mrb[8].mxu1  ;;  %v1462_v62 = vpop.f32.mrb[8].mxu0 }
 0x128   : >> { %553 = vrot.lane.b32.xlu0 %v522_v61, %s1157_s20  ;;  %v524_v63 = vpop.f32.mrb[9].mxu1  ;;  %v394_v0 = vpop.f32.mrb[9].mxu0 }
 0x129   : >> { %v525_v1 = vpop.f32.mrb[10].mxu1  ;;  %v1465_v2 = vpop.f32.mrb[10].mxu0 }
 0x12a   : >> { %555 = vrot.lane.b32.xlu1 %v525_v1, %s1157_s20  ;;  %v527_v3 = vpop.f32.mrb[11].mxu1  ;;  %v397_v4 = vpop.f32.mrb[11].mxu0 }
 0x12f   : >> { %v530_v5 = vpop.f32.mrb[12].mxu1  ;;  %v1468_v6 = vpop.f32.mrb[12].mxu0 }
 0x130   : >> { %557 = vrot.lane.b32.xlu0 %v530_v5, %s1157_s20  ;;  %v532_v7 = vpop.f32.mrb[13].mxu1  ;;  %v402_v8 = vpop.f32.mrb[13].mxu0 }
 0x131   : >> { %v533_v9 = vpop.f32.mrb[14].mxu1  ;;  %v1471_v10 = vpop.f32.mrb[14].mxu0 }
 0x132   : >> { %559 = vrot.lane.b32.xlu1 %v533_v9, %s1157_s20  ;;  %v405_v11 = vpop.f32.mrb[15].mxu0  ;;  %v535_v12 = vpop.f32.mrb[15].mxu1 }
 0x147   : >> { %v668_v13 = vpop.f32.mrb[16].mxu0  ;;  %v684_v14 = vpop.f32.mrb[16].mxu1 }
 0x148   : >> { %707 = vrot.lane.b32.xlu0 %v668_v13, %s1158_s23  ;;  %v670_v15 = vpop.f32.mrb[17].mxu0  ;;  %v686_v16 = vpop.f32.mrb[17].mxu1 }
 0x149   : >> { %v671_v17 = vpop.f32.mrb[18].mxu0  ;;  %v687_v18 = vpop.f32.mrb[18].mxu1 }
 0x14a   : >> { %709 = vrot.lane.b32.xlu1 %v671_v17, %s1158_s23  ;;  %v673_v19 = vpop.f32.mrb[19].mxu0  ;;  %v689_v20 = vpop.f32.mrb[19].mxu1 }
 0x14c   : >> { %715 = vrot.lane.b32.xlu0 %v684_v14, %s1158_s23 }
 0x14e   : >> { %717 = vrot.lane.b32.xlu1 %v687_v18, %s1158_s23 }
 0x14f   : >> { %v676_v21 = vpop.f32.mrb[20].mxu0  ;;  %v692_v22 = vpop.f32.mrb[20].mxu1 }
 0x150   : >> { %711 = vrot.lane.b32.xlu0 %v676_v21, %s1158_s23  ;;  %v678_v23 = vpop.f32.mrb[21].mxu0  ;;  %v694_v24 = vpop.f32.mrb[21].mxu1 }
 0x151   : >> { %v679_v25 = vpop.f32.mrb[22].mxu0  ;;  %v695_v26 = vpop.f32.mrb[22].mxu1 }
 0x152   : >> { %713 = vrot.lane.b32.xlu1 %v679_v25, %s1158_s23  ;;  %v681_v27 = vpop.f32.mrb[23].mxu0  ;;  %v697_v28 = vpop.f32.mrb[23].mxu1 }
 0x154   : >> { %719 = vrot.lane.b32.xlu0 %v692_v22, %s1158_s23 }
 0x156   : >> { %721 = vrot.lane.b32.xlu1 %v695_v26, %s1158_s23 }
 0x18a   : >> { %v546_v37 = vpop.permute.xlu0 %545 }
 0x18b   : >> { %v569_v46 = vadd.f32 %v546_v37, %v1450_v45 }
 0x18c   : >> { %v548_v38 = vpop.permute.xlu1 %547 }
 0x18d   : >> { %v570_v48 = vadd.f32 %v548_v38, %v1453_v49 }
 0x192   : >> { %v550_v39 = vpop.permute.xlu0 %549 }
 0x193   : >> { %v571_v61 = vadd.f32 %v550_v39, %v1456_v54 }
 0x194   : >> { %v552_v40 = vpop.permute.xlu1 %551 }
 0x195   : >> { %v572_v1 = vadd.f32 %v552_v40, %v1459_v58 }
 0x19a   : >> { %v554_v41 = vpop.permute.xlu0 %553 }
 0x19b   : >> { %v573_v52 = vadd.f32 %v554_v41, %v1462_v62 }
 0x19c   : >> { %v556_v42 = vpop.permute.xlu1 %555 }
 0x19d   : >> { %v574_v45 = vadd.f32 %v556_v42, %v1465_v2 }
 0x1a2   : >> { %v558_v43 = vpop.permute.xlu0 %557 }
 0x1a3   : >> { %v575_v12 = vadd.f32 %v558_v43, %v1468_v6 }
 0x1a4   : >> { %v560_v44 = vpop.permute.xlu1 %559 }
 0x1a5   : >> { %v576_v21 = vadd.f32 %v560_v44, %v1471_v10 }
 0x1ba   : >> { %v708_v47 = vpop.permute.xlu0 %707 }
 0x1bb   : >> { %v731_v50 = vadd.f32 %v708_v47, %v569_v46 }
 0x1bc   : >> { %v710_v51 = vpop.permute.xlu1 %709 }
 0x1bd   : >> { %v787_v53 = vadd.f32 %v750_v29, %v731_v50  ;;  %v732_v55 = vadd.f32 %v710_v51, %v570_v48 }
 0x1be   : >> { %v716_v56 = vpop.permute.xlu0 %715 }
 0x1bf   : >> { %vm795_vm1 = vcmp.ge.f32.partialorder %v787_v53, 0.0  ;;  %v803_v57 = vmul.f32 0.25, %v787_v53  ;;  %v788_v59 = vadd.f32 %v755_v31, %v732_v55  ;;  %v735_v60 = vadd.f32 %v716_v56, %v573_v52 }
 0x1c0   : >> { %v718_v63 = vpop.permute.xlu1 %717 }
 0x1c1   : >> { %v811_v49 = vsel %vm795_vm1, %v787_v53, %v803_v57  ;;  %vm796_vm3 = vcmp.ge.f32.partialorder %v788_v59, 0.0  ;;  %v804_v62 = vmul.f32 0.25, %v788_v59  ;;  %v791_v0 = vadd.f32 %v770_v33, %v735_v60 }
 0x1c2   : >> { %v1037_v3 = vpack.c.bf16 %v811_v49, %v811_v49  ;;  %v736_v4 = vadd.f32 %v718_v63, %v574_v45  ;;  %v712_v5 = vpop.permute.xlu0 %711 }
 0x1c3   : >> { %v812_v7 = vsel %vm796_vm3, %v788_v59, %v804_v62  ;;  %vm799_vm4 = vcmp.ge.f32.partialorder %v791_v0, 0.0  ;;  %v807_v54 = vmul.f32 0.25, %v791_v0  ;;  %v733_v2 = vadd.f32 %v712_v5, %v571_v61 }
 0x1c4   : >> { %854 = vst.msk [vmem:[%s1486_s24] sm:$0xf] %vm853_vm2, %v1037_v3  ;;  %v1038_v8 = vpack.c.bf16 %v812_v7, %v812_v7  ;;  %v792_v9 = vadd.f32 %v775_v34, %v736_v4  ;;  %v714_v11 = vpop.permute.xlu1 %713 }
 0x1c5   : >> { %v815_v13 = vsel %vm799_vm4, %v791_v0, %v807_v54  ;;  %v789_v14 = vadd.f32 %v760_v30, %v733_v2  ;;  %v734_v15 = vadd.f32 %v714_v11, %v572_v1 }
 0x1c6   : >> { %855 = vst.msk [vmem:[%s1486_s24 + $0x4] sm:$0xf] %vm853_vm2, %v1038_v8  ;;  %v1041_v58 = vpack.c.bf16 %v815_v13, %v815_v13  ;;  %vm800_vm5 = vcmp.ge.f32.partialorder %v792_v9, 0.0  ;;  %v808_v16 = vmul.f32 0.25, %v792_v9  ;;  %v720_v17 = vpop.permute.xlu0 %719 }
 0x1c7   : >> { %vm797_vm6 = vcmp.ge.f32.partialorder %v789_v14, 0.0  ;;  %v805_v18 = vmul.f32 0.25, %v789_v14  ;;  %v790_v19 = vadd.f32 %v765_v32, %v734_v15  ;;  %v737_v20 = vadd.f32 %v720_v17, %v575_v12 }
 0x1c8   : >> { %858 = vst.msk [vmem:[%s1486_s24 + $0x10] sm:$0xf] %vm853_vm2, %v1041_v58  ;;  %v816_v6 = vsel %vm800_vm5, %v792_v9, %v808_v16  ;;  %v722_v22 = vpop.permute.xlu1 %721 }
 0x1c9   : >> { %v1042_v23 = vpack.c.bf16 %v816_v6, %v816_v6  ;;  %v813_v24 = vsel %vm797_vm6, %v789_v14, %v805_v18  ;;  %vm798_vm7 = vcmp.ge.f32.partialorder %v790_v19, 0.0  ;;  %v806_v25 = vmul.f32 0.25, %v790_v19 }
 0x1ca   : >> { %v1039_v26 = vpack.c.bf16 %v813_v24, %v813_v24  ;;  %v793_v27 = vadd.f32 %v1474_v35, %v737_v20  ;;  %v738_v28 = vadd.f32 %v722_v22, %v576_v21 }
 0x1cb   : >> { %859 = vst.msk [vmem:[%s1486_s24 + $0x14] sm:$0xf] %vm853_vm2, %v1042_v23  ;;  %v814_v29 = vsel %vm798_vm7, %v790_v19, %v806_v25 }
 0x1cc   : >> { %856 = vst.msk [vmem:[%s1486_s24 + $0x8] sm:$0xf] %vm853_vm2, %v1039_v26  ;;  %v1040_v10 = vpack.c.bf16 %v814_v29, %v814_v29  ;;  %vm801_vm8 = vcmp.ge.f32.partialorder %v793_v27, 0.0  ;;  %v809_v30 = vmul.f32 0.25, %v793_v27  ;;  %v794_v31 = vadd.f32 %v1476_v36, %v738_v28 }
 0x1cd   : > { %176 = sbr.rel (!%p174_p4) target bundleno = 17 (0x11), region = 75 }
 0x1ce   : >> { %857 = vst.msk [vmem:[%s1486_s24 + $0xc] sm:$0xf] %vm853_vm2, %v1040_v10  ;;  %v817_v32 = vsel %vm801_vm8, %v793_v27, %v809_v30  ;;  %vm802_vm9 = vcmp.ge.f32.partialorder %v794_v31, 0.0  ;;  %v810_v33 = vmul.f32 0.25, %v794_v31 }
 0x1cf   : >> { %v1043_v34 = vpack.c.bf16 %v817_v32, %v817_v32 }
 0x1d0   : >> { %v818_v37 = vsel %vm802_vm9, %v794_v31, %v810_v33 }
 0x1d1   : >> { %860 = vst.msk [vmem:[%s1486_s24 + $0x18] sm:$0xf] %vm853_vm2, %v1043_v34  ;;  %v1044_v35 = vpack.c.bf16 %v818_v37, %v818_v37 }
 0x1d3   : >> { %861 = vst.msk [vmem:[%s1486_s24 + $0x1c] sm:$0xf] %vm853_vm2, %v1044_v35 }
 0x1d4 PF: > { %s13_s12 = sadd.s32 1, %s1150_s12  }
 0x1d5   : > { %p10_p5 = scmp.ge.s32.totalorder %s13_s12, 6  }
 0x1d7   :  { %12 = sbr.rel (!%p10_p5) target bundleno = 1 (0x1), region = 86 }

// kernel: softsplat_baseline_forward.24
= control target key start
LH: loop header
LB: loop body
LE: loop exit
PB: predicated region body
PF: predicated region fallthrough
CT: control target
= control target key end

     0   :  { %s711_s14 = smov 0   ;;  %s844_s0 = inlined_call_operand.vmem [shape: bf16[4,18,64,18], index: 0, kind: input, shape index: {}]   ;;  %s845_s1 = inlined_call_operand.vmem [shape: bf16[3,1,192], index: 1, kind: input, shape index: {}]   ;;  %s846_s2 = inlined_call_operand.<no memory space> [shape: f32[1,1], index: 2, kind: input, shape index: {}]   ;;  %s847_s3 = inlined_call_operand.vmem [shape: f32[4,16,1,16], index: 3, kind: output, shape index: {}]  }
   0x1   :  { %v8_v0 = vstv %s846_s2 }
   0x2   :  { %9 = vst [vmem:[#allocation2] sm:$0x1] %v8_v0 }
   0x3 LB: > { %s584_s15 = sadd.s32 4294967295, %s678_s14   ;;  %p588_p0 = scmp.ge.s32.totalorder %s678_s14, 1  ;;  %s678_s14 = sphi %s711_s14, %s15_s14  }
   0x4   : > { %p139_p1 = scmp.lt.s32.totalorder %s678_s14, 5 }
   0x6   : > { %p140_p2 = pnand %p588_p0, %p139_p1 }
   0x7   : > { %p162_p3 = scmp.lt.s32.totalorder (!%p140_p2), %s584_s15, 3  ;;  %s729_s23 = smov (!%p140_p2), 0  }
   0x8   : > { %143 = sbr.rel (%p140_p2) target bundleno = 450 (0x1c2), region = 32 }
   0xf   : > { %s849_s15 = smov (!%p162_p3, %s584_s15), 3 }
  0x10   : > { %s634_s16 = smul.u32 576, %s849_s15  ;;  %s590_s2 = sshll.u32 %s849_s15, 4 }
  0x11   : > { %s722_s19 = scalar_lea.vmem %s847_s3, %s590_s2 }
  0x12   : > { %s727_s22 = scalar_lea.vmem %s844_s0, %s634_s16 }
  0x13 LB: >> { %v737_v1 = vld.sshfl [vmem:[%s845_s1] sm:$0x11 pattern:$0x75316420]  ;;  %v298_v2 = vlaneseq  ;;  %v684_v3 = vmov 0   ;;  %s633_s28 = sshll.u32 %s682_s23, 5  ;;  %s514_s7 = scalar_lea.vmem %s722_s19, %s682_s23  ;;  %s682_s23 = sphi %s729_s23, %s177_s23  }
  0x14   : >> { %314 = vmatprep.subr.bf16.mxu0 %v684_v3  ;;  %384 = vmatprep.subr.bf16.mxu1 %v684_v3  ;;  %v744_v4 = vld.sshfl [vmem:[%s845_s1 + $0x2] sm:$0x11 pattern:$0x75316420]  ;;  %v685_v5 = vmov 1966171168   ;;  %s751_s29 = scalar_lea.vmem %s727_s22, %s633_s28  ;;  %v294_v10 = vcombine.high %v737_v1, %v737_v1 }
  0x15   : >> { %v296_v6 = vunpack.c.l.s4 %v685_v5  ;;  %v747_v7 = vshrl.u32 %v298_v2, 7  ;;  %655 = vset.pattern.permute.xlu0 %v684_v3  ;;  %v503_v8 = vld [vmem:[#allocation2] sm:$0x1]  ;;  %v365_v12 = vcombine.high %v744_v4, %v744_v4  ;;  %v763_v13 = vld [vmem:[%s751_s29 + $0x8] sm:$0xff]   ;;  %vm310_vm0 = vcmask 523264   ;;  %v775_v17 = vld [vmem:[%s751_s29 + $0x10] sm:$0xff]  }
  0x16   : >> { %v754_v9 = vld [vmem:[%s751_s29] sm:$0xff]   ;;  %506 = vperm.xlu0 %655, %v503_v8   ;;  %v659_v18 = vld [vmem:[%s751_s29 + $0x18] sm:$0xff]   ;;  %v661_v20 = vld [vmem:[%s751_s29 + $0x28] sm:$0xff]   ;;  %s686_s5 = smov 127   ;;  %s687_s6 = smov 126   ;;  %vm515_vm1 = vcmask 122880  }
  0x17   : >> { %v297_v11 = vunpack.c.0.s8 %v296_v6  ;;  %315 = vmatpush1.bf16.msra.mxu0 %v754_v9  ;;  %385 = vmatpush1.bf16.msra.mxu1 %v754_v9  ;;  %v660_v19 = vld [vmem:[%s751_s29 + $0x20] sm:$0xff]   ;;  %v662_v21 = vld [vmem:[%s751_s29 + $0x30] sm:$0xff]   ;;  %v663_v22 = vld [vmem:[%s751_s29 + $0x38] sm:$0xff]   ;;  %v511_v47 = vsub.s32 0, %v747_v7  ;;  %s177_s23 = sadd.s32 1, %s682_s23  }
  0x18   : >> { %316 = vmatprep.subr.bf16.mxu0 %v684_v3  ;;  %386 = vmatprep.subr.bf16.mxu1 %v684_v3  ;;  %v664_v23 = vld [vmem:[%s751_s29 + $0x40] sm:$0xff]   ;;  %v665_v24 = vld [vmem:[%s751_s29 + $0x48] sm:$0xff]   ;;  %v666_v25 = vld [vmem:[%s751_s29 + $0x50] sm:$0xff]   ;;  %p174_p4 = scmp.ge.s32.totalorder %s177_s23, 16  }
  0x19   : >> { %v766_v14 = vsub.s32 %v297_v11, %v747_v7  ;;  %v629_v26 = vld.sshfl [vmem:[%s845_s1 + $0x4] sm:$0x11 pattern:$0x75316420]  ;;  %v667_v27 = vld [vmem:[%s751_s29 + $0x58] sm:$0xff]  }
  0x1a   : >> { %v439_v28 = vcombine.high %v629_v26, %v629_v26 }
  0x1b   : >> { %v308_v15 = vrot.slane %v294_v10, %v766_v14  ;;  %v379_v16 = vrot.slane %v365_v12, %v766_v14  ;;  %317 = vmatpush1.bf16.msra.mxu0 %v763_v13  ;;  %387 = vmatpush1.bf16.msra.mxu1 %v763_v13  ;;  %v301_v29 = vrot.slane %v737_v1, %v766_v14 }
  0x1c   : >> { %318 = vmatprep.subr.bf16.mxu0 %v684_v3  ;;  %388 = vmatprep.subr.bf16.mxu1 %v684_v3  ;;  %v372_v30 = vrot.slane %v744_v4, %v766_v14  ;;  %v453_v31 = vrot.slane %v439_v28, %v766_v14  ;;  %v446_v32 = vrot.slane %v629_v26, %v766_v14 }
  0x1d   : >> { %624 = vmatprep.mubr.msk.bf16.mxu0 %vm310_vm0, %v308_v15  ;;  %627 = vmatprep.mubr.msk.bf16.mxu1 %vm310_vm0, %v379_v16 }
  0x1f   : >> { %319 = vmatpush1.bf16.msra.mxu0 %v775_v17  ;;  %389 = vmatpush1.bf16.msra.mxu1 %v775_v17 }
  0x20   : >> { %320 = vmatprep.subr.bf16.mxu0 %v684_v3  ;;  %390 = vmatprep.subr.bf16.mxu1 %v684_v3 }
  0x23   : >> { %321 = vmatpush1.bf16.msra.mxu0 %v659_v18  ;;  %391 = vmatpush1.bf16.msra.mxu1 %v659_v18 }
  0x24   : >> { %322 = vmatprep.subr.bf16.mxu0 %v684_v3  ;;  %392 = vmatprep.subr.bf16.mxu1 %v684_v3 }
  0x27   : >> { %323 = vmatpush1.bf16.msra.mxu0 %v660_v19  ;;  %393 = vmatpush1.bf16.msra.mxu1 %v660_v19 }
  0x28   : >> { %324 = vmatprep.subr.bf16.mxu0 %v684_v3  ;;  %394 = vmatprep.subr.bf16.mxu1 %v684_v3 }
  0x2b   : >> { %325 = vmatpush1.bf16.msra.mxu0 %v661_v20  ;;  %395 = vmatpush1.bf16.msra.mxu1 %v661_v20 }
  0x2c   : >> { %326 = vmatprep.subr.bf16.mxu0 %v684_v3  ;;  %396 = vmatprep.subr.bf16.mxu1 %v684_v3 }
  0x2f   : >> { %327 = vmatpush1.bf16.msra.mxu0 %v662_v21  ;;  %397 = vmatpush1.bf16.msra.mxu1 %v662_v21 }
  0x30   : >> { %328 = vmatprep.subr.bf16.mxu0 %v684_v3  ;;  %398 = vmatprep.subr.bf16.mxu1 %v684_v3 }
  0x33   : >> { %329 = vmatpush1.bf16.msra.mxu0 %v663_v22  ;;  %399 = vmatpush1.bf16.msra.mxu1 %v663_v22 }
  0x34   : >> { %330 = vmatprep.subr.bf16.mxu0 %v684_v3  ;;  %400 = vmatprep.subr.bf16.mxu1 %v684_v3 }
  0x37   : >> { %331 = vmatpush1.bf16.msra.mxu0 %v664_v23  ;;  %401 = vmatpush1.bf16.msra.mxu1 %v664_v23 }
  0x38   : >> { %332 = vmatprep.subr.bf16.mxu0 %v684_v3  ;;  %402 = vmatprep.subr.bf16.mxu1 %v684_v3 }
  0x3b   : >> { %333 = vmatpush1.bf16.msra.mxu0 %v665_v24  ;;  %403 = vmatpush1.bf16.msra.mxu1 %v665_v24 }
  0x3c   : >> { %334 = vmatprep.subr.bf16.mxu0 %v684_v3  ;;  %404 = vmatprep.subr.bf16.mxu1 %v684_v3 }
  0x3f   : >> { %335 = vmatpush1.bf16.msra.mxu0 %v666_v25  ;;  %405 = vmatpush1.bf16.msra.mxu1 %v666_v25 }
  0x40   : >> { %336 = vmatprep.subr.bf16.mxu0 %v684_v3  ;;  %406 = vmatprep.subr.bf16.mxu1 %v684_v3 }
  0x43   : >> { %337 = vmatpush1.bf16.msra.mxu0 %v667_v27  ;;  %407 = vmatpush1.bf16.msra.mxu1 %v667_v27 }
  0x44   : >> { %458 = vmatprep.subr.bf16.mxu0 %v684_v3 }
  0x46   : >> { %347 = vmatmul.mubr.bf16.vlgmr.msra.gmra.mrb[0].mxu0 %v301_v29  ;;  %417 = vmatmul.mubr.bf16.vlgmr.msra.gmra.mrb[0].mxu1 %v372_v30 }
  0x47   : >> { %459 = vmatpush1.bf16.msra.mxu0 %v754_v9  ;;  %630 = vmatprep.mubr.msk.bf16.mxu0 %vm310_vm0, %v453_v31 }
  0x48   : >> { %460 = vmatprep.subr.bf16.mxu0 %v684_v3 }
  0x4b   : >> { %461 = vmatpush1.bf16.msra.mxu0 %v763_v13 }
  0x4c   : >> { %462 = vmatprep.subr.bf16.mxu0 %v684_v3 }
  0x4f   : >> { %463 = vmatpush1.bf16.msra.mxu0 %v775_v17 }
  0x50   : >> { %464 = vmatprep.subr.bf16.mxu0 %v684_v3 }
  0x53   : >> { %465 = vmatpush1.bf16.msra.mxu0 %v659_v18 }
  0x54   : >> { %466 = vmatprep.subr.bf16.mxu0 %v684_v3 }
  0x57   : >> { %467 = vmatpush1.bf16.msra.mxu0 %v660_v19 }
  0x58   : >> { %468 = vmatprep.subr.bf16.mxu0 %v684_v3 }
  0x5b   : >> { %469 = vmatpush1.bf16.msra.mxu0 %v661_v20 }
  0x5c   : >> { %470 = vmatprep.subr.bf16.mxu0 %v684_v3 }
  0x5f   : >> { %471 = vmatpush1.bf16.msra.mxu0 %v662_v21 }
  0x60   : >> { %472 = vmatprep.subr.bf16.mxu0 %v684_v3 }
  0x63   : >> { %473 = vmatpush1.bf16.msra.mxu0 %v663_v22 }
  0x64   : >> { %474 = vmatprep.subr.bf16.mxu0 %v684_v3 }
  0x67   : >> { %475 = vmatpush1.bf16.msra.mxu0 %v664_v23 }
  0x68   : >> { %476 = vmatprep.subr.bf16.mxu0 %v684_v3 }
  0x6b   : >> { %477 = vmatpush1.bf16.msra.mxu0 %v665_v24 }
  0x6c   : >> { %478 = vmatprep.subr.bf16.mxu0 %v684_v3 }
  0x6f   : >> { %479 = vmatpush1.bf16.msra.mxu0 %v666_v25 }
  0x70   : >> { %480 = vmatprep.subr.bf16.mxu0 %v684_v3 }
  0x73   : >> { %481 = vmatpush1.bf16.msra.mxu0 %v667_v27 }
  0x76   : >> { %491 = vmatmul.mubr.bf16.vlgmr.msra.gmra.mrb[4].mxu0 %v446_v32 }
  0x95   : >> { %v507_v45 = vpop.permute.xlu0 %506 }
  0x96   : >> { %v512_v50 = vrot.slane %v507_v45, %v511_v47 }
 0x119   : >> { %v348_v33 = vpop.f32.mrb[0].mxu0  ;;  %v418_v34 = vpop.f32.mrb[0].mxu1 }
 0x11a   : >> { %425 = vrot.lane.b32.xlu0 %v418_v34, %s686_s5  ;;  %v350_v35 = vpop.f32.mrb[1].mxu0  ;;  %v420_v36 = vpop.f32.mrb[1].mxu1 }
 0x11b   : >> { %v351_v37 = vpop.f32.mrb[2].mxu0  ;;  %v421_v38 = vpop.f32.mrb[2].mxu1 }
 0x11c   : >> { %v352_v39 = vpop.f32.mrb[3].mxu0  ;;  %v422_v40 = vpop.f32.mrb[3].mxu1 }
 0x149   : >> { %v492_v41 = vpop.f32.mrb[4].mxu0 }
 0x14a   : >> { %499 = vrot.lane.b32.xlu1 %v492_v41, %s687_s6  ;;  %v494_v42 = vpop.f32.mrb[5].mxu0 }
 0x14b   : >> { %v495_v43 = vpop.f32.mrb[6].mxu0 }
 0x14c   : >> { %v496_v44 = vpop.f32.mrb[7].mxu0 }
 0x18c   : >> { %v426_v46 = vpop.permute.xlu0 %425 }
 0x18d   : >> { %v428_v48 = vadd.f32 %v426_v46, %v348_v33 }
 0x1bb   : > { %176 = sbr.rel (!%p174_p4) target bundleno = 19 (0x13), region = 75 }
 0x1bc   : >> { %v500_v49 = vpop.permute.xlu1 %499 }
 0x1bd   : >> { %v502_v51 = vadd.f32 %v500_v49, %v428_v48 }
 0x1bf   : >> { %v513_v52 = vadd.f32 %v512_v50, %v502_v51 }
 0x1c1   : >> { %516 = vst.msk [vmem:[%s514_s7] sm:$0x1] %vm515_vm1, %v513_v52 }
 0x1c2 PF: > { %s15_s14 = sadd.s32 1, %s678_s14  }
 0x1c3   : > { %p12_p5 = scmp.ge.s32.totalorder %s15_s14, 6  }
 0x1c5   :  { %14 = sbr.rel (!%p12_p5) target bundleno = 3 (0x3), region = 86 }

// kernel: softsplat_baseline_forward.16
= control target key start
LH: loop header
LB: loop body
LE: loop exit
PB: predicated region body
PF: predicated region fallthrough
CT: control target
= control target key end

     0   :  { %s770_s12 = smov 0   ;;  %s843_s0 = inlined_call_operand.vmem [shape: bf16[4,18,16,18], index: 0, kind: input, shape index: {}]   ;;  %s844_s1 = inlined_call_operand.vmem [shape: bf16[3,32,48], index: 1, kind: input, shape index: {}]   ;;  %s845_s2 = inlined_call_operand.vmem [shape: f32[32,1], index: 2, kind: input, shape index: {}]   ;;  %s846_s3 = inlined_call_operand.vmem [shape: bf16[4,16,32,16], index: 3, kind: output, shape index: {}]  }
   0x1 LB: > { %s601_s13 = sadd.s32 4294967295, %s741_s12   ;;  %p605_p0 = scmp.ge.s32.totalorder %s741_s12, 1  ;;  %s741_s12 = sphi %s770_s12, %s13_s12  }
   0x2   : > { %p137_p1 = scmp.lt.s32.totalorder %s741_s12, 5 }
   0x4   : > { %p138_p2 = pnand %p605_p0, %p137_p1 }
   0x5   : > { %p161_p3 = scmp.lt.s32.totalorder (!%p138_p2), %s601_s13, 3  ;;  %s788_s22 = smov (!%p138_p2), 0  }
   0x6   : > { %141 = sbr.rel (%p138_p2) target bundleno = 389 (0x185), region = 32 }
   0xd   : > { %s848_s13 = smov (!%p161_p3, %s601_s13), 3 }
   0xe   : > { %s700_s14 = smul.u32 144, %s848_s13  ;;  %s648_s15 = sshll.u32 %s848_s13, 8 }
   0xf   : > { %s781_s18 = scalar_lea.vmem %s846_s3, %s648_s15 }
  0x10   : > { %s786_s21 = scalar_lea.vmem %s843_s0, %s700_s14 }
  0x11 LB: >> { %v725_v0 = vld [vmem:[%s844_s1] sm:$0xff]   ;;  %vm227_vm0 = vcmask 392192   ;;  %v726_v1 = vld [vmem:[%s844_s1 + $0x10] sm:$0xff]   ;;  %s649_s27 = sshll.u32 %s745_s22, 3  ;;  %v747_v2 = vmov 0   ;;  %v468_v8 = vld [vmem:[%s845_s2 + $0x8] sm:$0xff]  ;;  %s745_s22 = sphi %s788_s22, %s177_s22  }
  0x12   : >> { %676 = vmatprep.mubr.msk.bf16.mxu0 %vm227_vm0, %v725_v0  ;;  %720 = vset.pattern.permute.xlu0 %v747_v2  ;;  %s180_s28 = scalar_lea.vmem %s786_s21, %s649_s27  ;;  %v467_v6 = vld [vmem:[%s845_s2] sm:$0xff]  ;;  %v469_v7 = vld [vmem:[%s845_s2 + $0x10] sm:$0xff]  ;;  %v470_v9 = vld [vmem:[%s845_s2 + $0x18] sm:$0xff]  ;;  %s748_s20 = smov 127   ;;  %vm526_vm2 = vcmask 125952  }
  0x13   : >> { %686 = vmatprep.mubr.msk.bf16.mxu1 %vm227_vm0, %v726_v1  ;;  %721 = vset.pattern.permute.xlu1 %v747_v2  ;;  %v722_v3 = vld [vmem:[%s180_s28] sm:$0xff]   ;;  %v723_v4 = vld [vmem:[%s180_s28 + $0x8] sm:$0xff]   ;;  %v724_v5 = vld [vmem:[%s180_s28 + $0x10] sm:$0xff]   ;;  %s749_s23 = smov 126   ;;  %s654_s24 = sshll.u32 %s745_s22, 4 }
  0x14   : >> { %670 = vmatprep.subr.bf16.mxu0 %v722_v3  ;;  %680 = vmatprep.subr.bf16.mxu1 %v722_v3  ;;  %v727_v10 = vld [vmem:[%s844_s1 + $0x8] sm:$0xff]   ;;  %v728_v11 = vld [vmem:[%s844_s1 + $0x18] sm:$0xff]   ;;  %v729_v12 = vld [vmem:[%s844_s1 + $0x20] sm:$0xff]   ;;  %s525_s25 = scalar_lea.vmem %s781_s18, %s654_s24  ;;  %s177_s22 = sadd.s32 1, %s745_s22  }
  0x15   : >> { %671 = vmatpush3.bf16.msra.mxu0 %v722_v3  ;;  %681 = vmatpush3.bf16.msra.mxu1 %v722_v3  ;;  %v730_v13 = vld [vmem:[%s844_s1 + $0x28] sm:$0xff]   ;;  %p174_p4 = scmp.ge.s32.totalorder %s177_s22, 16  }
  0x16   : >> { %672 = vmatprep.subr.bf16.mxu0 %v723_v4  ;;  %682 = vmatprep.subr.bf16.mxu1 %v723_v4 }
  0x17   : >> { %473 = vperm.xlu0 %720, %v467_v6   ;;  %483 = vperm.xlu1 %721, %v469_v7  }
  0x19   : >> { %673 = vmatpush3.bf16.msra.mxu0 %v723_v4  ;;  %683 = vmatpush3.bf16.msra.mxu1 %v723_v4 }
  0x1a   : >> { %674 = vmatprep.subr.bf16.mxu0 %v724_v5  ;;  %684 = vmatprep.subr.bf16.mxu1 %v724_v5 }
  0x1b   : >> { %478 = vperm.xlu0 %720, %v468_v8   ;;  %488 = vperm.xlu1 %721, %v470_v9  }
  0x1d   : >> { %675 = vmatpush3.bf16.msra.mxu0 %v724_v5  ;;  %685 = vmatpush3.bf16.msra.mxu1 %v724_v5 }
  0x1e   : >> { %690 = vmatprep.subr.bf16.mxu0 %v722_v3 }
  0x20   : >> { %677 = vmatmul.mubr.msk.bf16.vlgmr.msra.gmra.mrb[0].mxu0 %vm227_vm0, %v727_v10  ;;  %687 = vmatmul.mubr.msk.bf16.vlgmr.msra.gmra.mrb[0].mxu1 %vm227_vm0, %v728_v11 }
  0x21   : >> { %691 = vmatpush3.bf16.msra.mxu0 %v722_v3  ;;  %696 = vmatprep.mubr.msk.bf16.mxu0 %vm227_vm0, %v729_v12 }
  0x22   : >> { %692 = vmatprep.subr.bf16.mxu0 %v723_v4 }
  0x25   : >> { %693 = vmatpush3.bf16.msra.mxu0 %v723_v4 }
  0x26   : >> { %694 = vmatprep.subr.bf16.mxu0 %v724_v5 }
  0x29   : >> { %695 = vmatpush3.bf16.msra.mxu0 %v724_v5 }
  0x2c   : >> { %697 = vmatmul.mubr.msk.bf16.vlgmr.msra.gmra.mrb[4].mxu0 %vm227_vm0, %v730_v13 }
  0x96   : >> { %v474_v26 = vpop.permute.xlu0 %473  ;;  %v484_v27 = vpop.permute.xlu1 %483 }
  0x9a   : >> { %v479_v28 = vpop.permute.xlu0 %478  ;;  %v489_v29 = vpop.permute.xlu1 %488 }
  0xf3   : >> { %v678_v14 = vpop.f32.mrb[0].mxu0  ;;  %v688_v15 = vpop.f32.mrb[0].mxu1 }
  0xf4   : >> { %365 = vrot.lane.b32.xlu0 %v688_v15, %s748_s20  ;;  %v268_v16 = vpop.f32.mrb[1].mxu0  ;;  %v342_v17 = vpop.f32.mrb[1].mxu1 }
  0xf5   : >> { %v679_v18 = vpop.f32.mrb[2].mxu0  ;;  %v689_v19 = vpop.f32.mrb[2].mxu1 }
  0xf6   : >> { %367 = vrot.lane.b32.xlu1 %v689_v19, %s748_s20  ;;  %v271_v20 = vpop.f32.mrb[3].mxu0  ;;  %v345_v21 = vpop.f32.mrb[3].mxu1 }
  0xf8   : >> { %361 = vrot.lane.b32.xlu0 %v342_v17, %s748_s20 }
  0xfa   : >> { %363 = vrot.lane.b32.xlu1 %v345_v21, %s748_s20 }
  0xff   : >> { %v698_v22 = vpop.f32.mrb[4].mxu0 }
 0x100   : >> { %v432_v23 = vpop.f32.mrb[5].mxu0 }
 0x101   : >> { %451 = vrot.lane.b32.xlu0 %v432_v23, %s749_s23  ;;  %v699_v24 = vpop.f32.mrb[6].mxu0 }
 0x102   : >> { %v435_v25 = vpop.f32.mrb[7].mxu0 }
 0x103   : >> { %453 = vrot.lane.b32.xlu1 %v435_v25, %s749_s23 }
 0x105   : >> { %455 = vrot.lane.b32.xlu0 %v698_v22, %s749_s23 }
 0x107   : >> { %457 = vrot.lane.b32.xlu1 %v699_v24, %s749_s23 }
 0x166   : >> { %v366_v30 = vpop.permute.xlu0 %365 }
 0x167   : >> { %v375_v39 = vadd.f32 %v678_v14, %v366_v30 }
 0x168   : >> { %v368_v31 = vpop.permute.xlu1 %367 }
 0x169   : >> { %v376_v46 = vadd.f32 %v679_v18, %v368_v31 }
 0x16a   : >> { %v362_v32 = vpop.permute.xlu0 %361 }
 0x16b   : >> { %v373_v34 = vadd.f32 %v362_v32, %v268_v16 }
 0x16c   : >> { %v364_v33 = vpop.permute.xlu1 %363 }
 0x16d   : >> { %v374_v36 = vadd.f32 %v364_v33, %v271_v20 }
 0x173   : >> { %v452_v35 = vpop.permute.xlu0 %451 }
 0x174   : >> { %v463_v37 = vadd.f32 %v452_v35, %v373_v34 }
 0x175   : >> { %v454_v38 = vpop.permute.xlu1 %453 }
 0x176   : >> { %v491_v40 = vadd.f32 %v474_v26, %v463_v37  ;;  %v464_v41 = vadd.f32 %v454_v38, %v374_v36 }
 0x177   : >> { %v456_v42 = vpop.permute.xlu0 %455 }
 0x178   : >> { %vm495_vm1 = vcmp.ge.f32.partialorder %v491_v40, 0.0  ;;  %v499_v43 = vmul.f32 0.25, %v491_v40  ;;  %v492_v44 = vadd.f32 %v479_v28, %v464_v41  ;;  %v465_v45 = vadd.f32 %v456_v42, %v375_v39 }
 0x179   : >> { %v458_v47 = vpop.permute.xlu1 %457 }
 0x17a   : >> { %v503_v48 = vsel %vm495_vm1, %v491_v40, %v499_v43  ;;  %vm496_vm3 = vcmp.ge.f32.partialorder %v492_v44, 0.0  ;;  %v500_v49 = vmul.f32 0.25, %v492_v44  ;;  %v493_v50 = vadd.f32 %v484_v27, %v465_v45 }
 0x17b   : >> { %v650_v51 = vpack.c.bf16 %v503_v48, %v503_v48  ;;  %v466_v52 = vadd.f32 %v458_v47, %v376_v46 }
 0x17c   : >> { %v504_v53 = vsel %vm496_vm3, %v492_v44, %v500_v49  ;;  %vm497_vm4 = vcmp.ge.f32.partialorder %v493_v50, 0.0  ;;  %v501_v54 = vmul.f32 0.25, %v493_v50 }
 0x17d   : >> { %527 = vst.msk [vmem:[%s525_s25] sm:$0xf] %vm526_vm2, %v650_v51  ;;  %v651_v55 = vpack.c.bf16 %v504_v53, %v504_v53  ;;  %v494_v56 = vadd.f32 %v489_v29, %v466_v52 }
 0x17e   : >> { %v505_v57 = vsel %vm497_vm4, %v493_v50, %v501_v54  ;;  %176 = sbr.rel (!%p174_p4) target bundleno = 17 (0x11), region = 75 }
 0x17f   : >> { %528 = vst.msk [vmem:[%s525_s25 + $0x4] sm:$0xf] %vm526_vm2, %v651_v55  ;;  %v652_v58 = vpack.c.bf16 %v505_v57, %v505_v57  ;;  %vm498_vm5 = vcmp.ge.f32.partialorder %v494_v56, 0.0  ;;  %v502_v59 = vmul.f32 0.25, %v494_v56 }
 0x181   : >> { %529 = vst.msk [vmem:[%s525_s25 + $0x8] sm:$0xf] %vm526_vm2, %v652_v58  ;;  %v506_v60 = vsel %vm498_vm5, %v494_v56, %v502_v59 }
 0x182   : >> { %v653_v61 = vpack.c.bf16 %v506_v60, %v506_v60 }
 0x184   : >> { %530 = vst.msk [vmem:[%s525_s25 + $0xc] sm:$0xf] %vm526_vm2, %v653_v61 }
 0x185 PF: > { %s13_s12 = sadd.s32 1, %s741_s12  }
 0x186   : > { %p10_p5 = scmp.ge.s32.totalorder %s13_s12, 6  }
 0x188   :  { %12 = sbr.rel (!%p10_p5) target bundleno = 1 (0x1), region = 86 }

// kernel: softsplat_baseline_forward.17
= control target key start
LH: loop header
LB: loop body
LE: loop exit
PB: predicated region body
PF: predicated region fallthrough
CT: control target
= control target key end

     0   :  { %s829_s12 = smov 0   ;;  %s913_s0 = inlined_call_operand.vmem [shape: bf16[4,18,32,18], index: 0, kind: input, shape index: {}]   ;;  %s914_s1 = inlined_call_operand.vmem [shape: bf16[3,32,96], index: 1, kind: input, shape index: {}]   ;;  %s915_s2 = inlined_call_operand.vmem [shape: f32[32,1], index: 2, kind: input, shape index: {}]   ;;  %s916_s3 = inlined_call_operand.vmem [shape: bf16[4,16,32,16], index: 3, kind: output, shape index: {}]  }
   0x1 LB: > { %s624_s13 = sadd.s32 4294967295, %s800_s12   ;;  %p628_p0 = scmp.ge.s32.totalorder %s800_s12, 1  ;;  %s800_s12 = sphi %s829_s12, %s13_s12  }
   0x2   : > { %p137_p1 = scmp.lt.s32.totalorder %s800_s12, 5 }
   0x4   : > { %p138_p2 = pnand %p628_p0, %p137_p1 }
   0x5   : > { %p161_p3 = scmp.lt.s32.totalorder (!%p138_p2), %s624_s13, 3  ;;  %s847_s22 = smov (!%p138_p2), 0  }
   0x6   : > { %141 = sbr.rel (%p138_p2) target bundleno = 413 (0x19d), region = 32 }
   0xd   : > { %s918_s13 = smov (!%p161_p3, %s624_s13), 3 }
   0xe   : > { %s756_s14 = smul.u32 288, %s918_s13  ;;  %s677_s15 = sshll.u32 %s918_s13, 8 }
   0xf   : > { %s840_s18 = scalar_lea.vmem %s916_s3, %s677_s15 }
  0x10   : > { %s845_s21 = scalar_lea.vmem %s913_s0, %s756_s14 }
  0x11 LB: >> { %v784_v0 = vld [vmem:[%s914_s1] sm:$0xff]   ;;  %vm251_vm0 = vcmask 785408   ;;  %v785_v1 = vld [vmem:[%s914_s1 + $0x10] sm:$0xff]   ;;  %s678_s27 = sshll.u32 %s804_s22, 4  ;;  %v806_v2 = vmov 0   ;;  %v492_v9 = vld [vmem:[%s915_s2 + $0x8] sm:$0xff]  ;;  %s804_s22 = sphi %s847_s22, %s177_s22  }
  0x12   : >> { %720 = vmatprep.mubr.msk.bf16.mxu0 %vm251_vm0, %v784_v0  ;;  %776 = vset.pattern.permute.xlu0 %v806_v2  ;;  %s863_s28 = scalar_lea.vmem %s845_s21, %s678_s27  ;;  %v491_v7 = vld [vmem:[%s915_s2] sm:$0xff]  ;;  %v493_v8 = vld [vmem:[%s915_s2 + $0x10] sm:$0xff]  ;;  %v494_v10 = vld [vmem:[%s915_s2 + $0x18] sm:$0xff]  ;;  %s807_s20 = smov 127   ;;  %vm549_vm2 = vcmask 125952  }
  0x13   : >> { %736 = vmatprep.mubr.msk.bf16.mxu1 %vm251_vm0, %v785_v1  ;;  %777 = vset.pattern.permute.xlu1 %v806_v2  ;;  %v778_v3 = vld [vmem:[%s863_s28] sm:$0xff]   ;;  %v779_v4 = vld [vmem:[%s863_s28 + $0x8] sm:$0xff]   ;;  %v780_v5 = vld [vmem:[%s863_s28 + $0x10] sm:$0xff]   ;;  %s808_s23 = smov 126   ;;  %s548_s24 = scalar_lea.vmem %s840_s18, %s678_s27 }
  0x14   : >> { %708 = vmatprep.subr.bf16.mxu0 %v778_v3  ;;  %724 = vmatprep.subr.bf16.mxu1 %v778_v3  ;;  %v781_v6 = vld [vmem:[%s863_s28 + $0x18] sm:$0xff]   ;;  %v782_v11 = vld [vmem:[%s863_s28 + $0x20] sm:$0xff]   ;;  %v783_v12 = vld [vmem:[%s863_s28 + $0x28] sm:$0xff]   ;;  %s177_s22 = sadd.s32 1, %s804_s22  }
  0x15   : >> { %709 = vmatpush3.bf16.msra.mxu0 %v778_v3  ;;  %725 = vmatpush3.bf16.msra.mxu1 %v778_v3  ;;  %v786_v13 = vld [vmem:[%s914_s1 + $0x8] sm:$0xff]   ;;  %v787_v14 = vld [vmem:[%s914_s1 + $0x18] sm:$0xff]   ;;  %v788_v15 = vld [vmem:[%s914_s1 + $0x20] sm:$0xff]   ;;  %p174_p4 = scmp.ge.s32.totalorder %s177_s22, 16  }
  0x16   : >> { %710 = vmatprep.subr.bf16.mxu0 %v779_v4  ;;  %726 = vmatprep.subr.bf16.mxu1 %v779_v4  ;;  %v789_v16 = vld [vmem:[%s914_s1 + $0x28] sm:$0xff]  }
  0x17   : >> { %497 = vperm.xlu0 %776, %v491_v7   ;;  %507 = vperm.xlu1 %777, %v493_v8  }
  0x19   : >> { %711 = vmatpush3.bf16.msra.mxu0 %v779_v4  ;;  %727 = vmatpush3.bf16.msra.mxu1 %v779_v4 }
  0x1a   : >> { %712 = vmatprep.subr.bf16.mxu0 %v780_v5  ;;  %728 = vmatprep.subr.bf16.mxu1 %v780_v5 }
  0x1b   : >> { %502 = vperm.xlu0 %776, %v492_v9   ;;  %512 = vperm.xlu1 %777, %v494_v10  }
  0x1d   : >> { %713 = vmatpush3.bf16.msra.mxu0 %v780_v5  ;;  %729 = vmatpush3.bf16.msra.mxu1 %v780_v5 }
  0x1e   : >> { %714 = vmatprep.subr.bf16.mxu0 %v781_v6  ;;  %730 = vmatprep.subr.bf16.mxu1 %v781_v6 }
  0x21   : >> { %715 = vmatpush3.bf16.msra.mxu0 %v781_v6  ;;  %731 = vmatpush3.bf16.msra.mxu1 %v781_v6 }
  0x22   : >> { %716 = vmatprep.subr.bf16.mxu0 %v782_v11  ;;  %732 = vmatprep.subr.bf16.mxu1 %v782_v11 }
  0x25   : >> { %717 = vmatpush3.bf16.msra.mxu0 %v782_v11  ;;  %733 = vmatpush3.bf16.msra.mxu1 %v782_v11 }
  0x26   : >> { %718 = vmatprep.subr.bf16.mxu0 %v783_v12  ;;  %734 = vmatprep.subr.bf16.mxu1 %v783_v12 }
  0x29   : >> { %719 = vmatpush3.bf16.msra.mxu0 %v783_v12  ;;  %735 = vmatpush3.bf16.msra.mxu1 %v783_v12 }
  0x2a   : >> { %740 = vmatprep.subr.bf16.mxu0 %v778_v3 }
  0x2c   : >> { %721 = vmatmul.mubr.msk.bf16.vlgmr.msra.gmra.mrb[0].mxu0 %vm251_vm0, %v786_v13  ;;  %737 = vmatmul.mubr.msk.bf16.vlgmr.msra.gmra.mrb[0].mxu1 %vm251_vm0, %v787_v14 }
  0x2d   : >> { %741 = vmatpush3.bf16.msra.mxu0 %v778_v3  ;;  %752 = vmatprep.mubr.msk.bf16.mxu0 %vm251_vm0, %v788_v15 }
  0x2e   : >> { %742 = vmatprep.subr.bf16.mxu0 %v779_v4 }
  0x31   : >> { %743 = vmatpush3.bf16.msra.mxu0 %v779_v4 }
  0x32   : >> { %744 = vmatprep.subr.bf16.mxu0 %v780_v5 }
  0x35   : >> { %745 = vmatpush3.bf16.msra.mxu0 %v780_v5 }
  0x36   : >> { %746 = vmatprep.subr.bf16.mxu0 %v781_v6 }
  0x39   : >> { %747 = vmatpush3.bf16.msra.mxu0 %v781_v6 }
  0x3a   : >> { %748 = vmatprep.subr.bf16.mxu0 %v782_v11 }
  0x3d   : >> { %749 = vmatpush3.bf16.msra.mxu0 %v782_v11 }
  0x3e   : >> { %750 = vmatprep.subr.bf16.mxu0 %v783_v12 }
  0x41   : >> { %751 = vmatpush3.bf16.msra.mxu0 %v783_v12 }
  0x44   : >> { %753 = vmatmul.mubr.msk.bf16.vlgmr.msra.gmra.mrb[4].mxu0 %vm251_vm0, %v789_v16 }
  0x96   : >> { %v498_v29 = vpop.permute.xlu0 %497  ;;  %v508_v30 = vpop.permute.xlu1 %507 }
  0x9a   : >> { %v503_v31 = vpop.permute.xlu0 %502  ;;  %v513_v32 = vpop.permute.xlu1 %512 }
  0xff   : >> { %v722_v17 = vpop.f32.mrb[0].mxu0  ;;  %v738_v18 = vpop.f32.mrb[0].mxu1 }
 0x100   : >> { %389 = vrot.lane.b32.xlu0 %v738_v18, %s807_s20  ;;  %v292_v19 = vpop.f32.mrb[1].mxu0  ;;  %v366_v20 = vpop.f32.mrb[1].mxu1 }
 0x101   : >> { %v723_v21 = vpop.f32.mrb[2].mxu0  ;;  %v739_v22 = vpop.f32.mrb[2].mxu1 }
 0x102   : >> { %391 = vrot.lane.b32.xlu1 %v739_v22, %s807_s20  ;;  %v295_v23 = vpop.f32.mrb[3].mxu0  ;;  %v369_v24 = vpop.f32.mrb[3].mxu1 }
 0x104   : >> { %385 = vrot.lane.b32.xlu0 %v366_v20, %s807_s20 }
 0x106   : >> { %387 = vrot.lane.b32.xlu1 %v369_v24, %s807_s20 }
 0x117   : >> { %v754_v25 = vpop.f32.mrb[4].mxu0 }
 0x118   : >> { %v456_v26 = vpop.f32.mrb[5].mxu0 }
 0x119   : >> { %475 = vrot.lane.b32.xlu0 %v456_v26, %s808_s23  ;;  %v755_v27 = vpop.f32.mrb[6].mxu0 }
 0x11a   : >> { %v459_v28 = vpop.f32.mrb[7].mxu0 }
 0x11b   : >> { %477 = vrot.lane.b32.xlu1 %v459_v28, %s808_s23 }
 0x11d   : >> { %479 = vrot.lane.b32.xlu0 %v754_v25, %s808_s23 }
 0x11f   : >> { %481 = vrot.lane.b32.xlu1 %v755_v27, %s808_s23 }
 0x172   : >> { %v390_v33 = vpop.permute.xlu0 %389 }
 0x173   : >> { %v399_v42 = vadd.f32 %v722_v17, %v390_v33 }
 0x174   : >> { %v392_v34 = vpop.permute.xlu1 %391 }
 0x175   : >> { %v400_v49 = vadd.f32 %v723_v21, %v392_v34 }
 0x176   : >> { %v386_v35 = vpop.permute.xlu0 %385 }
 0x177   : >> { %v397_v37 = vadd.f32 %v386_v35, %v292_v19 }
 0x178   : >> { %v388_v36 = vpop.permute.xlu1 %387 }
 0x179   : >> { %v398_v39 = vadd.f32 %v388_v36, %v295_v23 }
 0x18b   : >> { %v476_v38 = vpop.permute.xlu0 %475 }
 0x18c   : >> { %v487_v40 = vadd.f32 %v476_v38, %v397_v37 }
 0x18d   : >> { %v478_v41 = vpop.permute.xlu1 %477 }
 0x18e   : >> { %v515_v43 = vadd.f32 %v498_v29, %v487_v40  ;;  %v488_v44 = vadd.f32 %v478_v41, %v398_v39 }
 0x18f   : >> { %v480_v45 = vpop.permute.xlu0 %479 }
 0x190   : >> { %vm519_vm1 = vcmp.ge.f32.partialorder %v515_v43, 0.0  ;;  %v523_v46 = vmul.f32 0.25, %v515_v43  ;;  %v516_v47 = vadd.f32 %v503_v31, %v488_v44  ;;  %v489_v48 = vadd.f32 %v480_v45, %v399_v42 }
 0x191   : >> { %v482_v50 = vpop.permute.xlu1 %481 }
 0x192   : >> { %v527_v51 = vsel %vm519_vm1, %v515_v43, %v523_v46  ;;  %vm520_vm3 = vcmp.ge.f32.partialorder %v516_v47, 0.0  ;;  %v524_v52 = vmul.f32 0.25, %v516_v47  ;;  %v517_v53 = vadd.f32 %v508_v30, %v489_v48 }
 0x193   : >> { %v679_v54 = vpack.c.bf16 %v527_v51, %v527_v51  ;;  %v490_v55 = vadd.f32 %v482_v50, %v400_v49 }
 0x194   : >> { %v528_v56 = vsel %vm520_vm3, %v516_v47, %v524_v52  ;;  %vm521_vm4 = vcmp.ge.f32.partialorder %v517_v53, 0.0  ;;  %v525_v57 = vmul.f32 0.25, %v517_v53 }
 0x195   : >> { %550 = vst.msk [vmem:[%s548_s24] sm:$0xf] %vm549_vm2, %v679_v54  ;;  %v680_v58 = vpack.c.bf16 %v528_v56, %v528_v56  ;;  %v518_v59 = vadd.f32 %v513_v32, %v490_v55 }
 0x196   : >> { %v529_v60 = vsel %vm521_vm4, %v517_v53, %v525_v57  ;;  %176 = sbr.rel (!%p174_p4) target bundleno = 17 (0x11), region = 75 }
 0x197   : >> { %551 = vst.msk [vmem:[%s548_s24 + $0x4] sm:$0xf] %vm549_vm2, %v680_v58  ;;  %v681_v61 = vpack.c.bf16 %v529_v60, %v529_v60  ;;  %vm522_vm5 = vcmp.ge.f32.partialorder %v518_v59, 0.0  ;;  %v526_v62 = vmul.f32 0.25, %v518_v59 }
 0x199   : >> { %552 = vst.msk [vmem:[%s548_s24 + $0x8] sm:$0xf] %vm549_vm2, %v681_v61  ;;  %v530_v63 = vsel %vm522_vm5, %v518_v59, %v526_v62 }
 0x19a   : >> { %v682_v0 = vpack.c.bf16 %v530_v63, %v530_v63 }
 0x19c   : >> { %553 = vst.msk [vmem:[%s548_s24 + $0xc] sm:$0xf] %vm549_vm2, %v682_v0 }
 0x19d PF: > { %s13_s12 = sadd.s32 1, %s800_s12  }
 0x19e   : > { %p10_p5 = scmp.ge.s32.totalorder %s13_s12, 6  }
 0x1a0   :  { %12 = sbr.rel (!%p10_p5) target bundleno = 1 (0x1), region = 86 }

// kernel: softsplat_baseline_forward.26
= control target key start
LH: loop header
LB: loop body
LE: loop exit
PB: predicated region body
PF: predicated region fallthrough
CT: control target
= control target key end

     0   :  { %s414_s9 = smov 0   ;;  %s416_s10 = smov 0   ;;  %s457_s0 = inlined_call_operand.vmem [shape: f32[2,4,128], index: 0, kind: input, shape index: {}]   ;;  %s458_s1 = inlined_call_operand.vmem [shape: f32[1,128], index: 1, kind: input, shape index: {}]   ;;  %s459_s2 = inlined_call_operand.vmem [shape: f32[2,4,128], index: 2, kind: output, shape index: {}]  }
   0x1   :  { %s418_s11 = smov 0  }
   0x2 LB: > { %s24_s12 = sadd.s32 1, %s392_s10  ;;  %p340_p0 = scmp.ge.s32.totalorder %s396_s11, 1  ;;  %s396_s11 = sphi %s418_s11, %s12_s11   ;;  %s392_s10 = sphi %s416_s10, %s461_s10   ;;  %s388_s9 = sphi %s414_s9, %s460_s9  }
   0x3   : > { %p26_p1 = scmp.ge.s32.totalorder %s24_s12, 2  ;;  %p138_p2 = scmp.lt.s32.totalorder %s396_s11, 3 }
   0x5   : > { %s463_s12 = smov (%p26_p1, %s24_s12), 0  ;;  %p139_p3 = pnand %p340_p0, %p138_p2 }
   0x6   : > { %p167_p4 = scmp.lt.s32.totalorder (!%p139_p3), %s388_s9, 1  ;;  %v398_v4 = vmov (!%p139_p3), 1966171168   ;;  %v198_v6 = vlaneseq (!%p139_p3)  ;;  %v184_v7 = vld [vmem:[%s458_s1] sm:$0x1] (!%p139_p3) }
   0x7   : > { %142 = sbr.rel (%p139_p3) target bundleno = 49 (0x31), region = 28  ;;  %v196_v5 = vunpack.c.l.s4 (!%p139_p3), %v398_v4  ;;  %v186_v8 = vmul.f32 (!%p139_p3), 0.125, %v184_v7 }
   0x8   : > { %v199_v10 = vshrl.u32 (!%p139_p3), %v198_v6, 7 }
   0x9   : > { %v197_v9 = vunpack.c.0.s8 (!%p139_p3), %v196_v5  ;;  %v187_v11 = vsub.f32 (!%p139_p3), 1.5, %v186_v8 }
   0xa   : > { %v235_v21 = vsub.s32 (!%p139_p3), 0, %v199_v10 }
   0xb   : > { %v200_v12 = vsub.s32 (!%p139_p3), %v197_v9, %v199_v10  ;;  %v188_v16 = vadd.f32 (!%p139_p3), 0.0001, %v187_v11 }
   0xd   : > { %v212_v22 = vsub.f32 (!%p139_p3), 1.0, %v188_v16 }
   0xe   : > { %s465_s9 = smov (!%p167_p4, %s388_s9), 1 }
   0xf   : > { %s341_s13 = sshll.u32 %s465_s9, 2 }
  0x10   : > { %s173_s16 = scalar_lea.vmem %s457_s0, %s341_s13  ;;  %s183_s21 = scalar_lea.vmem %s459_s2, %s341_s13 }
  0x11   : > { %v185_v0 = vld [vmem:[%s173_s16] sm:$0xf] }
  0x12   : > { %v189_v1 = vmul.f32 0.125, %v185_v0 }
  0x14   : > { %v190_v2 = vadd.f32 1.0, %v189_v1  ;;  %v192_v3 = vsub.f32 1.0, %v189_v1 }
  0x16   : > { %370 = vrcp.f32 %v190_v2 }
  0x17   : > { %372 = vrcp.f32 %v192_v3 }
  0x20   : > { %v371_v13 = vpop.eup %370 }
  0x21   : > { %v373_v14 = vpop.eup %372  ;;  %v201_v15 = vrot.slane %v371_v13, %v200_v12 }
  0x22   : > { %v220_v17 = vrot.slane %v373_v14, %v200_v12 }
  0x23   : > { %v202_v18 = vcombine.high %v201_v15, %v201_v15 }
  0x24   : > { %v221_v19 = vcombine.high %v220_v17, %v220_v17 }
  0x25   : > { %v209_v20 = vrot.slane %v202_v18, %v200_v12 }
  0x26   : > { %v228_v23 = vrot.slane %v221_v19, %v200_v12 }
  0x27   : > { %v211_v24 = vmul.f32 %v209_v20, %v188_v16 }
  0x28   : > { %v229_v25 = vcombine.high %v228_v23, %v228_v23 }
  0x29   : > { %v236_v26 = vrot.slane %v211_v24, %v235_v21 }
  0x2a   : > { %v231_v27 = vmul.f32 %v229_v25, %v212_v22 }
  0x2b   : > { %v238_v28 = vmul.f32 %v236_v26, %v185_v0 }
  0x2c   : > { %v244_v29 = vrot.slane %v231_v27, %v235_v21 }
  0x2d   : > { %239 = vst [vmem:[%s183_s21] sm:$0x3] %v238_v28 }
  0x2e   : > { %v246_v30 = vmul.f32 %v244_v29, %v185_v0 }
  0x30   : > { %247 = vst [vmem:[%s183_s21] sm:$0xc] %v246_v30 }
  0x31 PF: > { %s12_s11 = sadd.s32 1, %s396_s11   ;;  %s460_s9 = smov %s392_s10 }
  0x32   : > { %p9_p5 = scmp.ge.s32.totalorder %s12_s11, 4   ;;  %s461_s10 = smov %s463_s12 }
  0x34   :  { %11 = sbr.rel (!%p9_p5) target bundleno = 2 (0x2), region = 61 }

// kernel: softsplat_baseline_forward.18
= control target key start
LH: loop header
LB: loop body
LE: loop exit
PB: predicated region body
PF: predicated region fallthrough
CT: control target
= control target key end

     0   :  { %s970_s12 = smov 0   ;;  %s1155_s0 = inlined_call_operand.vmem [shape: bf16[4,17,64,9], index: 0, kind: input, shape index: {}]   ;;  %s1156_s1 = inlined_call_operand.vmem [shape: bf16[2,64,192], index: 1, kind: input, shape index: {}]   ;;  %s1157_s2 = inlined_call_operand.vmem [shape: f32[64,1], index: 2, kind: input, shape index: {}]   ;;  %s1158_s3 = inlined_call_operand.vmem [shape: bf16[4,8,64,8], index: 3, kind: output, shape index: {}]  }
   0x1 LB: > { %s774_s13 = sadd.s32 4294967295, %s942_s12   ;;  %p778_p0 = scmp.ge.s32.totalorder %s942_s12, 1  ;;  %s942_s12 = sphi %s970_s12, %s13_s12  }
   0x2   : > { %p137_p1 = scmp.lt.s32.totalorder %s942_s12, 5 }
   0x4   : > { %p138_p2 = pnand %p778_p0, %p137_p1 }
   0x5   : > { %p161_p3 = scmp.lt.s32.totalorder (!%p138_p2), %s774_s13, 3  ;;  %s988_s22 = smov (!%p138_p2), 0  }
   0x6   : > { %141 = sbr.rel (%p138_p2) target bundleno = 430 (0x1ae), region = 32 }
   0xd   : > { %s1160_s13 = smov (!%p161_p3, %s774_s13), 3 }
   0xe   : > { %s875_s14 = smul.u32 544, %s1160_s13  ;;  %s861_s15 = sshll.u32 %s1160_s13, 8 }
   0xf   : > { %s981_s18 = scalar_lea.vmem %s1158_s3, %s861_s15 }
  0x10   : > { %s986_s21 = scalar_lea.vmem %s1155_s0, %s875_s14 }
  0x11 LB: >> { %vm330_vm0 = vcmask 523264   ;;  %v948_v0 = vmov 0   ;;  %v910_v1 = vld [vmem:[%s1156_s1 + $0x44] ss:$8 sps:$4 sm:$0xff]   ;;  %s863_s25 = sshll.u32 %s946_s22, 6  ;;  %v580_v10 = vld [vmem:[%s1157_s2 + $0x10] sm:$0xff]  ;;  %s946_s22 = sphi %s988_s22, %s177_s22  }
  0x12   : >> { %473 = vmatprep.subr.bf16.mxu1 %v948_v0  ;;  %343 = vmatprep.subr.bf16.mxu0 %v948_v0  ;;  %s1002_s26 = scalar_lea.vmem %s986_s21, %s863_s25  ;;  %v922_v7 = vld [vmem:[%s1156_s1 + $0x4] ss:$8 sps:$4 sm:$0xff]   ;;  %v581_v12 = vld [vmem:[%s1157_s2 + $0x18] sm:$0xff]  ;;  %v584_v17 = vld [vmem:[%s1157_s2 + $0x30] sm:$0xff]  ;;  %s949_s28 = smov 127   ;;  %vm693_vm2 = vcmask 60416  }
  0x13   : >> { %894 = vset.pattern.permute.xlu0 %v948_v0  ;;  %895 = vset.pattern.permute.xlu1 %v948_v0  ;;  %v896_v2 = vld [vmem:[%s1002_s26] sm:$0xff]   ;;  %v897_v3 = vld [vmem:[%s1002_s26 + $0x8] sm:$0xff]   ;;  %v898_v4 = vld [vmem:[%s1002_s26 + $0x10] sm:$0xff]  }
  0x14   : >> { %845 = vmatprep.mubr.msk.bf16.mxu1 %vm330_vm0, %v910_v1  ;;  %474 = vmatpush1.bf16.msra.mxu1 %v896_v2  ;;  %v899_v5 = vld [vmem:[%s1002_s26 + $0x18] sm:$0xff]   ;;  %v900_v6 = vld [vmem:[%s1002_s26 + $0x20] sm:$0xff]   ;;  %v901_v8 = vld [vmem:[%s1002_s26 + $0x28] sm:$0xff]  }
  0x15   : >> { %344 = vmatpush1.bf16.msra.mxu0 %v896_v2  ;;  %475 = vmatprep.subr.bf16.mxu1 %v948_v0  ;;  %v578_v9 = vld [vmem:[%s1157_s2] sm:$0xff]  ;;  %v579_v11 = vld [vmem:[%s1157_s2 + $0x8] sm:$0xff]  ;;  %v902_v13 = vld [vmem:[%s1002_s26 + $0x30] sm:$0xff]  }
  0x16   : >> { %345 = vmatprep.subr.bf16.mxu0 %v948_v0  ;;  %825 = vmatprep.mubr.msk.bf16.mxu0 %vm330_vm0, %v922_v7  ;;  %v582_v14 = vld [vmem:[%s1157_s2 + $0x20] sm:$0xff]  ;;  %v583_v15 = vld [vmem:[%s1157_s2 + $0x28] sm:$0xff]  ;;  %v903_v16 = vld [vmem:[%s1002_s26 + $0x38] sm:$0xff]  }
  0x17   : >> { %588 = vperm.xlu0 %894, %v578_v9   ;;  %598 = vperm.xlu1 %895, %v580_v10   ;;  %v585_v18 = vld [vmem:[%s1157_s2 + $0x38] sm:$0xff]  ;;  %v904_v19 = vld [vmem:[%s1002_s26 + $0x40] sm:$0xff]   ;;  %v905_v20 = vld [vmem:[%s1002_s26 + $0x48] sm:$0xff]  }
  0x18   : >> { %476 = vmatpush1.bf16.msra.mxu1 %v897_v3  ;;  %v906_v21 = vld [vmem:[%s1002_s26 + $0x50] sm:$0xff]   ;;  %v907_v22 = vld [vmem:[%s1002_s26 + $0x58] sm:$0xff]   ;;  %v908_v23 = vld [vmem:[%s1156_s1 + $0x40] ss:$8 sps:$4 sm:$0xff]   ;;  %s874_s26 = sshll.u32 %s946_s22, 5  ;;  %s177_s22 = sadd.s32 1, %s946_s22  }
  0x19   : >> { %346 = vmatpush1.bf16.msra.mxu0 %v897_v3  ;;  %477 = vmatprep.subr.bf16.mxu1 %v948_v0  ;;  %v920_v24 = vld [vmem:[%s1156_s1] ss:$8 sps:$4 sm:$0xff]   ;;  %v911_v25 = vld [vmem:[%s1156_s1 + $0x54] ss:$8 sps:$4 sm:$0xff]   ;;  %v913_v27 = vld [vmem:[%s1156_s1 + $0x50] ss:$8 sps:$4 sm:$0xff]   ;;  %s1129_s29 = scalar_lea.vmem %s981_s18, %s874_s26 }
  0x1a   : >> { %347 = vmatprep.subr.bf16.mxu0 %v948_v0  ;;  %v923_v26 = vld [vmem:[%s1156_s1 + $0x14] ss:$8 sps:$4 sm:$0xff]   ;;  %v925_v28 = vld [vmem:[%s1156_s1 + $0x10] ss:$8 sps:$4 sm:$0xff]   ;;  %v914_v29 = vld [vmem:[%s1156_s1 + $0x64] ss:$8 sps:$4 sm:$0xff]  }
  0x1b   : >> { %593 = vperm.xlu0 %894, %v579_v11   ;;  %603 = vperm.xlu1 %895, %v581_v12   ;;  %v926_v30 = vld [vmem:[%s1156_s1 + $0x24] ss:$8 sps:$4 sm:$0xff]   ;;  %v916_v31 = vld [vmem:[%s1156_s1 + $0x60] ss:$8 sps:$4 sm:$0xff]   ;;  %v917_v33 = vld [vmem:[%s1156_s1 + $0x74] ss:$8 sps:$4 sm:$0xff]  }
  0x1c   : >> { %478 = vmatpush1.bf16.msra.mxu1 %v898_v4  ;;  %v928_v32 = vld [vmem:[%s1156_s1 + $0x20] ss:$8 sps:$4 sm:$0xff]   ;;  %v929_v34 = vld [vmem:[%s1156_s1 + $0x34] ss:$8 sps:$4 sm:$0xff]   ;;  %v919_v35 = vld [vmem:[%s1156_s1 + $0x70] ss:$8 sps:$4 sm:$0xff]  }
  0x1d   : >> { %348 = vmatpush1.bf16.msra.mxu0 %v898_v4  ;;  %479 = vmatprep.subr.bf16.mxu1 %v948_v0  ;;  %v931_v36 = vld [vmem:[%s1156_s1 + $0x30] ss:$8 sps:$4 sm:$0xff]   ;;  %p174_p4 = scmp.ge.s32.totalorder %s177_s22, 8  }
  0x1e   : >> { %349 = vmatprep.subr.bf16.mxu0 %v948_v0 }
  0x1f   : >> { %608 = vperm.xlu0 %894, %v582_v14   ;;  %613 = vperm.xlu1 %895, %v583_v15  }
  0x20   : >> { %480 = vmatpush1.bf16.msra.mxu1 %v899_v5 }
  0x21   : >> { %350 = vmatpush1.bf16.msra.mxu0 %v899_v5  ;;  %481 = vmatprep.subr.bf16.mxu1 %v948_v0 }
  0x22   : >> { %351 = vmatprep.subr.bf16.mxu0 %v948_v0 }
  0x23   : >> { %618 = vperm.xlu0 %894, %v584_v17   ;;  %623 = vperm.xlu1 %895, %v585_v18  }
  0x24   : >> { %482 = vmatpush1.bf16.msra.mxu1 %v900_v6 }
  0x25   : >> { %352 = vmatpush1.bf16.msra.mxu0 %v900_v6  ;;  %483 = vmatprep.subr.bf16.mxu1 %v948_v0 }
  0x26   : >> { %353 = vmatprep.subr.bf16.mxu0 %v948_v0 }
  0x28   : >> { %484 = vmatpush1.bf16.msra.mxu1 %v901_v8 }
  0x29   : >> { %354 = vmatpush1.bf16.msra.mxu0 %v901_v8  ;;  %485 = vmatprep.subr.bf16.mxu1 %v948_v0 }
  0x2a   : >> { %355 = vmatprep.subr.bf16.mxu0 %v948_v0 }
  0x2c   : >> { %486 = vmatpush1.bf16.msra.mxu1 %v902_v13 }
  0x2d   : >> { %356 = vmatpush1.bf16.msra.mxu0 %v902_v13  ;;  %487 = vmatprep.subr.bf16.mxu1 %v948_v0 }
  0x2e   : >> { %357 = vmatprep.subr.bf16.mxu0 %v948_v0 }
  0x30   : >> { %488 = vmatpush1.bf16.msra.mxu1 %v903_v16 }
  0x31   : >> { %358 = vmatpush1.bf16.msra.mxu0 %v903_v16  ;;  %489 = vmatprep.subr.bf16.mxu1 %v948_v0 }
  0x32   : >> { %359 = vmatprep.subr.bf16.mxu0 %v948_v0 }
  0x34   : >> { %490 = vmatpush1.bf16.msra.mxu1 %v904_v19 }
  0x35   : >> { %360 = vmatpush1.bf16.msra.mxu0 %v904_v19  ;;  %491 = vmatprep.subr.bf16.mxu1 %v948_v0 }
  0x36   : >> { %361 = vmatprep.subr.bf16.mxu0 %v948_v0 }
  0x38   : >> { %492 = vmatpush1.bf16.msra.mxu1 %v905_v20 }
  0x39   : >> { %362 = vmatpush1.bf16.msra.mxu0 %v905_v20  ;;  %493 = vmatprep.subr.bf16.mxu1 %v948_v0 }
  0x3a   : >> { %363 = vmatprep.subr.bf16.mxu0 %v948_v0 }
  0x3c   : >> { %494 = vmatpush1.bf16.msra.mxu1 %v906_v21 }
  0x3d   : >> { %364 = vmatpush1.bf16.msra.mxu0 %v906_v21  ;;  %495 = vmatprep.subr.bf16.mxu1 %v948_v0 }
  0x3e   : >> { %365 = vmatprep.subr.bf16.mxu0 %v948_v0 }
  0x40   : >> { %496 = vmatpush1.bf16.msra.mxu1 %v907_v22 }
  0x41   : >> { %366 = vmatpush1.bf16.msra.mxu0 %v907_v22 }
  0x43   : >> { %506 = vmatmul.mubr.bf16.vlgmr.msra.gmra.mrb[0].mxu1 %v908_v23 }
  0x44   : >> { %376 = vmatmul.mubr.bf16.vlgmr.msra.gmra.mrb[0].mxu0 %v920_v24  ;;  %846 = vmatprep.mubr.msk.bf16.mxu1 %vm330_vm0, %v911_v25 }
  0x45   : >> { %826 = vmatprep.mubr.msk.bf16.mxu0 %vm330_vm0, %v923_v26 }
  0x4b   : >> { %514 = vmatmul.mubr.bf16.gmra.mrb[4].mxu1 %v913_v27 }
  0x4c   : >> { %384 = vmatmul.mubr.bf16.gmra.mrb[4].mxu0 %v925_v28  ;;  %847 = vmatprep.mubr.msk.bf16.mxu1 %vm330_vm0, %v914_v29 }
  0x4d   : >> { %827 = vmatprep.mubr.msk.bf16.mxu0 %vm330_vm0, %v926_v30 }
  0x53   : >> { %522 = vmatmul.mubr.bf16.gmra.mrb[8].mxu1 %v916_v31 }
  0x54   : >> { %392 = vmatmul.mubr.bf16.gmra.mrb[8].mxu0 %v928_v32  ;;  %848 = vmatprep.mubr.msk.bf16.mxu1 %vm330_vm0, %v917_v33 }
  0x55   : >> { %828 = vmatprep.mubr.msk.bf16.mxu0 %vm330_vm0, %v929_v34 }
  0x5b   : >> { %530 = vmatmul.mubr.bf16.gmra.mrb[12].mxu1 %v919_v35 }
  0x5c   : >> { %400 = vmatmul.mubr.bf16.gmra.mrb[12].mxu0 %v931_v36 }
  0x96   : >> { %v589_v5 = vpop.permute.xlu0 %588  ;;  %v599_v6 = vpop.permute.xlu1 %598 }
  0x9a   : >> { %v594_v7 = vpop.permute.xlu0 %593  ;;  %v604_v8 = vpop.permute.xlu1 %603 }
  0x9e   : >> { %v609_v9 = vpop.permute.xlu0 %608  ;;  %v614_v10 = vpop.permute.xlu1 %613 }
  0xa2   : >> { %v619_v11 = vpop.permute.xlu0 %618  ;;  %v624_v12 = vpop.permute.xlu1 %623 }
 0x116   : >> { %v507_v37 = vpop.f32.mrb[0].mxu1 }
 0x117   : >> { %v377_v38 = vpop.f32.mrb[0].mxu0  ;;  %546 = vrot.lane.b32.xlu0 %v507_v37, %s949_s28  ;;  %v509_v39 = vpop.f32.mrb[1].mxu1 }
 0x118   : >> { %v379_v40 = vpop.f32.mrb[1].mxu0  ;;  %v510_v41 = vpop.f32.mrb[2].mxu1 }
 0x119   : >> { %v380_v42 = vpop.f32.mrb[2].mxu0  ;;  %548 = vrot.lane.b32.xlu1 %v510_v41, %s949_s28  ;;  %v512_v43 = vpop.f32.mrb[3].mxu1 }
 0x11a   : >> { %v382_v44 = vpop.f32.mrb[3].mxu0 }
 0x11e   : >> { %v515_v45 = vpop.f32.mrb[4].mxu1 }
 0x11f   : >> { %v385_v46 = vpop.f32.mrb[4].mxu0  ;;  %550 = vrot.lane.b32.xlu0 %v515_v45, %s949_s28  ;;  %v517_v47 = vpop.f32.mrb[5].mxu1 }
 0x120   : >> { %v387_v48 = vpop.f32.mrb[5].mxu0  ;;  %v518_v49 = vpop.f32.mrb[6].mxu1 }
 0x121   : >> { %v388_v50 = vpop.f32.mrb[6].mxu0  ;;  %552 = vrot.lane.b32.xlu1 %v518_v49, %s949_s28  ;;  %v520_v51 = vpop.f32.mrb[7].mxu1 }
 0x122   : >> { %v390_v52 = vpop.f32.mrb[7].mxu0 }
 0x126   : >> { %v523_v53 = vpop.f32.mrb[8].mxu1 }
 0x127   : >> { %v393_v54 = vpop.f32.mrb[8].mxu0  ;;  %554 = vrot.lane.b32.xlu0 %v523_v53, %s949_s28  ;;  %v525_v55 = vpop.f32.mrb[9].mxu1 }
 0x128   : >> { %v395_v56 = vpop.f32.mrb[9].mxu0  ;;  %v526_v57 = vpop.f32.mrb[10].mxu1 }
 0x129   : >> { %v396_v58 = vpop.f32.mrb[10].mxu0  ;;  %556 = vrot.lane.b32.xlu1 %v526_v57, %s949_s28  ;;  %v528_v59 = vpop.f32.mrb[11].mxu1 }
 0x12a   : >> { %v398_v60 = vpop.f32.mrb[11].mxu0 }
 0x12e   : >> { %v531_v61 = vpop.f32.mrb[12].mxu1 }
 0x12f   : >> { %v1121_v62 = vpop.f32.mrb[12].mxu0  ;;  %558 = vrot.lane.b32.xlu0 %v531_v61, %s949_s28  ;;  %v533_v63 = vpop.f32.mrb[13].mxu1 }
 0x130   : >> { %v403_v0 = vpop.f32.mrb[13].mxu0  ;;  %v534_v1 = vpop.f32.mrb[14].mxu1 }
 0x131   : >> { %v1124_v2 = vpop.f32.mrb[14].mxu0  ;;  %560 = vrot.lane.b32.xlu1 %v534_v1, %s949_s28  ;;  %v536_v3 = vpop.f32.mrb[15].mxu1 }
 0x132   : >> { %v406_v4 = vpop.f32.mrb[15].mxu0 }
 0x189   : >> { %v547_v13 = vpop.permute.xlu0 %546 }
 0x18a   : >> { %v570_v14 = vadd.f32 %v547_v13, %v377_v38 }
 0x18b   : >> { %v549_v15 = vpop.permute.xlu1 %548 }
 0x18c   : >> { %v626_v16 = vadd.f32 %v589_v5, %v570_v14  ;;  %v571_v17 = vadd.f32 %v549_v15, %v380_v42 }
 0x18e   : >> { %vm634_vm1 = vcmp.ge.f32.partialorder %v626_v16, 0.0  ;;  %v642_v18 = vmul.f32 0.25, %v626_v16  ;;  %v627_v19 = vadd.f32 %v594_v7, %v571_v17 }
 0x190   : >> { %v650_v20 = vsel %vm634_vm1, %v626_v16, %v642_v18  ;;  %vm635_vm3 = vcmp.ge.f32.partialorder %v627_v19, 0.0  ;;  %v643_v21 = vmul.f32 0.25, %v627_v19 }
 0x191   : >> { %v866_v22 = vpack.c.bf16 %v650_v20, %v650_v20  ;;  %v551_v23 = vpop.permute.xlu0 %550 }
 0x192   : >> { %v651_v24 = vsel %vm635_vm3, %v627_v19, %v643_v21  ;;  %v572_v25 = vadd.f32 %v551_v23, %v385_v46 }
 0x193   : >> { %694 = vst.msk [vmem:[%s1129_s29] sm:$0xf] %vm693_vm2, %v866_v22  ;;  %v867_v26 = vpack.c.bf16 %v651_v24, %v651_v24  ;;  %v553_v27 = vpop.permute.xlu1 %552 }
 0x194   : >> { %v628_v28 = vadd.f32 %v599_v6, %v572_v25  ;;  %v573_v29 = vadd.f32 %v553_v27, %v388_v50 }
 0x195   : >> { %695 = vst.msk [vmem:[%s1129_s29 + $0x4] sm:$0xf] %vm693_vm2, %v867_v26 }
 0x196   : >> { %vm636_vm4 = vcmp.ge.f32.partialorder %v628_v28, 0.0  ;;  %v644_v30 = vmul.f32 0.25, %v628_v28  ;;  %v629_v31 = vadd.f32 %v604_v8, %v573_v29 }
 0x198   : >> { %v652_v32 = vsel %vm636_vm4, %v628_v28, %v644_v30  ;;  %vm637_vm5 = vcmp.ge.f32.partialorder %v629_v31, 0.0  ;;  %v645_v33 = vmul.f32 0.25, %v629_v31 }
 0x199   : >> { %v868_v34 = vpack.c.bf16 %v652_v32, %v652_v32  ;;  %v555_v35 = vpop.permute.xlu0 %554 }
 0x19a   : >> { %v653_v36 = vsel %vm637_vm5, %v629_v31, %v645_v33  ;;  %v574_v37 = vadd.f32 %v555_v35, %v393_v54 }
 0x19b   : >> { %696 = vst.msk [vmem:[%s1129_s29 + $0x8] sm:$0xf] %vm693_vm2, %v868_v34  ;;  %v869_v38 = vpack.c.bf16 %v653_v36, %v653_v36  ;;  %v557_v39 = vpop.permute.xlu1 %556 }
 0x19c   : >> { %v630_v40 = vadd.f32 %v609_v9, %v574_v37  ;;  %v575_v41 = vadd.f32 %v557_v39, %v396_v58 }
 0x19d   : >> { %697 = vst.msk [vmem:[%s1129_s29 + $0xc] sm:$0xf] %vm693_vm2, %v869_v38 }
 0x19e   : >> { %vm638_vm6 = vcmp.ge.f32.partialorder %v630_v40, 0.0  ;;  %v646_v42 = vmul.f32 0.25, %v630_v40  ;;  %v631_v43 = vadd.f32 %v614_v10, %v575_v41 }
 0x1a0   : >> { %v654_v44 = vsel %vm638_vm6, %v630_v40, %v646_v42  ;;  %vm639_vm7 = vcmp.ge.f32.partialorder %v631_v43, 0.0  ;;  %v647_v45 = vmul.f32 0.25, %v631_v43 }
 0x1a1   : >> { %v870_v46 = vpack.c.bf16 %v654_v44, %v654_v44  ;;  %v559_v47 = vpop.permute.xlu0 %558 }
 0x1a2   : >> { %v655_v48 = vsel %vm639_vm7, %v631_v43, %v647_v45  ;;  %v576_v49 = vadd.f32 %v559_v47, %v1121_v62 }
 0x1a3   : >> { %698 = vst.msk [vmem:[%s1129_s29 + $0x10] sm:$0xf] %vm693_vm2, %v870_v46  ;;  %v871_v50 = vpack.c.bf16 %v655_v48, %v655_v48  ;;  %v561_v51 = vpop.permute.xlu1 %560 }
 0x1a4   : >> { %v632_v52 = vadd.f32 %v619_v11, %v576_v49  ;;  %v577_v53 = vadd.f32 %v561_v51, %v1124_v2 }
 0x1a5   : >> { %699 = vst.msk [vmem:[%s1129_s29 + $0x14] sm:$0xf] %vm693_vm2, %v871_v50 }
 0x1a6   : >> { %vm640_vm8 = vcmp.ge.f32.partialorder %v632_v52, 0.0  ;;  %v648_v54 = vmul.f32 0.25, %v632_v52  ;;  %v633_v55 = vadd.f32 %v624_v12, %v577_v53 }
 0x1a7   : > { %176 = sbr.rel (!%p174_p4) target bundleno = 17 (0x11), region = 74 }
 0x1a8   : >> { %v656_v56 = vsel %vm640_vm8, %v632_v52, %v648_v54  ;;  %vm641_vm9 = vcmp.ge.f32.partialorder %v633_v55, 0.0  ;;  %v649_v57 = vmul.f32 0.25, %v633_v55 }
 0x1a9   : >> { %v872_v58 = vpack.c.bf16 %v656_v56, %v656_v56 }
 0x1aa   : >> { %v657_v59 = vsel %vm641_vm9, %v633_v55, %v649_v57 }
 0x1ab   : >> { %700 = vst.msk [vmem:[%s1129_s29 + $0x18] sm:$0xf] %vm693_vm2, %v872_v58  ;;  %v873_v60 = vpack.c.bf16 %v657_v59, %v657_v59 }
 0x1ad   : >> { %701 = vst.msk [vmem:[%s1129_s29 + $0x1c] sm:$0xf] %vm693_vm2, %v873_v60 }
 0x1ae PF: > { %s13_s12 = sadd.s32 1, %s942_s12  }
 0x1af   : > { %p10_p5 = scmp.ge.s32.totalorder %s13_s12, 6  }
 0x1b1   :  { %12 = sbr.rel (!%p10_p5) target bundleno = 1 (0x1), region = 85 }

// kernel: softsplat_baseline_forward.19
= control target key start
LH: loop header
LB: loop body
LE: loop exit
PB: predicated region body
PF: predicated region fallthrough
CT: control target
= control target key end

     0   :  { %s1179_s12 = smov 0   ;;  %s1515_s0 = inlined_call_operand.vmem [shape: bf16[4,10,64,10], index: 0, kind: input, shape index: {}]   ;;  %s1516_s1 = inlined_call_operand.vmem [shape: bf16[3,64,192], index: 1, kind: input, shape index: {}]   ;;  %s1517_s2 = inlined_call_operand.vmem [shape: f32[64,1], index: 2, kind: input, shape index: {}]   ;;  %s1518_s3 = inlined_call_operand.vmem [shape: bf16[4,8,64,8], index: 3, kind: output, shape index: {}]  }
   0x1 LB: > { %s932_s13 = sadd.s32 4294967295, %s1150_s12   ;;  %p936_p0 = scmp.ge.s32.totalorder %s1150_s12, 1  ;;  %s1150_s12 = sphi %s1179_s12, %s13_s12  }
   0x2   : > { %p137_p1 = scmp.lt.s32.totalorder %s1150_s12, 5 }
   0x4   : > { %p138_p2 = pnand %p936_p0, %p137_p1 }
   0x5   : > { %p161_p3 = scmp.lt.s32.totalorder (!%p138_p2), %s932_s13, 3  ;;  %s1197_s22 = smov (!%p138_p2), 0  }
   0x6   : > { %141 = sbr.rel (%p138_p2) target bundleno = 468 (0x1d4), region = 32 }
   0xd   : > { %s1520_s13 = smov (!%p161_p3, %s932_s13), 3 }
   0xe   : > { %s1070_s14 = smul.u32 320, %s1520_s13  ;;  %s1035_s15 = sshll.u32 %s1520_s13, 8 }
   0xf   : > { %s1190_s18 = scalar_lea.vmem %s1518_s3, %s1035_s15 }
  0x10   : > { %s1195_s21 = scalar_lea.vmem %s1515_s0, %s1070_s14 }
  0x11 LB: >> { %vm329_vm0 = vcmask 523264   ;;  %v1156_v0 = vmov 0   ;;  %v1106_v1 = vld [vmem:[%s1516_s1 + $0x4] ss:$8 sps:$4 sm:$0xff]   ;;  %s1036_s25 = sshll.u32 %s1154_s22, 5  ;;  %v741_v11 = vld [vmem:[%s1517_s2 + $0x10] sm:$0xff]  ;;  %s1154_s22 = sphi %s1197_s22, %s177_s22  }
  0x12   : >> { %342 = vmatprep.subr.bf16.mxu0 %v1156_v0  ;;  %472 = vmatprep.subr.bf16.mxu1 %v1156_v0  ;;  %v1109_v2 = vld [vmem:[%s1516_s1 + $0x44] ss:$8 sps:$4 sm:$0xff]   ;;  %s1216_s28 = scalar_lea.vmem %s1195_s21, %s1036_s25  ;;  %v742_v14 = vld [vmem:[%s1517_s2 + $0x18] sm:$0xff]  ;;  %v745_v19 = vld [vmem:[%s1517_s2 + $0x30] sm:$0xff]  ;;  %s1157_s20 = smov 127   ;;  %vm853_vm2 = vcmask 60416  }
  0x13   : >> { %1090 = vset.pattern.permute.xlu0 %v1156_v0  ;;  %1091 = vset.pattern.permute.xlu1 %v1156_v0  ;;  %v1220_v3 = vld [vmem:[%s1216_s28] sm:$0xff]   ;;  %v1226_v4 = vld [vmem:[%s1216_s28 + $0x8] sm:$0xff]   ;;  %v1233_v5 = vld [vmem:[%s1216_s28 + $0x10] sm:$0xff]   ;;  %s1158_s23 = smov 126   ;;  %s1486_s24 = scalar_lea.vmem %s1190_s18, %s1036_s25 }
  0x14   : >> { %980 = vmatprep.mubr.msk.bf16.mxu0 %vm329_vm0, %v1106_v1  ;;  %1000 = vmatprep.mubr.msk.bf16.mxu1 %vm329_vm0, %v1109_v2  ;;  %v1240_v6 = vld [vmem:[%s1216_s28 + $0x18] sm:$0xff]   ;;  %v1247_v7 = vld [vmem:[%s1216_s28 + $0x20] sm:$0xff]   ;;  %v1254_v8 = vld [vmem:[%s1216_s28 + $0x28] sm:$0xff]   ;;  %s177_s22 = sadd.s32 1, %s1154_s22  }
  0x15   : >> { %343 = vmatpush1.bf16.msra.mxu0 %v1220_v3  ;;  %473 = vmatpush1.bf16.msra.mxu1 %v1220_v3  ;;  %v1261_v9 = vld [vmem:[%s1216_s28 + $0x30] sm:$0xff]   ;;  %v739_v10 = vld [vmem:[%s1517_s2] sm:$0xff]  ;;  %v1274_v12 = vld [vmem:[%s1216_s28 + $0x38] sm:$0xff]   ;;  %p174_p4 = scmp.ge.s32.totalorder %s177_s22, 8  }
  0x16   : >> { %344 = vmatprep.subr.bf16.mxu0 %v1156_v0  ;;  %474 = vmatprep.subr.bf16.mxu1 %v1156_v0  ;;  %v740_v13 = vld [vmem:[%s1517_s2 + $0x8] sm:$0xff]  ;;  %v1287_v15 = vld [vmem:[%s1216_s28 + $0x40] sm:$0xff]   ;;  %v746_v20 = vld [vmem:[%s1517_s2 + $0x38] sm:$0xff] }
  0x17   : >> { %749 = vperm.xlu0 %1090, %v739_v10   ;;  %759 = vperm.xlu1 %1091, %v741_v11   ;;  %v743_v16 = vld [vmem:[%s1517_s2 + $0x20] sm:$0xff]  ;;  %v744_v17 = vld [vmem:[%s1517_s2 + $0x28] sm:$0xff]  ;;  %v1313_v21 = vld [vmem:[%s1216_s28 + $0x50] sm:$0xff]  }
  0x18   : >> { %v1300_v18 = vld [vmem:[%s1216_s28 + $0x48] sm:$0xff]   ;;  %v1320_v22 = vld [vmem:[%s1216_s28 + $0x58] sm:$0xff]  }
  0x19   : >> { %345 = vmatpush1.bf16.msra.mxu0 %v1226_v4  ;;  %475 = vmatpush1.bf16.msra.mxu1 %v1226_v4  ;;  %v1104_v23 = vld [vmem:[%s1516_s1] ss:$8 sps:$4 sm:$0xff]   ;;  %v1110_v25 = vld [vmem:[%s1516_s1 + $0x54] ss:$8 sps:$4 sm:$0xff]   ;;  %v1112_v27 = vld [vmem:[%s1516_s1 + $0x50] ss:$8 sps:$4 sm:$0xff]  }
  0x1a   : >> { %346 = vmatprep.subr.bf16.mxu0 %v1156_v0  ;;  %476 = vmatprep.subr.bf16.mxu1 %v1156_v0  ;;  %v1107_v24 = vld [vmem:[%s1516_s1 + $0x40] ss:$8 sps:$4 sm:$0xff]   ;;  %v1116_v26 = vld [vmem:[%s1516_s1 + $0x14] ss:$8 sps:$4 sm:$0xff]   ;;  %v1118_v28 = vld [vmem:[%s1516_s1 + $0x10] ss:$8 sps:$4 sm:$0xff]  }
  0x1b   : >> { %754 = vperm.xlu0 %1090, %v740_v13   ;;  %764 = vperm.xlu1 %1091, %v742_v14   ;;  %v1113_v29 = vld [vmem:[%s1516_s1 + $0x64] ss:$8 sps:$4 sm:$0xff]   ;;  %v1115_v31 = vld [vmem:[%s1516_s1 + $0x60] ss:$8 sps:$4 sm:$0xff]   ;;  %v1119_v33 = vld [vmem:[%s1516_s1 + $0x74] ss:$8 sps:$4 sm:$0xff]  }
  0x1c   : >> { %v1122_v30 = vld [vmem:[%s1516_s1 + $0x24] ss:$8 sps:$4 sm:$0xff]   ;;  %v1124_v32 = vld [vmem:[%s1516_s1 + $0x20] ss:$8 sps:$4 sm:$0xff]   ;;  %v1125_v34 = vld [vmem:[%s1516_s1 + $0x34] ss:$8 sps:$4 sm:$0xff]  }
  0x1d   : >> { %347 = vmatpush1.bf16.msra.mxu0 %v1233_v5  ;;  %477 = vmatpush1.bf16.msra.mxu1 %v1233_v5  ;;  %v1121_v35 = vld [vmem:[%s1516_s1 + $0x70] ss:$8 sps:$4 sm:$0xff]   ;;  %v1130_v37 = vld [vmem:[%s1516_s1 + $0x84] ss:$8 sps:$4 sm:$0xff]   ;;  %v1128_v39 = vld [vmem:[%s1516_s1 + $0x80] ss:$8 sps:$4 sm:$0xff]  }
  0x1e   : >> { %348 = vmatprep.subr.bf16.mxu0 %v1156_v0  ;;  %478 = vmatprep.subr.bf16.mxu1 %v1156_v0  ;;  %v1127_v36 = vld [vmem:[%s1516_s1 + $0x30] ss:$8 sps:$4 sm:$0xff]   ;;  %v1133_v38 = vld [vmem:[%s1516_s1 + $0xa4] ss:$8 sps:$4 sm:$0xff]   ;;  %v1131_v40 = vld [vmem:[%s1516_s1 + $0xa0] ss:$8 sps:$4 sm:$0xff]  }
  0x1f   : >> { %769 = vperm.xlu0 %1090, %v743_v16   ;;  %774 = vperm.xlu1 %1091, %v744_v17   ;;  %v1134_v41 = vld [vmem:[%s1516_s1 + $0x94] ss:$8 sps:$4 sm:$0xff]   ;;  %v1136_v43 = vld [vmem:[%s1516_s1 + $0x90] ss:$8 sps:$4 sm:$0xff]  }
  0x20   : >> { %v1137_v42 = vld [vmem:[%s1516_s1 + $0xb4] ss:$8 sps:$4 sm:$0xff]   ;;  %v1139_v44 = vld [vmem:[%s1516_s1 + $0xb0] ss:$8 sps:$4 sm:$0xff]  }
  0x21   : >> { %349 = vmatpush1.bf16.msra.mxu0 %v1240_v6  ;;  %479 = vmatpush1.bf16.msra.mxu1 %v1240_v6 }
  0x22   : >> { %350 = vmatprep.subr.bf16.mxu0 %v1156_v0  ;;  %480 = vmatprep.subr.bf16.mxu1 %v1156_v0 }
  0x23   : >> { %779 = vperm.xlu0 %1090, %v745_v19   ;;  %784 = vperm.xlu1 %1091, %v746_v20  }
  0x25   : >> { %351 = vmatpush1.bf16.msra.mxu0 %v1247_v7  ;;  %481 = vmatpush1.bf16.msra.mxu1 %v1247_v7 }
  0x26   : >> { %352 = vmatprep.subr.bf16.mxu0 %v1156_v0  ;;  %482 = vmatprep.subr.bf16.mxu1 %v1156_v0 }
  0x29   : >> { %353 = vmatpush1.bf16.msra.mxu0 %v1254_v8  ;;  %483 = vmatpush1.bf16.msra.mxu1 %v1254_v8 }
  0x2a   : >> { %354 = vmatprep.subr.bf16.mxu0 %v1156_v0  ;;  %484 = vmatprep.subr.bf16.mxu1 %v1156_v0 }
  0x2d   : >> { %355 = vmatpush1.bf16.msra.mxu0 %v1261_v9  ;;  %485 = vmatpush1.bf16.msra.mxu1 %v1261_v9 }
  0x2e   : >> { %356 = vmatprep.subr.bf16.mxu0 %v1156_v0  ;;  %486 = vmatprep.subr.bf16.mxu1 %v1156_v0 }
  0x31   : >> { %357 = vmatpush1.bf16.msra.mxu0 %v1274_v12  ;;  %487 = vmatpush1.bf16.msra.mxu1 %v1274_v12 }
  0x32   : >> { %358 = vmatprep.subr.bf16.mxu0 %v1156_v0  ;;  %488 = vmatprep.subr.bf16.mxu1 %v1156_v0 }
  0x35   : >> { %359 = vmatpush1.bf16.msra.mxu0 %v1287_v15  ;;  %489 = vmatpush1.bf16.msra.mxu1 %v1287_v15 }
  0x36   : >> { %360 = vmatprep.subr.bf16.mxu0 %v1156_v0  ;;  %490 = vmatprep.subr.bf16.mxu1 %v1156_v0 }
  0x39   : >> { %361 = vmatpush1.bf16.msra.mxu0 %v1300_v18  ;;  %491 = vmatpush1.bf16.msra.mxu1 %v1300_v18 }
  0x3a   : >> { %362 = vmatprep.subr.bf16.mxu0 %v1156_v0  ;;  %492 = vmatprep.subr.bf16.mxu1 %v1156_v0 }
  0x3d   : >> { %363 = vmatpush1.bf16.msra.mxu0 %v1313_v21  ;;  %493 = vmatpush1.bf16.msra.mxu1 %v1313_v21 }
  0x3e   : >> { %364 = vmatprep.subr.bf16.mxu0 %v1156_v0  ;;  %494 = vmatprep.subr.bf16.mxu1 %v1156_v0 }
  0x41   : >> { %365 = vmatpush1.bf16.msra.mxu0 %v1320_v22  ;;  %495 = vmatpush1.bf16.msra.mxu1 %v1320_v22 }
  0x42   : >> { %634 = vmatprep.subr.bf16.mxu0 %v1156_v0  ;;  %1046 = vmatprep.subr.bf16.mxu1 %v1156_v0 }
  0x44   : >> { %375 = vmatmul.mubr.bf16.vlgmr.msra.gmra.mrb[0].mxu0 %v1104_v23  ;;  %505 = vmatmul.mubr.bf16.vlgmr.msra.gmra.mrb[0].mxu1 %v1107_v24 }
  0x45   : >> { %635 = vmatpush1.bf16.msra.mxu0 %v1220_v3  ;;  %1058 = vmatpush1.bf16.msra.mxu1 %v1220_v3 }
  0x46   : >> { %636 = vmatprep.subr.bf16.mxu0 %v1156_v0  ;;  %1047 = vmatprep.subr.bf16.mxu1 %v1156_v0 }
  0x47   : >> { %1001 = vmatprep.mubr.msk.bf16.mxu1 %vm329_vm0, %v1110_v25  ;;  %981 = vmatprep.mubr.msk.bf16.mxu0 %vm329_vm0, %v1116_v26 }
  0x49   : >> { %637 = vmatpush1.bf16.msra.mxu0 %v1226_v4  ;;  %1059 = vmatpush1.bf16.msra.mxu1 %v1226_v4 }
  0x4a   : >> { %638 = vmatprep.subr.bf16.mxu0 %v1156_v0  ;;  %1048 = vmatprep.subr.bf16.mxu1 %v1156_v0 }
  0x4c   : >> { %513 = vmatmul.mubr.bf16.gmra.mrb[4].mxu1 %v1112_v27  ;;  %383 = vmatmul.mubr.bf16.gmra.mrb[4].mxu0 %v1118_v28 }
  0x4d   : >> { %639 = vmatpush1.bf16.msra.mxu0 %v1233_v5  ;;  %1060 = vmatpush1.bf16.msra.mxu1 %v1233_v5 }
  0x4e   : >> { %640 = vmatprep.subr.bf16.mxu0 %v1156_v0  ;;  %1049 = vmatprep.subr.bf16.mxu1 %v1156_v0 }
  0x4f   : >> { %1002 = vmatprep.mubr.msk.bf16.mxu1 %vm329_vm0, %v1113_v29  ;;  %982 = vmatprep.mubr.msk.bf16.mxu0 %vm329_vm0, %v1122_v30 }
  0x51   : >> { %641 = vmatpush1.bf16.msra.mxu0 %v1240_v6  ;;  %1061 = vmatpush1.bf16.msra.mxu1 %v1240_v6 }
  0x52   : >> { %642 = vmatprep.subr.bf16.mxu0 %v1156_v0  ;;  %1050 = vmatprep.subr.bf16.mxu1 %v1156_v0 }
  0x54   : >> { %521 = vmatmul.mubr.bf16.gmra.mrb[8].mxu1 %v1115_v31  ;;  %391 = vmatmul.mubr.bf16.gmra.mrb[8].mxu0 %v1124_v32 }
  0x55   : >> { %643 = vmatpush1.bf16.msra.mxu0 %v1247_v7  ;;  %1062 = vmatpush1.bf16.msra.mxu1 %v1247_v7 }
  0x56   : >> { %644 = vmatprep.subr.bf16.mxu0 %v1156_v0  ;;  %1051 = vmatprep.subr.bf16.mxu1 %v1156_v0 }
  0x57   : >> { %1003 = vmatprep.mubr.msk.bf16.mxu1 %vm329_vm0, %v1119_v33  ;;  %983 = vmatprep.mubr.msk.bf16.mxu0 %vm329_vm0, %v1125_v34 }
  0x59   : >> { %645 = vmatpush1.bf16.msra.mxu0 %v1254_v8  ;;  %1063 = vmatpush1.bf16.msra.mxu1 %v1254_v8 }
  0x5a   : >> { %646 = vmatprep.subr.bf16.mxu0 %v1156_v0  ;;  %1052 = vmatprep.subr.bf16.mxu1 %v1156_v0 }
  0x5c   : >> { %529 = vmatmul.mubr.bf16.gmra.mrb[12].mxu1 %v1121_v35  ;;  %399 = vmatmul.mubr.bf16.gmra.mrb[12].mxu0 %v1127_v36 }
  0x5d   : >> { %647 = vmatpush1.bf16.msra.mxu0 %v1261_v9  ;;  %1064 = vmatpush1.bf16.msra.mxu1 %v1261_v9 }
  0x5e   : >> { %648 = vmatprep.subr.bf16.mxu0 %v1156_v0  ;;  %1053 = vmatprep.subr.bf16.mxu1 %v1156_v0 }
  0x5f   : >> { %1020 = vmatprep.mubr.msk.bf16.mxu0 %vm329_vm0, %v1130_v37  ;;  %1022 = vmatprep.mubr.msk.bf16.mxu1 %vm329_vm0, %v1133_v38 }
  0x61   : >> { %649 = vmatpush1.bf16.msra.mxu0 %v1274_v12  ;;  %1065 = vmatpush1.bf16.msra.mxu1 %v1274_v12 }
  0x62   : >> { %650 = vmatprep.subr.bf16.mxu0 %v1156_v0  ;;  %1054 = vmatprep.subr.bf16.mxu1 %v1156_v0 }
  0x65   : >> { %651 = vmatpush1.bf16.msra.mxu0 %v1287_v15  ;;  %1066 = vmatpush1.bf16.msra.mxu1 %v1287_v15 }
  0x66   : >> { %652 = vmatprep.subr.bf16.mxu0 %v1156_v0  ;;  %1055 = vmatprep.subr.bf16.mxu1 %v1156_v0 }
  0x69   : >> { %653 = vmatpush1.bf16.msra.mxu0 %v1300_v18  ;;  %1067 = vmatpush1.bf16.msra.mxu1 %v1300_v18 }
  0x6a   : >> { %654 = vmatprep.subr.bf16.mxu0 %v1156_v0  ;;  %1056 = vmatprep.subr.bf16.mxu1 %v1156_v0 }
  0x6d   : >> { %655 = vmatpush1.bf16.msra.mxu0 %v1313_v21  ;;  %1068 = vmatpush1.bf16.msra.mxu1 %v1313_v21 }
  0x6e   : >> { %656 = vmatprep.subr.bf16.mxu0 %v1156_v0  ;;  %1057 = vmatprep.subr.bf16.mxu1 %v1156_v0 }
  0x71   : >> { %657 = vmatpush1.bf16.msra.mxu0 %v1320_v22  ;;  %1069 = vmatpush1.bf16.msra.mxu1 %v1320_v22 }
  0x74   : >> { %667 = vmatmul.mubr.bf16.vlgmr.msra.gmra.mrb[16].mxu0 %v1128_v39  ;;  %683 = vmatmul.mubr.bf16.vlgmr.msra.gmra.mrb[16].mxu1 %v1131_v40 }
  0x75   : >> { %1021 = vmatprep.mubr.msk.bf16.mxu0 %vm329_vm0, %v1134_v41  ;;  %1023 = vmatprep.mubr.msk.bf16.mxu1 %vm329_vm0, %v1137_v42 }
  0x7c   : >> { %675 = vmatmul.mubr.bf16.gmra.mrb[20].mxu0 %v1136_v43  ;;  %691 = vmatmul.mubr.bf16.gmra.mrb[20].mxu1 %v1139_v44 }
  0x96   : >> { %v750_v29 = vpop.permute.xlu0 %749  ;;  %v760_v30 = vpop.permute.xlu1 %759 }
  0x9a   : >> { %v755_v31 = vpop.permute.xlu0 %754  ;;  %v765_v32 = vpop.permute.xlu1 %764 }
  0x9e   : >> { %v770_v33 = vpop.permute.xlu0 %769  ;;  %v775_v34 = vpop.permute.xlu1 %774 }
  0xa2   : >> { %v1474_v35 = vpop.permute.xlu0 %779  ;;  %v1476_v36 = vpop.permute.xlu1 %784 }
 0x117   : >> { %v1450_v45 = vpop.f32.mrb[0].mxu0  ;;  %v506_v46 = vpop.f32.mrb[0].mxu1 }
 0x118   : >> { %545 = vrot.lane.b32.xlu0 %v506_v46, %s1157_s20  ;;  %v378_v47 = vpop.f32.mrb[1].mxu0  ;;  %v508_v48 = vpop.f32.mrb[1].mxu1 }
 0x119   : >> { %v1453_v49 = vpop.f32.mrb[2].mxu0  ;;  %v509_v50 = vpop.f32.mrb[2].mxu1 }
 0x11a   : >> { %547 = vrot.lane.b32.xlu1 %v509_v50, %s1157_s20  ;;  %v381_v51 = vpop.f32.mrb[3].mxu0  ;;  %v511_v52 = vpop.f32.mrb[3].mxu1 }
 0x11f   : >> { %v514_v53 = vpop.f32.mrb[4].mxu1  ;;  %v1456_v54 = vpop.f32.mrb[4].mxu0 }
 0x120   : >> { %549 = vrot.lane.b32.xlu0 %v514_v53, %s1157_s20  ;;  %v516_v55 = vpop.f32.mrb[5].mxu1  ;;  %v386_v56 = vpop.f32.mrb[5].mxu0 }
 0x121   : >> { %v517_v57 = vpop.f32.mrb[6].mxu1  ;;  %v1459_v58 = vpop.f32.mrb[6].mxu0 }
 0x122   : >> { %551 = vrot.lane.b32.xlu1 %v517_v57, %s1157_s20  ;;  %v519_v59 = vpop.f32.mrb[7].mxu1  ;;  %v389_v60 = vpop.f32.mrb[7].mxu0 }
 0x127   : >> { %v522_v61 = vpop.f32.mrb[8].mxu1  ;;  %v1462_v62 = vpop.f32.mrb[8].mxu0 }
 0x128   : >> { %553 = vrot.lane.b32.xlu0 %v522_v61, %s1157_s20  ;;  %v524_v63 = vpop.f32.mrb[9].mxu1  ;;  %v394_v0 = vpop.f32.mrb[9].mxu0 }
 0x129   : >> { %v525_v1 = vpop.f32.mrb[10].mxu1  ;;  %v1465_v2 = vpop.f32.mrb[10].mxu0 }
 0x12a   : >> { %555 = vrot.lane.b32.xlu1 %v525_v1, %s1157_s20  ;;  %v527_v3 = vpop.f32.mrb[11].mxu1  ;;  %v397_v4 = vpop.f32.mrb[11].mxu0 }
 0x12f   : >> { %v530_v5 = vpop.f32.mrb[12].mxu1  ;;  %v1468_v6 = vpop.f32.mrb[12].mxu0 }
 0x130   : >> { %557 = vrot.lane.b32.xlu0 %v530_v5, %s1157_s20  ;;  %v532_v7 = vpop.f32.mrb[13].mxu1  ;;  %v402_v8 = vpop.f32.mrb[13].mxu0 }
 0x131   : >> { %v533_v9 = vpop.f32.mrb[14].mxu1  ;;  %v1471_v10 = vpop.f32.mrb[14].mxu0 }
 0x132   : >> { %559 = vrot.lane.b32.xlu1 %v533_v9, %s1157_s20  ;;  %v405_v11 = vpop.f32.mrb[15].mxu0  ;;  %v535_v12 = vpop.f32.mrb[15].mxu1 }
 0x147   : >> { %v668_v13 = vpop.f32.mrb[16].mxu0  ;;  %v684_v14 = vpop.f32.mrb[16].mxu1 }
 0x148   : >> { %707 = vrot.lane.b32.xlu0 %v668_v13, %s1158_s23  ;;  %v670_v15 = vpop.f32.mrb[17].mxu0  ;;  %v686_v16 = vpop.f32.mrb[17].mxu1 }
 0x149   : >> { %v671_v17 = vpop.f32.mrb[18].mxu0  ;;  %v687_v18 = vpop.f32.mrb[18].mxu1 }
 0x14a   : >> { %709 = vrot.lane.b32.xlu1 %v671_v17, %s1158_s23  ;;  %v673_v19 = vpop.f32.mrb[19].mxu0  ;;  %v689_v20 = vpop.f32.mrb[19].mxu1 }
 0x14c   : >> { %715 = vrot.lane.b32.xlu0 %v684_v14, %s1158_s23 }
 0x14e   : >> { %717 = vrot.lane.b32.xlu1 %v687_v18, %s1158_s23 }
 0x14f   : >> { %v676_v21 = vpop.f32.mrb[20].mxu0  ;;  %v692_v22 = vpop.f32.mrb[20].mxu1 }
 0x150   : >> { %711 = vrot.lane.b32.xlu0 %v676_v21, %s1158_s23  ;;  %v678_v23 = vpop.f32.mrb[21].mxu0  ;;  %v694_v24 = vpop.f32.mrb[21].mxu1 }
 0x151   : >> { %v679_v25 = vpop.f32.mrb[22].mxu0  ;;  %v695_v26 = vpop.f32.mrb[22].mxu1 }
 0x152   : >> { %713 = vrot.lane.b32.xlu1 %v679_v25, %s1158_s23  ;;  %v681_v27 = vpop.f32.mrb[23].mxu0  ;;  %v697_v28 = vpop.f32.mrb[23].mxu1 }
 0x154   : >> { %719 = vrot.lane.b32.xlu0 %v692_v22, %s1158_s23 }
 0x156   : >> { %721 = vrot.lane.b32.xlu1 %v695_v26, %s1158_s23 }
 0x18a   : >> { %v546_v37 = vpop.permute.xlu0 %545 }
 0x18b   : >> { %v569_v46 = vadd.f32 %v546_v37, %v1450_v45 }
 0x18c   : >> { %v548_v38 = vpop.permute.xlu1 %547 }
 0x18d   : >> { %v570_v48 = vadd.f32 %v548_v38, %v1453_v49 }
 0x192   : >> { %v550_v39 = vpop.permute.xlu0 %549 }
 0x193   : >> { %v571_v61 = vadd.f32 %v550_v39, %v1456_v54 }
 0x194   : >> { %v552_v40 = vpop.permute.xlu1 %551 }
 0x195   : >> { %v572_v1 = vadd.f32 %v552_v40, %v1459_v58 }
 0x19a   : >> { %v554_v41 = vpop.permute.xlu0 %553 }
 0x19b   : >> { %v573_v52 = vadd.f32 %v554_v41, %v1462_v62 }
 0x19c   : >> { %v556_v42 = vpop.permute.xlu1 %555 }
 0x19d   : >> { %v574_v45 = vadd.f32 %v556_v42, %v1465_v2 }
 0x1a2   : >> { %v558_v43 = vpop.permute.xlu0 %557 }
 0x1a3   : >> { %v575_v12 = vadd.f32 %v558_v43, %v1468_v6 }
 0x1a4   : >> { %v560_v44 = vpop.permute.xlu1 %559 }
 0x1a5   : >> { %v576_v21 = vadd.f32 %v560_v44, %v1471_v10 }
 0x1ba   : >> { %v708_v47 = vpop.permute.xlu0 %707 }
 0x1bb   : >> { %v731_v50 = vadd.f32 %v708_v47, %v569_v46 }
 0x1bc   : >> { %v710_v51 = vpop.permute.xlu1 %709 }
 0x1bd   : >> { %v787_v53 = vadd.f32 %v750_v29, %v731_v50  ;;  %v732_v55 = vadd.f32 %v710_v51, %v570_v48 }
 0x1be   : >> { %v716_v56 = vpop.permute.xlu0 %715 }
 0x1bf   : >> { %vm795_vm1 = vcmp.ge.f32.partialorder %v787_v53, 0.0  ;;  %v803_v57 = vmul.f32 0.25, %v787_v53  ;;  %v788_v59 = vadd.f32 %v755_v31, %v732_v55  ;;  %v735_v60 = vadd.f32 %v716_v56, %v573_v52 }
 0x1c0   : >> { %v718_v63 = vpop.permute.xlu1 %717 }
 0x1c1   : >> { %v811_v49 = vsel %vm795_vm1, %v787_v53, %v803_v57  ;;  %vm796_vm3 = vcmp.ge.f32.partialorder %v788_v59, 0.0  ;;  %v804_v62 = vmul.f32 0.25, %v788_v59  ;;  %v791_v0 = vadd.f32 %v770_v33, %v735_v60 }
 0x1c2   : >> { %v1037_v3 = vpack.c.bf16 %v811_v49, %v811_v49  ;;  %v736_v4 = vadd.f32 %v718_v63, %v574_v45  ;;  %v712_v5 = vpop.permute.xlu0 %711 }
 0x1c3   : >> { %v812_v7 = vsel %vm796_vm3, %v788_v59, %v804_v62  ;;  %vm799_vm4 = vcmp.ge.f32.partialorder %v791_v0, 0.0  ;;  %v807_v54 = vmul.f32 0.25, %v791_v0  ;;  %v733_v2 = vadd.f32 %v712_v5, %v571_v61 }
 0x1c4   : >> { %854 = vst.msk [vmem:[%s1486_s24] sm:$0xf] %vm853_vm2, %v1037_v3  ;;  %v1038_v8 = vpack.c.bf16 %v812_v7, %v812_v7  ;;  %v792_v9 = vadd.f32 %v775_v34, %v736_v4  ;;  %v714_v11 = vpop.permute.xlu1 %713 }
 0x1c5   : >> { %v815_v13 = vsel %vm799_vm4, %v791_v0, %v807_v54  ;;  %v789_v14 = vadd.f32 %v760_v30, %v733_v2  ;;  %v734_v15 = vadd.f32 %v714_v11, %v572_v1 }
 0x1c6   : >> { %855 = vst.msk [vmem:[%s1486_s24 + $0x4] sm:$0xf] %vm853_vm2, %v1038_v8  ;;  %v1041_v58 = vpack.c.bf16 %v815_v13, %v815_v13  ;;  %vm800_vm5 = vcmp.ge.f32.partialorder %v792_v9, 0.0  ;;  %v808_v16 = vmul.f32 0.25, %v792_v9  ;;  %v720_v17 = vpop.permute.xlu0 %719 }
 0x1c7   : >> { %vm797_vm6 = vcmp.ge.f32.partialorder %v789_v14, 0.0  ;;  %v805_v18 = vmul.f32 0.25, %v789_v14  ;;  %v790_v19 = vadd.f32 %v765_v32, %v734_v15  ;;  %v737_v20 = vadd.f32 %v720_v17, %v575_v12 }
 0x1c8   : >> { %858 = vst.msk [vmem:[%s1486_s24 + $0x10] sm:$0xf] %vm853_vm2, %v1041_v58  ;;  %v816_v6 = vsel %vm800_vm5, %v792_v9, %v808_v16  ;;  %v722_v22 = vpop.permute.xlu1 %721 }
 0x1c9   : >> { %v1042_v23 = vpack.c.bf16 %v816_v6, %v816_v6  ;;  %v813_v24 = vsel %vm797_vm6, %v789_v14, %v805_v18  ;;  %vm798_vm7 = vcmp.ge.f32.partialorder %v790_v19, 0.0  ;;  %v806_v25 = vmul.f32 0.25, %v790_v19 }
 0x1ca   : >> { %v1039_v26 = vpack.c.bf16 %v813_v24, %v813_v24  ;;  %v793_v27 = vadd.f32 %v1474_v35, %v737_v20  ;;  %v738_v28 = vadd.f32 %v722_v22, %v576_v21 }
 0x1cb   : >> { %859 = vst.msk [vmem:[%s1486_s24 + $0x14] sm:$0xf] %vm853_vm2, %v1042_v23  ;;  %v814_v29 = vsel %vm798_vm7, %v790_v19, %v806_v25 }
 0x1cc   : >> { %856 = vst.msk [vmem:[%s1486_s24 + $0x8] sm:$0xf] %vm853_vm2, %v1039_v26  ;;  %v1040_v10 = vpack.c.bf16 %v814_v29, %v814_v29  ;;  %vm801_vm8 = vcmp.ge.f32.partialorder %v793_v27, 0.0  ;;  %v809_v30 = vmul.f32 0.25, %v793_v27  ;;  %v794_v31 = vadd.f32 %v1476_v36, %v738_v28 }
 0x1cd   : > { %176 = sbr.rel (!%p174_p4) target bundleno = 17 (0x11), region = 75 }
 0x1ce   : >> { %857 = vst.msk [vmem:[%s1486_s24 + $0xc] sm:$0xf] %vm853_vm2, %v1040_v10  ;;  %v817_v32 = vsel %vm801_vm8, %v793_v27, %v809_v30  ;;  %vm802_vm9 = vcmp.ge.f32.partialorder %v794_v31, 0.0  ;;  %v810_v33 = vmul.f32 0.25, %v794_v31 }
 0x1cf   : >> { %v1043_v34 = vpack.c.bf16 %v817_v32, %v817_v32 }
 0x1d0   : >> { %v818_v37 = vsel %vm802_vm9, %v794_v31, %v810_v33 }
 0x1d1   : >> { %860 = vst.msk [vmem:[%s1486_s24 + $0x18] sm:$0xf] %vm853_vm2, %v1043_v34  ;;  %v1044_v35 = vpack.c.bf16 %v818_v37, %v818_v37 }
 0x1d3   : >> { %861 = vst.msk [vmem:[%s1486_s24 + $0x1c] sm:$0xf] %vm853_vm2, %v1044_v35 }
 0x1d4 PF: > { %s13_s12 = sadd.s32 1, %s1150_s12  }
 0x1d5   : > { %p10_p5 = scmp.ge.s32.totalorder %s13_s12, 6  }
 0x1d7   :  { %12 = sbr.rel (!%p10_p5) target bundleno = 1 (0x1), region = 86 }

// kernel: softsplat_baseline_forward.27
= control target key start
LH: loop header
LB: loop body
LE: loop exit
PB: predicated region body
PF: predicated region fallthrough
CT: control target
= control target key end

     0   :  { %s414_s9 = smov 0   ;;  %s416_s10 = smov 0   ;;  %s457_s0 = inlined_call_operand.vmem [shape: f32[2,4,128], index: 0, kind: input, shape index: {}]   ;;  %s458_s1 = inlined_call_operand.vmem [shape: f32[1,128], index: 1, kind: input, shape index: {}]   ;;  %s459_s2 = inlined_call_operand.vmem [shape: f32[2,4,128], index: 2, kind: output, shape index: {}]  }
   0x1   :  { %s418_s11 = smov 0  }
   0x2 LB: > { %s24_s12 = sadd.s32 1, %s392_s10  ;;  %p340_p0 = scmp.ge.s32.totalorder %s396_s11, 1  ;;  %s396_s11 = sphi %s418_s11, %s12_s11   ;;  %s392_s10 = sphi %s416_s10, %s461_s10   ;;  %s388_s9 = sphi %s414_s9, %s460_s9  }
   0x3   : > { %p26_p1 = scmp.ge.s32.totalorder %s24_s12, 2  ;;  %p138_p2 = scmp.lt.s32.totalorder %s396_s11, 3 }
   0x5   : > { %s463_s12 = smov (%p26_p1, %s24_s12), 0  ;;  %p139_p3 = pnand %p340_p0, %p138_p2 }
   0x6   : > { %p167_p4 = scmp.lt.s32.totalorder (!%p139_p3), %s388_s9, 1  ;;  %v398_v4 = vmov (!%p139_p3), 1966171168   ;;  %v198_v6 = vlaneseq (!%p139_p3)  ;;  %v184_v7 = vld [vmem:[%s458_s1] sm:$0x1] (!%p139_p3) }
   0x7   : > { %142 = sbr.rel (%p139_p3) target bundleno = 49 (0x31), region = 28  ;;  %v196_v5 = vunpack.c.l.s4 (!%p139_p3), %v398_v4  ;;  %v186_v8 = vmul.f32 (!%p139_p3), 0.25, %v184_v7 }
   0x8   : > { %v199_v10 = vshrl.u32 (!%p139_p3), %v198_v6, 7 }
   0x9   : > { %v197_v9 = vunpack.c.0.s8 (!%p139_p3), %v196_v5  ;;  %v187_v11 = vsub.f32 (!%p139_p3), 1.5, %v186_v8 }
   0xa   : > { %v235_v21 = vsub.s32 (!%p139_p3), 0, %v199_v10 }
   0xb   : > { %v200_v12 = vsub.s32 (!%p139_p3), %v197_v9, %v199_v10  ;;  %v188_v16 = vadd.f32 (!%p139_p3), 0.0001, %v187_v11 }
   0xd   : > { %v212_v22 = vsub.f32 (!%p139_p3), 1.0, %v188_v16 }
   0xe   : > { %s465_s9 = smov (!%p167_p4, %s388_s9), 1 }
   0xf   : > { %s341_s13 = sshll.u32 %s465_s9, 2 }
  0x10   : > { %s173_s16 = scalar_lea.vmem %s457_s0, %s341_s13  ;;  %s183_s21 = scalar_lea.vmem %s459_s2, %s341_s13 }
  0x11   : > { %v185_v0 = vld [vmem:[%s173_s16] sm:$0xf] }
  0x12   : > { %v189_v1 = vmul.f32 0.25, %v185_v0 }
  0x14   : > { %v190_v2 = vadd.f32 1.0, %v189_v1  ;;  %v192_v3 = vsub.f32 1.0, %v189_v1 }
  0x16   : > { %370 = vrcp.f32 %v190_v2 }
  0x17   : > { %372 = vrcp.f32 %v192_v3 }
  0x20   : > { %v371_v13 = vpop.eup %370 }
  0x21   : > { %v373_v14 = vpop.eup %372  ;;  %v201_v15 = vrot.slane %v371_v13, %v200_v12 }
  0x22   : > { %v220_v17 = vrot.slane %v373_v14, %v200_v12 }
  0x23   : > { %v202_v18 = vcombine.high %v201_v15, %v201_v15 }
  0x24   : > { %v221_v19 = vcombine.high %v220_v17, %v220_v17 }
  0x25   : > { %v209_v20 = vrot.slane %v202_v18, %v200_v12 }
  0x26   : > { %v228_v23 = vrot.slane %v221_v19, %v200_v12 }
  0x27   : > { %v211_v24 = vmul.f32 %v209_v20, %v188_v16 }
  0x28   : > { %v229_v25 = vcombine.high %v228_v23, %v228_v23 }
  0x29   : > { %v236_v26 = vrot.slane %v211_v24, %v235_v21 }
  0x2a   : > { %v231_v27 = vmul.f32 %v229_v25, %v212_v22 }
  0x2b   : > { %v238_v28 = vmul.f32 %v236_v26, %v185_v0 }
  0x2c   : > { %v244_v29 = vrot.slane %v231_v27, %v235_v21 }
  0x2d   : > { %239 = vst [vmem:[%s183_s21] sm:$0x3] %v238_v28 }
  0x2e   : > { %v246_v30 = vmul.f32 %v244_v29, %v185_v0 }
  0x30   : > { %247 = vst [vmem:[%s183_s21] sm:$0xc] %v246_v30 }
  0x31 PF: > { %s12_s11 = sadd.s32 1, %s396_s11   ;;  %s460_s9 = smov %s392_s10 }
  0x32   : > { %p9_p5 = scmp.ge.s32.totalorder %s12_s11, 4   ;;  %s461_s10 = smov %s463_s12 }
  0x34   :  { %11 = sbr.rel (!%p9_p5) target bundleno = 2 (0x2), region = 61 }

// kernel: softsplat_baseline_forward.20
= control target key start
LH: loop header
LB: loop body
LE: loop exit
PB: predicated region body
PF: predicated region fallthrough
CT: control target
= control target key end

     0   :  { %s1757_s12 = smov 0   ;;  %s2134_s0 = inlined_call_operand.vmem [shape: bf16[4,9,128,5], index: 0, kind: input, shape index: {}]   ;;  %s2135_s1 = inlined_call_operand.vmem [shape: bf16[2,96,384], index: 1, kind: input, shape index: {}]   ;;  %s2136_s2 = inlined_call_operand.vmem [shape: f32[96,1], index: 2, kind: input, shape index: {}]   ;;  %s2137_s3 = inlined_call_operand.vmem [shape: bf16[4,4,96,4], index: 3, kind: output, shape index: {}]  }
   0x1 LB: > { %s1275_s13 = sadd.s32 4294967295, %s1729_s12   ;;  %p1279_p0 = scmp.ge.s32.totalorder %s1729_s12, 1  ;;  %s1729_s12 = sphi %s1757_s12, %s13_s12  }
   0x2   : > { %p137_p1 = scmp.lt.s32.totalorder %s1729_s12, 5 }
   0x4   : > { %p138_p2 = pnand %p1279_p0, %p137_p1 }
   0x5   : > { %p161_p3 = scmp.lt.s32.totalorder (!%p138_p2), %s1275_s13, 3  ;;  %s1775_s22 = smov (!%p138_p2), 0  }
   0x6   : > { %141 = sbr.rel (%p138_p2) target bundleno = 470 (0x1d6), region = 32 }
   0xd   : > { %s2139_s13 = smov (!%p161_p3, %s1275_s13), 3 }
   0xe   : > { %s1625_s14 = smul.u32 576, %s2139_s13 }
   0xf   : > { %s1626_s15 = smul.u32 192, %s2139_s13 }
  0x10   : > { %s1768_s18 = scalar_lea.vmem %s2134_s0, %s1625_s14 }
  0x11   : > { %s1773_s21 = scalar_lea.vmem %s2137_s3, %s1626_s15 }
  0x12 LB: >> { %v1673_v0 = vld [vmem:[%s2135_s1 + $0x4] ss:$12 sps:$4 sm:$0xff]   ;;  %s1421_s25 = sshll.u32 %s1733_s22, 7  ;;  %v1674_v1 = vld [vmem:[%s2135_s1 + $0x8] ss:$12 sps:$4 sm:$0xff]   ;;  %v1735_v60 = vmov 0   ;;  %s1733_s22 = sphi %s1775_s22, %s177_s22  }
  0x13   : >> { %s1788_s28 = scalar_lea.vmem %s1768_s18, %s1421_s25  ;;  %534 = vmatprep.mubr.bf16.mxu0 %v1673_v0  ;;  %1585 = vmatprep.mubr.bf16.mxu1 %v1674_v1  ;;  %v1671_v26 = vld [vmem:[%s2135_s1] ss:$12 sps:$4 sm:$0xff]   ;;  %v1676_v28 = vld [vmem:[%s2135_s1 + $0x1c] ss:$12 sps:$4 sm:$0xff]   ;;  %v1679_v29 = vld [vmem:[%s2135_s1 + $0x38] ss:$12 sps:$4 sm:$0xff]  }
  0x14   : >> { %v1647_v2 = vld [vmem:[%s1788_s28 + $0x40] sm:$0xff]   ;;  %v1650_v5 = vld [vmem:[%s1788_s28 + $0x48] sm:$0xff]   ;;  %v1653_v8 = vld [vmem:[%s1788_s28 + $0x50] sm:$0xff]   ;;  %1646 = vset.pattern.permute.xlu1 %v1735_v60  ;;  %1645 = vset.pattern.permute.xlu0 %v1735_v60  ;;  %s1736_s29 = smov 127   ;;  %s1436_s30 = smul.u32 48, %s1733_s22  ;;  %vm1190_vm1 = vcmask 27648  }
  0x15   : >> { %v1792_v3 = vld [vmem:[%s1788_s28 + $0x80] sm:$0xff]   ;;  %1437 = vmatprep.subr.bf16.mxu0 %v1647_v2  ;;  %v1799_v6 = vld [vmem:[%s1788_s28 + $0x88] sm:$0xff]   ;;  %v1805_v9 = vld [vmem:[%s1788_s28 + $0x90] sm:$0xff]   ;;  %s177_s22 = sadd.s32 1, %s1733_s22  }
  0x16   : >> { %v1649_v4 = vld [vmem:[%s1788_s28] sm:$0xff]   ;;  %1569 = vmatprep.subr.bf16.mxu1 %v1792_v3  ;;  %v1652_v7 = vld [vmem:[%s1788_s28 + $0x8] sm:$0xff]   ;;  %v1809_v10 = vld [vmem:[%s1788_s28 + $0x10] sm:$0xff]   ;;  %s2089_s4 = scalar_lea.vmem %s1773_s21, %s1436_s30  ;;  %p174_p4 = scmp.ge.s32.totalorder %s177_s22, 4  }
  0x17   : >> { %1438 = vmatpush3.bf16.msra.mxu0 %v1649_v4  ;;  %1570 = vmatpush3.bf16.msra.mxu1 %v1792_v3  ;;  %v1656_v11 = vld [vmem:[%s1788_s28 + $0x58] sm:$0xff]   ;;  %v1822_v14 = vld [vmem:[%s1788_s28 + $0x60] sm:$0xff]   ;;  %v1834_v17 = vld [vmem:[%s1788_s28 + $0x68] sm:$0xff]  }
  0x18   : >> { %1439 = vmatprep.subr.bf16.mxu0 %v1650_v5  ;;  %1571 = vmatprep.subr.bf16.mxu1 %v1799_v6  ;;  %v1814_v12 = vld [vmem:[%s1788_s28 + $0x98] sm:$0xff]   ;;  %v1826_v15 = vld [vmem:[%s1788_s28 + $0xa0] sm:$0xff]   ;;  %v1839_v18 = vld [vmem:[%s1788_s28 + $0xa8] sm:$0xff]  }
  0x19   : >> { %v1817_v13 = vld [vmem:[%s1788_s28 + $0x18] sm:$0xff]   ;;  %v1829_v16 = vld [vmem:[%s1788_s28 + $0x20] sm:$0xff]   ;;  %v1842_v19 = vld [vmem:[%s1788_s28 + $0x28] sm:$0xff]  }
  0x1a   : >> { %v1847_v20 = vld [vmem:[%s1788_s28 + $0x70] sm:$0xff]   ;;  %v1860_v23 = vld [vmem:[%s1788_s28 + $0x78] sm:$0xff]   ;;  %v1675_v27 = vld [vmem:[%s2135_s1 + $0x20] ss:$12 sps:$4 sm:$0xff]  }
  0x1b   : >> { %1440 = vmatpush3.bf16.msra.mxu0 %v1652_v7  ;;  %1572 = vmatpush3.bf16.msra.mxu1 %v1799_v6  ;;  %v1852_v21 = vld [vmem:[%s1788_s28 + $0xb0] sm:$0xff]   ;;  %v1865_v24 = vld [vmem:[%s1788_s28 + $0xb8] sm:$0xff]   ;;  %v1685_v35 = vld [vmem:[%s2135_s1 + $0x80] ss:$12 sps:$4 sm:$0xff]  }
  0x1c   : >> { %1441 = vmatprep.subr.bf16.mxu0 %v1653_v8  ;;  %1573 = vmatprep.subr.bf16.mxu1 %v1805_v9  ;;  %v1857_v22 = vld [vmem:[%s1788_s28 + $0x30] sm:$0xff]   ;;  %v1870_v25 = vld [vmem:[%s1788_s28 + $0x38] sm:$0xff]   ;;  %v1694_v41 = vld [vmem:[%s2135_s1 + $0x60] ss:$12 sps:$4 sm:$0xff]  }
  0x1d   : >> { %v1678_v30 = vld [vmem:[%s2135_s1 + $0x18] ss:$12 sps:$4 sm:$0xff]   ;;  %v1680_v31 = vld [vmem:[%s2135_s1 + $0x50] ss:$12 sps:$4 sm:$0xff]   ;;  %v1681_v32 = vld [vmem:[%s2135_s1 + $0x34] ss:$12 sps:$4 sm:$0xff]  }
  0x1e   : >> { %v1684_v33 = vld [vmem:[%s2135_s1 + $0x68] ss:$12 sps:$4 sm:$0xff]   ;;  %v1683_v34 = vld [vmem:[%s2135_s1 + $0x30] ss:$12 sps:$4 sm:$0xff]   ;;  %v1686_v36 = vld [vmem:[%s2135_s1 + $0x4c] ss:$12 sps:$4 sm:$0xff]  }
  0x1f   : >> { %1442 = vmatpush3.bf16.msra.mxu0 %v1809_v10  ;;  %1574 = vmatpush3.bf16.msra.mxu1 %v1805_v9  ;;  %v1693_v37 = vld [vmem:[%s2135_s1 + $0x94] ss:$12 sps:$4 sm:$0xff]   ;;  %v1689_v39 = vld [vmem:[%s2135_s1 + $0x64] ss:$12 sps:$4 sm:$0xff]   ;;  %v1695_v42 = vld [vmem:[%s2135_s1 + $0x7c] ss:$12 sps:$4 sm:$0xff]  }
  0x20   : >> { %1443 = vmatprep.subr.bf16.mxu0 %v1656_v11  ;;  %1575 = vmatprep.subr.bf16.mxu1 %v1814_v12  ;;  %v1688_v38 = vld [vmem:[%s2135_s1 + $0x48] ss:$12 sps:$4 sm:$0xff]   ;;  %v1691_v40 = vld [vmem:[%s2135_s1 + $0x90] ss:$12 sps:$4 sm:$0xff]   ;;  %v1697_v43 = vld [vmem:[%s2135_s1 + $0xac] ss:$12 sps:$4 sm:$0xff]  }
  0x21   : >> { %v1699_v44 = vld [vmem:[%s2135_s1 + $0x78] ss:$12 sps:$4 sm:$0xff]   ;;  %v1700_v45 = vld [vmem:[%s2135_s1 + $0xa8] ss:$12 sps:$4 sm:$0xff]   ;;  %v1704_v48 = vld [vmem:[%s2135_s1 + $0xc0] ss:$12 sps:$4 sm:$0xff]  }
  0x22   : >> { %v1701_v46 = vld [vmem:[%s2135_s1 + $0xc4] ss:$12 sps:$4 sm:$0xff]   ;;  %v1706_v50 = vld [vmem:[%s2135_s1 + $0xdc] ss:$12 sps:$4 sm:$0xff]   ;;  %v1710_v53 = vld [vmem:[%s2135_s1 + $0xe0] ss:$12 sps:$4 sm:$0xff]  }
  0x23   : >> { %1444 = vmatpush3.bf16.msra.mxu0 %v1817_v13  ;;  %1576 = vmatpush3.bf16.msra.mxu1 %v1814_v12  ;;  %v1703_v47 = vld [vmem:[%s2135_s1 + $0x98] ss:$12 sps:$4 sm:$0xff]   ;;  %v1705_v49 = vld [vmem:[%s2135_s1 + $0xb0] ss:$12 sps:$4 sm:$0xff]   ;;  %v1708_v51 = vld [vmem:[%s2135_s1 + $0xc8] ss:$12 sps:$4 sm:$0xff]  }
  0x24   : >> { %1445 = vmatprep.subr.bf16.mxu0 %v1822_v14  ;;  %1577 = vmatprep.subr.bf16.mxu1 %v1826_v15  ;;  %v1709_v52 = vld [vmem:[%s2135_s1 + $0xd8] ss:$12 sps:$4 sm:$0xff]   ;;  %v1711_v54 = vld [vmem:[%s2135_s1 + $0xf4] ss:$12 sps:$4 sm:$0xff]   ;;  %v1713_v56 = vld [vmem:[%s2135_s1 + $0xf0] ss:$12 sps:$4 sm:$0xff]  }
  0x25   : >> { %v1714_v55 = vld [vmem:[%s2135_s1 + $0xf8] ss:$12 sps:$4 sm:$0xff]   ;;  %v1715_v57 = vld [vmem:[%s2135_s1 + $0x110] ss:$12 sps:$4 sm:$0xff]   ;;  %v1718_v59 = vld [vmem:[%s2135_s1 + $0x108] ss:$12 sps:$4 sm:$0xff]  }
  0x26   : >> { %v1716_v58 = vld [vmem:[%s2135_s1 + $0x10c] ss:$12 sps:$4 sm:$0xff]   ;;  %v1021_v61 = vld [vmem:[%s2136_s2 + $0x10] sm:$0xff]  ;;  %v1019_v62 = vld [vmem:[%s2136_s2] sm:$0xff] }
  0x27   : >> { %1446 = vmatpush3.bf16.msra.mxu0 %v1829_v16  ;;  %1578 = vmatpush3.bf16.msra.mxu1 %v1826_v15  ;;  %v1022_v63 = vld [vmem:[%s2136_s2 + $0x18] sm:$0xff]  ;;  %v1020_v0 = vld [vmem:[%s2136_s2 + $0x8] sm:$0xff] }
  0x28   : >> { %1447 = vmatprep.subr.bf16.mxu0 %v1834_v17  ;;  %1579 = vmatprep.subr.bf16.mxu1 %v1839_v18  ;;  %v1024_v1 = vld [vmem:[%s2136_s2 + $0x28] sm:$0xff] }
  0x29   : >> { %1043 = vperm.xlu1 %1646, %v1021_v61   ;;  %1033 = vperm.xlu0 %1645, %v1019_v62  }
  0x2b   : >> { %1448 = vmatpush3.bf16.msra.mxu0 %v1842_v19  ;;  %1580 = vmatpush3.bf16.msra.mxu1 %v1839_v18 }
  0x2c   : >> { %1449 = vmatprep.subr.bf16.mxu0 %v1847_v20  ;;  %1581 = vmatprep.subr.bf16.mxu1 %v1852_v21 }
  0x2d   : >> { %1048 = vperm.xlu1 %1646, %v1022_v63   ;;  %1038 = vperm.xlu0 %1645, %v1020_v0  }
  0x2f   : >> { %1450 = vmatpush3.bf16.msra.mxu0 %v1857_v22  ;;  %1582 = vmatpush3.bf16.msra.mxu1 %v1852_v21 }
  0x30   : >> { %1451 = vmatprep.subr.bf16.mxu0 %v1860_v23  ;;  %1583 = vmatprep.subr.bf16.mxu1 %v1865_v24 }
  0x31   : >> { %1058 = vperm.xlu1 %1646, %v1024_v1  }
  0x33   : >> { %1452 = vmatpush3.bf16.msra.mxu0 %v1870_v25  ;;  %1584 = vmatpush3.bf16.msra.mxu1 %v1865_v24 }
  0x34   : >> { %1503 = vmatprep.subr.bf16.mxu1 %v1647_v2  ;;  %1597 = vmatprep.subr.bf16.mxu0 %v1792_v3  ;;  %v1023_v2 = vld [vmem:[%s2136_s2 + $0x20] sm:$0xff] }
  0x35   : >> { %1053 = vperm.xlu0 %1645, %v1023_v2  }
  0x36   : >> { %535 = vmatmul.mubr.bf16.vlgmr.msra.gmra.mrb[0].mxu0 %v1671_v26  ;;  %1586 = vmatmul.mubr.bf16.vlgmr.msra.gmra.mrb[0].mxu1 %v1675_v27 }
  0x37   : >> { %1504 = vmatpush3.bf16.msra.mxu1 %v1649_v4  ;;  %1598 = vmatpush3.bf16.msra.mxu0 %v1792_v3  ;;  %v1026_v3 = vld [vmem:[%s2136_s2 + $0x38] sm:$0xff]  ;;  %v1025_v4 = vld [vmem:[%s2136_s2 + $0x30] sm:$0xff] }
  0x38   : >> { %1505 = vmatprep.subr.bf16.mxu1 %v1650_v5  ;;  %542 = vmatprep.mubr.bf16.mxu0 %v1676_v28  ;;  %v1028_v5 = vld [vmem:[%s2136_s2 + $0x48] sm:$0xff] }
  0x39   : >> { %1599 = vmatprep.subr.bf16.mxu0 %v1799_v6  ;;  %1589 = vmatprep.mubr.bf16.mxu1 %v1679_v29 }
  0x3a   : >> { %1068 = vperm.xlu1 %1646, %v1026_v3   ;;  %1063 = vperm.xlu0 %1645, %v1025_v4  }
  0x3b   : >> { %1506 = vmatpush3.bf16.msra.mxu1 %v1652_v7  ;;  %1600 = vmatpush3.bf16.msra.mxu0 %v1799_v6  ;;  %v1027_v6 = vld [vmem:[%s2136_s2 + $0x40] sm:$0xff]  ;;  %v1030_v7 = vld [vmem:[%s2136_s2 + $0x58] sm:$0xff] }
  0x3c   : >> { %1507 = vmatprep.subr.bf16.mxu1 %v1653_v8  ;;  %1601 = vmatprep.subr.bf16.mxu0 %v1805_v9  ;;  %v1029_v8 = vld [vmem:[%s2136_s2 + $0x50] sm:$0xff] }
  0x3e   : >> { %543 = vmatmul.mubr.bf16.gmra.mrb[4].mxu0 %v1678_v30  ;;  %1590 = vmatmul.mubr.bf16.gmra.mrb[4].mxu1 %v1680_v31 }
  0x3f   : >> { %1508 = vmatpush3.bf16.msra.mxu1 %v1809_v10  ;;  %550 = vmatprep.mubr.bf16.mxu0 %v1681_v32 }
  0x40   : >> { %1509 = vmatprep.subr.bf16.mxu1 %v1656_v11  ;;  %1602 = vmatpush3.bf16.msra.mxu0 %v1805_v9 }
  0x41   : >> { %1593 = vmatprep.mubr.bf16.mxu1 %v1684_v33  ;;  %1603 = vmatprep.subr.bf16.mxu0 %v1814_v12 }
  0x42   : >> { %1078 = vperm.xlu1 %1646, %v1028_v5   ;;  %1073 = vperm.xlu0 %1645, %v1027_v6  }
  0x43   : >> { %1510 = vmatpush3.bf16.msra.mxu1 %v1817_v13 }
  0x44   : >> { %1511 = vmatprep.subr.bf16.mxu1 %v1822_v14  ;;  %1604 = vmatpush3.bf16.msra.mxu0 %v1814_v12 }
  0x45   : >> { %1605 = vmatprep.subr.bf16.mxu0 %v1826_v15 }
  0x46   : >> { %551 = vmatmul.mubr.bf16.gmra.mrb[8].mxu0 %v1683_v34  ;;  %1594 = vmatmul.mubr.bf16.gmra.mrb[8].mxu1 %v1685_v35 }
  0x47   : >> { %1512 = vmatpush3.bf16.msra.mxu1 %v1829_v16  ;;  %558 = vmatprep.mubr.bf16.mxu0 %v1686_v36 }
  0x48   : >> { %1513 = vmatprep.subr.bf16.mxu1 %v1834_v17  ;;  %1606 = vmatpush3.bf16.msra.mxu0 %v1826_v15 }
  0x49   : >> { %829 = vmatprep.mubr.bf16.mxu1 %v1693_v37  ;;  %1607 = vmatprep.subr.bf16.mxu0 %v1839_v18 }
  0x4a   : >> { %1088 = vperm.xlu1 %1646, %v1030_v7   ;;  %1083 = vperm.xlu0 %1645, %v1029_v8  }
  0x4b   : >> { %1514 = vmatpush3.bf16.msra.mxu1 %v1842_v19 }
  0x4c   : >> { %1515 = vmatprep.subr.bf16.mxu1 %v1847_v20  ;;  %1608 = vmatpush3.bf16.msra.mxu0 %v1839_v18 }
  0x4d   : >> { %1609 = vmatprep.subr.bf16.mxu0 %v1852_v21 }
  0x4e   : >> { %559 = vmatmul.mubr.bf16.gmra.mrb[12].mxu0 %v1688_v38 }
  0x4f   : >> { %1516 = vmatpush3.bf16.msra.mxu1 %v1857_v22  ;;  %566 = vmatprep.mubr.bf16.mxu0 %v1689_v39 }
  0x50   : >> { %1517 = vmatprep.subr.bf16.mxu1 %v1860_v23  ;;  %1610 = vmatpush3.bf16.msra.mxu0 %v1852_v21 }
  0x51   : >> { %1611 = vmatprep.subr.bf16.mxu0 %v1865_v24 }
  0x53   : >> { %1518 = vmatpush3.bf16.msra.mxu1 %v1870_v25 }
  0x54   : >> { %1612 = vmatpush3.bf16.msra.mxu0 %v1865_v24 }
  0x56   : >> { %567 = vmatmul.mubr.bf16.gmra.mrb[16].mxu0 %v1694_v41  ;;  %830 = vmatmul.mubr.bf16.vlgmr.msra.gmra.mrb[12].mxu1 %v1691_v40 }
  0x57   : >> { %574 = vmatprep.mubr.bf16.mxu0 %v1695_v42  ;;  %837 = vmatprep.mubr.bf16.mxu1 %v1697_v43 }
  0x5e   : >> { %575 = vmatmul.mubr.bf16.gmra.mrb[20].mxu0 %v1699_v44  ;;  %838 = vmatmul.mubr.bf16.gmra.mrb[16].mxu1 %v1700_v45 }
  0x5f   : >> { %845 = vmatprep.mubr.bf16.mxu1 %v1701_v46  ;;  %1613 = vmatprep.mubr.bf16.mxu0 %v1703_v47 }
  0x66   : >> { %846 = vmatmul.mubr.bf16.gmra.mrb[20].mxu1 %v1704_v48  ;;  %1614 = vmatmul.mubr.bf16.vlgmr.msra.gmra.mrb[24].mxu0 %v1705_v49 }
  0x67   : >> { %853 = vmatprep.mubr.bf16.mxu1 %v1706_v50  ;;  %1617 = vmatprep.mubr.bf16.mxu0 %v1708_v51 }
  0x6e   : >> { %854 = vmatmul.mubr.bf16.gmra.mrb[24].mxu1 %v1709_v52  ;;  %1618 = vmatmul.mubr.bf16.gmra.mrb[28].mxu0 %v1710_v53 }
  0x6f   : >> { %861 = vmatprep.mubr.bf16.mxu1 %v1711_v54  ;;  %1621 = vmatprep.mubr.bf16.mxu0 %v1714_v55 }
  0x76   : >> { %862 = vmatmul.mubr.bf16.gmra.mrb[28].mxu1 %v1713_v56  ;;  %1622 = vmatmul.mubr.bf16.gmra.mrb[32].mxu0 %v1715_v57 }
  0x77   : >> { %869 = vmatprep.mubr.bf16.mxu1 %v1716_v58 }
  0x7e   : >> { %870 = vmatmul.mubr.bf16.gmra.mrb[32].mxu1 %v1718_v59 }
 0x109   : >> { %v1453_v9 = vpop.f32.mrb[0].mxu0  ;;  %v1587_v10 = vpop.f32.mrb[0].mxu1 }
 0x10a   : >> { %v1454_v11 = vpop.f32.mrb[1].mxu0  ;;  %v617_v12 = vpop.f32.mrb[1].mxu1 }
 0x10b   : >> { %v1455_v13 = vadd.f32 %v1454_v11, %v1453_v9  ;;  %v1456_v14 = vpop.f32.mrb[2].mxu0  ;;  %v1588_v15 = vpop.f32.mrb[2].mxu1 }
 0x10c   : >> { %v1457_v16 = vpop.f32.mrb[3].mxu0  ;;  %v620_v17 = vpop.f32.mrb[3].mxu1 }
 0x10d   : >> { %v2040_v18 = vadd.f32 %v1455_v13, %v617_v12  ;;  %v1458_v19 = vadd.f32 %v1457_v16, %v1456_v14 }
 0x10f   : >> { %v2042_v20 = vadd.f32 %v1458_v19, %v620_v17 }
 0x111   : >> { %v1459_v21 = vpop.f32.mrb[4].mxu0  ;;  %v1591_v22 = vpop.f32.mrb[4].mxu1 }
 0x112   : >> { %v1460_v23 = vpop.f32.mrb[5].mxu0  ;;  %v633_v24 = vpop.f32.mrb[5].mxu1 }
 0x113   : >> { %v1461_v25 = vadd.f32 %v1460_v23, %v1459_v21  ;;  %v1462_v26 = vpop.f32.mrb[6].mxu0  ;;  %v1592_v27 = vpop.f32.mrb[6].mxu1 }
 0x114   : >> { %v1463_v28 = vpop.f32.mrb[7].mxu0  ;;  %v636_v29 = vpop.f32.mrb[7].mxu1 }
 0x115   : >> { %v1464_v30 = vadd.f32 %v1463_v28, %v1462_v26  ;;  %v2044_v31 = vadd.f32 %v1587_v10, %v1461_v25 }
 0x117   : >> { %v2046_v32 = vadd.f32 %v1588_v15, %v1464_v30 }
 0x119   : >> { %v1465_v33 = vpop.f32.mrb[8].mxu0  ;;  %v1595_v34 = vpop.f32.mrb[8].mxu1 }
 0x11a   : >> { %v1466_v35 = vpop.f32.mrb[9].mxu0  ;;  %v649_v36 = vpop.f32.mrb[9].mxu1 }
 0x11b   : >> { %v1467_v37 = vadd.f32 %v1466_v35, %v1465_v33  ;;  %v1468_v38 = vpop.f32.mrb[10].mxu0  ;;  %v1596_v39 = vpop.f32.mrb[10].mxu1 }
 0x11c   : >> { %v1469_v40 = vpop.f32.mrb[11].mxu0  ;;  %v652_v41 = vpop.f32.mrb[11].mxu1 }
 0x11d   : >> { %v1470_v42 = vadd.f32 %v1469_v40, %v1468_v38  ;;  %v2048_v43 = vadd.f32 %v1467_v37, %v633_v24 }
 0x11f   : >> { %v2050_v44 = vadd.f32 %v1470_v42, %v636_v29 }
 0x121   : >> { %v1471_v45 = vpop.f32.mrb[12].mxu0 }
 0x122   : >> { %v1472_v46 = vpop.f32.mrb[13].mxu0 }
 0x123   : >> { %v1473_v47 = vadd.f32 %v1472_v46, %v1471_v45  ;;  %v1474_v48 = vpop.f32.mrb[14].mxu0 }
 0x124   : >> { %v1475_v49 = vpop.f32.mrb[15].mxu0 }
 0x125   : >> { %v1476_v50 = vadd.f32 %v1475_v49, %v1474_v48  ;;  %v2052_v51 = vadd.f32 %v1591_v22, %v1473_v47 }
 0x127   : >> { %v2054_v52 = vadd.f32 %v1592_v27, %v1476_v50 }
 0x129   : >> { %v1477_v53 = vpop.f32.mrb[16].mxu0  ;;  %v1519_v54 = vpop.f32.mrb[12].mxu1 }
 0x12a   : >> { %v1478_v55 = vpop.f32.mrb[17].mxu0  ;;  %v1520_v56 = vpop.f32.mrb[13].mxu1 }
 0x12b   : >> { %v1479_v57 = vadd.f32 %v1478_v55, %v1477_v53  ;;  %v1521_v58 = vadd.f32 %v1520_v56, %v1519_v54  ;;  %v1480_v59 = vpop.f32.mrb[18].mxu0  ;;  %v1522_v60 = vpop.f32.mrb[14].mxu1 }
 0x12c   : >> { %v1481_v61 = vpop.f32.mrb[19].mxu0  ;;  %v1523_v62 = vpop.f32.mrb[15].mxu1 }
 0x12d   : >> { %v1482_v63 = vadd.f32 %v1481_v61, %v1480_v59  ;;  %v1524_v0 = vadd.f32 %v1523_v62, %v1522_v60  ;;  %v2056_v1 = vadd.f32 %v1479_v57, %v649_v36 }
 0x12f   : >> { %v2058_v2 = vadd.f32 %v1482_v63, %v652_v41 }
 0x131   : >> { %v1483_v3 = vpop.f32.mrb[20].mxu0  ;;  %v1525_v4 = vpop.f32.mrb[16].mxu1 }
 0x132   : >> { %v1484_v5 = vpop.f32.mrb[21].mxu0  ;;  %v1526_v6 = vpop.f32.mrb[17].mxu1 }
 0x133   : >> { %v1485_v7 = vadd.f32 %v1484_v5, %v1483_v3  ;;  %v1527_v8 = vadd.f32 %v1526_v6, %v1525_v4  ;;  %v1486_v9 = vpop.f32.mrb[22].mxu0  ;;  %v1528_v10 = vpop.f32.mrb[18].mxu1 }
 0x134   : >> { %v1487_v11 = vpop.f32.mrb[23].mxu0  ;;  %v1529_v12 = vpop.f32.mrb[19].mxu1 }
 0x135   : >> { %v1488_v13 = vadd.f32 %v1487_v11, %v1486_v9  ;;  %v1530_v14 = vadd.f32 %v1529_v12, %v1528_v10  ;;  %v2060_v15 = vadd.f32 %v1595_v34, %v1485_v7  ;;  %v1034_v11 = vpop.permute.xlu0 %1033  ;;  %v1044_v12 = vpop.permute.xlu1 %1043 }
 0x137   : >> { %v2062_v16 = vadd.f32 %v1596_v39, %v1488_v13 }
 0x139   : >> { %v1531_v17 = vpop.f32.mrb[20].mxu1  ;;  %v1615_v19 = vpop.f32.mrb[24].mxu0 }
 0x13a   : >> { %v921_v21 = vadd.f32 %v1615_v19, %v1527_v8  ;;  %v1532_v22 = vpop.f32.mrb[21].mxu1  ;;  %v912_v23 = vpop.f32.mrb[25].mxu0 }
 0x13b   : >> { %v1533_v24 = vadd.f32 %v1532_v22, %v1531_v17  ;;  %v913_v25 = vadd.f32 %v1521_v58, %v912_v23  ;;  %v1534_v26 = vpop.f32.mrb[22].mxu1  ;;  %v1616_v27 = vpop.f32.mrb[26].mxu0 }
 0x13c   : >> { %v924_v28 = vadd.f32 %v1616_v27, %v1530_v14  ;;  %v1535_v29 = vpop.f32.mrb[23].mxu1  ;;  %975 = vrot.lane.b32.xlu0 %v921_v21, %s1736_s29  ;;  %v915_v30 = vpop.f32.mrb[27].mxu0 }
 0x13d   : >> { %v1536_v33 = vadd.f32 %v1535_v29, %v1534_v26  ;;  %v916_v34 = vadd.f32 %v1524_v0, %v915_v30  ;;  %v1039_v13 = vpop.permute.xlu0 %1038  ;;  %v1049_v14 = vpop.permute.xlu1 %1048 }
 0x13e   : >> { %977 = vrot.lane.b32.xlu1 %v924_v28, %s1736_s29 }
 0x140   : >> { %971 = vrot.lane.b32.xlu0 %v913_v25, %s1736_s29 }
 0x141   : >> { %v1537_v35 = vpop.f32.mrb[24].mxu1  ;;  %v1619_v36 = vpop.f32.mrb[28].mxu0 }
 0x142   : >> { %v1538_v37 = vpop.f32.mrb[25].mxu1  ;;  %v928_v38 = vpop.f32.mrb[29].mxu0  ;;  %973 = vrot.lane.b32.xlu1 %v916_v34, %s1736_s29 }
 0x143   : >> { %v1539_v39 = vadd.f32 %v1538_v37, %v1537_v35  ;;  %v929_v40 = vadd.f32 %v1533_v24, %v928_v38  ;;  %v1540_v41 = vpop.f32.mrb[26].mxu1  ;;  %v1620_v42 = vpop.f32.mrb[30].mxu0 }
 0x144   : >> { %v1541_v45 = vpop.f32.mrb[27].mxu1  ;;  %v931_v46 = vpop.f32.mrb[31].mxu0 }
 0x145   : >> { %v937_v47 = vadd.f32 %v1619_v36, %v1539_v39  ;;  %v1542_v48 = vadd.f32 %v1541_v45, %v1540_v41  ;;  %v932_v49 = vadd.f32 %v1536_v33, %v931_v46  ;;  %979 = vrot.lane.b32.xlu0 %v929_v40, %s1736_s29  ;;  %v1054_v17 = vpop.permute.xlu0 %1053  ;;  %v1059_v19 = vpop.permute.xlu1 %1058 }
 0x147   : >> { %v940_v50 = vadd.f32 %v1620_v42, %v1542_v48  ;;  %981 = vrot.lane.b32.xlu1 %v932_v49, %s1736_s29 }
 0x149   : >> { %v1543_v53 = vpop.f32.mrb[28].mxu1  ;;  %983 = vrot.lane.b32.xlu0 %v937_v47, %s1736_s29  ;;  %v1623_v54 = vpop.f32.mrb[32].mxu0 }
 0x14a   : >> { %v1544_v55 = vpop.f32.mrb[29].mxu1  ;;  %v944_v56 = vpop.f32.mrb[33].mxu0 }
 0x14b   : >> { %v1545_v57 = vadd.f32 %v1544_v55, %v1543_v53  ;;  %v1546_v58 = vpop.f32.mrb[30].mxu1  ;;  %985 = vrot.lane.b32.xlu1 %v940_v50, %s1736_s29  ;;  %v1624_v59 = vpop.f32.mrb[34].mxu0 }
 0x14c   : >> { %v1547_v60 = vpop.f32.mrb[31].mxu1  ;;  %v947_v61 = vpop.f32.mrb[35].mxu0 }
 0x14d   : >> { %v1548_v62 = vadd.f32 %v1547_v60, %v1546_v58  ;;  %v945_v63 = vadd.f32 %v1545_v57, %v944_v56  ;;  %v1064_v21 = vpop.permute.xlu0 %1063  ;;  %v1069_v22 = vpop.permute.xlu1 %1068 }
 0x14f   : >> { %v948_v0 = vadd.f32 %v1548_v62, %v947_v61  ;;  %987 = vrot.lane.b32.xlu0 %v945_v63, %s1736_s29 }
 0x151   : >> { %v1549_v3 = vpop.f32.mrb[32].mxu1  ;;  %989 = vrot.lane.b32.xlu1 %v948_v0, %s1736_s29  ;;  %v2076_v23 = vpop.permute.xlu0 %1073 }
 0x152   : >> { %v1550_v4 = vpop.f32.mrb[33].mxu1  ;;  %v2078_v24 = vpop.permute.xlu1 %1078 }
 0x153   : >> { %v1551_v5 = vadd.f32 %v1550_v4, %v1549_v3  ;;  %v1552_v6 = vpop.f32.mrb[34].mxu1 }
 0x154   : >> { %v1553_v7 = vpop.f32.mrb[35].mxu1 }
 0x155   : >> { %v953_v8 = vadd.f32 %v1623_v54, %v1551_v5  ;;  %v1554_v9 = vadd.f32 %v1553_v7, %v1552_v6  ;;  %v2080_v25 = vpop.permute.xlu0 %1083 }
 0x156   : >> { %v2082_v26 = vpop.permute.xlu1 %1088 }
 0x157   : >> { %v956_v10 = vadd.f32 %v1624_v59, %v1554_v9  ;;  %991 = vrot.lane.b32.xlu0 %v953_v8, %s1736_s29 }
 0x159   : >> { %993 = vrot.lane.b32.xlu1 %v956_v10, %s1736_s29 }
 0x1ae   : >> { %v976_v27 = vpop.permute.xlu0 %975 }
 0x1af   : >> { %v1009_v28 = vadd.f32 %v976_v27, %v2044_v31 }
 0x1b0   : >> { %v978_v29 = vpop.permute.xlu1 %977 }
 0x1b1   : >> { %v1093_v30 = vadd.f32 %v1044_v12, %v1009_v28  ;;  %v1010_v33 = vadd.f32 %v978_v29, %v2046_v32 }
 0x1b2   : >> { %v972_v34 = vpop.permute.xlu0 %971 }
 0x1b3   : >> { %vm1105_vm0 = vcmp.ge.f32.partialorder %v1093_v30, 0.0  ;;  %v1117_v35 = vmul.f32 0.25, %v1093_v30  ;;  %v1094_v36 = vadd.f32 %v1049_v14, %v1010_v33  ;;  %v1007_v37 = vadd.f32 %v972_v34, %v2040_v18 }
 0x1b4   : >> { %v974_v38 = vpop.permute.xlu1 %973 }
 0x1b5   : >> { %v1129_v39 = vsel %vm1105_vm0, %v1093_v30, %v1117_v35  ;;  %vm1106_vm2 = vcmp.ge.f32.partialorder %v1094_v36, 0.0  ;;  %v1118_v31 = vmul.f32 0.25, %v1094_v36  ;;  %v1091_v40 = vadd.f32 %v1034_v11, %v1007_v37 }
 0x1b6   : >> { %v1426_v41 = vpack.c.bf16 %v1129_v39, %v1129_v39  ;;  %v1008_v42 = vadd.f32 %v974_v38, %v2042_v20 }
 0x1b7   : >> { %v1130_v32 = vsel %vm1106_vm2, %v1094_v36, %v1118_v31  ;;  %vm1103_vm3 = vcmp.ge.f32.partialorder %v1091_v40, 0.0  ;;  %v1115_v45 = vmul.f32 0.25, %v1091_v40  ;;  %v980_v46 = vpop.permute.xlu0 %979 }
 0x1b8   : >> { %1193 = vst.msk [vmem:[%s2089_s4 + $0x8] sm:$0xf] %vm1190_vm1, %v1426_v41  ;;  %v1427_v18 = vpack.c.bf16 %v1130_v32, %v1130_v32  ;;  %v1092_v47 = vadd.f32 %v1039_v13, %v1008_v42  ;;  %v1011_v48 = vadd.f32 %v980_v46, %v2048_v43 }
 0x1b9   : >> { %v1127_v49 = vsel %vm1103_vm3, %v1091_v40, %v1115_v45  ;;  %v982_v50 = vpop.permute.xlu1 %981 }
 0x1ba   : >> { %1194 = vst.msk [vmem:[%s2089_s4 + $0xc] sm:$0xf] %vm1190_vm1, %v1427_v18  ;;  %v1424_v53 = vpack.c.bf16 %v1127_v49, %v1127_v49  ;;  %vm1104_vm4 = vcmp.ge.f32.partialorder %v1092_v47, 0.0  ;;  %v1116_v54 = vmul.f32 0.25, %v1092_v47  ;;  %v1095_v20 = vadd.f32 %v1054_v17, %v1011_v48 }
 0x1bb   : >> { %v1012_v55 = vadd.f32 %v982_v50, %v2050_v44  ;;  %v984_v56 = vpop.permute.xlu0 %983 }
 0x1bc   : >> { %1191 = vst.msk [vmem:[%s2089_s4] sm:$0xf] %vm1190_vm1, %v1424_v53  ;;  %v1128_v57 = vsel %vm1104_vm4, %v1092_v47, %v1116_v54  ;;  %vm1107_vm5 = vcmp.ge.f32.partialorder %v1095_v20, 0.0  ;;  %v1119_v58 = vmul.f32 0.25, %v1095_v20  ;;  %v1013_v43 = vadd.f32 %v984_v56, %v2052_v51 }
 0x1bd   : >> { %v1425_v59 = vpack.c.bf16 %v1128_v57, %v1128_v57  ;;  %v1096_v60 = vadd.f32 %v1059_v19, %v1012_v55  ;;  %v986_v61 = vpop.permute.xlu1 %985 }
 0x1be   : >> { %v1131_v62 = vsel %vm1107_vm5, %v1095_v20, %v1119_v58  ;;  %v1097_v63 = vadd.f32 %v1064_v21, %v1013_v43  ;;  %v1014_v0 = vadd.f32 %v986_v61, %v2054_v52 }
 0x1bf   : >> { %1192 = vst.msk [vmem:[%s2089_s4 + $0x4] sm:$0xf] %vm1190_vm1, %v1425_v59  ;;  %v1428_v3 = vpack.c.bf16 %v1131_v62, %v1131_v62  ;;  %vm1108_vm6 = vcmp.ge.f32.partialorder %v1096_v60, 0.0  ;;  %v1120_v44 = vmul.f32 0.25, %v1096_v60 }
 0x1c0   : >> { %vm1109_vm7 = vcmp.ge.f32.partialorder %v1097_v63, 0.0  ;;  %v1121_v4 = vmul.f32 0.25, %v1097_v63  ;;  %v1098_v5 = vadd.f32 %v1069_v22, %v1014_v0 }
 0x1c1   : >> { %1195 = vst.msk [vmem:[%s2089_s4 + $0x10] sm:$0xf] %vm1190_vm1, %v1428_v3  ;;  %v1132_v51 = vsel %vm1108_vm6, %v1096_v60, %v1120_v44  ;;  %v988_v6 = vpop.permute.xlu0 %987 }
 0x1c2   : >> { %v1429_v7 = vpack.c.bf16 %v1132_v51, %v1132_v51  ;;  %v1133_v8 = vsel %vm1109_vm7, %v1097_v63, %v1121_v4  ;;  %vm1110_vm8 = vcmp.ge.f32.partialorder %v1098_v5, 0.0  ;;  %v1122_v9 = vmul.f32 0.25, %v1098_v5 }
 0x1c3   : >> { %v1430_v52 = vpack.c.bf16 %v1133_v8, %v1133_v8  ;;  %v1015_v10 = vadd.f32 %v988_v6, %v2056_v1  ;;  %v990_v11 = vpop.permute.xlu1 %989 }
 0x1c4   : >> { %1196 = vst.msk [vmem:[%s2089_s4 + $0x14] sm:$0xf] %vm1190_vm1, %v1429_v7  ;;  %v1134_v12 = vsel %vm1110_vm8, %v1098_v5, %v1122_v9  ;;  %v1016_v13 = vadd.f32 %v990_v11, %v2058_v2 }
 0x1c5   : >> { %1197 = vst.msk [vmem:[%s2089_s4 + $0x18] sm:$0xf] %vm1190_vm1, %v1430_v52  ;;  %v1431_v14 = vpack.c.bf16 %v1134_v12, %v1134_v12  ;;  %v1099_v17 = vadd.f32 %v2076_v23, %v1015_v10 }
 0x1c6   : >> { %v1100_v19 = vadd.f32 %v2078_v24, %v1016_v13 }
 0x1c7   : >> { %1198 = vst.msk [vmem:[%s2089_s4 + $0x1c] sm:$0xf] %vm1190_vm1, %v1431_v14  ;;  %vm1111_vm9 = vcmp.ge.f32.partialorder %v1099_v17, 0.0  ;;  %v1123_v21 = vmul.f32 0.25, %v1099_v17 }
 0x1c8   : >> { %vm1112_vm10 = vcmp.ge.f32.partialorder %v1100_v19, 0.0  ;;  %v1124_v1 = vmul.f32 0.25, %v1100_v19 }
 0x1c9   : >> { %v1135_v22 = vsel %vm1111_vm9, %v1099_v17, %v1123_v21  ;;  %v992_v27 = vpop.permute.xlu0 %991 }
 0x1ca   : >> { %v1432_v28 = vpack.c.bf16 %v1135_v22, %v1135_v22  ;;  %v1136_v29 = vsel %vm1112_vm10, %v1100_v19, %v1124_v1  ;;  %v1017_v2 = vadd.f32 %v992_v27, %v2060_v15 }
 0x1cb   : >> { %v1433_v30 = vpack.c.bf16 %v1136_v29, %v1136_v29  ;;  %v994_v33 = vpop.permute.xlu1 %993 }
 0x1cc   : >> { %1199 = vst.msk [vmem:[%s2089_s4 + $0x20] sm:$0xf] %vm1190_vm1, %v1432_v28  ;;  %v1101_v23 = vadd.f32 %v2080_v25, %v1017_v2  ;;  %v1018_v24 = vadd.f32 %v994_v33, %v2062_v16 }
 0x1cd   : >> { %1200 = vst.msk [vmem:[%s2089_s4 + $0x24] sm:$0xf] %vm1190_vm1, %v1433_v30 }
 0x1ce   : >> { %vm1113_vm11 = vcmp.ge.f32.partialorder %v1101_v23, 0.0  ;;  %v1125_v34 = vmul.f32 0.25, %v1101_v23  ;;  %v1102_v35 = vadd.f32 %v2082_v26, %v1018_v24 }
 0x1cf   : > { %176 = sbr.rel (!%p174_p4) target bundleno = 18 (0x12), region = 74 }
 0x1d0   : >> { %v1137_v36 = vsel %vm1113_vm11, %v1101_v23, %v1125_v34  ;;  %vm1114_vm12 = vcmp.ge.f32.partialorder %v1102_v35, 0.0  ;;  %v1126_v37 = vmul.f32 0.25, %v1102_v35 }
 0x1d1   : >> { %v1434_v38 = vpack.c.bf16 %v1137_v36, %v1137_v36 }
 0x1d2   : >> { %v1138_v15 = vsel %vm1114_vm12, %v1102_v35, %v1126_v37 }
 0x1d3   : >> { %1201 = vst.msk [vmem:[%s2089_s4 + $0x28] sm:$0xf] %vm1190_vm1, %v1434_v38  ;;  %v1435_v39 = vpack.c.bf16 %v1138_v15, %v1138_v15 }
 0x1d5   : >> { %1202 = vst.msk [vmem:[%s2089_s4 + $0x2c] sm:$0xf] %vm1190_vm1, %v1435_v39 }
 0x1d6 PF: > { %s13_s12 = sadd.s32 1, %s1729_s12  }
 0x1d7   : > { %p10_p5 = scmp.ge.s32.totalorder %s13_s12, 6  }
 0x1d9   :  { %12 = sbr.rel (!%p10_p5) target bundleno = 1 (0x1), region = 85 }

// kernel: softsplat_baseline_forward.21
= control target key start
LH: loop header
LB: loop body
LE: loop exit
PB: predicated region body
PF: predicated region fallthrough
CT: control target
= control target key end

     0   :  { %s2182_s12 = smov 0   ;;  %s2681_s0 = inlined_call_operand.vmem [shape: bf16[4,6,96,6], index: 0, kind: input, shape index: {}]   ;;  %s2682_s1 = inlined_call_operand.vmem [shape: bf16[3,96,288], index: 1, kind: input, shape index: {}]   ;;  %s2683_s2 = inlined_call_operand.vmem [shape: f32[96,1], index: 2, kind: input, shape index: {}]   ;;  %s2684_s3 = inlined_call_operand.vmem [shape: bf16[4,4,96,4], index: 3, kind: output, shape index: {}]  }
   0x1 LB: > { %s1603_s13 = sadd.s32 4294967295, %s2153_s12   ;;  %p1607_p0 = scmp.ge.s32.totalorder %s2153_s12, 1  ;;  %s2153_s12 = sphi %s2182_s12, %s13_s12  }
   0x2   : > { %p137_p1 = scmp.lt.s32.totalorder %s2153_s12, 5 }
   0x4   : > { %p138_p2 = pnand %p1607_p0, %p137_p1 }
   0x5   : > { %p161_p3 = scmp.lt.s32.totalorder (!%p138_p2), %s1603_s13, 3  ;;  %s2200_s22 = smov (!%p138_p2), 0  }
   0x6   : > { %141 = sbr.rel (%p138_p2) target bundleno = 495 (0x1ef), region = 32 }
   0xd   : > { %s2686_s13 = smov (!%p161_p3, %s1603_s13), 3 }
   0xe   : > { %s2030_s14 = smul.u32 288, %s2686_s13 }
   0xf   : > { %s2031_s15 = smul.u32 192, %s2686_s13 }
  0x10   : > { %s2193_s18 = scalar_lea.vmem %s2681_s0, %s2030_s14 }
  0x11   : > { %s2198_s21 = scalar_lea.vmem %s2684_s3, %s2031_s15 }
  0x12 LB: >> { %v2059_v0 = vld [vmem:[%s2682_s1 + $0x8] ss:$12 sps:$4 sm:$0xff]   ;;  %vm447_vm0 = vcmask 261120   ;;  %s1788_s25 = smul.u32 48, %s2157_s22  ;;  %v2061_v8 = vld [vmem:[%s2682_s1 + $0x20] ss:$12 sps:$4 sm:$0xff]   ;;  %s2157_s22 = sphi %s2200_s22, %s177_s22  }
  0x13   : >> { %1986 = vmatprep.mubr.msk.bf16.mxu1 %vm447_vm0, %v2059_v0  ;;  %v2069_v11 = vld [vmem:[%s2682_s1 + $0x38] ss:$12 sps:$4 sm:$0xff]   ;;  %v2070_v14 = vld [vmem:[%s2682_s1 + $0x50] ss:$12 sps:$4 sm:$0xff]   ;;  %v2075_v17 = vld [vmem:[%s2682_s1 + $0x68] ss:$12 sps:$4 sm:$0xff]  }
  0x14   : >> { %s2213_s26 = scalar_lea.vmem %s2193_s18, %s1788_s25  ;;  %v2079_v19 = vld [vmem:[%s2682_s1 + $0x4] ss:$12 sps:$4 sm:$0xff]   ;;  %v2076_v21 = vld [vmem:[%s2682_s1 + $0x80] ss:$12 sps:$4 sm:$0xff]   ;;  %v2080_v27 = vld [vmem:[%s2682_s1 + $0x1c] ss:$12 sps:$4 sm:$0xff]   ;;  %s2633_s27 = scalar_lea.vmem %s2198_s21, %s1788_s25 }
  0x15   : >> { %v2216_v1 = vld [vmem:[%s2213_s26 + $0x40] sm:$0xff]   ;;  %v2227_v4 = vld [vmem:[%s2213_s26 + $0x48] sm:$0xff]   ;;  %v2240_v7 = vld [vmem:[%s2213_s26 + $0x50] sm:$0xff]   ;;  %498 = vmatprep.mubr.bf16.mxu0 %v2079_v19  ;;  %s2160_s24 = smov 127   ;;  %vm1520_vm3 = vcmask 27648   ;;  %s177_s22 = sadd.s32 1, %s2157_s22  }
  0x16   : >> { %v2219_v2 = vld [vmem:[%s2213_s26 + $0x80] sm:$0xff]   ;;  %1802 = vmatprep.subr.bf16.mxu0 %v2216_v1  ;;  %v2232_v5 = vld [vmem:[%s2213_s26 + $0x88] sm:$0xff]   ;;  %v2248_v9 = vld [vmem:[%s2213_s26 + $0x10] sm:$0xff]   ;;  %p174_p4 = scmp.ge.s32.totalorder %s177_s22, 4  }
  0x17   : >> { %v2223_v3 = vld [vmem:[%s2213_s26] sm:$0xff]   ;;  %1982 = vmatprep.subr.bf16.mxu1 %v2219_v2  ;;  %v2236_v6 = vld [vmem:[%s2213_s26 + $0x8] sm:$0xff]   ;;  %v2253_v10 = vld [vmem:[%s2213_s26 + $0x58] sm:$0xff]  }
  0x18   : >> { %1803 = vmatpush3.bf16.msra.mxu0 %v2223_v3  ;;  %1983 = vmatpush3.bf16.msra.mxu1 %v2219_v2  ;;  %v2262_v12 = vld [vmem:[%s2213_s26 + $0x18] sm:$0xff]   ;;  %v2267_v13 = vld [vmem:[%s2213_s26 + $0x60] sm:$0xff]   ;;  %v2281_v16 = vld [vmem:[%s2213_s26 + $0x68] sm:$0xff]  }
  0x19   : >> { %1804 = vmatprep.subr.bf16.mxu0 %v2227_v4  ;;  %1984 = vmatprep.subr.bf16.mxu1 %v2232_v5  ;;  %v2276_v15 = vld [vmem:[%s2213_s26 + $0x20] sm:$0xff]   ;;  %v2287_v18 = vld [vmem:[%s2213_s26 + $0x28] sm:$0xff]   ;;  %v2298_v20 = vld [vmem:[%s2213_s26 + $0x70] sm:$0xff]  }
  0x1a   : >> { %v2307_v22 = vld [vmem:[%s2213_s26 + $0x30] sm:$0xff]   ;;  %v2312_v23 = vld [vmem:[%s2213_s26 + $0x78] sm:$0xff]   ;;  %v2077_v26 = vld [vmem:[%s2682_s1] ss:$12 sps:$4 sm:$0xff]  }
  0x1b   : >> { %v2084_v24 = vld [vmem:[%s2682_s1 + $0x94] ss:$12 sps:$4 sm:$0xff]   ;;  %v2321_v25 = vld [vmem:[%s2213_s26 + $0x38] sm:$0xff]   ;;  %v2094_v35 = vld [vmem:[%s2682_s1 + $0xc4] ss:$12 sps:$4 sm:$0xff]   ;;  %s2161_s26 = smov 126  }
  0x1c   : >> { %1805 = vmatpush3.bf16.msra.mxu0 %v2236_v6  ;;  %1985 = vmatpush3.bf16.msra.mxu1 %v2232_v5  ;;  %v2082_v28 = vld [vmem:[%s2682_s1 + $0x90] ss:$12 sps:$4 sm:$0xff]   ;;  %v2085_v29 = vld [vmem:[%s2682_s1 + $0x18] ss:$12 sps:$4 sm:$0xff]   ;;  %v2086_v30 = vld [vmem:[%s2682_s1 + $0x34] ss:$12 sps:$4 sm:$0xff]  }
  0x1d   : >> { %1806 = vmatprep.subr.bf16.mxu0 %v2240_v7  ;;  %1862 = vmatprep.subr.bf16.mxu1 %v2216_v1  ;;  %v2088_v31 = vld [vmem:[%s2682_s1 + $0xac] ss:$12 sps:$4 sm:$0xff]   ;;  %v2090_v32 = vld [vmem:[%s2682_s1 + $0x30] ss:$12 sps:$4 sm:$0xff]   ;;  %v2091_v33 = vld [vmem:[%s2682_s1 + $0xa8] ss:$12 sps:$4 sm:$0xff]  }
  0x1e   : >> { %v2092_v34 = vld [vmem:[%s2682_s1 + $0x4c] ss:$12 sps:$4 sm:$0xff]   ;;  %v2096_v36 = vld [vmem:[%s2682_s1 + $0x48] ss:$12 sps:$4 sm:$0xff]   ;;  %v2098_v38 = vld [vmem:[%s2682_s1 + $0x64] ss:$12 sps:$4 sm:$0xff]  }
  0x1f   : >> { %1987 = vmatmul.mubr.msk.bf16.vlgmr.msra.gmra.mrb[0].mxu1 %vm447_vm0, %v2061_v8  ;;  %v2097_v37 = vld [vmem:[%s2682_s1 + $0xc0] ss:$12 sps:$4 sm:$0xff]   ;;  %v2100_v39 = vld [vmem:[%s2682_s1 + $0xdc] ss:$12 sps:$4 sm:$0xff]   ;;  %v2103_v41 = vld [vmem:[%s2682_s1 + $0xd8] ss:$12 sps:$4 sm:$0xff]  }
  0x20   : >> { %1807 = vmatpush3.bf16.msra.mxu0 %v2248_v9  ;;  %1863 = vmatpush3.bf16.msra.mxu1 %v2223_v3  ;;  %v2102_v40 = vld [vmem:[%s2682_s1 + $0x60] ss:$12 sps:$4 sm:$0xff]   ;;  %v2104_v42 = vld [vmem:[%s2682_s1 + $0x7c] ss:$12 sps:$4 sm:$0xff]   ;;  %v2108_v44 = vld [vmem:[%s2682_s1 + $0x78] ss:$12 sps:$4 sm:$0xff]  }
  0x21   : >> { %1808 = vmatprep.subr.bf16.mxu0 %v2253_v10  ;;  %1864 = vmatprep.subr.bf16.mxu1 %v2227_v4  ;;  %v2106_v43 = vld [vmem:[%s2682_s1 + $0xf4] ss:$12 sps:$4 sm:$0xff]   ;;  %v2109_v45 = vld [vmem:[%s2682_s1 + $0xf0] ss:$12 sps:$4 sm:$0xff]   ;;  %v2110_v46 = vld [vmem:[%s2682_s1 + $0x10c] ss:$12 sps:$4 sm:$0xff]  }
  0x22   : >> { %1990 = vmatprep.mubr.msk.bf16.mxu1 %vm447_vm0, %v2069_v11  ;;  %v2112_v47 = vld [vmem:[%s2682_s1 + $0x98] ss:$12 sps:$4 sm:$0xff]   ;;  %v2113_v48 = vld [vmem:[%s2682_s1 + $0x108] ss:$12 sps:$4 sm:$0xff]   ;;  %v2114_v49 = vld [vmem:[%s2682_s1 + $0xb0] ss:$12 sps:$4 sm:$0xff]  }
  0x23   : >> { %v2115_v50 = vld [vmem:[%s2682_s1 + $0xc8] ss:$12 sps:$4 sm:$0xff]   ;;  %v2118_v51 = vld [vmem:[%s2682_s1 + $0x124] ss:$12 sps:$4 sm:$0xff]   ;;  %v2116_v52 = vld [vmem:[%s2682_s1 + $0x120] ss:$12 sps:$4 sm:$0xff]  }
  0x24   : >> { %1809 = vmatpush3.bf16.msra.mxu0 %v2262_v12  ;;  %1865 = vmatpush3.bf16.msra.mxu1 %v2236_v6  ;;  %v2119_v53 = vld [vmem:[%s2682_s1 + $0xe0] ss:$12 sps:$4 sm:$0xff]   ;;  %v2120_v54 = vld [vmem:[%s2682_s1 + $0xf8] ss:$12 sps:$4 sm:$0xff]   ;;  %v2121_v55 = vld [vmem:[%s2682_s1 + $0x13c] ss:$12 sps:$4 sm:$0xff]  }
  0x25   : >> { %1810 = vmatprep.subr.bf16.mxu0 %v2267_v13  ;;  %1866 = vmatprep.subr.bf16.mxu1 %v2240_v7  ;;  %v2123_v56 = vld [vmem:[%s2682_s1 + $0x110] ss:$12 sps:$4 sm:$0xff]   ;;  %v2124_v57 = vld [vmem:[%s2682_s1 + $0x138] ss:$12 sps:$4 sm:$0xff]   ;;  %v2125_v58 = vld [vmem:[%s2682_s1 + $0x154] ss:$12 sps:$4 sm:$0xff]  }
  0x26   : >> { %v2127_v59 = vld [vmem:[%s2682_s1 + $0x128] ss:$12 sps:$4 sm:$0xff]   ;;  %v2128_v60 = vld [vmem:[%s2682_s1 + $0x150] ss:$12 sps:$4 sm:$0xff]   ;;  %v2129_v61 = vld [vmem:[%s2682_s1 + $0x140] ss:$12 sps:$4 sm:$0xff]  }
  0x27   : >> { %1991 = vmatmul.mubr.msk.bf16.gmra.mrb[4].mxu1 %vm447_vm0, %v2070_v14  ;;  %v2130_v62 = vld [vmem:[%s2682_s1 + $0x16c] ss:$12 sps:$4 sm:$0xff]   ;;  %v2133_v0 = vld [vmem:[%s2682_s1 + $0x168] ss:$12 sps:$4 sm:$0xff]  }
  0x28   : >> { %1811 = vmatpush3.bf16.msra.mxu0 %v2276_v15  ;;  %1867 = vmatpush3.bf16.msra.mxu1 %v2248_v9  ;;  %v2132_v63 = vld [vmem:[%s2682_s1 + $0x158] ss:$12 sps:$4 sm:$0xff]   ;;  %v1351_v8 = vld [vmem:[%s2683_s2 + $0x8] sm:$0xff]  ;;  %v1360_v19 = vld [vmem:[%s2683_s2 + $0x50] sm:$0xff] }
  0x29   : >> { %1812 = vmatprep.subr.bf16.mxu0 %v2281_v16  ;;  %1868 = vmatprep.subr.bf16.mxu1 %v2253_v10  ;;  %v1353_v11 = vld [vmem:[%s2683_s2 + $0x18] sm:$0xff]  ;;  %v1355_v14 = vld [vmem:[%s2683_s2 + $0x28] sm:$0xff] }
  0x2a   : >> { %1994 = vmatprep.mubr.msk.bf16.mxu1 %vm447_vm0, %v2075_v17  ;;  %v1358_v17 = vld [vmem:[%s2683_s2 + $0x40] sm:$0xff] }
  0x2c   : >> { %1813 = vmatpush3.bf16.msra.mxu0 %v2287_v18  ;;  %1869 = vmatpush3.bf16.msra.mxu1 %v2262_v12 }
  0x2d   : >> { %1814 = vmatprep.subr.bf16.mxu0 %v2298_v20  ;;  %1870 = vmatprep.subr.bf16.mxu1 %v2267_v13 }
  0x2f   : >> { %1995 = vmatmul.mubr.msk.bf16.gmra.mrb[8].mxu1 %vm447_vm0, %v2076_v21 }
  0x30   : >> { %1815 = vmatpush3.bf16.msra.mxu0 %v2307_v22  ;;  %1871 = vmatpush3.bf16.msra.mxu1 %v2276_v15 }
  0x31   : >> { %1816 = vmatprep.subr.bf16.mxu0 %v2312_v23  ;;  %1872 = vmatprep.subr.bf16.mxu1 %v2281_v16 }
  0x32   : >> { %805 = vmatprep.mubr.bf16.mxu1 %v2084_v24 }
  0x34   : >> { %1817 = vmatpush3.bf16.msra.mxu0 %v2321_v25  ;;  %1873 = vmatpush3.bf16.msra.mxu1 %v2287_v18 }
  0x35   : >> { %1874 = vmatprep.subr.bf16.mxu1 %v2298_v20  ;;  %1998 = vmatprep.subr.bf16.mxu0 %v2219_v2 }
  0x37   : >> { %499 = vmatmul.mubr.bf16.vlgmr.msra.gmra.mrb[0].mxu0 %v2077_v26 }
  0x38   : >> { %1875 = vmatpush3.bf16.msra.mxu1 %v2307_v22  ;;  %506 = vmatprep.mubr.bf16.mxu0 %v2080_v27 }
  0x39   : >> { %1876 = vmatprep.subr.bf16.mxu1 %v2312_v23  ;;  %1999 = vmatpush3.bf16.msra.mxu0 %v2219_v2 }
  0x3a   : >> { %2000 = vmatprep.subr.bf16.mxu0 %v2232_v5 }
  0x3c   : >> { %1877 = vmatpush3.bf16.msra.mxu1 %v2321_v25 }
  0x3d   : >> { %1922 = vmatprep.subr.bf16.mxu1 %v2216_v1  ;;  %2001 = vmatpush3.bf16.msra.mxu0 %v2232_v5  ;;  %v2134_v1 = vld [vmem:[%s2682_s1 + $0x170] ss:$12 sps:$4 sm:$0xff]  }
  0x3e   : >> { %2014 = vmatprep.subr.bf16.mxu0 %v2219_v2 }
  0x3f   : >> { %507 = vmatmul.mubr.bf16.gmra.mrb[4].mxu0 %v2085_v29  ;;  %806 = vmatmul.mubr.bf16.vlgmr.msra.gmra.mrb[12].mxu1 %v2082_v28 }
  0x40   : >> { %1923 = vmatpush3.bf16.msra.mxu1 %v2223_v3  ;;  %514 = vmatprep.mubr.bf16.mxu0 %v2086_v30  ;;  %v2138_v3 = vld [vmem:[%s2682_s1 + $0x188] ss:$12 sps:$4 sm:$0xff]  }
  0x41   : >> { %1924 = vmatprep.subr.bf16.mxu1 %v2227_v4  ;;  %813 = vmatprep.mubr.bf16.mxu1 %v2088_v31  ;;  %v2137_v4 = vld [vmem:[%s2682_s1 + $0x180] ss:$12 sps:$4 sm:$0xff]  }
  0x44   : >> { %1925 = vmatpush3.bf16.msra.mxu1 %v2236_v6  ;;  %v2140_v6 = vld [vmem:[%s2682_s1 + $0x19c] ss:$12 sps:$4 sm:$0xff]  }
  0x45   : >> { %1926 = vmatprep.subr.bf16.mxu1 %v2240_v7  ;;  %v2159_v7 = vmov 0  }
  0x46   : >> { %2052 = vset.pattern.permute.xlu1 %v2159_v7  ;;  %2051 = vset.pattern.permute.xlu0 %v2159_v7 }
  0x47   : >> { %515 = vmatmul.mubr.bf16.gmra.mrb[8].mxu0 %v2090_v32  ;;  %814 = vmatmul.mubr.bf16.gmra.mrb[16].mxu1 %v2091_v33 }
  0x48   : >> { %1927 = vmatpush3.bf16.msra.mxu1 %v2248_v9  ;;  %522 = vmatprep.mubr.bf16.mxu0 %v2092_v34  ;;  %v1350_v9 = vld [vmem:[%s2683_s2] sm:$0xff] }
  0x49   : >> { %821 = vmatprep.mubr.bf16.mxu1 %v2094_v35  ;;  %1928 = vmatprep.subr.bf16.mxu1 %v2253_v10  ;;  %v1352_v10 = vld [vmem:[%s2683_s2 + $0x10] sm:$0xff] }
  0x4a   : >> { %1369 = vperm.xlu1 %2052, %v1351_v8   ;;  %1364 = vperm.xlu0 %2051, %v1350_v9  }
  0x4c   : >> { %1929 = vmatpush3.bf16.msra.mxu1 %v2262_v12  ;;  %v2142_v12 = vld [vmem:[%s2682_s1 + $0x198] ss:$12 sps:$4 sm:$0xff]  }
  0x4d   : >> { %1930 = vmatprep.subr.bf16.mxu1 %v2267_v13  ;;  %v1354_v13 = vld [vmem:[%s2683_s2 + $0x20] sm:$0xff] }
  0x4e   : >> { %1374 = vperm.xlu1 %2052, %v1352_v10   ;;  %1379 = vperm.xlu0 %2051, %v1353_v11  }
  0x4f   : >> { %523 = vmatmul.mubr.bf16.gmra.mrb[12].mxu0 %v2096_v36  ;;  %822 = vmatmul.mubr.bf16.gmra.mrb[20].mxu1 %v2097_v37 }
  0x50   : >> { %530 = vmatprep.mubr.bf16.mxu0 %v2098_v38  ;;  %829 = vmatprep.mubr.bf16.mxu1 %v2100_v39 }
  0x51   : >> { %1931 = vmatpush3.bf16.msra.mxu1 %v2276_v15  ;;  %v1356_v15 = vld [vmem:[%s2683_s2 + $0x30] sm:$0xff] }
  0x52   : >> { %1932 = vmatprep.subr.bf16.mxu1 %v2281_v16  ;;  %1384 = vperm.xlu1 %2052, %v1354_v13   ;;  %v1357_v16 = vld [vmem:[%s2683_s2 + $0x38] sm:$0xff] }
  0x53   : >> { %1389 = vperm.xlu0 %2051, %v1355_v14  }
  0x55   : >> { %1933 = vmatpush3.bf16.msra.mxu1 %v2287_v18  ;;  %v1359_v18 = vld [vmem:[%s2683_s2 + $0x48] sm:$0xff] }
  0x56   : >> { %1934 = vmatprep.subr.bf16.mxu1 %v2298_v20  ;;  %1394 = vperm.xlu1 %2052, %v1356_v15   ;;  %v1361_v20 = vld [vmem:[%s2683_s2 + $0x58] sm:$0xff] }
  0x57   : >> { %531 = vmatmul.mubr.bf16.gmra.mrb[16].mxu0 %v2102_v40  ;;  %830 = vmatmul.mubr.bf16.gmra.mrb[24].mxu1 %v2103_v41 }
  0x58   : >> { %538 = vmatprep.mubr.bf16.mxu0 %v2104_v42  ;;  %837 = vmatprep.mubr.bf16.mxu1 %v2106_v43 }
  0x59   : >> { %1935 = vmatpush3.bf16.msra.mxu1 %v2307_v22  ;;  %1399 = vperm.xlu0 %2051, %v1357_v16  }
  0x5a   : >> { %1936 = vmatprep.subr.bf16.mxu1 %v2312_v23  ;;  %1404 = vperm.xlu1 %2052, %v1358_v17  }
  0x5d   : >> { %1937 = vmatpush3.bf16.msra.mxu1 %v2321_v25  ;;  %1409 = vperm.xlu0 %2051, %v1359_v18  }
  0x5e   : >> { %1414 = vperm.xlu1 %2052, %v1360_v19  }
  0x5f   : >> { %539 = vmatmul.mubr.bf16.gmra.mrb[20].mxu0 %v2108_v44  ;;  %838 = vmatmul.mubr.bf16.gmra.mrb[28].mxu1 %v2109_v45 }
  0x60   : >> { %845 = vmatprep.mubr.bf16.mxu1 %v2110_v46  ;;  %2002 = vmatprep.mubr.msk.bf16.mxu0 %vm447_vm0, %v2112_v47 }
  0x61   : >> { %1419 = vperm.xlu0 %2051, %v1361_v20  }
  0x67   : >> { %846 = vmatmul.mubr.bf16.gmra.mrb[32].mxu1 %v2113_v48  ;;  %2003 = vmatmul.mubr.msk.bf16.vlgmr.msra.gmra.mrb[24].mxu0 %vm447_vm0, %v2114_v49 }
  0x68   : >> { %2006 = vmatprep.mubr.msk.bf16.mxu0 %vm447_vm0, %v2115_v50  ;;  %1160 = vmatprep.mubr.bf16.mxu1 %v2118_v51 }
  0x69   : >> { %2015 = vmatpush3.bf16.msra.mxu0 %v2219_v2  ;;  %v2135_v2 = vld [vmem:[%s2682_s1 + $0x184] ss:$12 sps:$4 sm:$0xff]  }
  0x6a   : >> { %2016 = vmatprep.subr.bf16.mxu0 %v2232_v5 }
  0x6d   : >> { %2017 = vmatpush3.bf16.msra.mxu0 %v2232_v5  ;;  %v2139_v5 = vld [vmem:[%s2682_s1 + $0x1a0] ss:$12 sps:$4 sm:$0xff]  }
  0x6f   : >> { %2007 = vmatmul.mubr.msk.bf16.gmra.mrb[28].mxu0 %vm447_vm0, %v2119_v53  ;;  %1161 = vmatmul.mubr.bf16.vlgmr.msra.gmra.mrb[36].mxu1 %v2116_v52 }
  0x70   : >> { %2010 = vmatprep.mubr.msk.bf16.mxu0 %vm447_vm0, %v2120_v54  ;;  %1168 = vmatprep.mubr.bf16.mxu1 %v2121_v55 }
  0x77   : >> { %2011 = vmatmul.mubr.msk.bf16.gmra.mrb[32].mxu0 %vm447_vm0, %v2123_v56  ;;  %1169 = vmatmul.mubr.bf16.gmra.mrb[40].mxu1 %v2124_v57 }
  0x78   : >> { %1176 = vmatprep.mubr.bf16.mxu1 %v2125_v58  ;;  %2018 = vmatprep.mubr.msk.bf16.mxu0 %vm447_vm0, %v2127_v59 }
  0x7f   : >> { %1177 = vmatmul.mubr.bf16.gmra.mrb[44].mxu1 %v2128_v60  ;;  %2019 = vmatmul.mubr.msk.bf16.vlgmr.msra.gmra.mrb[36].mxu0 %vm447_vm0, %v2129_v61 }
  0x80   : >> { %1184 = vmatprep.mubr.bf16.mxu1 %v2130_v62  ;;  %2022 = vmatprep.mubr.msk.bf16.mxu0 %vm447_vm0, %v2132_v63 }
  0x87   : >> { %1185 = vmatmul.mubr.bf16.gmra.mrb[48].mxu1 %v2133_v0  ;;  %2023 = vmatmul.mubr.msk.bf16.gmra.mrb[40].mxu0 %vm447_vm0, %v2134_v1 }
  0x88   : >> { %1192 = vmatprep.mubr.bf16.mxu1 %v2135_v2  ;;  %2026 = vmatprep.mubr.msk.bf16.mxu0 %vm447_vm0, %v2138_v3 }
  0x8f   : >> { %1193 = vmatmul.mubr.bf16.gmra.mrb[52].mxu1 %v2137_v4  ;;  %2027 = vmatmul.mubr.msk.bf16.gmra.mrb[44].mxu0 %vm447_vm0, %v2139_v5 }
  0x90   : >> { %1200 = vmatprep.mubr.bf16.mxu1 %v2140_v6 }
  0x97   : >> { %1201 = vmatmul.mubr.bf16.gmra.mrb[56].mxu1 %v2142_v12 }
  0xf2   : >> { %v1988_v21 = vpop.f32.mrb[0].mxu1 }
  0xf3   : >> { %v581_v22 = vpop.f32.mrb[1].mxu1 }
  0xf4   : >> { %v1989_v23 = vpop.f32.mrb[2].mxu1 }
  0xf5   : >> { %v584_v24 = vpop.f32.mrb[3].mxu1 }
  0xfa   : >> { %v1992_v25 = vpop.f32.mrb[4].mxu1 }
  0xfb   : >> { %v597_v26 = vpop.f32.mrb[5].mxu1 }
  0xfc   : >> { %v1993_v27 = vpop.f32.mrb[6].mxu1 }
  0xfd   : >> { %v600_v28 = vpop.f32.mrb[7].mxu1 }
 0x102   : >> { %v2541_v29 = vpop.f32.mrb[8].mxu1 }
 0x103   : >> { %v2543_v30 = vpop.f32.mrb[9].mxu1 }
 0x104   : >> { %v2545_v31 = vpop.f32.mrb[10].mxu1 }
 0x105   : >> { %v2547_v32 = vpop.f32.mrb[11].mxu1 }
 0x10a   : >> { %v1818_v33 = vpop.f32.mrb[0].mxu0 }
 0x10b   : >> { %v1819_v34 = vpop.f32.mrb[1].mxu0 }
 0x10c   : >> { %v1820_v35 = vadd.f32 %v1819_v34, %v1818_v33  ;;  %v1821_v36 = vpop.f32.mrb[2].mxu0 }
 0x10d   : >> { %v1822_v37 = vpop.f32.mrb[3].mxu0 }
 0x10e   : >> { %v1823_v38 = vadd.f32 %v1822_v37, %v1821_v36  ;;  %v2549_v39 = vadd.f32 %v1820_v35, %v581_v22 }
 0x110   : >> { %v2551_v40 = vadd.f32 %v1823_v38, %v584_v24 }
 0x112   : >> { %v1824_v41 = vpop.f32.mrb[4].mxu0  ;;  %v1878_v42 = vpop.f32.mrb[12].mxu1 }
 0x113   : >> { %v1825_v43 = vpop.f32.mrb[5].mxu0  ;;  %v1879_v44 = vpop.f32.mrb[13].mxu1 }
 0x114   : >> { %v1826_v45 = vadd.f32 %v1825_v43, %v1824_v41  ;;  %v2553_v46 = vadd.f32 %v1879_v44, %v1878_v42  ;;  %v1827_v47 = vpop.f32.mrb[6].mxu0  ;;  %v1881_v48 = vpop.f32.mrb[14].mxu1 }
 0x115   : >> { %v1828_v49 = vpop.f32.mrb[7].mxu0  ;;  %v1882_v50 = vpop.f32.mrb[15].mxu1 }
 0x116   : >> { %v1829_v51 = vadd.f32 %v1828_v49, %v1827_v47  ;;  %v2555_v52 = vadd.f32 %v1882_v50, %v1881_v48  ;;  %v2557_v53 = vadd.f32 %v1988_v21, %v1826_v45 }
 0x118   : >> { %v2559_v54 = vadd.f32 %v1989_v23, %v1829_v51 }
 0x11a   : >> { %v1830_v55 = vpop.f32.mrb[8].mxu0  ;;  %v1884_v56 = vpop.f32.mrb[16].mxu1 }
 0x11b   : >> { %v1831_v57 = vpop.f32.mrb[9].mxu0  ;;  %v1885_v58 = vpop.f32.mrb[17].mxu1 }
 0x11c   : >> { %v1832_v59 = vadd.f32 %v1831_v57, %v1830_v55  ;;  %v1886_v60 = vadd.f32 %v1885_v58, %v1884_v56  ;;  %v1833_v61 = vpop.f32.mrb[10].mxu0  ;;  %v1887_v62 = vpop.f32.mrb[18].mxu1 }
 0x11d   : >> { %v1834_v63 = vpop.f32.mrb[11].mxu0  ;;  %v1888_v0 = vpop.f32.mrb[19].mxu1 }
 0x11e   : >> { %v1835_v1 = vadd.f32 %v1834_v63, %v1833_v61  ;;  %v1889_v2 = vadd.f32 %v1888_v0, %v1887_v62  ;;  %v2561_v3 = vadd.f32 %v1832_v59, %v597_v26 }
 0x120   : >> { %v2563_v4 = vadd.f32 %v1835_v1, %v600_v28 }
 0x122   : >> { %v1836_v5 = vpop.f32.mrb[12].mxu0  ;;  %v1890_v6 = vpop.f32.mrb[20].mxu1 }
 0x123   : >> { %v1837_v7 = vpop.f32.mrb[13].mxu0  ;;  %v1891_v8 = vpop.f32.mrb[21].mxu1 }
 0x124   : >> { %v1838_v9 = vadd.f32 %v1837_v7, %v1836_v5  ;;  %v1892_v10 = vadd.f32 %v1891_v8, %v1890_v6  ;;  %v1839_v11 = vpop.f32.mrb[14].mxu0  ;;  %v1893_v12 = vpop.f32.mrb[22].mxu1 }
 0x125   : >> { %v1840_v13 = vpop.f32.mrb[15].mxu0  ;;  %v1894_v14 = vpop.f32.mrb[23].mxu1 }
 0x126   : >> { %v1841_v15 = vadd.f32 %v1840_v13, %v1839_v11  ;;  %v1895_v16 = vadd.f32 %v1894_v14, %v1893_v12  ;;  %v2565_v17 = vadd.f32 %v1992_v25, %v1838_v9 }
 0x128   : >> { %v2567_v18 = vadd.f32 %v1993_v27, %v1841_v15 }
 0x12a   : >> { %v1842_v19 = vpop.f32.mrb[16].mxu0  ;;  %v1896_v20 = vpop.f32.mrb[24].mxu1 }
 0x12b   : >> { %v1843_v21 = vpop.f32.mrb[17].mxu0  ;;  %v1897_v22 = vpop.f32.mrb[25].mxu1 }
 0x12c   : >> { %v1844_v23 = vadd.f32 %v1843_v21, %v1842_v19  ;;  %v1898_v24 = vadd.f32 %v1897_v22, %v1896_v20  ;;  %v1845_v26 = vpop.f32.mrb[18].mxu0  ;;  %v1899_v28 = vpop.f32.mrb[26].mxu1 }
 0x12d   : >> { %v1846_v33 = vpop.f32.mrb[19].mxu0  ;;  %v1900_v34 = vpop.f32.mrb[27].mxu1 }
 0x12e   : >> { %v1847_v35 = vadd.f32 %v1846_v33, %v1845_v26  ;;  %v1901_v36 = vadd.f32 %v1900_v34, %v1899_v28  ;;  %v2570_v37 = vadd.f32 %v1844_v23, %v2543_v30 }
 0x130   : >> { %v2573_v25 = vadd.f32 %v1847_v35, %v2547_v32 }
 0x132   : >> { %v1848_v27 = vpop.f32.mrb[20].mxu0  ;;  %v1902_v38 = vpop.f32.mrb[28].mxu1 }
 0x133   : >> { %v1849_v41 = vpop.f32.mrb[21].mxu0  ;;  %v1903_v42 = vpop.f32.mrb[29].mxu1 }
 0x134   : >> { %v1850_v43 = vadd.f32 %v1849_v41, %v1848_v27  ;;  %v1904_v44 = vadd.f32 %v1903_v42, %v1902_v38  ;;  %v1851_v45 = vpop.f32.mrb[22].mxu0  ;;  %v1905_v47 = vpop.f32.mrb[30].mxu1 }
 0x135   : >> { %v1852_v48 = vpop.f32.mrb[23].mxu0  ;;  %v1906_v49 = vpop.f32.mrb[31].mxu1 }
 0x136   : >> { %v1853_v50 = vadd.f32 %v1852_v48, %v1851_v45  ;;  %v1907_v51 = vadd.f32 %v1906_v49, %v1905_v47  ;;  %v2576_v55 = vadd.f32 %v2541_v29, %v1850_v43 }
 0x138   : >> { %v2579_v30 = vadd.f32 %v2545_v31, %v1853_v50 }
 0x13a   : >> { %v1908_v32 = vpop.f32.mrb[32].mxu1  ;;  %v2004_v56 = vpop.f32.mrb[24].mxu0 }
 0x13b   : >> { %v897_v57 = vadd.f32 %v2004_v56, %v1886_v60  ;;  %v1909_v58 = vpop.f32.mrb[33].mxu1  ;;  %v888_v59 = vpop.f32.mrb[25].mxu0 }
 0x13c   : >> { %v1910_v61 = vadd.f32 %v1909_v58, %v1908_v32  ;;  %v889_v62 = vadd.f32 %v2553_v46, %v888_v59  ;;  %v1911_v63 = vpop.f32.mrb[34].mxu1  ;;  %v2005_v0 = vpop.f32.mrb[26].mxu0 }
 0x13d   : >> { %v900_v1 = vadd.f32 %v2005_v0, %v1889_v2  ;;  %v1912_v5 = vpop.f32.mrb[35].mxu1  ;;  %951 = vrot.lane.b32.xlu1 %v897_v57, %s2160_s24  ;;  %v891_v29 = vpop.f32.mrb[27].mxu0 }
 0x13e   : >> { %v1913_v6 = vadd.f32 %v1912_v5, %v1911_v63  ;;  %v892_v31 = vadd.f32 %v2555_v52, %v891_v29  ;;  %947 = vrot.lane.b32.xlu0 %v889_v62, %s2160_s24 }
 0x141   : >> { %953 = vrot.lane.b32.xlu1 %v900_v1, %s2160_s24 }
 0x142   : >> { %v2008_v60 = vpop.f32.mrb[28].mxu0  ;;  %v1938_v7 = vpop.f32.mrb[36].mxu1  ;;  %949 = vrot.lane.b32.xlu0 %v892_v31, %s2160_s24 }
 0x143   : >> { %v913_v46 = vadd.f32 %v2008_v60, %v1898_v24  ;;  %v904_v8 = vpop.f32.mrb[29].mxu0  ;;  %v1939_v9 = vpop.f32.mrb[37].mxu1 }
 0x144   : >> { %v905_v2 = vadd.f32 %v1892_v10, %v904_v8  ;;  %v1940_v11 = vadd.f32 %v1939_v9, %v1938_v7  ;;  %v2009_v12 = vpop.f32.mrb[30].mxu0  ;;  %v1941_v13 = vpop.f32.mrb[38].mxu1 }
 0x145   : >> { %v916_v14 = vadd.f32 %v2009_v12, %v1901_v36  ;;  %v907_v15 = vpop.f32.mrb[31].mxu0  ;;  %v1942_v19 = vpop.f32.mrb[39].mxu1 }
 0x146   : >> { %v908_v20 = vadd.f32 %v1895_v16, %v907_v15  ;;  %v1943_v52 = vadd.f32 %v1942_v19, %v1941_v13  ;;  %959 = vrot.lane.b32.xlu0 %v913_v46, %s2160_s24 }
 0x147   : >> { %961 = vrot.lane.b32.xlu1 %v916_v14, %s2160_s24 }
 0x14a   : >> { %v2012_v21 = vpop.f32.mrb[32].mxu0  ;;  %v1944_v22 = vpop.f32.mrb[40].mxu1  ;;  %955 = vrot.lane.b32.xlu0 %v905_v2, %s2160_s24 }
 0x14b   : >> { %v929_v23 = vadd.f32 %v2012_v21, %v1910_v61  ;;  %v920_v24 = vpop.f32.mrb[33].mxu0  ;;  %v1945_v26 = vpop.f32.mrb[41].mxu1  ;;  %957 = vrot.lane.b32.xlu1 %v908_v20, %s2160_s24 }
 0x14c   : >> { %v921_v10 = vadd.f32 %v1904_v44, %v920_v24  ;;  %v1946_v28 = vadd.f32 %v1945_v26, %v1944_v22  ;;  %v2013_v33 = vpop.f32.mrb[34].mxu0  ;;  %v1947_v34 = vpop.f32.mrb[42].mxu1 }
 0x14d   : >> { %v932_v35 = vadd.f32 %v2013_v33, %v1913_v6  ;;  %v923_v16 = vpop.f32.mrb[35].mxu0  ;;  %v1948_v36 = vpop.f32.mrb[43].mxu1 }
 0x14e   : >> { %v924_v27 = vadd.f32 %v1907_v51, %v923_v16  ;;  %v1949_v38 = vadd.f32 %v1948_v36, %v1947_v34  ;;  %967 = vrot.lane.b32.xlu0 %v929_v23, %s2160_s24  ;;  %v1370_v16 = vpop.permute.xlu1 %1369  ;;  %v1365_v36 = vpop.permute.xlu0 %1364 }
 0x14f   : >> { %969 = vrot.lane.b32.xlu1 %v932_v35, %s2160_s24 }
 0x152   : >> { %v1950_v41 = vpop.f32.mrb[44].mxu1  ;;  %v2020_v42 = vpop.f32.mrb[36].mxu0  ;;  %963 = vrot.lane.b32.xlu0 %v921_v10, %s2160_s24 }
 0x153   : >> { %v1252_v43 = vadd.f32 %v2020_v42, %v1946_v28  ;;  %v1951_v45 = vpop.f32.mrb[45].mxu1  ;;  %v1243_v47 = vpop.f32.mrb[37].mxu0  ;;  %965 = vrot.lane.b32.xlu1 %v924_v27, %s2160_s24 }
 0x154   : >> { %v1952_v44 = vadd.f32 %v1951_v45, %v1950_v41  ;;  %v1244_v48 = vadd.f32 %v1940_v11, %v1243_v47  ;;  %v1953_v49 = vpop.f32.mrb[46].mxu1  ;;  %v2021_v50 = vpop.f32.mrb[38].mxu0 }
 0x155   : >> { %v1255_v32 = vadd.f32 %v2021_v50, %v1949_v38  ;;  %v1954_v51 = vpop.f32.mrb[47].mxu1  ;;  %v1246_v56 = vpop.f32.mrb[39].mxu0 }
 0x156   : >> { %v1955_v57 = vadd.f32 %v1954_v51, %v1953_v49  ;;  %v1247_v58 = vadd.f32 %v1943_v52, %v1246_v56  ;;  %v1375_v27 = vpop.permute.xlu1 %1374  ;;  %v1380_v38 = vpop.permute.xlu0 %1379 }
 0x157   : >> { %1306 = vrot.lane.b32.xlu1 %v1252_v43, %s2161_s26  ;;  %1308 = vrot.lane.b32.xlu0 %v1255_v32, %s2161_s26 }
 0x15a   : >> { %v1956_v59 = vpop.f32.mrb[48].mxu1  ;;  %v2024_v61 = vpop.f32.mrb[40].mxu0 }
 0x15b   : >> { %v1957_v62 = vpop.f32.mrb[49].mxu1  ;;  %v1259_v63 = vpop.f32.mrb[41].mxu0  ;;  %1302 = vrot.lane.b32.xlu1 %v1244_v48, %s2161_s26  ;;  %1304 = vrot.lane.b32.xlu0 %v1247_v58, %s2161_s26 }
 0x15c   : >> { %v1958_v0 = vadd.f32 %v1957_v62, %v1956_v59  ;;  %v1260_v1 = vadd.f32 %v1952_v44, %v1259_v63  ;;  %v1959_v5 = vpop.f32.mrb[50].mxu1  ;;  %v2025_v29 = vpop.f32.mrb[42].mxu0 }
 0x15d   : >> { %v1960_v6 = vpop.f32.mrb[51].mxu1  ;;  %v1262_v31 = vpop.f32.mrb[43].mxu0 }
 0x15e   : >> { %v1268_v60 = vadd.f32 %v2024_v61, %v1958_v0  ;;  %v1961_v7 = vadd.f32 %v1960_v6, %v1959_v5  ;;  %v1263_v46 = vadd.f32 %v1955_v57, %v1262_v31  ;;  %v1385_v41 = vpop.permute.xlu1 %1384  ;;  %v2607_v42 = vpop.permute.xlu0 %1389 }
 0x15f   : >> { %1310 = vrot.lane.b32.xlu1 %v1260_v1, %s2161_s26 }
 0x160   : >> { %v1271_v8 = vadd.f32 %v2025_v29, %v1961_v7  ;;  %1312 = vrot.lane.b32.xlu0 %v1263_v46, %s2161_s26 }
 0x162   : >> { %v1962_v9 = vpop.f32.mrb[52].mxu1  ;;  %v2028_v2 = vpop.f32.mrb[44].mxu0 }
 0x163   : >> { %v1963_v11 = vpop.f32.mrb[53].mxu1  ;;  %1314 = vrot.lane.b32.xlu1 %v1268_v60, %s2161_s26  ;;  %v1275_v12 = vpop.f32.mrb[45].mxu0 }
 0x164   : >> { %v1964_v13 = vadd.f32 %v1963_v11, %v1962_v9  ;;  %v1965_v14 = vpop.f32.mrb[54].mxu1  ;;  %1316 = vrot.lane.b32.xlu0 %v1271_v8, %s2161_s26  ;;  %v2029_v15 = vpop.f32.mrb[46].mxu0 }
 0x165   : >> { %v1966_v19 = vpop.f32.mrb[55].mxu1  ;;  %v1278_v20 = vpop.f32.mrb[47].mxu0 }
 0x166   : >> { %v1967_v52 = vadd.f32 %v1966_v19, %v1965_v14  ;;  %v1276_v21 = vadd.f32 %v1964_v13, %v1275_v12  ;;  %v2609_v43 = vpop.permute.xlu1 %1394  ;;  %v2611_v45 = vpop.permute.xlu0 %1399 }
 0x168   : >> { %v1279_v22 = vadd.f32 %v1967_v52, %v1278_v20  ;;  %1318 = vrot.lane.b32.xlu1 %v1276_v21, %s2161_s26 }
 0x16a   : >> { %v1968_v23 = vpop.f32.mrb[56].mxu1  ;;  %1320 = vrot.lane.b32.xlu0 %v1279_v22, %s2161_s26  ;;  %v2613_v47 = vpop.permute.xlu1 %1404 }
 0x16b   : >> { %v1969_v24 = vpop.f32.mrb[57].mxu1  ;;  %v2615_v44 = vpop.permute.xlu0 %1409 }
 0x16c   : >> { %v1970_v26 = vadd.f32 %v1969_v24, %v1968_v23  ;;  %v1971_v10 = vpop.f32.mrb[58].mxu1 }
 0x16d   : >> { %v1972_v28 = vpop.f32.mrb[59].mxu1 }
 0x16e   : >> { %v1284_v33 = vadd.f32 %v2028_v2, %v1970_v26  ;;  %v1973_v34 = vadd.f32 %v1972_v28, %v1971_v10  ;;  %v2617_v48 = vpop.permute.xlu1 %1414 }
 0x16f   : >> { %v2619_v49 = vpop.permute.xlu0 %1419 }
 0x170   : >> { %v1287_v35 = vadd.f32 %v2029_v15, %v1973_v34  ;;  %1322 = vrot.lane.b32.xlu1 %v1284_v33, %s2161_s26 }
 0x172   : >> { %1324 = vrot.lane.b32.xlu0 %v1287_v35, %s2161_s26 }
 0x1af   : >> { %v952_v50 = vpop.permute.xlu1 %951 }
 0x1b0   : >> { %v948_v32 = vpop.permute.xlu0 %947  ;;  %v985_v5 = vadd.f32 %v952_v50, %v2557_v53 }
 0x1b1   : >> { %v983_v9 = vadd.f32 %v948_v32, %v2549_v39 }
 0x1b3   : >> { %v954_v56 = vpop.permute.xlu1 %953 }
 0x1b4   : >> { %v950_v51 = vpop.permute.xlu0 %949  ;;  %v986_v29 = vadd.f32 %v954_v56, %v2559_v54 }
 0x1b5   : >> { %v984_v2 = vadd.f32 %v950_v51, %v2551_v40 }
 0x1b8   : >> { %v960_v57 = vpop.permute.xlu0 %959 }
 0x1b9   : >> { %v962_v58 = vpop.permute.xlu1 %961  ;;  %v989_v34 = vadd.f32 %v960_v57, %v2565_v17 }
 0x1ba   : >> { %v990_v35 = vadd.f32 %v962_v58, %v2567_v18 }
 0x1bc   : >> { %v956_v59 = vpop.permute.xlu0 %955 }
 0x1bd   : >> { %v958_v61 = vpop.permute.xlu1 %957  ;;  %v987_v15 = vadd.f32 %v956_v59, %v2561_v3 }
 0x1be   : >> { %v988_v23 = vadd.f32 %v958_v61, %v2563_v4 }
 0x1c0   : >> { %v2621_v62 = vpop.permute.xlu0 %967 }
 0x1c1   : >> { %v2623_v63 = vpop.permute.xlu1 %969 }
 0x1c4   : >> { %v964_v0 = vpop.permute.xlu0 %963 }
 0x1c5   : >> { %v966_v1 = vpop.permute.xlu1 %965  ;;  %v991_v59 = vadd.f32 %v964_v0, %v2570_v37 }
 0x1c6   : >> { %v992_v61 = vadd.f32 %v966_v1, %v2573_v25 }
 0x1c9   : >> { %v1307_v6 = vpop.permute.xlu1 %1306  ;;  %v1309_v31 = vpop.permute.xlu0 %1308 }
 0x1ca   : >> { %v1340_v60 = vadd.f32 %v1307_v6, %v985_v5  ;;  %v1341_v7 = vadd.f32 %v1309_v31, %v986_v29 }
 0x1cc   : >> { %v1424_v46 = vadd.f32 %v1375_v27, %v1340_v60  ;;  %v1425_v8 = vadd.f32 %v1380_v38, %v1341_v7 }
 0x1cd   : >> { %v1303_v11 = vpop.permute.xlu1 %1302  ;;  %v1305_v12 = vpop.permute.xlu0 %1304 }
 0x1ce   : >> { %vm1436_vm1 = vcmp.ge.f32.partialorder %v1424_v46, 0.0  ;;  %v1448_v13 = vmul.f32 0.25, %v1424_v46  ;;  %vm1437_vm2 = vcmp.ge.f32.partialorder %v1425_v8, 0.0  ;;  %v1449_v53 = vmul.f32 0.25, %v1425_v8 }
 0x1cf   : >> { %v1338_v14 = vadd.f32 %v1303_v11, %v983_v9  ;;  %v1339_v54 = vadd.f32 %v1305_v12, %v984_v2  ;;  %v993_v2 = vadd.f32 %v2621_v62, %v2576_v55 }
 0x1d0   : >> { %v1460_v19 = vsel %vm1436_vm1, %v1424_v46, %v1448_v13  ;;  %v1461_v39 = vsel %vm1437_vm2, %v1425_v8, %v1449_v53  ;;  %v994_v53 = vadd.f32 %v2623_v63, %v2579_v30 }
 0x1d1   : >> { %v1791_v20 = vpack.c.bf16 %v1460_v19, %v1460_v19  ;;  %v1792_v40 = vpack.c.bf16 %v1461_v39, %v1461_v39  ;;  %v1422_v52 = vadd.f32 %v1365_v36, %v1338_v14  ;;  %v1423_v21 = vadd.f32 %v1370_v16, %v1339_v54  ;;  %v1311_v22 = vpop.permute.xlu1 %1310 }
 0x1d2   : >> { %v1342_v24 = vadd.f32 %v1311_v22, %v987_v15  ;;  %v1313_v26 = vpop.permute.xlu0 %1312 }
 0x1d3   : >> { %1523 = vst.msk [vmem:[%s2633_s27 + $0x8] sm:$0xf] %vm1520_vm3, %v1791_v20  ;;  %1524 = vst.msk [vmem:[%s2633_s27 + $0xc] sm:$0xf] %vm1520_vm3, %v1792_v40  ;;  %vm1434_vm4 = vcmp.ge.f32.partialorder %v1422_v52, 0.0  ;;  %v1446_v3 = vmul.f32 0.25, %v1422_v52  ;;  %v1343_v33 = vadd.f32 %v1313_v26, %v988_v23 }
 0x1d4   : >> { %vm1435_vm5 = vcmp.ge.f32.partialorder %v1423_v21, 0.0  ;;  %v1447_v10 = vmul.f32 0.25, %v1423_v21  ;;  %v1426_v28 = vadd.f32 %v1385_v41, %v1342_v24 }
 0x1d5   : >> { %v1458_v16 = vsel %vm1434_vm4, %v1422_v52, %v1446_v3  ;;  %v1315_v36 = vpop.permute.xlu1 %1314  ;;  %v1427_v51 = vadd.f32 %v2607_v42, %v1343_v33 }
 0x1d6   : >> { %v1459_v4 = vsel %vm1435_vm5, %v1423_v21, %v1447_v10  ;;  %v1789_v27 = vpack.c.bf16 %v1458_v16, %v1458_v16  ;;  %vm1438_vm6 = vcmp.ge.f32.partialorder %v1426_v28, 0.0  ;;  %v1450_v50 = vmul.f32 0.25, %v1426_v28  ;;  %v1317_v32 = vpop.permute.xlu0 %1316 }
 0x1d7   : >> { %v1790_v38 = vpack.c.bf16 %v1459_v4, %v1459_v4  ;;  %v1344_v56 = vadd.f32 %v1315_v36, %v989_v34  ;;  %v1345_v41 = vadd.f32 %v1317_v32, %v990_v35  ;;  %vm1439_vm7 = vcmp.ge.f32.partialorder %v1427_v51, 0.0 }
 0x1d8   : >> { %1521 = vst.msk [vmem:[%s2633_s27] sm:$0xf] %vm1520_vm3, %v1789_v27  ;;  %v1462_v17 = vsel %vm1438_vm6, %v1426_v28, %v1450_v50  ;;  %v1451_v57 = vmul.f32 0.25, %v1427_v51 }
 0x1d9   : >> { %1522 = vst.msk [vmem:[%s2633_s27 + $0x4] sm:$0xf] %vm1520_vm3, %v1790_v38  ;;  %v1793_v18 = vpack.c.bf16 %v1462_v17, %v1462_v17  ;;  %v1428_v58 = vadd.f32 %v2609_v43, %v1344_v56  ;;  %v1429_v5 = vadd.f32 %v2611_v45, %v1345_v41 }
 0x1da   : >> { %v1319_v42 = vpop.permute.xlu1 %1318  ;;  %v1463_v29 = vsel %vm1439_vm7, %v1427_v51, %v1451_v57 }
 0x1db   : >> { %1525 = vst.msk [vmem:[%s2633_s27 + $0x10] sm:$0xf] %vm1520_vm3, %v1793_v18  ;;  %vm1440_vm8 = vcmp.ge.f32.partialorder %v1428_v58, 0.0  ;;  %v1452_v37 = vmul.f32 0.25, %v1428_v58  ;;  %v1346_v0 = vadd.f32 %v1319_v42, %v991_v59  ;;  %v1794_v6 = vpack.c.bf16 %v1463_v29, %v1463_v29 }
 0x1dc   : >> { %vm1441_vm9 = vcmp.ge.f32.partialorder %v1429_v5, 0.0  ;;  %v1453_v31 = vmul.f32 0.25, %v1429_v5  ;;  %v1321_v60 = vpop.permute.xlu0 %1320 }
 0x1dd   : >> { %v1464_v7 = vsel %vm1440_vm8, %v1428_v58, %v1452_v37  ;;  %v1430_v43 = vadd.f32 %v2613_v47, %v1346_v0  ;;  %v1347_v46 = vadd.f32 %v1321_v60, %v992_v61  ;;  %1526 = vst.msk [vmem:[%s2633_s27 + $0x14] sm:$0xf] %vm1520_vm3, %v1794_v6 }
 0x1de   : >> { %v1795_v25 = vpack.c.bf16 %v1464_v7, %v1464_v7  ;;  %v1465_v45 = vsel %vm1441_vm9, %v1429_v5, %v1453_v31 }
 0x1df   : >> { %v1796_v1 = vpack.c.bf16 %v1465_v45, %v1465_v45  ;;  %vm1442_vm10 = vcmp.ge.f32.partialorder %v1430_v43, 0.0  ;;  %v1454_v8 = vmul.f32 0.25, %v1430_v43  ;;  %v1431_v9 = vadd.f32 %v2615_v44, %v1347_v46 }
 0x1e0   : >> { %1527 = vst.msk [vmem:[%s2633_s27 + $0x18] sm:$0xf] %vm1520_vm3, %v1795_v25 }
 0x1e1   : >> { %1528 = vst.msk [vmem:[%s2633_s27 + $0x1c] sm:$0xf] %vm1520_vm3, %v1796_v1  ;;  %v1466_v47 = vsel %vm1442_vm10, %v1430_v43, %v1454_v8  ;;  %vm1443_vm11 = vcmp.ge.f32.partialorder %v1431_v9, 0.0  ;;  %v1455_v11 = vmul.f32 0.25, %v1431_v9 }
 0x1e2   : >> { %v1797_v12 = vpack.c.bf16 %v1466_v47, %v1466_v47  ;;  %v1323_v13 = vpop.permute.xlu1 %1322 }
 0x1e3   : >> { %v1467_v14 = vsel %vm1443_vm11, %v1431_v9, %v1455_v11  ;;  %v1348_v54 = vadd.f32 %v1323_v13, %v993_v2 }
 0x1e4   : >> { %1529 = vst.msk [vmem:[%s2633_s27 + $0x20] sm:$0xf] %vm1520_vm3, %v1797_v12  ;;  %v1798_v44 = vpack.c.bf16 %v1467_v14, %v1467_v14  ;;  %v1325_v15 = vpop.permute.xlu0 %1324 }
 0x1e5   : >> { %v1432_v55 = vadd.f32 %v2617_v48, %v1348_v54  ;;  %v1349_v62 = vadd.f32 %v1325_v15, %v994_v53 }
 0x1e6   : >> { %1530 = vst.msk [vmem:[%s2633_s27 + $0x24] sm:$0xf] %vm1520_vm3, %v1798_v44 }
 0x1e7   : >> { %vm1444_vm12 = vcmp.ge.f32.partialorder %v1432_v55, 0.0  ;;  %v1456_v19 = vmul.f32 0.25, %v1432_v55  ;;  %v1433_v39 = vadd.f32 %v2619_v49, %v1349_v62 }
 0x1e8   : > { %176 = sbr.rel (!%p174_p4) target bundleno = 18 (0x12), region = 75 }
 0x1e9   : >> { %v1468_v20 = vsel %vm1444_vm12, %v1432_v55, %v1456_v19  ;;  %vm1445_vm13 = vcmp.ge.f32.partialorder %v1433_v39, 0.0  ;;  %v1457_v30 = vmul.f32 0.25, %v1433_v39 }
 0x1ea   : >> { %v1799_v63 = vpack.c.bf16 %v1468_v20, %v1468_v20 }
 0x1eb   : >> { %v1469_v40 = vsel %vm1445_vm13, %v1433_v39, %v1457_v30 }
 0x1ec   : >> { %1531 = vst.msk [vmem:[%s2633_s27 + $0x28] sm:$0xf] %vm1520_vm3, %v1799_v63  ;;  %v1800_v52 = vpack.c.bf16 %v1469_v40, %v1469_v40 }
 0x1ee   : >> { %1532 = vst.msk [vmem:[%s2633_s27 + $0x2c] sm:$0xf] %vm1520_vm3, %v1800_v52 }
 0x1ef PF: > { %s13_s12 = sadd.s32 1, %s2153_s12  }
 0x1f0   : > { %p10_p5 = scmp.ge.s32.totalorder %s13_s12, 6  }
 0x1f2   :  { %12 = sbr.rel (!%p10_p5) target bundleno = 1 (0x1), region = 86 }

// kernel: softsplat_baseline_forward.28
= control target key start
LH: loop header
LB: loop body
LE: loop exit
PB: predicated region body
PF: predicated region fallthrough
CT: control target
= control target key end

     0   :  { %s2948_s12 = smov 0   ;;  %s3682_s0 = inlined_call_operand.vmem [shape: bf16[2,18,400,18], index: 0, kind: input, shape index: {}]   ;;  %s3683_s1 = inlined_call_operand.vmem [shape: bf16[3,32,1200], index: 1, kind: input, shape index: {}]   ;;  %s3684_s2 = inlined_call_operand.vmem [shape: f32[32,1], index: 2, kind: input, shape index: {}]   ;;  %s3685_s3 = inlined_call_operand.vmem [shape: bf16[2,16,32,16], index: 3, kind: output, shape index: {}]  }
   0x1 LB: > { %s2077_s13 = sadd.s32 4294967295, %s2919_s12   ;;  %p2081_p0 = scmp.ge.s32.totalorder %s2919_s12, 1  ;;  %s2919_s12 = sphi %s2948_s12, %s13_s12  }
   0x2   : > { %p137_p1 = scmp.lt.s32.totalorder %s2919_s12, 3 }
   0x4   : > { %p138_p2 = pnand %p2081_p0, %p137_p1 }
   0x5   : > { %p161_p3 = scmp.lt.s32.totalorder (!%p138_p2), %s2077_s13, 1  ;;  %s2966_s22 = smov (!%p138_p2), 0  }
   0x6   : > { %141 = sbr.rel (%p138_p2) target bundleno = 640 (0x280), region = 32 }
   0xd   : > { %s3746_s13 = smov (!%p161_p3, %s2077_s13), 1 }
   0xe   : > { %s2718_s14 = smul.u32 3600, %s3746_s13  ;;  %s2375_s15 = sshll.u32 %s3746_s13, 8 }
   0xf   : > { %s2959_s18 = scalar_lea.vmem %s3685_s3, %s2375_s15 }
  0x10   : > { %s2964_s21 = scalar_lea.vmem %s3682_s0, %s2718_s14 }
  0x11 LB: >> { %v2774_v0 = vld [vmem:[%s3683_s1 + $0x4] ss:$40 sps:$4 sm:$0xff]   ;;  %v3686_v1 = vmov 0   ;;  %s2376_s25 = smul.u32 200, %s2923_s22  ;;  %v2772_v33 = vld [vmem:[%s3683_s1] ss:$40 sps:$4 sm:$0xff]   ;;  %s2923_s22 = sphi %s2966_s22, %s177_s22  }
  0x12   : >> { %2738 = vset.pattern.permute.xlu0 %v3686_v1  ;;  %2739 = vset.pattern.permute.xlu1 %v3686_v1  ;;  %v2777_v2 = vld [vmem:[%s3683_s1 + $0xc] ss:$40 sps:$4 sm:$0xff]   ;;  %v2775_v35 = vld [vmem:[%s3683_s1 + $0x8] ss:$40 sps:$4 sm:$0xff]   ;;  %v2802_v39 = vld [vmem:[%s3683_s1 + $0x5c] ss:$40 sps:$4 sm:$0xff]  }
  0x13   : >> { %946 = vmatprep.mubr.bf16.mxu0 %v2774_v0  ;;  %s2981_s28 = scalar_lea.vmem %s2964_s21, %s2376_s25  ;;  %995 = vmatprep.mubr.bf16.mxu1 %v2777_v2  ;;  %v2800_v37 = vld [vmem:[%s3683_s1 + $0x54] ss:$40 sps:$4 sm:$0xff]   ;;  %v2806_v45 = vld [vmem:[%s3683_s1 + $0x50] ss:$40 sps:$4 sm:$0xff]   ;;  %vm907_vm0 = vcmask 392192   ;;  %s2926_s15 = smov 127  }
  0x14   : >> { %v2984_v3 = vld [vmem:[%s2981_s28 + $0x40] sm:$0xff]   ;;  %v2999_v7 = vld [vmem:[%s2981_s28 + $0x48] sm:$0xff]   ;;  %v3015_v11 = vld [vmem:[%s2981_s28 + $0x50] sm:$0xff]   ;;  %s2927_s16 = smov 126   ;;  %s2381_s17 = sshll.u32 %s2923_s22, 4  ;;  %vm2002_vm2 = vcmask 125952  }
  0x15   : >> { %v2987_v4 = vld [vmem:[%s2981_s28 + $0xc0] sm:$0xff]   ;;  %2382 = vmatprep.subr.bf16.mxu0 %v2984_v3  ;;  %v3003_v8 = vld [vmem:[%s2981_s28 + $0xc8] sm:$0xff]   ;;  %v3019_v12 = vld [vmem:[%s2981_s28 + $0xd0] sm:$0xff]   ;;  %s2001_s19 = scalar_lea.vmem %s2959_s18, %s2381_s17  ;;  %s177_s22 = sadd.s32 1, %s2923_s22  }
  0x16   : >> { %v2991_v5 = vld [vmem:[%s2981_s28] sm:$0xff]   ;;  %2410 = vmatprep.subr.bf16.mxu1 %v2987_v4  ;;  %v3007_v9 = vld [vmem:[%s2981_s28 + $0x8] sm:$0xff]   ;;  %v3023_v13 = vld [vmem:[%s2981_s28 + $0x10] sm:$0xff]   ;;  %p174_p4 = scmp.ge.s32.totalorder %s177_s22, 16  }
  0x17   : >> { %v2995_v6 = vld [vmem:[%s2981_s28 + $0x80] sm:$0xff]   ;;  %2383 = vmatpush3.bf16.msra.mxu0 %v2991_v5  ;;  %v3011_v10 = vld [vmem:[%s2981_s28 + $0x88] sm:$0xff]   ;;  %v3027_v14 = vld [vmem:[%s2981_s28 + $0x90] sm:$0xff]  }
  0x18   : >> { %2411 = vmatpush3.bf16.msra.mxu1 %v2995_v6  ;;  %2384 = vmatprep.subr.bf16.mxu0 %v2999_v7  ;;  %v3031_v15 = vld [vmem:[%s2981_s28 + $0x58] sm:$0xff]   ;;  %v3047_v19 = vld [vmem:[%s2981_s28 + $0x60] sm:$0xff]   ;;  %v3063_v23 = vld [vmem:[%s2981_s28 + $0x68] sm:$0xff]  }
  0x19   : >> { %2412 = vmatprep.subr.bf16.mxu1 %v3003_v8  ;;  %3711 = vst [vmem:[#allocation2_spill] sm:$0xff] %v3031_v15  ;;  %v3035_v16 = vld [vmem:[%s2981_s28 + $0xd8] sm:$0xff]   ;;  %v3051_v20 = vld [vmem:[%s2981_s28 + $0xe0] sm:$0xff]   ;;  %3712 = vst [vmem:[#allocation3_spill] sm:$0xff] %v3063_v23 }
  0x1a   : >> { %v3039_v17 = vld [vmem:[%s2981_s28 + $0x18] sm:$0xff]   ;;  %v3055_v21 = vld [vmem:[%s2981_s28 + $0x20] sm:$0xff]   ;;  %v3067_v24 = vld [vmem:[%s2981_s28 + $0xe8] sm:$0xff]  }
  0x1b   : >> { %2385 = vmatpush3.bf16.msra.mxu0 %v3007_v9  ;;  %v3043_v18 = vld [vmem:[%s2981_s28 + $0x98] sm:$0xff]   ;;  %v3059_v22 = vld [vmem:[%s2981_s28 + $0xa0] sm:$0xff]   ;;  %v3071_v25 = vld [vmem:[%s2981_s28 + $0x28] sm:$0xff]  }
  0x1c   : >> { %2413 = vmatpush3.bf16.msra.mxu1 %v3011_v10  ;;  %2386 = vmatprep.subr.bf16.mxu0 %v3015_v11  ;;  %3713 = vst [vmem:[#allocation4_spill] sm:$0xff] %v3071_v25  ;;  %v3075_v26 = vld [vmem:[%s2981_s28 + $0xa8] sm:$0xff]   ;;  %v3079_v27 = vld [vmem:[%s2981_s28 + $0x70] sm:$0xff]   ;;  %v3095_v31 = vld [vmem:[%s2981_s28 + $0x78] sm:$0xff]  }
  0x1d   : >> { %2414 = vmatprep.subr.bf16.mxu1 %v3019_v12  ;;  %v3083_v28 = vld [vmem:[%s2981_s28 + $0xf0] sm:$0xff]   ;;  %3715 = vst [vmem:[#allocation6_spill] sm:$0xff] %v3095_v31  ;;  %v3099_v32 = vld [vmem:[%s2981_s28 + $0xf8] sm:$0xff]   ;;  %v3120_v38 = vld [vmem:[%s2981_s28 + $0x140] sm:$0xff]  }
  0x1e   : >> { %v3087_v29 = vld [vmem:[%s2981_s28 + $0x30] sm:$0xff]   ;;  %v3106_v34 = vld [vmem:[%s2981_s28 + $0x38] sm:$0xff]   ;;  %v3127_v40 = vld [vmem:[%s2981_s28 + $0x1c0] sm:$0xff]  }
  0x1f   : >> { %2387 = vmatpush3.bf16.msra.mxu0 %v3023_v13  ;;  %3714 = vst [vmem:[#allocation5_spill] sm:$0xff] %v3087_v29  ;;  %v3091_v30 = vld [vmem:[%s2981_s28 + $0xb0] sm:$0xff]   ;;  %3716 = vst [vmem:[#allocation7_spill] sm:$0xff] %v3106_v34  ;;  %v3113_v36 = vld [vmem:[%s2981_s28 + $0xb8] sm:$0xff]  }
  0x20   : >> { %2415 = vmatpush3.bf16.msra.mxu1 %v3027_v14  ;;  %2388 = vmatprep.subr.bf16.mxu0 %v3031_v15  ;;  %v3131_v41 = vld [vmem:[%s2981_s28 + $0x100] sm:$0xff]   ;;  %v3139_v43 = vld [vmem:[%s2981_s28 + $0x148] sm:$0xff]   ;;  %v3158_v48 = vld [vmem:[%s2981_s28 + $0x150] sm:$0xff]  }
  0x21   : >> { %2416 = vmatprep.subr.bf16.mxu1 %v3035_v16  ;;  %v3135_v42 = vld [vmem:[%s2981_s28 + $0x180] sm:$0xff]   ;;  %v3143_v44 = vld [vmem:[%s2981_s28 + $0x1c8] sm:$0xff]   ;;  %v3162_v49 = vld [vmem:[%s2981_s28 + $0x1d0] sm:$0xff]  }
  0x22   : >> { %v3150_v46 = vld [vmem:[%s2981_s28 + $0x108] sm:$0xff]   ;;  %v3166_v50 = vld [vmem:[%s2981_s28 + $0x110] sm:$0xff]   ;;  %v3174_v52 = vld [vmem:[%s2981_s28 + $0x158] sm:$0xff]  }
  0x23   : >> { %2389 = vmatpush3.bf16.msra.mxu0 %v3039_v17  ;;  %v3154_v47 = vld [vmem:[%s2981_s28 + $0x188] sm:$0xff]   ;;  %v3170_v51 = vld [vmem:[%s2981_s28 + $0x190] sm:$0xff]   ;;  %v3178_v53 = vld [vmem:[%s2981_s28 + $0x1d8] sm:$0xff]  }
  0x24   : >> { %2417 = vmatpush3.bf16.msra.mxu1 %v3043_v18  ;;  %2390 = vmatprep.subr.bf16.mxu0 %v3047_v19  ;;  %v3182_v54 = vld [vmem:[%s2981_s28 + $0x118] sm:$0xff]   ;;  %v3190_v56 = vld [vmem:[%s2981_s28 + $0x160] sm:$0xff]   ;;  %v3206_v60 = vld [vmem:[%s2981_s28 + $0x168] sm:$0xff]  }
  0x25   : >> { %2418 = vmatprep.subr.bf16.mxu1 %v3051_v20  ;;  %v3186_v55 = vld [vmem:[%s2981_s28 + $0x198] sm:$0xff]   ;;  %v3194_v57 = vld [vmem:[%s2981_s28 + $0x1e0] sm:$0xff]   ;;  %v3210_v61 = vld [vmem:[%s2981_s28 + $0x1e8] sm:$0xff]  }
  0x26   : >> { %3717 = vst [vmem:[#allocation8_spill] sm:$0xff] %v3194_v57  ;;  %v3198_v58 = vld [vmem:[%s2981_s28 + $0x120] sm:$0xff]   ;;  %3719 = vst [vmem:[#allocation10_spill] sm:$0xff] %v3210_v61  ;;  %v3214_v62 = vld [vmem:[%s2981_s28 + $0x128] sm:$0xff]  }
  0x27   : >> { %2391 = vmatpush3.bf16.msra.mxu0 %v3055_v21  ;;  %v3202_v59 = vld [vmem:[%s2981_s28 + $0x1a0] sm:$0xff]   ;;  %v3218_v63 = vld [vmem:[%s2981_s28 + $0x1a8] sm:$0xff]   ;;  %v3226_v2 = vld [vmem:[%s2981_s28 + $0x170] sm:$0xff]  }
  0x28   : >> { %2419 = vmatpush3.bf16.msra.mxu1 %v3059_v22  ;;  %2392 = vmatprep.subr.bf16.mxu0 %v3063_v23  ;;  %3718 = vst [vmem:[#allocation9_spill] sm:$0xff] %v3202_v59  ;;  %3720 = vst [vmem:[#allocation11_spill] sm:$0xff] %v3218_v63  ;;  %v2807_v0 = vld [vmem:[%s3683_s1 + $0x58] ss:$40 sps:$4 sm:$0xff]  }
  0x29   : >> { %2420 = vmatprep.subr.bf16.mxu1 %v3067_v24  ;;  %v3253_v1 = vld [vmem:[%s2981_s28 + $0x1b8] sm:$0xff]  }
  0x2a   : >> { %3724 = vst [vmem:[#allocation15_spill] sm:$0xff] %v3253_v1 }
  0x2b   : >> { %2393 = vmatpush3.bf16.msra.mxu0 %v3071_v25 }
  0x2c   : >> { %2421 = vmatpush3.bf16.msra.mxu1 %v3075_v26  ;;  %2394 = vmatprep.subr.bf16.mxu0 %v3079_v27 }
  0x2d   : >> { %2422 = vmatprep.subr.bf16.mxu1 %v3083_v28 }
  0x2f   : >> { %2395 = vmatpush3.bf16.msra.mxu0 %v3087_v29 }
  0x30   : >> { %2423 = vmatpush3.bf16.msra.mxu1 %v3091_v30  ;;  %2396 = vmatprep.subr.bf16.mxu0 %v3095_v31 }
  0x31   : >> { %2424 = vmatprep.subr.bf16.mxu1 %v3099_v32 }
  0x33   : >> { %2397 = vmatpush3.bf16.msra.mxu0 %v3106_v34 }
  0x34   : >> { %2425 = vmatpush3.bf16.msra.mxu1 %v3113_v36  ;;  %2438 = vmatprep.subr.bf16.mxu0 %v3120_v38 }
  0x35   : >> { %2466 = vmatprep.subr.bf16.mxu1 %v3127_v40 }
  0x36   : >> { %947 = vmatmul.mubr.bf16.vlgmr.msra.gmra.mrb[0].mxu0 %v2772_v33  ;;  %v3229_v33 = vld [vmem:[%s2981_s28 + $0x1f0] sm:$0xff]  }
  0x37   : >> { %996 = vmatmul.mubr.bf16.vlgmr.msra.gmra.mrb[0].mxu1 %v2775_v35  ;;  %2439 = vmatpush3.bf16.msra.mxu0 %v3131_v41  ;;  %3721 = vst [vmem:[#allocation12_spill] sm:$0xff] %v3229_v33  ;;  %v3233_v35 = vld [vmem:[%s2981_s28 + $0x130] sm:$0xff]  }
  0x38   : >> { %2467 = vmatpush3.bf16.msra.mxu1 %v3135_v42  ;;  %954 = vmatprep.mubr.bf16.mxu0 %v2800_v37  ;;  %v3237_v37 = vld [vmem:[%s2981_s28 + $0x1b0] sm:$0xff]  }
  0x39   : >> { %2440 = vmatprep.subr.bf16.mxu0 %v3139_v43  ;;  %1003 = vmatprep.mubr.bf16.mxu1 %v2802_v39  ;;  %3722 = vst [vmem:[#allocation13_spill] sm:$0xff] %v3237_v37  ;;  %v3241_v39 = vld [vmem:[%s2981_s28 + $0x178] sm:$0xff]  }
  0x3a   : >> { %2468 = vmatprep.subr.bf16.mxu1 %v3143_v44 }
  0x3b   : >> { %2441 = vmatpush3.bf16.msra.mxu0 %v3150_v46 }
  0x3c   : >> { %2469 = vmatpush3.bf16.msra.mxu1 %v3154_v47  ;;  %2442 = vmatprep.subr.bf16.mxu0 %v3158_v48 }
  0x3d   : >> { %2470 = vmatprep.subr.bf16.mxu1 %v3162_v49 }
  0x3e   : >> { %955 = vmatmul.mubr.bf16.gmra.mrb[4].mxu0 %v2806_v45  ;;  %v3245_v45 = vld [vmem:[%s2981_s28 + $0x1f8] sm:$0xff]  }
  0x3f   : >> { %2443 = vmatpush3.bf16.msra.mxu0 %v3166_v50  ;;  %1004 = vmatmul.mubr.bf16.gmra.mrb[4].mxu1 %v2807_v0  ;;  %3723 = vst [vmem:[#allocation14_spill] sm:$0xff] %v3245_v45  ;;  %v3249_v0 = vld [vmem:[%s2981_s28 + $0x138] sm:$0xff]  }
  0x40   : >> { %2471 = vmatpush3.bf16.msra.mxu1 %v3170_v51  ;;  %2444 = vmatprep.subr.bf16.mxu0 %v3174_v52 }
  0x41   : >> { %2472 = vmatprep.subr.bf16.mxu1 %v3178_v53 }
  0x43   : >> { %2445 = vmatpush3.bf16.msra.mxu0 %v3182_v54 }
  0x44   : >> { %2473 = vmatpush3.bf16.msra.mxu1 %v3186_v55  ;;  %2446 = vmatprep.subr.bf16.mxu0 %v3190_v56 }
  0x45   : >> { %2474 = vmatprep.subr.bf16.mxu1 %v3194_v57  ;;  %v3275_v57 = vld [vmem:[%s2981_s28 + $0x208] sm:$0xff]  }
  0x46   : >> { %3726 = vst [vmem:[#allocation16_spill] sm:$0xff] %v3275_v57 }
  0x47   : >> { %2447 = vmatpush3.bf16.msra.mxu0 %v3198_v58 }
  0x48   : >> { %2475 = vmatpush3.bf16.msra.mxu1 %v3202_v59  ;;  %2448 = vmatprep.subr.bf16.mxu0 %v3206_v60  ;;  %v3272_v59 = vld [vmem:[%s2981_s28 + $0x200] sm:$0xff]  }
  0x49   : >> { %2476 = vmatprep.subr.bf16.mxu1 %v3210_v61  ;;  %v3725_v61 = vmov 0  }
  0x4b   : >> { %2449 = vmatpush3.bf16.msra.mxu0 %v3214_v62 }
  0x4c   : >> { %2477 = vmatpush3.bf16.msra.mxu1 %v3218_v63  ;;  %2450 = vmatprep.subr.bf16.mxu0 %v3226_v2  ;;  %v2819_v63 = vld [vmem:[%s3683_s1 + $0x18] ss:$40 sps:$4 sm:$0xff]  }
  0x4d   : >> { %2478 = vmatprep.subr.bf16.mxu1 %v3229_v33  ;;  %v2816_v33 = vld [vmem:[%s3683_s1 + $0x10] ss:$40 sps:$4 sm:$0xff]  }
  0x4f   : >> { %2451 = vmatpush3.bf16.msra.mxu0 %v3233_v35 }
  0x50   : >> { %2479 = vmatpush3.bf16.msra.mxu1 %v3237_v37  ;;  %2452 = vmatprep.subr.bf16.mxu0 %v3241_v39  ;;  %v2818_v37 = vld [vmem:[%s3683_s1 + $0x14] ss:$40 sps:$4 sm:$0xff]  }
  0x51   : >> { %2480 = vmatprep.subr.bf16.mxu1 %v3245_v45  ;;  %v2821_v45 = vld [vmem:[%s3683_s1 + $0x1c] ss:$40 sps:$4 sm:$0xff]   ;;  %1044 = vmatprep.mubr.bf16.mxu0 %v2818_v37  ;;  %v3291_v37 = vld [vmem:[%s2981_s28 + $0x210] sm:$0xff]  }
  0x52   : >> { %1093 = vmatprep.mubr.bf16.mxu1 %v2821_v45  ;;  %v2830_v45 = vld [vmem:[%s3683_s1 + $0x68] ss:$40 sps:$4 sm:$0xff]  }
  0x53   : >> { %2453 = vmatpush3.bf16.msra.mxu0 %v3249_v0 }
  0x54   : >> { %2481 = vmatpush3.bf16.msra.mxu1 %v3253_v1  ;;  %1110 = vmatprep.subr.bf16.mxu0 %v3725_v61  ;;  %v2824_v1 = vld [vmem:[%s3683_s1 + $0x64] ss:$40 sps:$4 sm:$0xff]  }
  0x55   : >> { %2494 = vmatprep.subr.bf16.mxu1 %v2984_v3 }
  0x56   : >> { %1045 = vmatmul.mubr.bf16.vlgmr.msra.gmra.mrb[8].mxu0 %v2816_v33  ;;  %v2827_v33 = vld [vmem:[%s3683_s1 + $0x6c] ss:$40 sps:$4 sm:$0xff]  }
  0x57   : >> { %1094 = vmatmul.mubr.bf16.vlgmr.msra.gmra.mrb[8].mxu1 %v2819_v63  ;;  %1111 = vmatpush1.bf16.msra.mxu0 %v3272_v59  ;;  %v2826_v63 = vld [vmem:[%s3683_s1 + $0x60] ss:$40 sps:$4 sm:$0xff]  }
  0x58   : >> { %2495 = vmatpush3.bf16.msra.mxu1 %v2991_v5  ;;  %1112 = vmatprep.subr.bf16.mxu0 %v3725_v61 }
  0x59   : >> { %2496 = vmatprep.subr.bf16.mxu1 %v2999_v7  ;;  %1052 = vmatprep.mubr.bf16.mxu0 %v2824_v1  ;;  %v3302_v1 = vld [vmem:[%s2981_s28 + $0x218] sm:$0xff]  }
  0x5a   : >> { %1101 = vmatprep.mubr.bf16.mxu1 %v2827_v33  ;;  %v2838_v33 = vld [vmem:[%s3683_s1 + $0xa4] ss:$40 sps:$4 sm:$0xff]  }
  0x5b   : >> { %1113 = vmatpush1.bf16.msra.mxu0 %v3275_v57 }
  0x5c   : >> { %2497 = vmatpush3.bf16.msra.mxu1 %v3007_v9  ;;  %1114 = vmatprep.subr.bf16.mxu0 %v3725_v61 }
  0x5d   : >> { %2498 = vmatprep.subr.bf16.mxu1 %v3015_v11 }
  0x5e   : >> { %1053 = vmatmul.mubr.bf16.gmra.mrb[12].mxu0 %v2826_v63  ;;  %v3312_v63 = vld [vmem:[%s2981_s28 + $0x220] sm:$0xff]  }
  0x5f   : >> { %1115 = vmatpush1.bf16.msra.mxu0 %v3291_v37  ;;  %1102 = vmatmul.mubr.bf16.gmra.mrb[12].mxu1 %v2830_v45  ;;  %v2844_v45 = vld [vmem:[%s3683_s1 + $0x24] ss:$40 sps:$4 sm:$0xff]  }
  0x60   : >> { %2499 = vmatpush3.bf16.msra.mxu1 %v3023_v13  ;;  %1116 = vmatprep.subr.bf16.mxu0 %v3725_v61 }
  0x61   : >> { %2500 = vmatprep.subr.bf16.mxu1 %v3031_v15  ;;  %1320 = vmatprep.mubr.bf16.mxu1 %v2838_v33  ;;  %v3322_v15 = vld [vmem:[%s2981_s28 + $0x228] sm:$0xff]   ;;  %v3330_v33 = vld [vmem:[%s2981_s28 + $0x230] sm:$0xff]  }
  0x62   : >> { %2281 = vmatprep.mubr.msk.bf16.mxu0 %vm907_vm0, %v2844_v45  ;;  %v3337_v45 = vld [vmem:[%s2981_s28 + $0x238] sm:$0xff]  }
  0x63   : >> { %1117 = vmatpush1.bf16.msra.mxu0 %v3302_v1 }
  0x64   : >> { %2501 = vmatpush3.bf16.msra.mxu1 %v3039_v17  ;;  %1118 = vmatprep.subr.bf16.mxu0 %v3725_v61 }
  0x65   : >> { %2502 = vmatprep.subr.bf16.mxu1 %v3047_v19 }
  0x67   : >> { %1119 = vmatpush1.bf16.msra.mxu0 %v3312_v63 }
  0x68   : >> { %2503 = vmatpush3.bf16.msra.mxu1 %v3055_v21  ;;  %1120 = vmatprep.subr.bf16.mxu0 %v3725_v61 }
  0x69   : >> { %2504 = vmatprep.subr.bf16.mxu1 %v3063_v23  ;;  %v3347_v23 = vld [vmem:[%s2981_s28 + $0x240] sm:$0xff]  }
  0x6b   : >> { %1121 = vmatpush1.bf16.msra.mxu0 %v3322_v15 }
  0x6c   : >> { %2505 = vmatpush3.bf16.msra.mxu1 %v3071_v25  ;;  %1122 = vmatprep.subr.bf16.mxu0 %v3725_v61  ;;  %v2836_v25 = vld [vmem:[%s3683_s1 + $0xa0] ss:$40 sps:$4 sm:$0xff]  }
  0x6d   : >> { %2506 = vmatprep.subr.bf16.mxu1 %v3079_v27 }
  0x6f   : >> { %1123 = vmatpush1.bf16.msra.mxu0 %v3330_v33 }
  0x70   : >> { %2507 = vmatpush3.bf16.msra.mxu1 %v3087_v29  ;;  %1124 = vmatprep.subr.bf16.mxu0 %v3725_v61  ;;  %v2848_v29 = vld [vmem:[%s3683_s1 + $0xf4] ss:$40 sps:$4 sm:$0xff]  }
  0x71   : >> { %2508 = vmatprep.subr.bf16.mxu1 %v3095_v31  ;;  %v3357_v31 = vld [vmem:[%s2981_s28 + $0x248] sm:$0xff]  }
  0x73   : >> { %1125 = vmatpush1.bf16.msra.mxu0 %v3337_v45 }
  0x74   : >> { %2509 = vmatpush3.bf16.msra.mxu1 %v3106_v34  ;;  %1126 = vmatprep.subr.bf16.mxu0 %v3725_v61  ;;  %v3363_v34 = vld [vmem:[%s2981_s28 + $0x250] sm:$0xff]  }
  0x75   : >> { %2522 = vmatprep.subr.bf16.mxu1 %v2987_v4  ;;  %v2850_v4 = vld [vmem:[%s3683_s1 + $0xf0] ss:$40 sps:$4 sm:$0xff]  }
  0x77   : >> { %1321 = vmatmul.mubr.bf16.vlgmr.msra.gmra.mrb[16].mxu1 %v2836_v25  ;;  %1127 = vmatpush1.bf16.msra.mxu0 %v3347_v23  ;;  %v2845_v25 = vld [vmem:[%s3683_s1 + $0x74] ss:$40 sps:$4 sm:$0xff]  }
  0x78   : >> { %2523 = vmatpush3.bf16.msra.mxu1 %v2995_v6  ;;  %1128 = vmatprep.subr.bf16.mxu0 %v3725_v61  ;;  %v2853_v6 = vld [vmem:[%s3683_s1 + $0xac] ss:$40 sps:$4 sm:$0xff]  }
  0x79   : >> { %2524 = vmatprep.subr.bf16.mxu1 %v3003_v8  ;;  %1328 = vmatprep.mubr.bf16.mxu1 %v2848_v29  ;;  %v2842_v8 = vld [vmem:[%s3683_s1 + $0x20] ss:$40 sps:$4 sm:$0xff]   ;;  %v2859_v29 = vld [vmem:[%s3683_s1 + $0xb4] ss:$40 sps:$4 sm:$0xff]  }
  0x7b   : >> { %1129 = vmatpush1.bf16.msra.mxu0 %v3357_v31 }
  0x7c   : >> { %2525 = vmatpush3.bf16.msra.mxu1 %v3011_v10  ;;  %1130 = vmatprep.subr.bf16.mxu0 %v3725_v61  ;;  %v2847_v10 = vld [vmem:[%s3683_s1 + $0x70] ss:$40 sps:$4 sm:$0xff]  }
  0x7d   : >> { %2526 = vmatprep.subr.bf16.mxu1 %v3019_v12 }
  0x7f   : >> { %1131 = vmatpush1.bf16.msra.mxu0 %v3363_v34  ;;  %1329 = vmatmul.mubr.bf16.gmra.mrb[20].mxu1 %v2850_v4  ;;  %v2851_v4 = vld [vmem:[%s3683_s1 + $0xa8] ss:$40 sps:$4 sm:$0xff]  }
  0x80   : >> { %2527 = vmatpush3.bf16.msra.mxu1 %v3027_v14  ;;  %2550 = vmatprep.subr.bf16.mxu0 %v3120_v38 }
  0x81   : >> { %2528 = vmatprep.subr.bf16.mxu1 %v3035_v16  ;;  %1369 = vmatprep.mubr.bf16.mxu1 %v2853_v6  ;;  %v2854_v6 = vld [vmem:[%s3683_s1 + $0xfc] ss:$40 sps:$4 sm:$0xff]  }
  0x82   : >> { %1143 = vmatmul.mubr.bf16.vlgmr.msra.gmra.mrb[16].mxu0 %v2842_v8  ;;  %v2856_v8 = vld [vmem:[%s3683_s1 + $0xf8] ss:$40 sps:$4 sm:$0xff]  }
  0x83   : >> { %2551 = vmatpush3.bf16.msra.mxu0 %v3131_v41  ;;  %2282 = vmatprep.mubr.msk.bf16.mxu0 %vm907_vm0, %v2845_v25  ;;  %v2865_v25 = vld [vmem:[%s3683_s1 + $0xbc] ss:$40 sps:$4 sm:$0xff]  }
  0x84   : >> { %2529 = vmatpush3.bf16.msra.mxu1 %v3043_v18  ;;  %2552 = vmatprep.subr.bf16.mxu0 %v3139_v43 }
  0x85   : >> { %2530 = vmatprep.subr.bf16.mxu1 %v3051_v20 }
  0x87   : >> { %2553 = vmatpush3.bf16.msra.mxu0 %v3150_v46 }
  0x88   : >> { %2531 = vmatpush3.bf16.msra.mxu1 %v3059_v22  ;;  %2554 = vmatprep.subr.bf16.mxu0 %v3158_v48 }
  0x89   : >> { %2532 = vmatprep.subr.bf16.mxu1 %v3067_v24 }
  0x8a   : >> { %1151 = vmatmul.mubr.bf16.gmra.mrb[20].mxu0 %v2847_v10  ;;  %v2857_v10 = vld [vmem:[%s3683_s1 + $0xb0] ss:$40 sps:$4 sm:$0xff]  }
  0x8b   : >> { %2555 = vmatpush3.bf16.msra.mxu0 %v3166_v50  ;;  %1418 = vmatprep.mubr.bf16.mxu0 %v2859_v29  ;;  %v2860_v29 = vld [vmem:[%s3683_s1 + $0x104] ss:$40 sps:$4 sm:$0xff]  }
  0x8c   : >> { %2533 = vmatpush3.bf16.msra.mxu1 %v3075_v26  ;;  %2556 = vmatprep.subr.bf16.mxu0 %v3174_v52 }
  0x8d   : >> { %2534 = vmatprep.subr.bf16.mxu1 %v3083_v28 }
  0x8f   : >> { %2557 = vmatpush3.bf16.msra.mxu0 %v3182_v54 }
  0x90   : >> { %2535 = vmatpush3.bf16.msra.mxu1 %v3091_v30  ;;  %2558 = vmatprep.subr.bf16.mxu0 %v3190_v56 }
  0x91   : >> { %2536 = vmatprep.subr.bf16.mxu1 %v3099_v32 }
  0x93   : >> { %2559 = vmatpush3.bf16.msra.mxu0 %v3198_v58 }
  0x94   : >> { %2537 = vmatpush3.bf16.msra.mxu1 %v3113_v36  ;;  %2560 = vmatprep.subr.bf16.mxu0 %v3206_v60 }
  0x95   : >> { %2578 = vmatprep.subr.bf16.mxu1 %v3127_v40 }
  0x97   : >> { %1370 = vmatmul.mubr.bf16.vlgmr.msra.gmra.mrb[24].mxu1 %v2851_v4  ;;  %2561 = vmatpush3.bf16.msra.mxu0 %v3214_v62  ;;  %v3727_v4 = vld [vmem:[#allocation8_spill] sm:$0xff] }
  0x98   : >> { %2579 = vmatpush3.bf16.msra.mxu1 %v3135_v42  ;;  %2562 = vmatprep.subr.bf16.mxu0 %v3226_v2 }
  0x99   : >> { %2580 = vmatprep.subr.bf16.mxu1 %v3143_v44  ;;  %1377 = vmatprep.mubr.bf16.mxu1 %v2854_v6  ;;  %v2862_v6 = vld [vmem:[%s3683_s1 + $0x100] ss:$40 sps:$4 sm:$0xff]  }
  0x9b   : >> { %2563 = vmatpush3.bf16.msra.mxu0 %v3233_v35 }
  0x9c   : >> { %2581 = vmatpush3.bf16.msra.mxu1 %v3154_v47  ;;  %2564 = vmatprep.subr.bf16.mxu0 %v3241_v39 }
  0x9d   : >> { %2582 = vmatprep.subr.bf16.mxu1 %v3162_v49 }
  0x9f   : >> { %1378 = vmatmul.mubr.bf16.gmra.mrb[28].mxu1 %v2856_v8  ;;  %2565 = vmatpush3.bf16.msra.mxu0 %v3249_v0  ;;  %v2871_v8 = vld [vmem:[%s3683_s1 + $0xc4] ss:$40 sps:$4 sm:$0xff]  }
  0xa0   : >> { %2583 = vmatpush3.bf16.msra.mxu1 %v3170_v51  ;;  %1484 = vmatprep.subr.bf16.mxu0 %v3725_v61 }
  0xa1   : >> { %2584 = vmatprep.subr.bf16.mxu1 %v3178_v53  ;;  %1467 = vmatprep.mubr.bf16.mxu1 %v2865_v25  ;;  %v3728_v25 = vld [vmem:[#allocation9_spill] sm:$0xff] }
  0xa2   : >> { %1419 = vmatmul.mubr.bf16.vlgmr.msra.gmra.mrb[24].mxu0 %v2857_v10  ;;  %v3729_v10 = vld [vmem:[#allocation10_spill] sm:$0xff] }
  0xa3   : >> { %1485 = vmatpush1.bf16.msra.mxu0 %v3272_v59  ;;  %1426 = vmatprep.mubr.bf16.mxu0 %v2860_v29  ;;  %v3730_v29 = vld [vmem:[#allocation11_spill] sm:$0xff] }
  0xa4   : >> { %2585 = vmatpush3.bf16.msra.mxu1 %v3186_v55  ;;  %1486 = vmatprep.subr.bf16.mxu0 %v3725_v61 }
  0xa5   : >> { %2586 = vmatprep.subr.bf16.mxu1 %v3727_v4  ;;  %v3731_v4 = vld [vmem:[#allocation12_spill] sm:$0xff] }
  0xa7   : >> { %1487 = vmatpush1.bf16.msra.mxu0 %v3275_v57  ;;  %v3732_v57 = vld [vmem:[#allocation13_spill] sm:$0xff] }
  0xa8   : >> { %2587 = vmatpush3.bf16.msra.mxu1 %v3728_v25  ;;  %1488 = vmatprep.subr.bf16.mxu0 %v3725_v61  ;;  %v3733_v25 = vld [vmem:[#allocation14_spill] sm:$0xff] }
  0xa9   : >> { %2588 = vmatprep.subr.bf16.mxu1 %v3729_v10 }
  0xaa   : >> { %1427 = vmatmul.mubr.bf16.gmra.mrb[28].mxu0 %v2862_v6  ;;  %v2863_v6 = vld [vmem:[%s3683_s1 + $0xb8] ss:$40 sps:$4 sm:$0xff]  }
  0xab   : >> { %1489 = vmatpush1.bf16.msra.mxu0 %v3291_v37  ;;  %2323 = vmatprep.mubr.msk.bf16.mxu0 %vm907_vm0, %v2871_v8  ;;  %v3734_v8 = vld [vmem:[#allocation15_spill] sm:$0xff] }
  0xac   : >> { %2589 = vmatpush3.bf16.msra.mxu1 %v3730_v29  ;;  %1490 = vmatprep.subr.bf16.mxu0 %v3725_v61 }
  0xad   : >> { %2590 = vmatprep.subr.bf16.mxu1 %v3731_v4 }
  0xaf   : >> { %1491 = vmatpush1.bf16.msra.mxu0 %v3302_v1 }
  0xb0   : >> { %2591 = vmatpush3.bf16.msra.mxu1 %v3732_v57  ;;  %1492 = vmatprep.subr.bf16.mxu0 %v3725_v61  ;;  %v2866_v57 = vld [vmem:[%s3683_s1 + $0x10c] ss:$40 sps:$4 sm:$0xff]  }
  0xb1   : >> { %2592 = vmatprep.subr.bf16.mxu1 %v3733_v25 }
  0xb3   : >> { %1493 = vmatpush1.bf16.msra.mxu0 %v3312_v63 }
  0xb4   : >> { %2593 = vmatpush3.bf16.msra.mxu1 %v3734_v8  ;;  %1494 = vmatprep.subr.bf16.mxu0 %v3725_v61 }
  0xb5   : >> { %2606 = vmatprep.subr.bf16.mxu1 %v2984_v3  ;;  %v2868_v3 = vld [vmem:[%s3683_s1 + $0x108] ss:$40 sps:$4 sm:$0xff]  }
  0xb7   : >> { %1468 = vmatmul.mubr.bf16.vlgmr.msra.gmra.mrb[32].mxu1 %v2863_v6  ;;  %1495 = vmatpush1.bf16.msra.mxu0 %v3322_v15  ;;  %v2907_v6 = vld [vmem:[%s2981_s28 + $0xc8] sm:$0xff]  }
  0xb8   : >> { %2607 = vmatpush3.bf16.msra.mxu1 %v2991_v5  ;;  %1496 = vmatprep.subr.bf16.mxu0 %v3725_v61  ;;  %v2876_v5 = vld [vmem:[%s3683_s1 + $0x144] ss:$40 sps:$4 sm:$0xff]  }
  0xb9   : >> { %2608 = vmatprep.subr.bf16.mxu1 %v2999_v7  ;;  %1475 = vmatprep.mubr.bf16.mxu1 %v2866_v57  ;;  %v3735_v7 = vld [vmem:[#allocation2_spill] sm:$0xff]  ;;  %v3738_v57 = vld [vmem:[#allocation5_spill] sm:$0xff] }
  0xbb   : >> { %1497 = vmatpush1.bf16.msra.mxu0 %v3330_v33 }
  0xbc   : >> { %2609 = vmatpush3.bf16.msra.mxu1 %v3007_v9  ;;  %1498 = vmatprep.subr.bf16.mxu0 %v3725_v61  ;;  %v3736_v9 = vld [vmem:[#allocation3_spill] sm:$0xff] }
  0xbd   : >> { %2610 = vmatprep.subr.bf16.mxu1 %v3015_v11  ;;  %v2869_v11 = vld [vmem:[%s3683_s1 + $0xc0] ss:$40 sps:$4 sm:$0xff]  }
  0xbf   : >> { %1476 = vmatmul.mubr.bf16.gmra.mrb[36].mxu1 %v2868_v3  ;;  %1499 = vmatpush1.bf16.msra.mxu0 %v3337_v45  ;;  %v3739_v3 = vld [vmem:[#allocation6_spill] sm:$0xff] }
  0xc0   : >> { %2611 = vmatpush3.bf16.msra.mxu1 %v3023_v13  ;;  %1500 = vmatprep.subr.bf16.mxu0 %v3725_v61  ;;  %v2872_v13 = vld [vmem:[%s3683_s1 + $0x114] ss:$40 sps:$4 sm:$0xff]  }
  0xc1   : >> { %2612 = vmatprep.subr.bf16.mxu1 %v3735_v7  ;;  %1710 = vmatprep.mubr.bf16.mxu1 %v2876_v5  ;;  %v2877_v5 = vld [vmem:[%s3683_s1 + $0x110] ss:$40 sps:$4 sm:$0xff]   ;;  %v2908_v7 = vld [vmem:[%s2981_s28 + $0x88] sm:$0xff]  }
  0xc3   : >> { %1501 = vmatpush1.bf16.msra.mxu0 %v3347_v23 }
  0xc4   : >> { %2613 = vmatpush3.bf16.msra.mxu1 %v3039_v17  ;;  %1502 = vmatprep.subr.bf16.mxu0 %v3725_v61  ;;  %v3737_v17 = vld [vmem:[#allocation4_spill] sm:$0xff] }
  0xc5   : >> { %2614 = vmatprep.subr.bf16.mxu1 %v3047_v19  ;;  %v2905_v19 = vld [vmem:[%s2981_s28 + $0xc0] sm:$0xff]  }
  0xc7   : >> { %1503 = vmatpush1.bf16.msra.mxu0 %v3357_v31 }
  0xc8   : >> { %2615 = vmatpush3.bf16.msra.mxu1 %v3055_v21  ;;  %1504 = vmatprep.subr.bf16.mxu0 %v3725_v61  ;;  %v2906_v21 = vld [vmem:[%s2981_s28 + $0x80] sm:$0xff]  }
  0xc9   : >> { %2616 = vmatprep.subr.bf16.mxu1 %v3736_v9  ;;  %v3740_v9 = vld [vmem:[#allocation7_spill] sm:$0xff] }
  0xcb   : >> { %1505 = vmatpush1.bf16.msra.mxu0 %v3363_v34 }
  0xcc   : >> { %2617 = vmatpush3.bf16.msra.mxu1 %v3737_v17  ;;  %2634 = vmatprep.subr.bf16.mxu0 %v2905_v19 }
  0xcd   : >> { %2618 = vmatprep.subr.bf16.mxu1 %v3079_v27  ;;  %v2874_v27 = vld [vmem:[%s3683_s1 + $0x140] ss:$40 sps:$4 sm:$0xff]  }
  0xce   : >> { %1517 = vmatmul.mubr.bf16.vlgmr.msra.gmra.mrb[32].mxu0 %v2869_v11  ;;  %v2878_v11 = vld [vmem:[%s3683_s1 + $0x194] ss:$40 sps:$4 sm:$0xff]  }
  0xcf   : >> { %2635 = vmatpush3.bf16.msra.mxu0 %v2906_v21  ;;  %2324 = vmatprep.mubr.msk.bf16.mxu0 %vm907_vm0, %v2872_v13  ;;  %v2883_v13 = vld [vmem:[%s3683_s1 + $0x14c] ss:$40 sps:$4 sm:$0xff]  }
  0xd0   : >> { %2619 = vmatpush3.bf16.msra.mxu1 %v3738_v57  ;;  %2636 = vmatprep.subr.bf16.mxu0 %v2907_v6 }
  0xd1   : >> { %2620 = vmatprep.subr.bf16.mxu1 %v3739_v3 }
  0xd3   : >> { %2637 = vmatpush3.bf16.msra.mxu0 %v2908_v7 }
  0xd4   : >> { %2621 = vmatpush3.bf16.msra.mxu1 %v3740_v9  ;;  %2638 = vmatprep.subr.bf16.mxu0 %v3019_v12  ;;  %v2880_v12 = vld [vmem:[%s3683_s1 + $0x190] ss:$40 sps:$4 sm:$0xff]  }
  0xd5   : >> { %2662 = vmatprep.subr.bf16.mxu1 %v3120_v38  ;;  %v3743_v38 = vld [vmem:[#allocation9_spill] sm:$0xff] }
  0xd6   : >> { %1525 = vmatmul.mubr.bf16.gmra.mrb[36].mxu0 %v2877_v5 }
  0xd7   : >> { %1711 = vmatmul.mubr.bf16.vlgmr.msra.gmra.mrb[40].mxu1 %v2874_v27  ;;  %2639 = vmatpush3.bf16.msra.mxu0 %v3027_v14  ;;  %v2888_v14 = vld [vmem:[%s3683_s1 + $0x154] ss:$40 sps:$4 sm:$0xff]  }
  0xd8   : >> { %2663 = vmatpush3.bf16.msra.mxu1 %v3131_v41  ;;  %2640 = vmatprep.subr.bf16.mxu0 %v3035_v16  ;;  %v2881_v16 = vld [vmem:[%s3683_s1 + $0x148] ss:$40 sps:$4 sm:$0xff]  }
  0xd9   : >> { %2664 = vmatprep.subr.bf16.mxu1 %v3139_v43  ;;  %1718 = vmatprep.mubr.bf16.mxu1 %v2878_v11 }
  0xda   : >> { %1759 = vmatprep.mubr.bf16.mxu0 %v2883_v13 }
  0xdb   : >> { %2641 = vmatpush3.bf16.msra.mxu0 %v3043_v18  ;;  %v2884_v18 = vld [vmem:[%s3683_s1 + $0x19c] ss:$40 sps:$4 sm:$0xff]  }
  0xdc   : >> { %2665 = vmatpush3.bf16.msra.mxu1 %v3150_v46  ;;  %2642 = vmatprep.subr.bf16.mxu0 %v3051_v20  ;;  %v2889_v20 = vld [vmem:[%s3683_s1 + $0x198] ss:$40 sps:$4 sm:$0xff]  }
  0xdd   : >> { %2666 = vmatprep.subr.bf16.mxu1 %v3158_v48  ;;  %v2893_v48 = vld [vmem:[%s3683_s1 + $0x158] ss:$40 sps:$4 sm:$0xff]  }
  0xdf   : >> { %2643 = vmatpush3.bf16.msra.mxu0 %v3059_v22  ;;  %1719 = vmatmul.mubr.bf16.gmra.mrb[44].mxu1 %v2880_v12  ;;  %v2886_v22 = vld [vmem:[%s3683_s1 + $0x150] ss:$40 sps:$4 sm:$0xff]  }
  0xe0   : >> { %2667 = vmatpush3.bf16.msra.mxu1 %v3166_v50  ;;  %2644 = vmatprep.subr.bf16.mxu0 %v3067_v24  ;;  %v2890_v24 = vld [vmem:[%s3683_s1 + $0x1a4] ss:$40 sps:$4 sm:$0xff]  }
  0xe1   : >> { %2668 = vmatprep.subr.bf16.mxu1 %v3174_v52  ;;  %1808 = vmatprep.mubr.bf16.mxu1 %v2888_v14  ;;  %v2896_v52 = vld [vmem:[%s3683_s1 + $0x1ac] ss:$40 sps:$4 sm:$0xff]  }
  0xe3   : >> { %2645 = vmatpush3.bf16.msra.mxu0 %v3075_v26  ;;  %v2895_v26 = vld [vmem:[%s3683_s1 + $0x15c] ss:$40 sps:$4 sm:$0xff]  }
  0xe4   : >> { %2669 = vmatpush3.bf16.msra.mxu1 %v3182_v54  ;;  %2646 = vmatprep.subr.bf16.mxu0 %v3083_v28  ;;  %v2892_v28 = vld [vmem:[%s3683_s1 + $0x1a0] ss:$40 sps:$4 sm:$0xff]  }
  0xe5   : >> { %2670 = vmatprep.subr.bf16.mxu1 %v3190_v56 }
  0xe7   : >> { %2647 = vmatpush3.bf16.msra.mxu0 %v3091_v30  ;;  %v3741_v30 = vld [vmem:[#allocation16_spill] sm:$0xff] }
  0xe8   : >> { %2671 = vmatpush3.bf16.msra.mxu1 %v3198_v58  ;;  %2648 = vmatprep.subr.bf16.mxu0 %v3099_v32  ;;  %v3742_v32 = vld [vmem:[#allocation8_spill] sm:$0xff]  ;;  %v1943_v58 = vld [vmem:[%s3684_s2] sm:$0xff] }
  0xe9   : >> { %2672 = vmatprep.subr.bf16.mxu1 %v3206_v60  ;;  %1949 = vperm.xlu0 %2738, %v1943_v58  }
  0xeb   : >> { %2649 = vmatpush3.bf16.msra.mxu0 %v3113_v36  ;;  %v2901_v36 = vld [vmem:[%s3683_s1 + $0x164] ss:$40 sps:$4 sm:$0xff]  }
  0xec   : >> { %2673 = vmatpush3.bf16.msra.mxu1 %v3214_v62  ;;  %2690 = vmatprep.subr.bf16.mxu0 %v3127_v40  ;;  %v3744_v40 = vld [vmem:[#allocation13_spill] sm:$0xff] }
  0xed   : >> { %2674 = vmatprep.subr.bf16.mxu1 %v3226_v2  ;;  %v2898_v2 = vld [vmem:[%s3683_s1 + $0x1a8] ss:$40 sps:$4 sm:$0xff]  }
  0xee   : >> { %1760 = vmatmul.mubr.bf16.vlgmr.msra.gmra.mrb[40].mxu0 %v2881_v16 }
  0xef   : >> { %2691 = vmatpush3.bf16.msra.mxu0 %v3135_v42  ;;  %1767 = vmatprep.mubr.bf16.mxu0 %v2884_v18 }
  0xf0   : >> { %2675 = vmatpush3.bf16.msra.mxu1 %v3233_v35  ;;  %2692 = vmatprep.subr.bf16.mxu0 %v3143_v44 }
  0xf1   : >> { %2676 = vmatprep.subr.bf16.mxu1 %v3241_v39 }
  0xf3   : >> { %2693 = vmatpush3.bf16.msra.mxu0 %v3154_v47 }
  0xf4   : >> { %2677 = vmatpush3.bf16.msra.mxu1 %v3249_v0  ;;  %2694 = vmatprep.subr.bf16.mxu0 %v3162_v49 }
  0xf5   : >> { %1874 = vmatprep.subr.bf16.mxu1 %v3725_v61 }
  0xf6   : >> { %1768 = vmatmul.mubr.bf16.gmra.mrb[44].mxu0 %v2889_v20 }
  0xf7   : >> { %1809 = vmatmul.mubr.bf16.vlgmr.msra.gmra.mrb[48].mxu1 %v2886_v22  ;;  %2695 = vmatpush3.bf16.msra.mxu0 %v3170_v51 }
  0xf8   : >> { %1875 = vmatpush1.bf16.msra.mxu1 %v3272_v59  ;;  %2696 = vmatprep.subr.bf16.mxu0 %v3178_v53  ;;  %v1945_v59 = vld [vmem:[%s3684_s2 + $0x10] sm:$0xff] }
  0xf9   : >> { %1876 = vmatprep.subr.bf16.mxu1 %v3725_v61  ;;  %1816 = vmatprep.mubr.bf16.mxu1 %v2890_v24 }
  0xfa   : >> { %1857 = vmatprep.mubr.bf16.mxu0 %v2895_v26  ;;  %1959 = vperm.xlu1 %2739, %v1945_v59  }
  0xfb   : >> { %2697 = vmatpush3.bf16.msra.mxu0 %v3186_v55 }
  0xfc   : >> { %1877 = vmatpush1.bf16.msra.mxu1 %v3741_v30  ;;  %2698 = vmatprep.subr.bf16.mxu0 %v3742_v32 }
  0xfd   : >> { %1878 = vmatprep.subr.bf16.mxu1 %v3725_v61 }
  0xff   : >> { %1817 = vmatmul.mubr.bf16.gmra.mrb[52].mxu1 %v2892_v28  ;;  %2699 = vmatpush3.bf16.msra.mxu0 %v3743_v38 }
 0x100   : >> { %1879 = vmatpush1.bf16.msra.mxu1 %v3291_v37  ;;  %2700 = vmatprep.subr.bf16.mxu0 %v3729_v10  ;;  %v1944_v37 = vld [vmem:[%s3684_s2 + $0x8] sm:$0xff] }
 0x101   : >> { %1880 = vmatprep.subr.bf16.mxu1 %v3725_v61  ;;  %2365 = vmatprep.mubr.msk.bf16.mxu1 %vm907_vm0, %v2901_v36 }
 0x102   : >> { %1954 = vperm.xlu0 %2738, %v1944_v37  }
 0x103   : >> { %2701 = vmatpush3.bf16.msra.mxu0 %v3730_v29 }
 0x104   : >> { %1881 = vmatpush1.bf16.msra.mxu1 %v3302_v1  ;;  %2702 = vmatprep.subr.bf16.mxu0 %v3731_v4 }
 0x105   : >> { %1882 = vmatprep.subr.bf16.mxu1 %v3725_v61 }
 0x107   : >> { %2703 = vmatpush3.bf16.msra.mxu0 %v3744_v40 }
 0x108   : >> { %1883 = vmatpush1.bf16.msra.mxu1 %v3312_v63  ;;  %2704 = vmatprep.subr.bf16.mxu0 %v3733_v25  ;;  %v1946_v63 = vld [vmem:[%s3684_s2 + $0x18] sm:$0xff] }
 0x109   : >> { %v2398_v41 = vpop.f32.mrb[0].mxu0  ;;  %1884 = vmatprep.subr.bf16.mxu1 %v3725_v61  ;;  %1964 = vperm.xlu1 %2739, %v1946_v63   ;;  %v2902_v25 = vld [vmem:[%s3683_s1 + $0x1b4] ss:$40 sps:$4 sm:$0xff]  }
 0x10a   : >> { %v2426_v42 = vpop.f32.mrb[0].mxu1  ;;  %v2399_v43 = vpop.f32.mrb[1].mxu0 }
 0x10b   : >> { %v2400_v44 = vadd.f32 %v2399_v43, %v2398_v41  ;;  %v2427_v46 = vpop.f32.mrb[1].mxu1  ;;  %v2401_v47 = vpop.f32.mrb[2].mxu0  ;;  %2705 = vmatpush3.bf16.msra.mxu0 %v3734_v8 }
 0x10c   : >> { %v2428_v49 = vadd.f32 %v2427_v46, %v2426_v42  ;;  %v2429_v50 = vpop.f32.mrb[2].mxu1  ;;  %v2402_v51 = vpop.f32.mrb[3].mxu0  ;;  %1885 = vmatpush1.bf16.msra.mxu1 %v3322_v15 }
 0x10d   : >> { %v2403_v53 = vadd.f32 %v2402_v51, %v2401_v47  ;;  %v2430_v54 = vpop.f32.mrb[3].mxu1  ;;  %1886 = vmatprep.subr.bf16.mxu1 %v3725_v61 }
 0x10e   : >> { %v998_v55 = vadd.f32 %v2428_v49, %v2400_v44  ;;  %v2431_v56 = vadd.f32 %v2430_v54, %v2429_v50  ;;  %1858 = vmatmul.mubr.bf16.vlgmr.msra.gmra.mrb[48].mxu0 %v2893_v48 }
 0x10f   : >> { %1865 = vmatprep.mubr.bf16.mxu0 %v2896_v52 }
 0x110   : >> { %v1001_v60 = vadd.f32 %v2431_v56, %v2403_v53  ;;  %1887 = vmatpush1.bf16.msra.mxu1 %v3330_v33 }
 0x111   : >> { %v2404_v15 = vpop.f32.mrb[4].mxu0  ;;  %1888 = vmatprep.subr.bf16.mxu1 %v3725_v61 }
 0x112   : >> { %v2405_v62 = vpop.f32.mrb[5].mxu0  ;;  %v2432_v33 = vpop.f32.mrb[4].mxu1 }
 0x113   : >> { %v2406_v35 = vadd.f32 %v2405_v62, %v2404_v15  ;;  %v2407_v39 = vpop.f32.mrb[6].mxu0  ;;  %v2433_v4 = vpop.f32.mrb[5].mxu1 }
 0x114   : >> { %v2408_v0 = vpop.f32.mrb[7].mxu0  ;;  %1889 = vmatpush1.bf16.msra.mxu1 %v3337_v45  ;;  %v2899_v45 = vld [vmem:[%s3683_s1 + $0x160] ss:$40 sps:$4 sm:$0xff]   ;;  %v2434_v10 = vadd.f32 %v2433_v4, %v2432_v33 }
 0x115   : >> { %v2409_v1 = vadd.f32 %v2408_v0, %v2407_v39  ;;  %1890 = vmatprep.subr.bf16.mxu1 %v3725_v61 }
 0x116   : >> { %1866 = vmatmul.mubr.bf16.gmra.mrb[52].mxu0 %v2898_v2  ;;  %v1006_v8 = vadd.f32 %v2434_v10, %v2406_v35 }
 0x118   : >> { %1891 = vmatpush1.bf16.msra.mxu1 %v3347_v23  ;;  %v2435_v23 = vpop.f32.mrb[6].mxu1 }
 0x119   : >> { %1892 = vmatprep.subr.bf16.mxu1 %v3725_v61  ;;  %v2436_v29 = vpop.f32.mrb[7].mxu1 }
 0x11a   : >> { %v2437_v17 = vadd.f32 %v2436_v29, %v2435_v23 }
 0x11c   : >> { %1893 = vmatpush1.bf16.msra.mxu1 %v3357_v31  ;;  %v1009_v31 = vadd.f32 %v2437_v17, %v2409_v1 }
 0x11d   : >> { %1894 = vmatprep.subr.bf16.mxu1 %v3725_v61  ;;  %v2904_v61 = vld [vmem:[%s3683_s1 + $0x1b0] ss:$40 sps:$4 sm:$0xff]  }
 0x120   : >> { %1895 = vmatpush1.bf16.msra.mxu1 %v3363_v34 }
 0x123   : >> { %1907 = vmatmul.mubr.bf16.vlgmr.msra.gmra.mrb[56].mxu1 %v2899_v45 }
 0x124   : >> { %2366 = vmatprep.mubr.msk.bf16.mxu1 %vm907_vm0, %v2902_v25 }
 0x129   : >> { %v2454_v19 = vpop.f32.mrb[8].mxu0 }
 0x12a   : >> { %v2482_v34 = vpop.f32.mrb[8].mxu1  ;;  %v2455_v21 = vpop.f32.mrb[9].mxu0 }
 0x12b   : >> { %v2456_v57 = vadd.f32 %v2455_v21, %v2454_v19  ;;  %v2483_v6 = vpop.f32.mrb[9].mxu1  ;;  %1915 = vmatmul.mubr.bf16.gmra.mrb[60].mxu1 %v2904_v61  ;;  %v2457_v3 = vpop.f32.mrb[10].mxu0 }
 0x12c   : >> { %v2484_v5 = vadd.f32 %v2483_v6, %v2482_v34  ;;  %v2485_v7 = vpop.f32.mrb[10].mxu1  ;;  %v2458_v27 = vpop.f32.mrb[11].mxu0 }
 0x12d   : >> { %v1047_v9 = vadd.f32 %v2456_v57, %v998_v55  ;;  %v2459_v11 = vadd.f32 %v2458_v27, %v2457_v3  ;;  %v2486_v13 = vpop.f32.mrb[11].mxu1 }
 0x12e   : >> { %v2487_v12 = vadd.f32 %v2486_v13, %v2485_v7 }
 0x12f   : >> { %v1050_v14 = vadd.f32 %v2459_v11, %v1001_v60  ;;  %v1096_v16 = vadd.f32 %v2484_v5, %v1047_v9 }
 0x131   : >> { %v2460_v18 = vpop.f32.mrb[12].mxu0  ;;  %v1099_v20 = vadd.f32 %v2487_v12, %v1050_v14 }
 0x132   : >> { %v2461_v22 = vpop.f32.mrb[13].mxu0  ;;  %v2488_v24 = vpop.f32.mrb[12].mxu1 }
 0x133   : >> { %v2462_v26 = vadd.f32 %v2461_v22, %v2460_v18  ;;  %v2463_v28 = vpop.f32.mrb[14].mxu0  ;;  %v2489_v30 = vpop.f32.mrb[13].mxu1 }
 0x134   : >> { %v2464_v32 = vpop.f32.mrb[15].mxu0  ;;  %v2490_v36 = vadd.f32 %v2489_v30, %v2488_v24  ;;  %v2491_v38 = vpop.f32.mrb[14].mxu1 }
 0x135   : >> { %v1055_v40 = vadd.f32 %v2462_v26, %v1006_v8  ;;  %v2465_v41 = vadd.f32 %v2464_v32, %v2463_v28  ;;  %v2492_v42 = vpop.f32.mrb[15].mxu1 }
 0x136   : >> { %v2493_v43 = vadd.f32 %v2492_v42, %v2491_v38 }
 0x137   : >> { %v1058_v44 = vadd.f32 %v2465_v41, %v1009_v31  ;;  %v1104_v46 = vadd.f32 %v2490_v36, %v1055_v40 }
 0x139   : >> { %v1107_v47 = vadd.f32 %v2493_v43, %v1058_v44 }
 0x14a   : >> { %v2510_v48 = vpop.f32.mrb[16].mxu1 }
 0x14b   : >> { %v2511_v49 = vpop.f32.mrb[17].mxu1 }
 0x14c   : >> { %v2512_v50 = vadd.f32 %v2511_v49, %v2510_v48  ;;  %v2513_v51 = vpop.f32.mrb[18].mxu1 }
 0x14d   : >> { %v2514_v52 = vpop.f32.mrb[19].mxu1 }
 0x14e   : >> { %v2515_v53 = vadd.f32 %v2514_v52, %v2513_v51 }
 0x152   : >> { %v2516_v54 = vpop.f32.mrb[20].mxu1 }
 0x153   : >> { %v2517_v55 = vpop.f32.mrb[21].mxu1 }
 0x154   : >> { %v2518_v56 = vadd.f32 %v2517_v55, %v2516_v54  ;;  %v2519_v58 = vpop.f32.mrb[22].mxu1 }
 0x155   : >> { %v1144_v59 = vpop.f32.mrb[16].mxu0  ;;  %v2520_v60 = vpop.f32.mrb[23].mxu1 }
 0x156   : >> { %v3658_v15 = vadd.f32 %v1144_v59, %v1096_v16  ;;  %v1146_v62 = vpop.f32.mrb[17].mxu0  ;;  %v2521_v2 = vadd.f32 %v2520_v60, %v2519_v58 }
 0x157   : >> { %v1147_v35 = vpop.f32.mrb[18].mxu0 }
 0x158   : >> { %v3660_v39 = vadd.f32 %v1147_v35, %v1099_v20  ;;  %v1149_v0 = vpop.f32.mrb[19].mxu0 }
 0x15d   : >> { %v1152_v37 = vpop.f32.mrb[20].mxu0 }
 0x15e   : >> { %v3662_v1 = vadd.f32 %v1152_v37, %v1104_v46  ;;  %v1154_v63 = vpop.f32.mrb[21].mxu0 }
 0x15f   : >> { %v1155_v33 = vpop.f32.mrb[22].mxu0 }
 0x160   : >> { %v3664_v45 = vadd.f32 %v1155_v33, %v1107_v47  ;;  %v1157_v4 = vpop.f32.mrb[23].mxu0 }
 0x16a   : >> { %v2538_v25 = vpop.f32.mrb[24].mxu1 }
 0x16b   : >> { %v2539_v10 = vpop.f32.mrb[25].mxu1 }
 0x16c   : >> { %v2540_v23 = vadd.f32 %v2539_v10, %v2538_v25  ;;  %v2541_v29 = vpop.f32.mrb[26].mxu1 }
 0x16d   : >> { %v2542_v8 = vpop.f32.mrb[27].mxu1 }
 0x16e   : >> { %v1372_v17 = vadd.f32 %v2540_v23, %v2512_v50  ;;  %v2543_v31 = vadd.f32 %v2542_v8, %v2541_v29 }
 0x170   : >> { %v1375_v61 = vadd.f32 %v2543_v31, %v2515_v53 }
 0x172   : >> { %v2544_v19 = vpop.f32.mrb[28].mxu1 }
 0x173   : >> { %v2545_v34 = vpop.f32.mrb[29].mxu1 }
 0x174   : >> { %v2546_v21 = vadd.f32 %v2545_v34, %v2544_v19  ;;  %v2547_v57 = vpop.f32.mrb[30].mxu1 }
 0x175   : >> { %v2548_v6 = vpop.f32.mrb[31].mxu1  ;;  %v2566_v3 = vpop.f32.mrb[24].mxu0 }
 0x176   : >> { %v1380_v5 = vadd.f32 %v2546_v21, %v2518_v56  ;;  %v2549_v7 = vadd.f32 %v2548_v6, %v2547_v57  ;;  %v2567_v27 = vpop.f32.mrb[25].mxu0 }
 0x177   : >> { %v2568_v9 = vadd.f32 %v2567_v27, %v2566_v3  ;;  %v2569_v11 = vpop.f32.mrb[26].mxu0 }
 0x178   : >> { %v1383_v13 = vadd.f32 %v2549_v7, %v2521_v2  ;;  %v2570_v12 = vpop.f32.mrb[27].mxu0 }
 0x179   : >> { %v1421_v14 = vadd.f32 %v2568_v9, %v1372_v17  ;;  %v2571_v16 = vadd.f32 %v2570_v12, %v2569_v11 }
 0x17b   : >> { %v1424_v18 = vadd.f32 %v2571_v16, %v1375_v61 }
 0x17d   : >> { %v2572_v20 = vpop.f32.mrb[28].mxu0 }
 0x17e   : >> { %v2573_v22 = vpop.f32.mrb[29].mxu0 }
 0x17f   : >> { %v2574_v24 = vadd.f32 %v2573_v22, %v2572_v20  ;;  %v2575_v26 = vpop.f32.mrb[30].mxu0 }
 0x180   : >> { %v2576_v28 = vpop.f32.mrb[31].mxu0 }
 0x181   : >> { %v1429_v30 = vadd.f32 %v2574_v24, %v1380_v5  ;;  %v2577_v32 = vadd.f32 %v2576_v28, %v2575_v26 }
 0x183   : >> { %v1432_v36 = vadd.f32 %v2577_v32, %v1383_v13 }
 0x18a   : >> { %v2594_v38 = vpop.f32.mrb[32].mxu1 }
 0x18b   : >> { %v2595_v40 = vpop.f32.mrb[33].mxu1 }
 0x18c   : >> { %v2596_v41 = vadd.f32 %v2595_v40, %v2594_v38  ;;  %v2597_v42 = vpop.f32.mrb[34].mxu1 }
 0x18d   : >> { %v2598_v43 = vpop.f32.mrb[35].mxu1 }
 0x18e   : >> { %v2599_v44 = vadd.f32 %v2598_v43, %v2597_v42  ;;  %v1470_v46 = vadd.f32 %v2596_v41, %v1421_v14 }
 0x190   : >> { %v1473_v47 = vadd.f32 %v2599_v44, %v1424_v18 }
 0x192   : >> { %v2600_v48 = vpop.f32.mrb[36].mxu1 }
 0x193   : >> { %v2601_v49 = vpop.f32.mrb[37].mxu1 }
 0x194   : >> { %v2602_v50 = vadd.f32 %v2601_v49, %v2600_v48  ;;  %v2603_v51 = vpop.f32.mrb[38].mxu1 }
 0x195   : >> { %v2604_v52 = vpop.f32.mrb[39].mxu1 }
 0x196   : >> { %v2605_v53 = vadd.f32 %v2604_v52, %v2603_v51  ;;  %v1478_v54 = vadd.f32 %v2602_v50, %v1429_v30 }
 0x198   : >> { %v1481_v55 = vadd.f32 %v2605_v53, %v1432_v36 }
 0x1a1   : >> { %v1518_v56 = vpop.f32.mrb[32].mxu0 }
 0x1a2   : >> { %v1519_v58 = vadd.f32 %v1518_v56, %v1470_v46  ;;  %v1520_v59 = vpop.f32.mrb[33].mxu0 }
 0x1a3   : >> { %v1521_v60 = vpop.f32.mrb[34].mxu0 }
 0x1a4   : >> { %v1522_v62 = vadd.f32 %v1521_v60, %v1473_v47  ;;  %1537 = vrot.lane.b32.xlu0 %v1519_v58, %s2926_s15  ;;  %v1523_v2 = vpop.f32.mrb[35].mxu0 }
 0x1a6   : >> { %1539 = vrot.lane.b32.xlu1 %v1522_v62, %s2926_s15 }
 0x1a9   : >> { %v1526_v35 = vpop.f32.mrb[36].mxu0 }
 0x1aa   : >> { %v1527_v0 = vadd.f32 %v1526_v35, %v1478_v54  ;;  %v2622_v37 = vpop.f32.mrb[40].mxu1  ;;  %v1528_v63 = vpop.f32.mrb[37].mxu0 }
 0x1ab   : >> { %v2623_v33 = vpop.f32.mrb[41].mxu1  ;;  %v1529_v4 = vpop.f32.mrb[38].mxu0 }
 0x1ac   : >> { %v2624_v25 = vadd.f32 %v2623_v33, %v2622_v37  ;;  %v1530_v10 = vadd.f32 %v1529_v4, %v1481_v55  ;;  %v2625_v23 = vpop.f32.mrb[42].mxu1  ;;  %1541 = vrot.lane.b32.xlu0 %v1527_v0, %s2926_s15  ;;  %v1531_v29 = vpop.f32.mrb[39].mxu0 }
 0x1ad   : >> { %v2626_v8 = vpop.f32.mrb[43].mxu1 }
 0x1ae   : >> { %v2627_v17 = vadd.f32 %v2626_v8, %v2625_v23  ;;  %1543 = vrot.lane.b32.xlu1 %v1530_v10, %s2926_s15 }
 0x1b2   : >> { %v2628_v31 = vpop.f32.mrb[44].mxu1 }
 0x1b3   : >> { %v2629_v61 = vpop.f32.mrb[45].mxu1 }
 0x1b4   : >> { %v2630_v19 = vadd.f32 %v2629_v61, %v2628_v31  ;;  %v2631_v34 = vpop.f32.mrb[46].mxu1 }
 0x1b5   : >> { %v2632_v21 = vpop.f32.mrb[47].mxu1 }
 0x1b6   : >> { %v2633_v57 = vadd.f32 %v2632_v21, %v2631_v34 }
 0x1c1   : >> { %v2650_v6 = vpop.f32.mrb[40].mxu0 }
 0x1c2   : >> { %v2651_v3 = vpop.f32.mrb[41].mxu0 }
 0x1c3   : >> { %v2652_v5 = vadd.f32 %v2651_v3, %v2650_v6  ;;  %v2653_v7 = vpop.f32.mrb[42].mxu0  ;;  %v1950_v6 = vpop.permute.xlu0 %1949 }
 0x1c4   : >> { %v2654_v27 = vpop.f32.mrb[43].mxu0  ;;  %v1960_v3 = vpop.permute.xlu1 %1959 }
 0x1c5   : >> { %v1762_v9 = vadd.f32 %v2652_v5, %v2624_v25  ;;  %v2655_v11 = vadd.f32 %v2654_v27, %v2653_v7 }
 0x1c7   : >> { %v1765_v13 = vadd.f32 %v2655_v11, %v2627_v17  ;;  %v1955_v5 = vpop.permute.xlu0 %1954 }
 0x1c8   : >> { %v1965_v7 = vpop.permute.xlu1 %1964 }
 0x1c9   : >> { %v2656_v12 = vpop.f32.mrb[44].mxu0 }
 0x1ca   : >> { %v2678_v14 = vpop.f32.mrb[48].mxu1  ;;  %v2657_v16 = vpop.f32.mrb[45].mxu0 }
 0x1cb   : >> { %v2658_v18 = vadd.f32 %v2657_v16, %v2656_v12  ;;  %v2679_v20 = vpop.f32.mrb[49].mxu1  ;;  %v2659_v22 = vpop.f32.mrb[46].mxu0 }
 0x1cc   : >> { %v2680_v24 = vadd.f32 %v2679_v20, %v2678_v14  ;;  %v2681_v26 = vpop.f32.mrb[50].mxu1  ;;  %v2660_v28 = vpop.f32.mrb[47].mxu0 }
 0x1cd   : >> { %v1770_v30 = vadd.f32 %v2658_v18, %v2630_v19  ;;  %v2661_v32 = vadd.f32 %v2660_v28, %v2659_v22  ;;  %v2682_v36 = vpop.f32.mrb[51].mxu1 }
 0x1ce   : >> { %v1811_v38 = vadd.f32 %v2680_v24, %v1762_v9  ;;  %v2683_v40 = vadd.f32 %v2682_v36, %v2681_v26 }
 0x1cf   : >> { %v1773_v41 = vadd.f32 %v2661_v32, %v2633_v57 }
 0x1d0   : >> { %v1814_v42 = vadd.f32 %v2683_v40, %v1765_v13 }
 0x1d2   : >> { %v2684_v43 = vpop.f32.mrb[52].mxu1 }
 0x1d3   : >> { %v2685_v44 = vpop.f32.mrb[53].mxu1 }
 0x1d4   : >> { %v2686_v46 = vadd.f32 %v2685_v44, %v2684_v43  ;;  %v2687_v47 = vpop.f32.mrb[54].mxu1 }
 0x1d5   : >> { %v2688_v48 = vpop.f32.mrb[55].mxu1 }
 0x1d6   : >> { %v1819_v49 = vadd.f32 %v2686_v46, %v1770_v30  ;;  %v2689_v50 = vadd.f32 %v2688_v48, %v2687_v47 }
 0x1d8   : >> { %v1822_v51 = vadd.f32 %v2689_v50, %v1773_v41 }
 0x1e1   : >> { %v2706_v52 = vpop.f32.mrb[48].mxu0 }
 0x1e2   : >> { %v2707_v53 = vpop.f32.mrb[49].mxu0 }
 0x1e3   : >> { %v2708_v54 = vadd.f32 %v2707_v53, %v2706_v52  ;;  %v2709_v55 = vpop.f32.mrb[50].mxu0 }
 0x1e4   : >> { %v2710_v56 = vpop.f32.mrb[51].mxu0 }
 0x1e5   : >> { %v2711_v58 = vadd.f32 %v2710_v56, %v2709_v55  ;;  %v1860_v59 = vadd.f32 %v2708_v54, %v1811_v38 }
 0x1e7   : >> { %v1863_v60 = vadd.f32 %v2711_v58, %v1814_v42 }
 0x1e9   : >> { %v2712_v62 = vpop.f32.mrb[52].mxu0 }
 0x1ea   : >> { %v2713_v2 = vpop.f32.mrb[53].mxu0 }
 0x1eb   : >> { %v2714_v35 = vadd.f32 %v2713_v2, %v2712_v62  ;;  %v2715_v0 = vpop.f32.mrb[54].mxu0 }
 0x1ec   : >> { %v2716_v37 = vpop.f32.mrb[55].mxu0 }
 0x1ed   : >> { %v2717_v63 = vadd.f32 %v2716_v37, %v2715_v0  ;;  %v1868_v33 = vadd.f32 %v2714_v35, %v1819_v49 }
 0x1ef   : >> { %v1871_v4 = vadd.f32 %v2717_v63, %v1822_v51 }
 0x1f6   : >> { %v1908_v25 = vpop.f32.mrb[56].mxu1 }
 0x1f7   : >> { %v1909_v10 = vadd.f32 %v1908_v25, %v1860_v59  ;;  %v1910_v23 = vpop.f32.mrb[57].mxu1 }
 0x1f8   : >> { %v1911_v29 = vpop.f32.mrb[58].mxu1 }
 0x1f9   : >> { %v1912_v8 = vadd.f32 %v1911_v29, %v1863_v60  ;;  %v1913_v17 = vpop.f32.mrb[59].mxu1  ;;  %1927 = vrot.lane.b32.xlu0 %v1909_v10, %s2927_s16 }
 0x1fb   : >> { %1929 = vrot.lane.b32.xlu1 %v1912_v8, %s2927_s16 }
 0x1fe   : >> { %v1916_v31 = vpop.f32.mrb[60].mxu1 }
 0x1ff   : >> { %v1917_v61 = vadd.f32 %v1916_v31, %v1868_v33  ;;  %v1918_v19 = vpop.f32.mrb[61].mxu1 }
 0x200   : >> { %v1919_v34 = vpop.f32.mrb[62].mxu1 }
 0x201   : >> { %v1920_v21 = vadd.f32 %v1919_v34, %v1871_v4  ;;  %v1921_v57 = vpop.f32.mrb[63].mxu1  ;;  %1931 = vrot.lane.b32.xlu0 %v1917_v61, %s2927_s16 }
 0x203   : >> { %1933 = vrot.lane.b32.xlu1 %v1920_v21, %s2927_s16 }
 0x216   : >> { %v1538_v27 = vpop.permute.xlu0 %1537 }
 0x217   : >> { %v1549_v12 = vadd.f32 %v1538_v27, %v3658_v15 }
 0x218   : >> { %v1540_v9 = vpop.permute.xlu1 %1539 }
 0x219   : >> { %v1550_v16 = vadd.f32 %v1540_v9, %v3660_v39 }
 0x21e   : >> { %v1542_v11 = vpop.permute.xlu0 %1541 }
 0x21f   : >> { %v1551_v30 = vadd.f32 %v1542_v11, %v3662_v1 }
 0x220   : >> { %v1544_v13 = vpop.permute.xlu1 %1543 }
 0x221   : >> { %v1552_v40 = vadd.f32 %v1544_v13, %v3664_v45 }
 0x26b   : >> { %v1928_v14 = vpop.permute.xlu0 %1927 }
 0x26c   : >> { %v1939_v18 = vadd.f32 %v1928_v14, %v1549_v12 }
 0x26d   : >> { %v1930_v20 = vpop.permute.xlu1 %1929 }
 0x26e   : >> { %v1967_v22 = vadd.f32 %v1950_v6, %v1939_v18  ;;  %v1940_v24 = vadd.f32 %v1930_v20, %v1550_v16 }
 0x270   : >> { %vm1971_vm1 = vcmp.ge.f32.partialorder %v1967_v22, 0.0  ;;  %v1975_v26 = vmul.f32 0.25, %v1967_v22  ;;  %v1968_v28 = vadd.f32 %v1955_v5, %v1940_v24 }
 0x272   : >> { %v1979_v32 = vsel %vm1971_vm1, %v1967_v22, %v1975_v26  ;;  %vm1972_vm3 = vcmp.ge.f32.partialorder %v1968_v28, 0.0  ;;  %v1976_v36 = vmul.f32 0.25, %v1968_v28 }
 0x273   : >> { %v2377_v38 = vpack.c.bf16 %v1979_v32, %v1979_v32  ;;  %v1932_v15 = vpop.permute.xlu0 %1931 }
 0x274   : >> { %v1980_v39 = vsel %vm1972_vm3, %v1968_v28, %v1976_v36  ;;  %v1941_v41 = vadd.f32 %v1932_v15, %v1551_v30 }
 0x275   : >> { %2003 = vst.msk [vmem:[%s2001_s19] sm:$0xf] %vm2002_vm2, %v2377_v38  ;;  %v2378_v42 = vpack.c.bf16 %v1980_v39, %v1980_v39  ;;  %v1934_v43 = vpop.permute.xlu1 %1933 }
 0x276   : >> { %v1969_v44 = vadd.f32 %v1960_v3, %v1941_v41  ;;  %v1942_v46 = vadd.f32 %v1934_v43, %v1552_v40 }
 0x277   : >> { %2004 = vst.msk [vmem:[%s2001_s19 + $0x4] sm:$0xf] %vm2002_vm2, %v2378_v42 }
 0x278   : >> { %vm1973_vm4 = vcmp.ge.f32.partialorder %v1969_v44, 0.0  ;;  %v1977_v1 = vmul.f32 0.25, %v1969_v44  ;;  %v1970_v47 = vadd.f32 %v1965_v7, %v1942_v46 }
 0x279   : > { %176 = sbr.rel (!%p174_p4) target bundleno = 17 (0x11), region = 75 }
 0x27a   : >> { %v1981_v48 = vsel %vm1973_vm4, %v1969_v44, %v1977_v1  ;;  %vm1974_vm5 = vcmp.ge.f32.partialorder %v1970_v47, 0.0  ;;  %v1978_v49 = vmul.f32 0.25, %v1970_v47 }
 0x27b   : >> { %v2379_v50 = vpack.c.bf16 %v1981_v48, %v1981_v48 }
 0x27c   : >> { %v1982_v51 = vsel %vm1974_vm5, %v1970_v47, %v1978_v49 }
 0x27d   : >> { %2005 = vst.msk [vmem:[%s2001_s19 + $0x8] sm:$0xf] %vm2002_vm2, %v2379_v50  ;;  %v2380_v45 = vpack.c.bf16 %v1982_v51, %v1982_v51 }
 0x27f   : >> { %2006 = vst.msk [vmem:[%s2001_s19 + $0xc] sm:$0xf] %vm2002_vm2, %v2380_v45 }
 0x280 PF: > { %s13_s12 = sadd.s32 1, %s2919_s12  }
 0x281   : > { %p10_p5 = scmp.ge.s32.totalorder %s13_s12, 4  }
 0x283   :  { %12 = sbr.rel (!%p10_p5) target bundleno = 1 (0x1), region = 86 }

// kernel: softsplat_baseline_forward.29
= control target key start
LH: loop header
LB: loop body
LE: loop exit
PB: predicated region body
PF: predicated region fallthrough
CT: control target
= control target key end

     0   :  { %s829_s12 = smov 0   ;;  %s913_s0 = inlined_call_operand.vmem [shape: bf16[2,18,32,18], index: 0, kind: input, shape index: {}]   ;;  %s914_s1 = inlined_call_operand.vmem [shape: bf16[3,32,96], index: 1, kind: input, shape index: {}]   ;;  %s915_s2 = inlined_call_operand.vmem [shape: f32[32,1], index: 2, kind: input, shape index: {}]   ;;  %s916_s3 = inlined_call_operand.vmem [shape: bf16[2,16,32,16], index: 3, kind: output, shape index: {}]  }
   0x1 LB: > { %s624_s13 = sadd.s32 4294967295, %s800_s12   ;;  %p628_p0 = scmp.ge.s32.totalorder %s800_s12, 1  ;;  %s800_s12 = sphi %s829_s12, %s13_s12  }
   0x2   : > { %p137_p1 = scmp.lt.s32.totalorder %s800_s12, 3 }
   0x4   : > { %p138_p2 = pnand %p628_p0, %p137_p1 }
   0x5   : > { %p161_p3 = scmp.lt.s32.totalorder (!%p138_p2), %s624_s13, 1  ;;  %s847_s22 = smov (!%p138_p2), 0  }
   0x6   : > { %141 = sbr.rel (%p138_p2) target bundleno = 413 (0x19d), region = 32 }
   0xd   : > { %s918_s13 = smov (!%p161_p3, %s624_s13), 1 }
   0xe   : > { %s756_s14 = smul.u32 288, %s918_s13  ;;  %s677_s15 = sshll.u32 %s918_s13, 8 }
   0xf   : > { %s840_s18 = scalar_lea.vmem %s916_s3, %s677_s15 }
  0x10   : > { %s845_s21 = scalar_lea.vmem %s913_s0, %s756_s14 }
  0x11 LB: >> { %v784_v0 = vld [vmem:[%s914_s1] sm:$0xff]   ;;  %vm251_vm0 = vcmask 785408   ;;  %v785_v1 = vld [vmem:[%s914_s1 + $0x10] sm:$0xff]   ;;  %s678_s27 = sshll.u32 %s804_s22, 4  ;;  %v806_v2 = vmov 0   ;;  %v492_v9 = vld [vmem:[%s915_s2 + $0x8] sm:$0xff]  ;;  %s804_s22 = sphi %s847_s22, %s177_s22  }
  0x12   : >> { %720 = vmatprep.mubr.msk.bf16.mxu0 %vm251_vm0, %v784_v0  ;;  %776 = vset.pattern.permute.xlu0 %v806_v2  ;;  %s863_s28 = scalar_lea.vmem %s845_s21, %s678_s27  ;;  %v491_v7 = vld [vmem:[%s915_s2] sm:$0xff]  ;;  %v493_v8 = vld [vmem:[%s915_s2 + $0x10] sm:$0xff]  ;;  %v494_v10 = vld [vmem:[%s915_s2 + $0x18] sm:$0xff]  ;;  %s807_s20 = smov 127   ;;  %vm549_vm2 = vcmask 125952  }
  0x13   : >> { %736 = vmatprep.mubr.msk.bf16.mxu1 %vm251_vm0, %v785_v1  ;;  %777 = vset.pattern.permute.xlu1 %v806_v2  ;;  %v778_v3 = vld [vmem:[%s863_s28] sm:$0xff]   ;;  %v779_v4 = vld [vmem:[%s863_s28 + $0x8] sm:$0xff]   ;;  %v780_v5 = vld [vmem:[%s863_s28 + $0x10] sm:$0xff]   ;;  %s808_s23 = smov 126   ;;  %s548_s24 = scalar_lea.vmem %s840_s18, %s678_s27 }
  0x14   : >> { %708 = vmatprep.subr.bf16.mxu0 %v778_v3  ;;  %724 = vmatprep.subr.bf16.mxu1 %v778_v3  ;;  %v781_v6 = vld [vmem:[%s863_s28 + $0x18] sm:$0xff]   ;;  %v782_v11 = vld [vmem:[%s863_s28 + $0x20] sm:$0xff]   ;;  %v783_v12 = vld [vmem:[%s863_s28 + $0x28] sm:$0xff]   ;;  %s177_s22 = sadd.s32 1, %s804_s22  }
  0x15   : >> { %709 = vmatpush3.bf16.msra.mxu0 %v778_v3  ;;  %725 = vmatpush3.bf16.msra.mxu1 %v778_v3  ;;  %v786_v13 = vld [vmem:[%s914_s1 + $0x8] sm:$0xff]   ;;  %v787_v14 = vld [vmem:[%s914_s1 + $0x18] sm:$0xff]   ;;  %v788_v15 = vld [vmem:[%s914_s1 + $0x20] sm:$0xff]   ;;  %p174_p4 = scmp.ge.s32.totalorder %s177_s22, 16  }
  0x16   : >> { %710 = vmatprep.subr.bf16.mxu0 %v779_v4  ;;  %726 = vmatprep.subr.bf16.mxu1 %v779_v4  ;;  %v789_v16 = vld [vmem:[%s914_s1 + $0x28] sm:$0xff]  }
  0x17   : >> { %497 = vperm.xlu0 %776, %v491_v7   ;;  %507 = vperm.xlu1 %777, %v493_v8  }
  0x19   : >> { %711 = vmatpush3.bf16.msra.mxu0 %v779_v4  ;;  %727 = vmatpush3.bf16.msra.mxu1 %v779_v4 }
  0x1a   : >> { %712 = vmatprep.subr.bf16.mxu0 %v780_v5  ;;  %728 = vmatprep.subr.bf16.mxu1 %v780_v5 }
  0x1b   : >> { %502 = vperm.xlu0 %776, %v492_v9   ;;  %512 = vperm.xlu1 %777, %v494_v10  }
  0x1d   : >> { %713 = vmatpush3.bf16.msra.mxu0 %v780_v5  ;;  %729 = vmatpush3.bf16.msra.mxu1 %v780_v5 }
  0x1e   : >> { %714 = vmatprep.subr.bf16.mxu0 %v781_v6  ;;  %730 = vmatprep.subr.bf16.mxu1 %v781_v6 }
  0x21   : >> { %715 = vmatpush3.bf16.msra.mxu0 %v781_v6  ;;  %731 = vmatpush3.bf16.msra.mxu1 %v781_v6 }
  0x22   : >> { %716 = vmatprep.subr.bf16.mxu0 %v782_v11  ;;  %732 = vmatprep.subr.bf16.mxu1 %v782_v11 }
  0x25   : >> { %717 = vmatpush3.bf16.msra.mxu0 %v782_v11  ;;  %733 = vmatpush3.bf16.msra.mxu1 %v782_v11 }
  0x26   : >> { %718 = vmatprep.subr.bf16.mxu0 %v783_v12  ;;  %734 = vmatprep.subr.bf16.mxu1 %v783_v12 }
  0x29   : >> { %719 = vmatpush3.bf16.msra.mxu0 %v783_v12  ;;  %735 = vmatpush3.bf16.msra.mxu1 %v783_v12 }
  0x2a   : >> { %740 = vmatprep.subr.bf16.mxu0 %v778_v3 }
  0x2c   : >> { %721 = vmatmul.mubr.msk.bf16.vlgmr.msra.gmra.mrb[0].mxu0 %vm251_vm0, %v786_v13  ;;  %737 = vmatmul.mubr.msk.bf16.vlgmr.msra.gmra.mrb[0].mxu1 %vm251_vm0, %v787_v14 }
  0x2d   : >> { %741 = vmatpush3.bf16.msra.mxu0 %v778_v3  ;;  %752 = vmatprep.mubr.msk.bf16.mxu0 %vm251_vm0, %v788_v15 }
  0x2e   : >> { %742 = vmatprep.subr.bf16.mxu0 %v779_v4 }
  0x31   : >> { %743 = vmatpush3.bf16.msra.mxu0 %v779_v4 }
  0x32   : >> { %744 = vmatprep.subr.bf16.mxu0 %v780_v5 }
  0x35   : >> { %745 = vmatpush3.bf16.msra.mxu0 %v780_v5 }
  0x36   : >> { %746 = vmatprep.subr.bf16.mxu0 %v781_v6 }
  0x39   : >> { %747 = vmatpush3.bf16.msra.mxu0 %v781_v6 }
  0x3a   : >> { %748 = vmatprep.subr.bf16.mxu0 %v782_v11 }
  0x3d   : >> { %749 = vmatpush3.bf16.msra.mxu0 %v782_v11 }
  0x3e   : >> { %750 = vmatprep.subr.bf16.mxu0 %v783_v12 }
  0x41   : >> { %751 = vmatpush3.bf16.msra.mxu0 %v783_v12 }
  0x44   : >> { %753 = vmatmul.mubr.msk.bf16.vlgmr.msra.gmra.mrb[4].mxu0 %vm251_vm0, %v789_v16 }
  0x96   : >> { %v498_v29 = vpop.permute.xlu0 %497  ;;  %v508_v30 = vpop.permute.xlu1 %507 }
  0x9a   : >> { %v503_v31 = vpop.permute.xlu0 %502  ;;  %v513_v32 = vpop.permute.xlu1 %512 }
  0xff   : >> { %v722_v17 = vpop.f32.mrb[0].mxu0  ;;  %v738_v18 = vpop.f32.mrb[0].mxu1 }
 0x100   : >> { %389 = vrot.lane.b32.xlu0 %v738_v18, %s807_s20  ;;  %v292_v19 = vpop.f32.mrb[1].mxu0  ;;  %v366_v20 = vpop.f32.mrb[1].mxu1 }
 0x101   : >> { %v723_v21 = vpop.f32.mrb[2].mxu0  ;;  %v739_v22 = vpop.f32.mrb[2].mxu1 }
 0x102   : >> { %391 = vrot.lane.b32.xlu1 %v739_v22, %s807_s20  ;;  %v295_v23 = vpop.f32.mrb[3].mxu0  ;;  %v369_v24 = vpop.f32.mrb[3].mxu1 }
 0x104   : >> { %385 = vrot.lane.b32.xlu0 %v366_v20, %s807_s20 }
 0x106   : >> { %387 = vrot.lane.b32.xlu1 %v369_v24, %s807_s20 }
 0x117   : >> { %v754_v25 = vpop.f32.mrb[4].mxu0 }
 0x118   : >> { %v456_v26 = vpop.f32.mrb[5].mxu0 }
 0x119   : >> { %475 = vrot.lane.b32.xlu0 %v456_v26, %s808_s23  ;;  %v755_v27 = vpop.f32.mrb[6].mxu0 }
 0x11a   : >> { %v459_v28 = vpop.f32.mrb[7].mxu0 }
 0x11b   : >> { %477 = vrot.lane.b32.xlu1 %v459_v28, %s808_s23 }
 0x11d   : >> { %479 = vrot.lane.b32.xlu0 %v754_v25, %s808_s23 }
 0x11f   : >> { %481 = vrot.lane.b32.xlu1 %v755_v27, %s808_s23 }
 0x172   : >> { %v390_v33 = vpop.permute.xlu0 %389 }
 0x173   : >> { %v399_v42 = vadd.f32 %v722_v17, %v390_v33 }
 0x174   : >> { %v392_v34 = vpop.permute.xlu1 %391 }
 0x175   : >> { %v400_v49 = vadd.f32 %v723_v21, %v392_v34 }
 0x176   : >> { %v386_v35 = vpop.permute.xlu0 %385 }
 0x177   : >> { %v397_v37 = vadd.f32 %v386_v35, %v292_v19 }
 0x178   : >> { %v388_v36 = vpop.permute.xlu1 %387 }
 0x179   : >> { %v398_v39 = vadd.f32 %v388_v36, %v295_v23 }
 0x18b   : >> { %v476_v38 = vpop.permute.xlu0 %475 }
 0x18c   : >> { %v487_v40 = vadd.f32 %v476_v38, %v397_v37 }
 0x18d   : >> { %v478_v41 = vpop.permute.xlu1 %477 }
 0x18e   : >> { %v515_v43 = vadd.f32 %v498_v29, %v487_v40  ;;  %v488_v44 = vadd.f32 %v478_v41, %v398_v39 }
 0x18f   : >> { %v480_v45 = vpop.permute.xlu0 %479 }
 0x190   : >> { %vm519_vm1 = vcmp.ge.f32.partialorder %v515_v43, 0.0  ;;  %v523_v46 = vmul.f32 0.25, %v515_v43  ;;  %v516_v47 = vadd.f32 %v503_v31, %v488_v44  ;;  %v489_v48 = vadd.f32 %v480_v45, %v399_v42 }
 0x191   : >> { %v482_v50 = vpop.permute.xlu1 %481 }
 0x192   : >> { %v527_v51 = vsel %vm519_vm1, %v515_v43, %v523_v46  ;;  %vm520_vm3 = vcmp.ge.f32.partialorder %v516_v47, 0.0  ;;  %v524_v52 = vmul.f32 0.25, %v516_v47  ;;  %v517_v53 = vadd.f32 %v508_v30, %v489_v48 }
 0x193   : >> { %v679_v54 = vpack.c.bf16 %v527_v51, %v527_v51  ;;  %v490_v55 = vadd.f32 %v482_v50, %v400_v49 }
 0x194   : >> { %v528_v56 = vsel %vm520_vm3, %v516_v47, %v524_v52  ;;  %vm521_vm4 = vcmp.ge.f32.partialorder %v517_v53, 0.0  ;;  %v525_v57 = vmul.f32 0.25, %v517_v53 }
 0x195   : >> { %550 = vst.msk [vmem:[%s548_s24] sm:$0xf] %vm549_vm2, %v679_v54  ;;  %v680_v58 = vpack.c.bf16 %v528_v56, %v528_v56  ;;  %v518_v59 = vadd.f32 %v513_v32, %v490_v55 }
 0x196   : >> { %v529_v60 = vsel %vm521_vm4, %v517_v53, %v525_v57  ;;  %176 = sbr.rel (!%p174_p4) target bundleno = 17 (0x11), region = 75 }
 0x197   : >> { %551 = vst.msk [vmem:[%s548_s24 + $0x4] sm:$0xf] %vm549_vm2, %v680_v58  ;;  %v681_v61 = vpack.c.bf16 %v529_v60, %v529_v60  ;;  %vm522_vm5 = vcmp.ge.f32.partialorder %v518_v59, 0.0  ;;  %v526_v62 = vmul.f32 0.25, %v518_v59 }
 0x199   : >> { %552 = vst.msk [vmem:[%s548_s24 + $0x8] sm:$0xf] %vm549_vm2, %v681_v61  ;;  %v530_v63 = vsel %vm522_vm5, %v518_v59, %v526_v62 }
 0x19a   : >> { %v682_v0 = vpack.c.bf16 %v530_v63, %v530_v63 }
 0x19c   : >> { %553 = vst.msk [vmem:[%s548_s24 + $0xc] sm:$0xf] %vm549_vm2, %v682_v0 }
 0x19d PF: > { %s13_s12 = sadd.s32 1, %s800_s12  }
 0x19e   : > { %p10_p5 = scmp.ge.s32.totalorder %s13_s12, 4  }
 0x1a0   :  { %12 = sbr.rel (!%p10_p5) target bundleno = 1 (0x1), region = 86 }

// kernel: softsplat_baseline_forward.30
= control target key start
LH: loop header
LB: loop body
LE: loop exit
PB: predicated region body
PF: predicated region fallthrough
CT: control target
= control target key end

     0   :  { %s637_s12 = smov 0   ;;  %s688_s0 = inlined_call_operand.vmem [shape: bf16[2,18,32,18], index: 0, kind: input, shape index: {}]   ;;  %s689_s1 = inlined_call_operand.vmem [shape: bf16[3,3,96], index: 1, kind: input, shape index: {}]   ;;  %s690_s2 = inlined_call_operand.vmem [shape: f32[3,1], index: 2, kind: input, shape index: {}]   ;;  %s691_s3 = inlined_call_operand.vmem [shape: f32[2,16,3,16], index: 3, kind: output, shape index: {}]  }
   0x1 LB: > { %s463_s13 = sadd.s32 4294967295, %s606_s12   ;;  %p467_p0 = scmp.ge.s32.totalorder %s606_s12, 1  ;;  %s606_s12 = sphi %s637_s12, %s13_s12  }
   0x2   : > { %p137_p1 = scmp.lt.s32.totalorder %s606_s12, 3 }
   0x4   : > { %p138_p2 = pnand %p467_p0, %p137_p1 }
   0x5   : > { %p161_p3 = scmp.lt.s32.totalorder (!%p138_p2), %s463_s13, 1  ;;  %s655_s22 = smov (!%p138_p2), 0  }
   0x6   : > { %141 = sbr.rel (%p138_p2) target bundleno = 399 (0x18f), region = 32 }
   0xd   : > { %s693_s13 = smov (!%p161_p3, %s463_s13), 1 }
   0xe   : > { %s567_s14 = smul.u32 288, %s693_s13  ;;  %s496_s15 = sshll.u32 %s693_s13, 6 }
   0xf   : > { %s648_s18 = scalar_lea.vmem %s691_s3, %s496_s15 }
  0x10   : > { %s653_s21 = scalar_lea.vmem %s688_s0, %s567_s14 }
  0x11 LB: >> { %v612_v0 = vmov 0.0   ;;  %v383_v1 = vld [vmem:[%s690_s2] sm:$0x7]  ;;  %s497_s25 = sshll.u32 %s610_s22, 4  ;;  %vm613_vm0 = vmmov 0   ;;  %v614_v2 = vmov 0   ;;  %s610_s22 = sphi %s655_s22, %s177_s22  }
  0x12   : >> { %519 = vmatprep.subr.bf16.mxu0 %v612_v0  ;;  %535 = vmatprep.subr.bf16.mxu1 %v612_v0  ;;  %s180_s26 = scalar_lea.vmem %s653_s21, %s497_s25  ;;  %v237_v9 = vld [vmem:[%s689_s1] sm:$0x3]  ;;  %vm238_vm1 = vcmask 785408   ;;  %v490_v10 = vld [vmem:[%s689_s1 + $0x2] sm:$0x3]  ;;  %s615_s6 = smov 127  }
  0x13   : >> { %531 = vmatprep.mubr.msk.bf16.mxu0 %vm613_vm0, %v612_v0  ;;  %547 = vmatprep.mubr.msk.bf16.mxu1 %vm613_vm0, %v612_v0  ;;  %v590_v3 = vld [vmem:[%s180_s26] sm:$0xff]   ;;  %v591_v4 = vld [vmem:[%s180_s26 + $0x8] sm:$0xff]   ;;  %v592_v5 = vld [vmem:[%s180_s26 + $0x10] sm:$0xff]   ;;  %s616_s7 = smov 126   ;;  %s471_s8 = sshll.u32 %s610_s22, 2  ;;  %vm391_vm2 = vcmask 124928  }
  0x14   : >> { %589 = vset.pattern.permute.xlu0 %v614_v2  ;;  %520 = vmatpush3.bf16.msra.mxu0 %v590_v3  ;;  %v593_v6 = vld [vmem:[%s180_s26 + $0x18] sm:$0xff]   ;;  %v594_v7 = vld [vmem:[%s180_s26 + $0x20] sm:$0xff]   ;;  %v595_v8 = vld [vmem:[%s180_s26 + $0x28] sm:$0xff]   ;;  %s390_s9 = scalar_lea.vmem %s648_s18, %s471_s8  ;;  %s177_s22 = sadd.s32 1, %s610_s22  }
  0x15   : >> { %386 = vperm.xlu0 %589, %v383_v1   ;;  %536 = vmatpush3.bf16.msra.mxu1 %v590_v3  ;;  %v492_v11 = vld [vmem:[%s689_s1 + $0x4] sm:$0x3]  ;;  %p174_p4 = scmp.ge.s32.totalorder %s177_s22, 16  }
  0x16   : >> { %521 = vmatprep.subr.bf16.mxu0 %v612_v0  ;;  %537 = vmatprep.subr.bf16.mxu1 %v612_v0 }
  0x18   : >> { %522 = vmatpush3.bf16.msra.mxu0 %v591_v4 }
  0x19   : >> { %538 = vmatpush3.bf16.msra.mxu1 %v591_v4  ;;  %523 = vmatprep.subr.bf16.mxu0 %v612_v0 }
  0x1a   : >> { %539 = vmatprep.subr.bf16.mxu1 %v612_v0 }
  0x1c   : >> { %524 = vmatpush3.bf16.msra.mxu0 %v592_v5 }
  0x1d   : >> { %540 = vmatpush3.bf16.msra.mxu1 %v592_v5  ;;  %525 = vmatprep.subr.bf16.mxu0 %v612_v0 }
  0x1e   : >> { %541 = vmatprep.subr.bf16.mxu1 %v612_v0 }
  0x20   : >> { %526 = vmatpush3.bf16.msra.mxu0 %v593_v6 }
  0x21   : >> { %542 = vmatpush3.bf16.msra.mxu1 %v593_v6  ;;  %527 = vmatprep.subr.bf16.mxu0 %v612_v0 }
  0x22   : >> { %543 = vmatprep.subr.bf16.mxu1 %v612_v0 }
  0x24   : >> { %528 = vmatpush3.bf16.msra.mxu0 %v594_v7 }
  0x25   : >> { %544 = vmatpush3.bf16.msra.mxu1 %v594_v7  ;;  %529 = vmatprep.subr.bf16.mxu0 %v612_v0 }
  0x26   : >> { %545 = vmatprep.subr.bf16.mxu1 %v612_v0 }
  0x28   : >> { %530 = vmatpush3.bf16.msra.mxu0 %v595_v8 }
  0x29   : >> { %546 = vmatpush3.bf16.msra.mxu1 %v595_v8  ;;  %551 = vmatprep.subr.bf16.mxu0 %v612_v0 }
  0x2b   : >> { %532 = vmatmul.mubr.msk.bf16.vlgmr.msra.gmra.mrb[0].mxu0 %vm238_vm1, %v237_v9 }
  0x2c   : >> { %548 = vmatmul.mubr.msk.bf16.vlgmr.msra.gmra.mrb[0].mxu1 %vm238_vm1, %v490_v10  ;;  %552 = vmatpush3.bf16.msra.mxu0 %v590_v3 }
  0x2d   : >> { %563 = vmatprep.mubr.msk.bf16.mxu0 %vm613_vm0, %v612_v0  ;;  %553 = vmatprep.subr.bf16.mxu0 %v612_v0 }
  0x30   : >> { %554 = vmatpush3.bf16.msra.mxu0 %v591_v4 }
  0x31   : >> { %555 = vmatprep.subr.bf16.mxu0 %v612_v0 }
  0x34   : >> { %556 = vmatpush3.bf16.msra.mxu0 %v592_v5 }
  0x35   : >> { %557 = vmatprep.subr.bf16.mxu0 %v612_v0 }
  0x38   : >> { %558 = vmatpush3.bf16.msra.mxu0 %v593_v6 }
  0x39   : >> { %559 = vmatprep.subr.bf16.mxu0 %v612_v0 }
  0x3c   : >> { %560 = vmatpush3.bf16.msra.mxu0 %v594_v7 }
  0x3d   : >> { %561 = vmatprep.subr.bf16.mxu0 %v612_v0 }
  0x40   : >> { %562 = vmatpush3.bf16.msra.mxu0 %v595_v8 }
  0x43   : >> { %564 = vmatmul.mubr.msk.bf16.vlgmr.msra.gmra.mrb[4].mxu0 %vm238_vm1, %v492_v11 }
  0x94   : >> { %v387_v24 = vpop.permute.xlu0 %386 }
  0xfe   : >> { %v276_v12 = vpop.f32.mrb[0].mxu0 }
  0xff   : >> { %v322_v13 = vpop.f32.mrb[0].mxu1  ;;  %v533_v14 = vpop.f32.mrb[1].mxu0 }
 0x100   : >> { %329 = vrot.lane.b32.xlu0 %v322_v13, %s615_s6  ;;  %v549_v15 = vpop.f32.mrb[1].mxu1  ;;  %v279_v16 = vpop.f32.mrb[2].mxu0 }
 0x101   : >> { %v325_v17 = vpop.f32.mrb[2].mxu1  ;;  %v534_v18 = vpop.f32.mrb[3].mxu0 }
 0x102   : >> { %v550_v19 = vpop.f32.mrb[3].mxu1 }
 0x116   : >> { %v372_v20 = vpop.f32.mrb[4].mxu0 }
 0x117   : >> { %379 = vrot.lane.b32.xlu1 %v372_v20, %s616_s7  ;;  %v565_v21 = vpop.f32.mrb[5].mxu0 }
 0x118   : >> { %v375_v22 = vpop.f32.mrb[6].mxu0 }
 0x119   : >> { %v566_v23 = vpop.f32.mrb[7].mxu0 }
 0x172   : >> { %v330_v25 = vpop.permute.xlu0 %329 }
 0x173   : >> { %v332_v26 = vadd.f32 %v330_v25, %v276_v12 }
 0x188   : > { %176 = sbr.rel (!%p174_p4) target bundleno = 17 (0x11), region = 75 }
 0x189   : >> { %v380_v27 = vpop.permute.xlu1 %379 }
 0x18a   : >> { %v382_v28 = vadd.f32 %v380_v27, %v332_v26 }
 0x18c   : >> { %v389_v29 = vadd.f32 %v387_v24, %v382_v28 }
 0x18e   : >> { %392 = vst.msk [vmem:[%s390_s9] sm:$0x7] %vm391_vm2, %v389_v29 }
 0x18f PF: > { %s13_s12 = sadd.s32 1, %s606_s12  }
 0x190   : > { %p10_p5 = scmp.ge.s32.totalorder %s13_s12, 4  }
 0x192   :  { %12 = sbr.rel (!%p10_p5) target bundleno = 1 (0x1), region = 86 }

</bundles_post_ra>
